<compile_context>
chip_gen: v7x
topology: tpu7x:2x2x1
jax: 0.10.0
libtpu: 0.0.40
codegen_flags: <defaults>
</compile_context>

<pallas_src>
import functools

import jax
import jax.numpy as jnp
from jax.experimental import pallas as pl
from jax.experimental.pallas import tpu as pltpu


def _pick_tile(dim, preferred):
    for t in preferred:
        if dim % t == 0:
            return t
    return dim


# -----------------------------------------------------------------------------
# Kernel 1: fused backbone stand-in
#           (M,K) stem im2col matmul + BN-folded bias + swish  (kept in VMEM)
#           -> (M,32)@(32,1280) 1x1 head conv + BN-folded bias + swish
# -----------------------------------------------------------------------------
def _stem_head_kernel(x_ref, w0_ref, b0_ref, wh_ref, bh_ref, o_ref):
    h = jnp.dot(x_ref[...], w0_ref[...], preferred_element_type=jnp.float32)
    h = h + b0_ref[...]
    h = h * jax.nn.sigmoid(h)                                   # swish
    out = jnp.dot(h.astype(jnp.bfloat16), wh_ref[...],
                  preferred_element_type=jnp.float32)
    out = out + bh_ref[...]
    out = out * jax.nn.sigmoid(out)                             # swish
    o_ref[...] = out.astype(o_ref.dtype)


def stem_head_fused(cols, w0, b0, wh, bh, out_dtype=jnp.bfloat16):
    """cols: (M, K) bf16, w0: (K, 32) bf16, wh: (32, 1280) bf16. Returns (M, 1280)."""
    M, K = cols.shape
    _, C0 = w0.shape
    _, C1 = wh.shape
    tm = _pick_tile(M, (512, 256, 128, 64, 32, 16, 8))
    tn = _pick_tile(C1, (256, 128))       # 1280 -> 5 tiles; feeds both v7x TCs
    return pl.pallas_call(
        _stem_head_kernel,
        out_shape=jax.ShapeDtypeStruct((M, C1), out_dtype),
        grid=(M // tm, C1 // tn),
        in_specs=[
            pl.BlockSpec((tm, K), lambda i, j: (i, 0)),
            pl.BlockSpec((K, C0), lambda i, j: (0, 0)),
            pl.BlockSpec((1, C0), lambda i, j: (0, 0)),
            pl.BlockSpec((C0, tn), lambda i, j: (0, j)),
            pl.BlockSpec((1, tn), lambda i, j: (0, j)),
        ],
        out_specs=pl.BlockSpec((tm, tn), lambda i, j: (i, j)),
        compiler_params=pltpu.CompilerParams(
            dimension_semantics=("parallel", "parallel"),
        ),
    )(cols, w0, b0.reshape(1, C0).astype(jnp.float32),
      wh, bh.reshape(1, C1).astype(jnp.float32))


# -----------------------------------------------------------------------------
# Kernel 2: 3x3 stride-1 'same' conv + bias + ReLU, fused with spatial mean and
#           the FC head (Linear 128->64 + ReLU + Linear 64->num_classes).
#           Grid = (batch,); whole Cin per step; 9 accumulating K=Cin matmuls.
# -----------------------------------------------------------------------------
def _conv_pool_fc_kernel(x_ref, w_ref, b_ref, w1_ref, b1_ref, w2_ref, b2_ref,
                         o_ref, *, inv_hw):
    _, Hp, Wp, Cin = x_ref.shape
    H, W = Hp - 2, Wp - 2
    Cout = w_ref.shape[-1]

    x = x_ref[0]                                        # (Hp, Wp, Cin) bf16

    # 9 accumulating matmuls, one per 3x3 tap -- no im2col slab / concat build.
    acc = jnp.zeros((H * W, Cout), jnp.float32)
    for kh in range(3):
        for kw in range(3):
            win = x[kh:kh + H, kw:kw + W, :].reshape(H * W, Cin)
            acc = acc + jnp.dot(win, w_ref[kh * 3 + kw],
                                preferred_element_type=jnp.float32)

    y = jnp.maximum(acc + b_ref[...], 0.0)              # Conv bias + ReLU (Dropout = id)
    pooled = jnp.sum(y, axis=0, keepdims=True) * inv_hw  # (1, Cout) == mean over H, W

    # additional_fc, fused (Dropouts = identity at inference).
    h = jnp.dot(pooled.astype(jnp.bfloat16), w1_ref[...],
                preferred_element_type=jnp.float32) + b1_ref[...]
    h = jnp.maximum(h, 0.0)
    logits = jnp.dot(h.astype(jnp.bfloat16), w2_ref[...],
                     preferred_element_type=jnp.float32) + b2_ref[...]   # (1, NCpad)

    # Replicate over 8 sublanes so the output tile stays (8,128)-friendly / lane-dense.
    o_ref[...] = jnp.broadcast_to(
        logits.reshape(1, 1, -1), o_ref.shape).astype(o_ref.dtype)


def conv3x3_relu_mean_fc(x, w, b, w1, b1, w2, b2):
    """x: (N, H, W, Cin) bf16, w: (3,3,Cin,Cout) bf16, b: (Cout,) f32,
    w1: (Cout, 64) bf16, b1: (64,) f32, w2: (64, NC) bf16, b2: (NC,) f32.

    Returns logits (N, NC) f32 of mean(ReLU(conv3x3_same(x)+b)) -> fc1 -> ReLU -> fc2.
    """
    N, H, W, Cin = x.shape
    Cout = w.shape[-1]
    H1 = w1.shape[1]
    NC = w2.shape[1]
    NCpad = max(128, ((NC + 127) // 128) * 128)         # lane-dense output store

    # TODO(synk): for large spatial sizes fuse this halo pad into the producer / kernel.
    xp = jnp.pad(x, ((0, 0), (1, 1), (1, 1), (0, 0)))
    Hp, Wp = H + 2, W + 2

    w9 = w.reshape(9, Cin, Cout)                         # (kh, kw) taps pre-flattened
    w2p = jnp.pad(w2, ((0, 0), (0, NCpad - NC)))
    b2p = jnp.pad(b2, (0, NCpad - NC)).astype(jnp.float32)

    kernel = functools.partial(_conv_pool_fc_kernel, inv_hw=1.0 / float(H * W))
    out = pl.pallas_call(
        kernel,
        out_shape=jax.ShapeDtypeStruct((N, 8, NCpad), jnp.float32),
        grid=(N,),
        in_specs=[
            pl.BlockSpec((1, Hp, Wp, Cin), lambda n: (n, 0, 0, 0)),
            # Constant block index across the batch axis -> weight DMA'd once, stays resident.
            pl.BlockSpec((9, Cin, Cout), lambda n: (0, 0, 0)),
            pl.BlockSpec((1, Cout), lambda n: (0, 0)),
            pl.BlockSpec((Cout, H1), lambda n: (0, 0)),
            pl.BlockSpec((1, H1), lambda n: (0, 0)),
            pl.BlockSpec((H1, NCpad), lambda n: (0, 0)),
            pl.BlockSpec((1, NCpad), lambda n: (0, 0)),
        ],
        out_specs=pl.BlockSpec((1, 8, NCpad), lambda n: (n, 0, 0)),
        compiler_params=pltpu.CompilerParams(
            dimension_semantics=("parallel",),
        ),
    )(xp, w9, b.reshape(1, Cout).astype(jnp.float32),
      w1, b1.reshape(1, H1).astype(jnp.float32), w2p, b2p.reshape(1, NCpad))
    return out[:, 0, :NC]


# -----------------------------------------------------------------------------
# JAX-side glue (padding / im2col / BN folding / parameter setup)
# -----------------------------------------------------------------------------
def im2col_tf_same(x, k, stride):
    """TF-style 'same' padding im2col for a k x k / stride conv (NHWC)."""
    N, H, W, C = x.shape
    Ho = -(-H // stride)
    Wo = -(-W // stride)
    pad_h = max((Ho - 1) * stride + k - H, 0)
    pad_w = max((Wo - 1) * stride + k - W, 0)
    x = jnp.pad(
        x,
        ((0, 0),
         (pad_h // 2, pad_h - pad_h // 2),
         (pad_w // 2, pad_w - pad_w // 2),
         (0, 0)),
    )
    cols = []
    for kh in range(k):
        for kw in range(k):
            cols.append(x[:, kh:kh + stride * Ho:stride, kw:kw + stride * Wo:stride, :])
    patches = jnp.stack(cols, axis=3)  # (N, Ho, Wo, k*k, C)
    return patches.reshape(N * Ho * Wo, k * k * C), (N, Ho, Wo)


def fold_bn(w, bn, eps=1e-3):
    """Fold inference-mode BatchNorm into the preceding (bias-free) conv."""
    gamma, beta, mean, var = bn
    scale = gamma / jnp.sqrt(var + eps)
    return w * scale, beta - mean * scale


def init_params(key, num_classes=10):
    ks = jax.random.split(key, 5)

    def normal(k, shape, std):
        return (std * jax.random.normal(k, shape)).astype(jnp.float32)

    return {
        # backbone stand-in (see TODO(synk) at the top of this file)
        "stem_w": normal(ks[0], (3, 3, 3, 32), 0.1),
        "stem_bn": (jnp.ones(32), jnp.zeros(32), jnp.zeros(32), jnp.ones(32)),
        "head_w": normal(ks[1], (1, 1, 32, 1280), 0.05),
        "head_bn": (jnp.ones(1280), jnp.zeros(1280), jnp.zeros(1280), jnp.ones(1280)),
        # additional_layers: Conv2d(1280, 128, 3, 1, 1)
        "add_conv_w": normal(ks[2], (3, 3, 1280, 128), 0.01),
        "add_conv_b": jnp.zeros((128,), jnp.float32),
        # additional_fc: Linear(128, 64), Linear(64, num_classes)
        "fc1_w": normal(ks[3], (128, 64), 0.05),
        "fc1_b": jnp.zeros((64,), jnp.float32),
        "fc2_w": normal(ks[4], (64, num_classes), 0.05),
        "fc2_b": jnp.zeros((num_classes,), jnp.float32),
    }


def modified_efficientnet_forward(x_nchw, p):
    """x_nchw: (N, 3, H, W) float32 -> (N, num_classes) float32 (inference mode)."""
    x = jnp.transpose(x_nchw, (0, 2, 3, 1))  # NCHW -> NHWC

    # ---- EfficientNet backbone stand-in (extract_features), one fused kernel ----
    # stem: 3x3 / stride 2, TF-"same" pad, BN (folded), swish; head: 1x1 32->1280, BN, swish.
    w_stem, b_stem = fold_bn(p["stem_w"], p["stem_bn"])
    w_head, b_head = fold_bn(p["head_w"], p["head_bn"])
    cols, (N, Ho, Wo) = im2col_tf_same(x, k=3, stride=2)        # (M, 27)
    k0 = cols.shape[1]
    kpad = 32                                                    # pad K 27 -> 32 (lane efficiency)
    cols = jnp.pad(cols, ((0, 0), (0, kpad - k0))).astype(jnp.bfloat16)
    w0 = jnp.pad(w_stem.reshape(k0, 32), ((0, kpad - k0), (0, 0))).astype(jnp.bfloat16)
    feat = stem_head_fused(
        cols, w0, b_stem,
        w_head.reshape(32, 1280).astype(jnp.bfloat16), b_head,
        out_dtype=jnp.bfloat16,
    ).reshape(N, Ho, Wo, 1280)
    # TODO(synk): 16 pretrained MBConv blocks of EfficientNet-B0 omitted (no checkpoint load).

    # ---- additional_layers (conv+ReLU, Dropout=id) + mean([2,3]) + additional_fc, fused ----
    return conv3x3_relu_mean_fc(
        feat,
        p["add_conv_w"].astype(jnp.bfloat16), p["add_conv_b"],
        p["fc1_w"].astype(jnp.bfloat16), p["fc1_b"],
        p["fc2_w"].astype(jnp.bfloat16), p["fc2_b"],
    )


if __name__ == "__main__":
    key = jax.random.PRNGKey(0)
    pkey, xkey = jax.random.split(key)
    num_classes = 10
    params = init_params(pkey, num_classes=num_classes)
    x = jax.random.normal(xkey, (2, 3, 16, 16), dtype=jnp.float32)  # NCHW input

    fwd = jax.jit(modified_efficientnet_forward)
    out = fwd(x, params)
    jax.block_until_ready(out)
    assert out.shape == (2, num_classes), out.shape
    assert out.dtype == jnp.float32
    print("KERNEL_OK")
</pallas_src>

<mosaic_0001>
module attributes {stable_mosaic.version = 11 : i64} {
  func.func @_stem_head_kernel(%arg0: i32, %arg1: i32, %arg2: memref<128x32xbf16, #tpu.memory_space<vmem>>, %arg3: memref<32x32xbf16, #tpu.memory_space<vmem>>, %arg4: memref<1x32xf32, #tpu.memory_space<vmem>>, %arg5: memref<32x256xbf16, #tpu.memory_space<vmem>>, %arg6: memref<1x256xf32, #tpu.memory_space<vmem>>, %arg7: memref<128x256xbf16, #tpu.memory_space<vmem>>) attributes {dimension_semantics = [#tpu.dimension_semantics<parallel>, #tpu.dimension_semantics<parallel>], iteration_bounds = array<i64: 1, 5>, scalar_prefetch = 0 : i64, scratch_operands = 0 : i64, tpu.core_type = #tpu.core_type<tc>, window_params = [{transform_indices = @transform_0, window_bounds = array<i64: 128, 32>}, {pipeline_mode = #tpu.pipeline_mode<synchronous>, transform_indices = @transform_1, window_bounds = array<i64: 32, 32>}, {pipeline_mode = #tpu.pipeline_mode<synchronous>, transform_indices = @transform_2, window_bounds = array<i64: 1, 32>}, {transform_indices = @transform_3, window_bounds = array<i64: 32, 256>}, {transform_indices = @transform_4, window_bounds = array<i64: 1, 256>}, {transform_indices = @transform_5, window_bounds = array<i64: 128, 256>}]} {
    %c0 = arith.constant 0 : index
    %c0_0 = arith.constant 0 : index
    %0 = vector.load %arg2[%c0, %c0_0] : memref<128x32xbf16, #tpu.memory_space<vmem>>, vector<128x32xbf16>
    %c0_1 = arith.constant 0 : index
    %c0_2 = arith.constant 0 : index
    %1 = vector.load %arg3[%c0_1, %c0_2] : memref<32x32xbf16, #tpu.memory_space<vmem>>, vector<32x32xbf16>
    %cst = arith.constant dense<0.000000e+00> : vector<128x32xf32>
    %2 = tpu.matmul %0, %1, %cst {dimension_numbers = #tpu.dot_dimension_numbers<[1], [0], [0], [1], [0, 0, 1, 1], [], []>} : vector<128x32xbf16>, vector<32x32xbf16>, vector<128x32xf32> -> vector<128x32xf32>
    %c0_3 = arith.constant 0 : index
    %c0_4 = arith.constant 0 : index
    %3 = vector.load %arg4[%c0_3, %c0_4] : memref<1x32xf32, #tpu.memory_space<vmem>>, vector<1x32xf32>
    %4 = vector.broadcast %3 : vector<1x32xf32> to vector<128x32xf32>
    %5 = arith.addf %2, %4 : vector<128x32xf32>
    %6 = arith.negf %5 : vector<128x32xf32>
    %7 = math.exp %6 : vector<128x32xf32>
    %cst_5 = arith.constant 1.000000e+00 : f32
    %8 = vector.broadcast %cst_5 : f32 to vector<128x32xf32>
    %9 = arith.addf %8, %7 : vector<128x32xf32>
    %10 = arith.divf %8, %9 : vector<128x32xf32>
    %11 = arith.mulf %5, %10 : vector<128x32xf32>
    %12 = arith.truncf %11 : vector<128x32xf32> to vector<128x32xbf16>
    %c0_6 = arith.constant 0 : index
    %c0_7 = arith.constant 0 : index
    %13 = vector.load %arg5[%c0_6, %c0_7] : memref<32x256xbf16, #tpu.memory_space<vmem>>, vector<32x256xbf16>
    %cst_8 = arith.constant dense<0.000000e+00> : vector<128x256xf32>
    %14 = tpu.matmul %12, %13, %cst_8 {dimension_numbers = #tpu.dot_dimension_numbers<[1], [0], [0], [1], [0, 0, 1, 1], [], []>} : vector<128x32xbf16>, vector<32x256xbf16>, vector<128x256xf32> -> vector<128x256xf32>
    %c0_9 = arith.constant 0 : index
    %c0_10 = arith.constant 0 : index
    %15 = vector.load %arg6[%c0_9, %c0_10] : memref<1x256xf32, #tpu.memory_space<vmem>>, vector<1x256xf32>
    %16 = vector.broadcast %15 : vector<1x256xf32> to vector<128x256xf32>
    %17 = arith.addf %14, %16 : vector<128x256xf32>
    %18 = arith.negf %17 : vector<128x256xf32>
    %19 = math.exp %18 : vector<128x256xf32>
    %cst_11 = arith.constant 1.000000e+00 : f32
    %20 = vector.broadcast %cst_11 : f32 to vector<128x256xf32>
    %21 = arith.addf %20, %19 : vector<128x256xf32>
    %22 = arith.divf %20, %21 : vector<128x256xf32>
    %23 = arith.mulf %17, %22 : vector<128x256xf32>
    %24 = arith.truncf %23 : vector<128x256xf32> to vector<128x256xbf16>
    %c0_12 = arith.constant 0 : index
    %c0_13 = arith.constant 0 : index
    %25 = vector.load %arg7[%c0_12, %c0_13] : memref<128x256xbf16, #tpu.memory_space<vmem>>, vector<128x256xbf16>
    tpu.vector_store %arg7[%c0_12, %c0_13], %24 {strides = array<i32>} : memref<128x256xbf16, #tpu.memory_space<vmem>>, vector<128x256xbf16>,
    return
  }
  func.func @transform_0(%arg0: i32, %arg1: i32) -> (i32, i32) {
    %c0_i32 = arith.constant 0 : i32
    %c0_i32_0 = arith.constant 0 : i32
    return %arg0, %c0_i32 : i32, i32
  }
  func.func @transform_1(%arg0: i32, %arg1: i32) -> (i32, i32) {
    %c0_i32 = arith.constant 0 : i32
    %c0_i32_0 = arith.constant 0 : i32
    %c0_i32_1 = arith.constant 0 : i32
    return %c0_i32, %c0_i32_0 : i32, i32
  }
  func.func @transform_2(%arg0: i32, %arg1: i32) -> (i32, i32) {
    %c0_i32 = arith.constant 0 : i32
    %c0_i32_0 = arith.constant 0 : i32
    %c0_i32_1 = arith.constant 0 : i32
    return %c0_i32, %c0_i32_0 : i32, i32
  }
  func.func @transform_3(%arg0: i32, %arg1: i32) -> (i32, i32) {
    %c0_i32 = arith.constant 0 : i32
    %c0_i32_0 = arith.constant 0 : i32
    return %c0_i32, %arg1 : i32, i32
  }
  func.func @transform_4(%arg0: i32, %arg1: i32) -> (i32, i32) {
    %c0_i32 = arith.constant 0 : i32
    %c0_i32_0 = arith.constant 0 : i32
    return %c0_i32, %arg1 : i32, i32
  }
  func.func @transform_5(%arg0: i32, %arg1: i32) -> (i32, i32) {
    %c0_i32 = arith.constant 0 : i32
    return %arg0, %arg1 : i32, i32
  }
}

module attributes {stable_mosaic.version = 11 : i64} {
  func.func @_conv_pool_fc_kernel(%arg0: i32, %arg1: memref<1x10x10x1280xbf16, #tpu.memory_space<vmem>>, %arg2: memref<9x1280x128xbf16, #tpu.memory_space<vmem>>, %arg3: memref<1x128xf32, #tpu.memory_space<vmem>>, %arg4: memref<128x64xbf16, #tpu.memory_space<vmem>>, %arg5: memref<1x64xf32, #tpu.memory_space<vmem>>, %arg6: memref<64x128xbf16, #tpu.memory_space<vmem>>, %arg7: memref<1x128xf32, #tpu.memory_space<vmem>>, %arg8: memref<1x8x128xf32, #tpu.memory_space<vmem>>) attributes {dimension_semantics = [#tpu.dimension_semantics<parallel>], iteration_bounds = array<i64: 2>, scalar_prefetch = 0 : i64, scratch_operands = 0 : i64, tpu.core_type = #tpu.core_type<tc>, window_params = [{transform_indices = @transform_0, window_bounds = array<i64: 1, 10, 10, 1280>}, {pipeline_mode = #tpu.pipeline_mode<synchronous>, transform_indices = @transform_1, window_bounds = array<i64: 9, 1280, 128>}, {pipeline_mode = #tpu.pipeline_mode<synchronous>, transform_indices = @transform_2, window_bounds = array<i64: 1, 128>}, {pipeline_mode = #tpu.pipeline_mode<synchronous>, transform_indices = @transform_3, window_bounds = array<i64: 128, 64>}, {pipeline_mode = #tpu.pipeline_mode<synchronous>, transform_indices = @transform_4, window_bounds = array<i64: 1, 64>}, {pipeline_mode = #tpu.pipeline_mode<synchronous>, transform_indices = @transform_5, window_bounds = array<i64: 64, 128>}, {pipeline_mode = #tpu.pipeline_mode<synchronous>, transform_indices = @transform_6, window_bounds = array<i64: 1, 128>}, {transform_indices = @transform_7, window_bounds = array<i64: 1, 8, 128>}]} {
    %c0 = arith.constant 0 : index
    %c0_0 = arith.constant 0 : index
    %c0_1 = arith.constant 0 : index
    %c0_2 = arith.constant 0 : index
    %0 = vector.load %arg1[%c0, %c0_0, %c0_1, %c0_2] : memref<1x10x10x1280xbf16, #tpu.memory_space<vmem>>, vector<1x10x10x1280xbf16>
    %1 = vector.shape_cast %0 : vector<1x10x10x1280xbf16> to vector<10x10x1280xbf16>
    %cst = arith.constant 0.000000e+00 : f32
    %2 = vector.broadcast %cst : f32 to vector<64x128xf32>
    %3 = vector.extract_strided_slice %1 {offsets = [0, 0, 0], sizes = [8, 8, 1280], strides = [1, 1, 1]} : vector<10x10x1280xbf16> to vector<8x8x1280xbf16>
    %4 = vector.shape_cast %3 : vector<8x8x1280xbf16> to vector<64x1280xbf16>
    %c0_3 = arith.constant 0 : index
    %c0_4 = arith.constant 0 : index
    %c0_5 = arith.constant 0 : index
    %5 = vector.load %arg2[%c0_3, %c0_4, %c0_5] : memref<9x1280x128xbf16, #tpu.memory_space<vmem>>, vector<1x1280x128xbf16>
    %6 = vector.shape_cast %5 : vector<1x1280x128xbf16> to vector<1280x128xbf16>
    %cst_6 = arith.constant dense<0.000000e+00> : vector<64x128xf32>
    %7 = tpu.matmul %4, %6, %cst_6 {dimension_numbers = #tpu.dot_dimension_numbers<[1], [0], [0], [1], [0, 0, 1, 1], [], []>} : vector<64x1280xbf16>, vector<1280x128xbf16>, vector<64x128xf32> -> vector<64x128xf32>
    %8 = arith.addf %2, %7 : vector<64x128xf32>
    %9 = vector.extract_strided_slice %1 {offsets = [0, 1, 0], sizes = [8, 8, 1280], strides = [1, 1, 1]} : vector<10x10x1280xbf16> to vector<8x8x1280xbf16>
    %10 = vector.shape_cast %9 : vector<8x8x1280xbf16> to vector<64x1280xbf16>
    %c1 = arith.constant 1 : index
    %c0_7 = arith.constant 0 : index
    %c0_8 = arith.constant 0 : index
    %11 = vector.load %arg2[%c1, %c0_7, %c0_8] : memref<9x1280x128xbf16, #tpu.memory_space<vmem>>, vector<1x1280x128xbf16>
    %12 = vector.shape_cast %11 : vector<1x1280x128xbf16> to vector<1280x128xbf16>
    %cst_9 = arith.constant dense<0.000000e+00> : vector<64x128xf32>
    %13 = tpu.matmul %10, %12, %cst_9 {dimension_numbers = #tpu.dot_dimension_numbers<[1], [0], [0], [1], [0, 0, 1, 1], [], []>} : vector<64x1280xbf16>, vector<1280x128xbf16>, vector<64x128xf32> -> vector<64x128xf32>
    %14 = arith.addf %8, %13 : vector<64x128xf32>
    %15 = vector.extract_strided_slice %1 {offsets = [0, 2, 0], sizes = [8, 8, 1280], strides = [1, 1, 1]} : vector<10x10x1280xbf16> to vector<8x8x1280xbf16>
    %16 = vector.shape_cast %15 : vector<8x8x1280xbf16> to vector<64x1280xbf16>
    %c2 = arith.constant 2 : index
    %c0_10 = arith.constant 0 : index
    %c0_11 = arith.constant 0 : index
    %17 = vector.load %arg2[%c2, %c0_10, %c0_11] : memref<9x1280x128xbf16, #tpu.memory_space<vmem>>, vector<1x1280x128xbf16>
    %18 = vector.shape_cast %17 : vector<1x1280x128xbf16> to vector<1280x128xbf16>
    %cst_12 = arith.constant dense<0.000000e+00> : vector<64x128xf32>
    %19 = tpu.matmul %16, %18, %cst_12 {dimension_numbers = #tpu.dot_dimension_numbers<[1], [0], [0], [1], [0, 0, 1, 1], [], []>} : vector<64x1280xbf16>, vector<1280x128xbf16>, vector<64x128xf32> -> vector<64x128xf32>
    %20 = arith.addf %14, %19 : vector<64x128xf32>
    %21 = vector.extract_strided_slice %1 {offsets = [1, 0, 0], sizes = [8, 8, 1280], strides = [1, 1, 1]} : vector<10x10x1280xbf16> to vector<8x8x1280xbf16>
    %22 = vector.shape_cast %21 : vector<8x8x1280xbf16> to vector<64x1280xbf16>
    %c3 = arith.constant 3 : index
    %c0_13 = arith.constant 0 : index
    %c0_14 = arith.constant 0 : index
    %23 = vector.load %arg2[%c3, %c0_13, %c0_14] : memref<9x1280x128xbf16, #tpu.memory_space<vmem>>, vector<1x1280x128xbf16>
    %24 = vector.shape_cast %23 : vector<1x1280x128xbf16> to vector<1280x128xbf16>
    %cst_15 = arith.constant dense<0.000000e+00> : vector<64x128xf32>
    %25 = tpu.matmul %22, %24, %cst_15 {dimension_numbers = #tpu.dot_dimension_numbers<[1], [0], [0], [1], [0, 0, 1, 1], [], []>} : vector<64x1280xbf16>, vector<1280x128xbf16>, vector<64x128xf32> -> vector<64x128xf32>
    %26 = arith.addf %20, %25 : vector<64x128xf32>
    %27 = vector.extract_strided_slice %1 {offsets = [1, 1, 0], sizes = [8, 8, 1280], strides = [1, 1, 1]} : vector<10x10x1280xbf16> to vector<8x8x1280xbf16>
    %28 = vector.shape_cast %27 : vector<8x8x1280xbf16> to vector<64x1280xbf16>
    %c4 = arith.constant 4 : index
    %c0_16 = arith.constant 0 : index
    %c0_17 = arith.constant 0 : index
    %29 = vector.load %arg2[%c4, %c0_16, %c0_17] : memref<9x1280x128xbf16, #tpu.memory_space<vmem>>, vector<1x1280x128xbf16>
    %30 = vector.shape_cast %29 : vector<1x1280x128xbf16> to vector<1280x128xbf16>
    %cst_18 = arith.constant dense<0.000000e+00> : vector<64x128xf32>
    %31 = tpu.matmul %28, %30, %cst_18 {dimension_numbers = #tpu.dot_dimension_numbers<[1], [0], [0], [1], [0, 0, 1, 1], [], []>} : vector<64x1280xbf16>, vector<1280x128xbf16>, vector<64x128xf32> -> vector<64x128xf32>
    %32 = arith.addf %26, %31 : vector<64x128xf32>
    %33 = vector.extract_strided_slice %1 {offsets = [1, 2, 0], sizes = [8, 8, 1280], strides = [1, 1, 1]} : vector<10x10x1280xbf16> to vector<8x8x1280xbf16>
    %34 = vector.shape_cast %33 : vector<8x8x1280xbf16> to vector<64x1280xbf16>
    %c5 = arith.constant 5 : index
    %c0_19 = arith.constant 0 : index
    %c0_20 = arith.constant 0 : index
    %35 = vector.load %arg2[%c5, %c0_19, %c0_20] : memref<9x1280x128xbf16, #tpu.memory_space<vmem>>, vector<1x1280x128xbf16>
    %36 = vector.shape_cast %35 : vector<1x1280x128xbf16> to vector<1280x128xbf16>
    %cst_21 = arith.constant dense<0.000000e+00> : vector<64x128xf32>
    %37 = tpu.matmul %34, %36, %cst_21 {dimension_numbers = #tpu.dot_dimension_numbers<[1], [0], [0], [1], [0, 0, 1, 1], [], []>} : vector<64x1280xbf16>, vector<1280x128xbf16>, vector<64x128xf32> -> vector<64x128xf32>
    %38 = arith.addf %32, %37 : vector<64x128xf32>
    %39 = vector.extract_strided_slice %1 {offsets = [2, 0, 0], sizes = [8, 8, 1280], strides = [1, 1, 1]} : vector<10x10x1280xbf16> to vector<8x8x1280xbf16>
    %40 = vector.shape_cast %39 : vector<8x8x1280xbf16> to vector<64x1280xbf16>
    %c6 = arith.constant 6 : index
    %c0_22 = arith.constant 0 : index
    %c0_23 = arith.constant 0 : index
    %41 = vector.load %arg2[%c6, %c0_22, %c0_23] : memref<9x1280x128xbf16, #tpu.memory_space<vmem>>, vector<1x1280x128xbf16>
    %42 = vector.shape_cast %41 : vector<1x1280x128xbf16> to vector<1280x128xbf16>
    %cst_24 = arith.constant dense<0.000000e+00> : vector<64x128xf32>
    %43 = tpu.matmul %40, %42, %cst_24 {dimension_numbers = #tpu.dot_dimension_numbers<[1], [0], [0], [1], [0, 0, 1, 1], [], []>} : vector<64x1280xbf16>, vector<1280x128xbf16>, vector<64x128xf32> -> vector<64x128xf32>
    %44 = arith.addf %38, %43 : vector<64x128xf32>
    %45 = vector.extract_strided_slice %1 {offsets = [2, 1, 0], sizes = [8, 8, 1280], strides = [1, 1, 1]} : vector<10x10x1280xbf16> to vector<8x8x1280xbf16>
    %46 = vector.shape_cast %45 : vector<8x8x1280xbf16> to vector<64x1280xbf16>
    %c7 = arith.constant 7 : index
    %c0_25 = arith.constant 0 : index
    %c0_26 = arith.constant 0 : index
    %47 = vector.load %arg2[%c7, %c0_25, %c0_26] : memref<9x1280x128xbf16, #tpu.memory_space<vmem>>, vector<1x1280x128xbf16>
    %48 = vector.shape_cast %47 : vector<1x1280x128xbf16> to vector<1280x128xbf16>
    %cst_27 = arith.constant dense<0.000000e+00> : vector<64x128xf32>
    %49 = tpu.matmul %46, %48, %cst_27 {dimension_numbers = #tpu.dot_dimension_numbers<[1], [0], [0], [1], [0, 0, 1, 1], [], []>} : vector<64x1280xbf16>, vector<1280x128xbf16>, vector<64x128xf32> -> vector<64x128xf32>
    %50 = arith.addf %44, %49 : vector<64x128xf32>
    %51 = vector.extract_strided_slice %1 {offsets = [2, 2, 0], sizes = [8, 8, 1280], strides = [1, 1, 1]} : vector<10x10x1280xbf16> to vector<8x8x1280xbf16>
    %52 = vector.shape_cast %51 : vector<8x8x1280xbf16> to vector<64x1280xbf16>
    %c8 = arith.constant 8 : index
    %c0_28 = arith.constant 0 : index
    %c0_29 = arith.constant 0 : index
    %53 = vector.load %arg2[%c8, %c0_28, %c0_29] : memref<9x1280x128xbf16, #tpu.memory_space<vmem>>, vector<1x1280x128xbf16>
    %54 = vector.shape_cast %53 : vector<1x1280x128xbf16> to vector<1280x128xbf16>
    %cst_30 = arith.constant dense<0.000000e+00> : vector<64x128xf32>
    %55 = tpu.matmul %52, %54, %cst_30 {dimension_numbers = #tpu.dot_dimension_numbers<[1], [0], [0], [1], [0, 0, 1, 1], [], []>} : vector<64x1280xbf16>, vector<1280x128xbf16>, vector<64x128xf32> -> vector<64x128xf32>
    %56 = arith.addf %50, %55 : vector<64x128xf32>
    %c0_31 = arith.constant 0 : index
    %c0_32 = arith.constant 0 : index
    %57 = vector.load %arg3[%c0_31, %c0_32] : memref<1x128xf32, #tpu.memory_space<vmem>>, vector<1x128xf32>
    %58 = vector.broadcast %57 : vector<1x128xf32> to vector<64x128xf32>
    %59 = arith.addf %56, %58 : vector<64x128xf32>
    %cst_33 = arith.constant 0.000000e+00 : f32
    %60 = vector.broadcast %cst_33 : f32 to vector<64x128xf32>
    %61 = arith.maximumf %59, %60 : vector<64x128xf32>
    %cst_34 = arith.constant dense<0.000000e+00> : vector<128xf32>
    %62 = vector.multi_reduction <add>, %61, %cst_34 [0] : vector<64x128xf32> to vector<128xf32>
    %63 = vector.shape_cast %62 : vector<128xf32> to vector<1x128xf32>
    %cst_35 = arith.constant 1.562500e-02 : f32
    %64 = vector.broadcast %cst_35 : f32 to vector<1x128xf32>
    %65 = arith.mulf %63, %64 : vector<1x128xf32>
    %66 = arith.truncf %65 : vector<1x128xf32> to vector<1x128xbf16>
    %c0_36 = arith.constant 0 : index
    %c0_37 = arith.constant 0 : index
    %67 = vector.load %arg4[%c0_36, %c0_37] : memref<128x64xbf16, #tpu.memory_space<vmem>>, vector<128x64xbf16>
    %cst_38 = arith.constant dense<0.000000e+00> : vector<1x64xf32>
    %68 = tpu.matmul %66, %67, %cst_38 {dimension_numbers = #tpu.dot_dimension_numbers<[1], [0], [0], [1], [0, 0, 1, 1], [], []>} : vector<1x128xbf16>, vector<128x64xbf16>, vector<1x64xf32> -> vector<1x64xf32>
    %c0_39 = arith.constant 0 : index
    %c0_40 = arith.constant 0 : index
    %69 = vector.load %arg5[%c0_39, %c0_40] : memref<1x64xf32, #tpu.memory_space<vmem>>, vector<1x64xf32>
    %70 = arith.addf %68, %69 : vector<1x64xf32>
    %cst_41 = arith.constant 0.000000e+00 : f32
    %71 = vector.broadcast %cst_41 : f32 to vector<1x64xf32>
    %72 = arith.maximumf %70, %71 : vector<1x64xf32>
    %73 = arith.truncf %72 : vector<1x64xf32> to vector<1x64xbf16>
    %c0_42 = arith.constant 0 : index
    %c0_43 = arith.constant 0 : index
    %74 = vector.load %arg6[%c0_42, %c0_43] : memref<64x128xbf16, #tpu.memory_space<vmem>>, vector<64x128xbf16>
    %cst_44 = arith.constant dense<0.000000e+00> : vector<1x128xf32>
    %75 = tpu.matmul %73, %74, %cst_44 {dimension_numbers = #tpu.dot_dimension_numbers<[1], [0], [0], [1], [0, 0, 1, 1], [], []>} : vector<1x64xbf16>, vector<64x128xbf16>, vector<1x128xf32> -> vector<1x128xf32>
    %c0_45 = arith.constant 0 : index
    %c0_46 = arith.constant 0 : index
    %76 = vector.load %arg7[%c0_45, %c0_46] : memref<1x128xf32, #tpu.memory_space<vmem>>, vector<1x128xf32>
    %77 = arith.addf %75, %76 : vector<1x128xf32>
    %78 = vector.shape_cast %77 : vector<1x128xf32> to vector<1x1x128xf32>
    %79 = vector.shape_cast %78 : vector<1x1x128xf32> to vector<1x1x128xf32>
    %80 = vector.broadcast %79 : vector<1x1x128xf32> to vector<1x8x128xf32>
    %c0_47 = arith.constant 0 : index
    %c0_48 = arith.constant 0 : index
    %c0_49 = arith.constant 0 : index
    %81 = vector.load %arg8[%c0_47, %c0_48, %c0_49] : memref<1x8x128xf32, #tpu.memory_space<vmem>>, vector<1x8x128xf32>
    tpu.vector_store %arg8[%c0_47, %c0_48, %c0_49], %80 {strides = array<i32>} : memref<1x8x128xf32, #tpu.memory_space<vmem>>, vector<1x8x128xf32>,
    return
  }
  func.func @transform_0(%arg0: i32) -> (i32, i32, i32, i32) {
    %c0_i32 = arith.constant 0 : i32
    %c0_i32_0 = arith.constant 0 : i32
    %c0_i32_1 = arith.constant 0 : i32
    %c0_i32_2 = arith.constant 0 : i32
    return %arg0, %c0_i32, %c0_i32_0, %c0_i32_1 : i32, i32, i32, i32
  }
  func.func @transform_1(%arg0: i32) -> (i32, i32, i32) {
    %c0_i32 = arith.constant 0 : i32
    %c0_i32_0 = arith.constant 0 : i32
    %c0_i32_1 = arith.constant 0 : i32
    %c0_i32_2 = arith.constant 0 : i32
    return %c0_i32, %c0_i32_0, %c0_i32_1 : i32, i32, i32
  }
  func.func @transform_2(%arg0: i32) -> (i32, i32) {
    %c0_i32 = arith.constant 0 : i32
    %c0_i32_0 = arith.constant 0 : i32
    %c0_i32_1 = arith.constant 0 : i32
    return %c0_i32, %c0_i32_0 : i32, i32
  }
  func.func @transform_3(%arg0: i32) -> (i32, i32) {
    %c0_i32 = arith.constant 0 : i32
    %c0_i32_0 = arith.constant 0 : i32
    %c0_i32_1 = arith.constant 0 : i32
    return %c0_i32, %c0_i32_0 : i32, i32
  }
  func.func @transform_4(%arg0: i32) -> (i32, i32) {
    %c0_i32 = arith.constant 0 : i32
    %c0_i32_0 = arith.constant 0 : i32
    %c0_i32_1 = arith.constant 0 : i32
    return %c0_i32, %c0_i32_0 : i32, i32
  }
  func.func @transform_5(%arg0: i32) -> (i32, i32) {
    %c0_i32 = arith.constant 0 : i32
    %c0_i32_0 = arith.constant 0 : i32
    %c0_i32_1 = arith.constant 0 : i32
    return %c0_i32, %c0_i32_0 : i32, i32
  }
  func.func @transform_6(%arg0: i32) -> (i32, i32) {
    %c0_i32 = arith.constant 0 : i32
    %c0_i32_0 = arith.constant 0 : i32
    %c0_i32_1 = arith.constant 0 : i32
    return %c0_i32, %c0_i32_0 : i32, i32
  }
  func.func @transform_7(%arg0: i32) -> (i32, i32, i32) {
    %c0_i32 = arith.constant 0 : i32
    %c0_i32_0 = arith.constant 0 : i32
    %c0_i32_1 = arith.constant 0 : i32
    return %arg0, %c0_i32, %c0_i32_0 : i32, i32, i32
  }
}

</mosaic_0001>

<bundles_post_ra>
// kernel: modified_efficientnet_forward.2
= control target key start
LH: loop header
LB: loop body
LE: loop exit
PB: predicated region body
PF: predicated region fallthrough
CT: control target
= control target key end

     0   :  { %s1836_s18 = smov 0   ;;  %s1838_s19 = smov 0   ;;  %s2253_s0 = inlined_call_operand.vmem [shape: bf16[128,32], index: 0, kind: input, shape index: {}]   ;;  %s2254_s1 = inlined_call_operand.vmem [shape: bf16[32,32], index: 1, kind: input, shape index: {}]   ;;  %s2255_s2 = inlined_call_operand.vmem [shape: f32[1,32], index: 2, kind: input, shape index: {}]   ;;  %s2256_s3 = inlined_call_operand.vmem [shape: bf16[32,1280], index: 3, kind: input, shape index: {}]   ;;  %s2257_s4 = inlined_call_operand.vmem [shape: f32[1,1280], index: 4, kind: input, shape index: {}]   ;;  %s2258_s5 = inlined_call_operand.vmem [shape: bf16[128,1280], index: 5, kind: output, shape index: {}]  }
   0x1   :  { %s1840_s20 = smov 0   ;;  %s1842_s21 = smov 0  }
   0x2   :  { %s1844_s22 = smov 0  }
   0x3 LB: > { %s24_s23 = sadd.s32 1, %s1799_s21  ;;  %s1352_s24 = sadd.s32 4294967295, %s1803_s22   ;;  %s1803_s22 = sphi %s1844_s22, %s15_s22   ;;  %s1799_s21 = sphi %s1842_s21, %s2263_s21   ;;  %s1795_s20 = sphi %s1840_s20, %s2262_s20   ;;  %s1791_s19 = sphi %s1838_s19, %s2261_s19   ;;  %s1787_s18 = sphi %s1836_s18, %s2260_s18  }
   0x4   : > { %p25_p0 = scmp.ge.s32.totalorder %s24_s23, 5  ;;  %p109_p1 = scmp.ne.s32.totalorder %s1791_s19, %s1787_s18 }
   0x5   : > { %p110_p2 = scmp.eq.s32.totalorder %s1803_s22, 0  ;;  %p167_p4 = scmp.eq.s32.totalorder %s1352_s24, 4 }
   0x6   : > { %s2265_s23 = smov (%p25_p0, %s24_s23), 0  ;;  %s102_s26 = sadd.s32 1, %s1791_s19 }
   0x7   : > { %p111_p3 = por %p110_p2, %p109_p1  ;;  %s99_s25 = ssub.s32 %s1799_s21, %s2265_s23 }
   0x8   : > { %p100_p5 = scmp.eq.s32.totalorder %s99_s25, 0  ;;  %p1871_p6 = por %p167_p4, %p109_p1 }
   0x9   : > { %p1356_p7 = scmp.ge.s32.totalorder %s1803_s22, 5 }
   0xa   : > { %s1876_s28 = scalar_select %p100_p5, %s1791_s19, %s102_s26  }
   0xb   : > { %204 = sbr.rel (%p1356_p7) target bundleno = 25 (0x19), region = 28 }
  0x12   : > { %207 = sbr.rel (!%p111_p3) target bundleno = 25 (0x19), region = 32  ;;  %s209_s29 = sand.u32 (%p111_p3), 1, %s1791_s19  }
  0x13   : > { %s1464_s30 = sshll.u32 (%p111_p3), %s1799_s21, 3  ;;  %s1357_s6 = sshll.u32 (%p111_p3), %s209_s29, 5 }
  0x14   : > { %s214_s9 = scalar_lea.vmem (%p111_p3), %s2256_s3, %s1464_s30  ;;  %s211_s10 = scalar_lea.vmem (%p111_p3), [#allocation2], %s1357_s6 }
  0x15   : > { %v248_v0 = vld [vmem:[%s214_s9] sm:$0xff] (%p111_p3)  ;;  %v250_v1 = vld [vmem:[%s214_s9 + $0x28] sm:$0xff] (%p111_p3)  ;;  %v252_v2 = vld [vmem:[%s214_s9 + $0x50] sm:$0xff] (%p111_p3) }
  0x16   : > { %249 = vst [vmem:[%s211_s10] sm:$0xff] (%p111_p3), %v248_v0  ;;  %251 = vst [vmem:[%s211_s10 + $0x8] sm:$0xff] (%p111_p3), %v250_v1  ;;  %v254_v3 = vld [vmem:[%s214_s9 + $0x78] sm:$0xff] (%p111_p3) }
  0x17   : > { %253 = vst [vmem:[%s211_s10 + $0x10] sm:$0xff] (%p111_p3), %v252_v2  ;;  %255 = vst [vmem:[%s211_s10 + $0x18] sm:$0xff] (%p111_p3), %v254_v3 }
  0x19 PF: > { %p1360_p8 = scmp.ge.s32.totalorder %s1803_s22, 1  ;;  %p268_p9 = scmp.lt.s32.totalorder %s1803_s22, 6 }
  0x1b   : > { %p269_p10 = pnand %p1360_p8, %p268_p9 }
  0x1c   : > { %v1557_v4 = vld [vmem:[%s2254_s1] sm:$0xff] (!%p269_p10)   ;;  %v1558_v5 = vld [vmem:[%s2254_s1 + $0x8] sm:$0xff] (!%p269_p10)   ;;  %vm404_vm0 = vcmask (!%p269_p10), 261120   ;;  %v1561_v8 = vld [vmem:[%s2253_s0 + $0x10] sm:$0xff] (!%p269_p10)   ;;  %s275_s14 = sand.u32 (!%p269_p10), 1, %s1787_s18   ;;  %v1805_v18 = vmov (!%p269_p10), 0  }
  0x1d   : > { %272 = sbr.rel (%p269_p10) target bundleno = 598 (0x256), region = 74  ;;  %1492 = vmatprep.subr.bf16.mxu0 (!%p269_p10), %v1557_v4  ;;  %v1559_v6 = vld [vmem:[%s2253_s0] sm:$0xff] (!%p269_p10)   ;;  %v1560_v7 = vld [vmem:[%s2253_s0 + $0x8] sm:$0xff] (!%p269_p10)   ;;  %v1562_v9 = vld [vmem:[%s2253_s0 + $0x18] sm:$0xff] (!%p269_p10)   ;;  %s1361_s15 = sshll.u32 (!%p269_p10), %s275_s14, 5  ;;  %758 = vmatprep.mubr.bf16.mxu1 (!%p269_p10), %v1805_v18 }
  0x1e   : > { %1493 = vmatpush3.bf16.msra.mxu0 (!%p269_p10), %v1557_v4  ;;  %1496 = vmatprep.mubr.msk.bf16.mxu0 (!%p269_p10), %vm404_vm0, %v1559_v6  ;;  %v1563_v10 = vld [vmem:[%s2253_s0 + $0x20] sm:$0xff] (!%p269_p10)   ;;  %v1564_v11 = vld [vmem:[%s2253_s0 + $0x28] sm:$0xff] (!%p269_p10)   ;;  %v1565_v12 = vld [vmem:[%s2253_s0 + $0x30] sm:$0xff] (!%p269_p10)   ;;  %s277_s16 = scalar_lea.vmem (!%p269_p10), [#allocation2], %s1361_s15  ;;  %s1363_s25 = sshll.u32 (!%p269_p10), %s1795_s20, 1 }
  0x1f   : > { %1494 = vmatprep.subr.bf16.mxu0 (!%p269_p10), %v1558_v5  ;;  %v1566_v13 = vld [vmem:[%s2253_s0 + $0x38] sm:$0xff] (!%p269_p10)   ;;  %v1569_v14 = vld [vmem:[%s277_s16 + $0x4] ss:$8 sps:$4 sm:$0xff] (!%p269_p10)   ;;  %v1567_v15 = vld [vmem:[%s277_s16] ss:$8 sps:$4 sm:$0xff] (!%p269_p10)   ;;  %p318_p11 = scmp.lt.s32.totalorder (!%p269_p10), %s1363_s25, 9 }
  0x20   : > { %1512 = vmatprep.subr.bf16.mxu1 (!%p269_p10), %v1569_v14  ;;  %v1572_v16 = vld [vmem:[%s277_s16 + $0x14] ss:$8 sps:$4 sm:$0xff] (!%p269_p10)   ;;  %v1570_v17 = vld [vmem:[%s277_s16 + $0x10] ss:$8 sps:$4 sm:$0xff] (!%p269_p10)   ;;  %v1932_v19 = vld [vmem:[%s2255_s2] ss:$0 sm:$0xff] (!%p269_p10) }
  0x21   : > { %1514 = vmatpush1.bf16.msra.mxu1 (!%p269_p10), %v1567_v15  ;;  %s1362_s6 = sshll.u32 (!%p269_p10), %s275_s14, 7 }
  0x22   : > { %1495 = vmatpush3.bf16.msra.mxu0 (!%p269_p10), %v1558_v5  ;;  %1513 = vmatprep.subr.bf16.mxu1 (!%p269_p10), %v1572_v16  ;;  %s2119_s18 = scalar_lea.vmem (!%p269_p10), [#allocation3], %s1362_s6 }
  0x23   : > { %706 = vmatprep.subr.bf16.mxu0 (!%p269_p10), %v1569_v14 }
  0x24   : > { %s2267_s25 = smov (!%p318_p11, %s1363_s25), 9  ;;  %s1481_s7 = sshll.u32 (%p1871_p6), %s1795_s20, 3 }
  0x25   : > { %1497 = vmatmul.mubr.msk.bf16.vlgmr.msra.gmra.mrb[0].mxu0 %vm404_vm0, %v1560_v7  ;;  %1515 = vmatpush1.bf16.msra.mxu1 %v1570_v17  ;;  %s320_s30 = scalar_lea.vmem %s2257_s4, %s2267_s25  ;;  %s1167_s10 = scalar_lea.vmem (%p1871_p6), %s2258_s5, %s1481_s7 }
  0x26   : > { %1500 = vmatprep.mubr.msk.bf16.mxu0 %vm404_vm0, %v1561_v8  ;;  %707 = vmatpush1.bf16.msra.mxu0 %v1567_v15 }
  0x27   : > { %708 = vmatprep.subr.bf16.mxu0 %v1572_v16 }
  0x2a   : > { %709 = vmatpush1.bf16.msra.mxu0 %v1570_v17 }
  0x2d   : > { %1501 = vmatmul.mubr.msk.bf16.gmra.mrb[4].mxu0 %vm404_vm0, %v1562_v9 }
  0x2e   : > { %1504 = vmatprep.mubr.msk.bf16.mxu0 %vm404_vm0, %v1563_v10 }
  0x35   : > { %1505 = vmatmul.mubr.msk.bf16.gmra.mrb[8].mxu0 %vm404_vm0, %v1564_v11 }
  0x36   : > { %1508 = vmatprep.mubr.msk.bf16.mxu0 %vm404_vm0, %v1565_v12 }
  0x3d   : > { %1509 = vmatmul.mubr.msk.bf16.gmra.mrb[12].mxu0 %vm404_vm0, %v1566_v13 }
  0x3e   : > { %738 = vmatprep.mubr.bf16.mxu0 %v1805_v18 }
  0xf8   : > { %v1498_v20 = vpop.f32.mrb[0].mxu0 }
  0xf9   : > { %v1935_v21 = vadd.f32 %v1498_v20, %v1932_v19  ;;  %v463_v22 = vpop.f32.mrb[1].mxu0 }
  0xfa   : > { %v1938_v23 = vadd.f32 %v1932_v19, %v463_v22  ;;  %v1499_v24 = vpop.f32.mrb[2].mxu0 }
  0xfb   : > { %v1385_v25 = vmul.f32 -1.442695, %v1935_v21  ;;  %v1942_v26 = vadd.f32 %v1499_v24, %v1932_v19  ;;  %v466_v27 = vpop.f32.mrb[3].mxu0 }
  0xfc   : > { %v1383_v28 = vmul.f32 -1.442695, %v1938_v23  ;;  %v1946_v29 = vadd.f32 %v1932_v19, %v466_v27 }
  0xfd   : > { %1573 = vpow2.f32 %v1385_v25  ;;  %v1386_v30 = vmul.f32 -1.442695, %v1942_v26 }
  0xfe   : > { %1575 = vpow2.f32 %v1383_v28  ;;  %v1384_v31 = vmul.f32 -1.442695, %v1946_v29 }
  0xff   : > { %1577 = vpow2.f32 %v1386_v30 }
 0x100   : > { %1579 = vpow2.f32 %v1384_v31  ;;  %v1502_v32 = vpop.f32.mrb[4].mxu0 }
 0x101   : > { %v1951_v33 = vadd.f32 %v1502_v32, %v1932_v19  ;;  %v479_v34 = vpop.f32.mrb[5].mxu0 }
 0x102   : > { %v1954_v35 = vadd.f32 %v1932_v19, %v479_v34  ;;  %v1503_v36 = vpop.f32.mrb[6].mxu0 }
 0x103   : > { %v1389_v37 = vmul.f32 -1.442695, %v1951_v33  ;;  %v1958_v38 = vadd.f32 %v1503_v36, %v1932_v19  ;;  %v482_v39 = vpop.f32.mrb[7].mxu0 }
 0x104   : > { %v1387_v40 = vmul.f32 -1.442695, %v1954_v35  ;;  %v1962_v41 = vadd.f32 %v1932_v19, %v482_v39 }
 0x105   : > { %1581 = vpow2.f32 %v1389_v37  ;;  %v1390_v42 = vmul.f32 -1.442695, %v1958_v38 }
 0x106   : > { %1583 = vpow2.f32 %v1387_v40  ;;  %v1388_v43 = vmul.f32 -1.442695, %v1962_v41 }
 0x107   : > { %v1574_v44 = vpop.eup %1573  ;;  %1585 = vpow2.f32 %v1390_v42 }
 0x108   : > { %v1576_v45 = vpop.eup %1575  ;;  %v576_v46 = vadd.f32 1.0, %v1574_v44  ;;  %1587 = vpow2.f32 %v1388_v43  ;;  %v1506_v47 = vpop.f32.mrb[8].mxu0 }
 0x109   : > { %v1578_v48 = vpop.eup %1577  ;;  %v574_v49 = vadd.f32 1.0, %v1576_v45  ;;  %v1967_v50 = vadd.f32 %v1506_v47, %v1932_v19  ;;  %v495_v51 = vpop.f32.mrb[9].mxu0 }
 0x10a   : > { %v1580_v52 = vpop.eup %1579  ;;  %1589 = vrcp.f32 %v576_v46  ;;  %v577_v53 = vadd.f32 1.0, %v1578_v48  ;;  %v1970_v54 = vadd.f32 %v1932_v19, %v495_v51  ;;  %v1507_v55 = vpop.f32.mrb[10].mxu0 }
 0x10b   : > { %1591 = vrcp.f32 %v574_v49  ;;  %v575_v56 = vadd.f32 1.0, %v1580_v52  ;;  %v1393_v57 = vmul.f32 -1.442695, %v1967_v50  ;;  %v1974_v58 = vadd.f32 %v1507_v55, %v1932_v19  ;;  %v498_v59 = vpop.f32.mrb[11].mxu0 }
 0x10c   : > { %1593 = vrcp.f32 %v577_v53  ;;  %v1391_v60 = vmul.f32 -1.442695, %v1970_v54  ;;  %v1978_v61 = vadd.f32 %v1932_v19, %v498_v59 }
 0x10d   : > { %1595 = vrcp.f32 %v575_v56  ;;  %v1394_v62 = vmul.f32 -1.442695, %v1974_v58 }
 0x10e   : > { %1597 = vpow2.f32 %v1393_v57  ;;  %v1392_v63 = vmul.f32 -1.442695, %v1978_v61 }
 0x10f   : > { %v1582_v0 = vpop.eup %1581  ;;  %1599 = vpow2.f32 %v1391_v60 }
 0x110   : > { %v1584_v1 = vpop.eup %1583  ;;  %v580_v2 = vadd.f32 1.0, %v1582_v0  ;;  %1601 = vpow2.f32 %v1394_v62  ;;  %v1510_v3 = vpop.f32.mrb[12].mxu0 }
 0x111   : > { %v1586_v4 = vpop.eup %1585  ;;  %v578_v5 = vadd.f32 1.0, %v1584_v1  ;;  %1603 = vpow2.f32 %v1392_v63  ;;  %v1983_v6 = vadd.f32 %v1510_v3, %v1932_v19  ;;  %v511_v7 = vpop.f32.mrb[13].mxu0 }
 0x112   : > { %v1588_v8 = vpop.eup %1587  ;;  %1605 = vrcp.f32 %v580_v2  ;;  %v581_v9 = vadd.f32 1.0, %v1586_v4  ;;  %v1986_v10 = vadd.f32 %v1932_v19, %v511_v7  ;;  %v1511_v11 = vpop.f32.mrb[14].mxu0 }
 0x113   : > { %1607 = vrcp.f32 %v578_v5  ;;  %v579_v12 = vadd.f32 1.0, %v1588_v8  ;;  %v1397_v13 = vmul.f32 -1.442695, %v1983_v6  ;;  %v1990_v14 = vadd.f32 %v1511_v11, %v1932_v19  ;;  %v514_v15 = vpop.f32.mrb[15].mxu0 }
 0x114   : > { %v1590_v16 = vpop.eup %1589  ;;  %1609 = vrcp.f32 %v581_v9  ;;  %v1395_v17 = vmul.f32 -1.442695, %v1986_v10  ;;  %v1994_v20 = vadd.f32 %v1932_v19, %v514_v15 }
 0x115   : > { %v1592_v22 = vpop.eup %1591  ;;  %1611 = vrcp.f32 %v579_v12  ;;  %v1398_v24 = vmul.f32 -1.442695, %v1990_v14  ;;  %v624_v30 = vmul.f32 %v1590_v16, %v1935_v21  ;;  %v650_v16 = vld [vmem:[%s320_s30] sm:$0x3] }
 0x116   : > { %v1594_v25 = vpop.eup %1593  ;;  %1613 = vpow2.f32 %v1397_v13  ;;  %v1396_v27 = vmul.f32 -1.442695, %v1994_v20  ;;  %v622_v34 = vmul.f32 %v1592_v22, %v1938_v23 }
 0x117   : > { %v1596_v28 = vpop.eup %1595  ;;  %v625_v31 = vmul.f32 %v1594_v25, %v1942_v26  ;;  %1615 = vpow2.f32 %v1395_v17 }
 0x118   : > { %v1598_v32 = vpop.eup %1597  ;;  %v623_v19 = vmul.f32 %v1596_v28, %v1946_v29  ;;  %1617 = vpow2.f32 %v1398_v24 }
 0x119   : > { %v1600_v36 = vpop.eup %1599  ;;  %v639_v37 = vpack.c.bf16 %v625_v31, %v624_v30  ;;  %v584_v39 = vadd.f32 1.0, %v1598_v32  ;;  %1619 = vpow2.f32 %v1396_v27 }
 0x11a   : > { %v1602_v40 = vpop.eup %1601  ;;  %v638_v42 = vpack.c.bf16 %v623_v19, %v622_v34  ;;  %v582_v43 = vadd.f32 1.0, %v1600_v36 }
 0x11b   : > { %v1604_v44 = vpop.eup %1603  ;;  %1621 = vrcp.f32 %v584_v39  ;;  %v585_v45 = vadd.f32 1.0, %v1602_v40 }
 0x11c   : > { %v1606_v21 = vpop.eup %1605  ;;  %1623 = vrcp.f32 %v582_v43  ;;  %v583_v26 = vadd.f32 1.0, %v1604_v44  ;;  %1403 = vmatmul.mubr.msk.bf16.vlgmr.msra.gmra.mrb[16].mxu0 %vm404_vm0, %v638_v42 }
 0x11d   : > { %v1608_v46 = vpop.eup %1607  ;;  %1625 = vrcp.f32 %v585_v45  ;;  %748 = vmatprep.mubr.bf16.mxu0 %v1805_v18  ;;  %v628_v47 = vmul.f32 %v1606_v21, %v1951_v33 }
 0x11e   : > { %v1610_v23 = vpop.eup %1609  ;;  %1627 = vrcp.f32 %v583_v26  ;;  %v626_v51 = vmul.f32 %v1608_v46, %v1954_v35 }
 0x11f   : > { %v1612_v29 = vpop.eup %1611  ;;  %v629_v48 = vmul.f32 %v1610_v23, %v1958_v38 }
 0x120   : > { %v1614_v49 = vpop.eup %1613  ;;  %v627_v52 = vmul.f32 %v1612_v29, %v1962_v41 }
 0x121   : > { %v1616_v53 = vpop.eup %1615  ;;  %v641_v55 = vpack.c.bf16 %v629_v48, %v628_v47  ;;  %v588_v56 = vadd.f32 1.0, %v1614_v49 }
 0x122   : > { %v1618_v57 = vpop.eup %1617  ;;  %v640_v59 = vpack.c.bf16 %v627_v52, %v626_v51  ;;  %v586_v60 = vadd.f32 1.0, %v1616_v53 }
 0x123   : > { %v1620_v62 = vpop.eup %1619  ;;  %1629 = vrcp.f32 %v588_v56  ;;  %v589_v63 = vadd.f32 1.0, %v1618_v57 }
 0x124   : > { %1631 = vrcp.f32 %v586_v60  ;;  %v587_v0 = vadd.f32 1.0, %v1620_v62  ;;  %1404 = vmatmul.mubr.msk.bf16.gmra.mrb[20].mxu0 %vm404_vm0, %v639_v37  ;;  %1405 = vmatmul.mubr.msk.bf16.vlgmr.msra.gmra.mrb[0].mxu1 %vm404_vm0, %v640_v59 }
 0x125   : > { %v1622_v33 = vpop.eup %1621  ;;  %1633 = vrcp.f32 %v589_v63  ;;  %768 = vmatprep.mubr.bf16.mxu1 %v1805_v18 }
 0x126   : > { %v1624_v35 = vpop.eup %1623  ;;  %1635 = vrcp.f32 %v587_v0  ;;  %v632_v1 = vmul.f32 %v1622_v33, %v1967_v50 }
 0x127   : > { %v1626_v38 = vpop.eup %1625  ;;  %v630_v3 = vmul.f32 %v1624_v35, %v1970_v54 }
 0x128   : > { %v1628_v41 = vpop.eup %1627  ;;  %v633_v2 = vmul.f32 %v1626_v38, %v1974_v58 }
 0x129   : > { %v631_v4 = vmul.f32 %v1628_v41, %v1978_v61 }
 0x12a   : > { %v643_v5 = vpack.c.bf16 %v633_v2, %v632_v1 }
 0x12b   : > { %v642_v7 = vpack.c.bf16 %v631_v4, %v630_v3 }
 0x12c   : > { %1406 = vmatmul.mubr.msk.bf16.gmra.mrb[4].mxu1 %vm404_vm0, %v641_v55 }
 0x12d   : > { %v1630_v8 = vpop.eup %1629  ;;  %778 = vmatprep.mubr.bf16.mxu1 %v1805_v18 }
 0x12e   : > { %v1632_v9 = vpop.eup %1631  ;;  %v636_v13 = vmul.f32 %v1630_v8, %v1983_v6  ;;  %v652_v6 = vlaneseq }
 0x12f   : > { %v1634_v11 = vpop.eup %1633  ;;  %v634_v58 = vmul.f32 %v1632_v9, %v1986_v10 }
 0x130   : > { %v1636_v12 = vpop.eup %1635  ;;  %v637_v50 = vmul.f32 %v1634_v11, %v1990_v14  ;;  %v653_v10 = vshrl.u32 %v652_v6, 7 }
 0x131   : > { %v635_v54 = vmul.f32 %v1636_v12, %v1994_v20 }
 0x132   : > { %v645_v61 = vpack.c.bf16 %v637_v50, %v636_v13  ;;  %v654_v14 = vsub.s32 0, %v653_v10  ;;  %v658_v17 = vsub.s32 1, %v653_v10 }
 0x133   : > { %v644_v15 = vpack.c.bf16 %v635_v54, %v634_v58 }
 0x134   : > { %1407 = vmatmul.mubr.msk.bf16.gmra.mrb[8].mxu1 %vm404_vm0, %v642_v7  ;;  %v2032_v20 = vrot.slane %v650_v16, %v654_v14  ;;  %v2034_v22 = vrot.slane %v650_v16, %v658_v17 }
 0x135   : > { %788 = vmatprep.mubr.bf16.mxu1 %v1805_v18 }
 0x13c   : > { %1408 = vmatmul.mubr.msk.bf16.gmra.mrb[12].mxu1 %vm404_vm0, %v643_v5 }
 0x13d   : > { %798 = vmatprep.mubr.bf16.mxu1 %v1805_v18 }
 0x144   : > { %1409 = vmatmul.mubr.msk.bf16.gmra.mrb[16].mxu1 %vm404_vm0, %v644_v15 }
 0x145   : > { %808 = vmatprep.mubr.bf16.mxu1 %v1805_v18 }
 0x14c   : > { %1410 = vmatmul.mubr.msk.bf16.gmra.mrb[20].mxu1 %vm404_vm0, %v645_v61 }
 0x1ef   : > { %v740_v24 = vpop.f32.mrb[16].mxu0 }
 0x1f0   : > { %v2037_v18 = vadd.f32 %v740_v24, %v2032_v20  ;;  %v742_v25 = vpop.f32.mrb[17].mxu0 }
 0x1f1   : > { %v2040_v27 = vadd.f32 %v742_v25, %v2034_v22  ;;  %v744_v28 = vpop.f32.mrb[18].mxu0 }
 0x1f2   : > { %v1411_v30 = vmul.f32 -1.442695, %v2037_v18  ;;  %v2044_v31 = vadd.f32 %v744_v28, %v2032_v20  ;;  %v746_v32 = vpop.f32.mrb[19].mxu0 }
 0x1f3   : > { %v1412_v34 = vmul.f32 -1.442695, %v2040_v27  ;;  %v2048_v19 = vadd.f32 %v746_v32, %v2034_v22 }
 0x1f4   : > { %1637 = vpow2.f32 %v1411_v30  ;;  %v1413_v36 = vmul.f32 -1.442695, %v2044_v31 }
 0x1f5   : > { %1639 = vpow2.f32 %v1412_v34  ;;  %v1414_v37 = vmul.f32 -1.442695, %v2048_v19 }
 0x1f6   : > { %1641 = vpow2.f32 %v1413_v36 }
 0x1f7   : > { %1643 = vpow2.f32 %v1414_v37  ;;  %v750_v39 = vpop.f32.mrb[20].mxu0  ;;  %v760_v40 = vpop.f32.mrb[0].mxu1 }
 0x1f8   : > { %v2053_v42 = vadd.f32 %v750_v39, %v2032_v20  ;;  %v2056_v43 = vadd.f32 %v760_v40, %v2032_v20  ;;  %v752_v44 = vpop.f32.mrb[21].mxu0  ;;  %v762_v45 = vpop.f32.mrb[1].mxu1 }
 0x1f9   : > { %v2059_v21 = vadd.f32 %v752_v44, %v2034_v22  ;;  %v2062_v26 = vadd.f32 %v762_v45, %v2034_v22  ;;  %v754_v46 = vpop.f32.mrb[22].mxu0  ;;  %v764_v23 = vpop.f32.mrb[2].mxu1 }
 0x1fa   : > { %v1415_v29 = vmul.f32 -1.442695, %v2053_v42  ;;  %v1419_v47 = vmul.f32 -1.442695, %v2056_v43  ;;  %v2067_v48 = vadd.f32 %v754_v46, %v2032_v20  ;;  %v756_v49 = vpop.f32.mrb[23].mxu0  ;;  %v766_v51 = vpop.f32.mrb[3].mxu1  ;;  %v2073_v56 = vadd.f32 %v764_v23, %v2032_v20 }
 0x1fb   : > { %v1416_v52 = vmul.f32 -1.442695, %v2059_v21  ;;  %v1420_v53 = vmul.f32 -1.442695, %v2062_v26  ;;  %v2076_v59 = vadd.f32 %v756_v49, %v2034_v22  ;;  %v2079_v63 = vadd.f32 %v766_v51, %v2034_v22 }
 0x1fc   : > { %1645 = vpow2.f32 %v1415_v29  ;;  %v1417_v55 = vmul.f32 -1.442695, %v2067_v48  ;;  %v1421_v3 = vmul.f32 -1.442695, %v2073_v56 }
 0x1fd   : > { %1647 = vpow2.f32 %v1419_v47  ;;  %v1418_v7 = vmul.f32 -1.442695, %v2076_v59  ;;  %v1422_v9 = vmul.f32 -1.442695, %v2079_v63 }
 0x1fe   : > { %v1638_v57 = vpop.eup %1637  ;;  %1649 = vpow2.f32 %v1416_v52 }
 0x1ff   : > { %v1640_v60 = vpop.eup %1639  ;;  %v915_v62 = vadd.f32 1.0, %v1638_v57  ;;  %1651 = vpow2.f32 %v1420_v53  ;;  %v770_v0 = vpop.f32.mrb[4].mxu1 }
 0x200   : > { %v1642_v33 = vpop.eup %1641  ;;  %v916_v35 = vadd.f32 1.0, %v1640_v60  ;;  %1653 = vpow2.f32 %v1417_v55  ;;  %v2082_v38 = vadd.f32 %v770_v0, %v2032_v20  ;;  %v772_v41 = vpop.f32.mrb[5].mxu1 }
 0x201   : > { %v1644_v1 = vpop.eup %1643  ;;  %1655 = vrcp.f32 %v915_v62  ;;  %v917_v2 = vadd.f32 1.0, %v1642_v33  ;;  %v774_v4 = vpop.f32.mrb[6].mxu1  ;;  %v2089_v13 = vadd.f32 %v772_v41, %v2034_v22 }
 0x202   : > { %1657 = vrcp.f32 %v916_v35  ;;  %v918_v5 = vadd.f32 1.0, %v1644_v1  ;;  %v776_v8 = vpop.f32.mrb[7].mxu1  ;;  %v1423_v11 = vmul.f32 -1.442695, %v2082_v38  ;;  %v2092_v54 = vadd.f32 %v774_v4, %v2032_v20 }
 0x203   : > { %1659 = vrcp.f32 %v917_v2  ;;  %v2095_v10 = vadd.f32 %v776_v8, %v2034_v22  ;;  %v1424_v32 = vmul.f32 -1.442695, %v2089_v13 }
 0x204   : > { %1661 = vrcp.f32 %v918_v5  ;;  %v1425_v39 = vmul.f32 -1.442695, %v2092_v54 }
 0x205   : > { %1663 = vpow2.f32 %v1421_v3  ;;  %v1426_v45 = vmul.f32 -1.442695, %v2095_v10 }
 0x206   : > { %v1646_v12 = vpop.eup %1645  ;;  %1665 = vpow2.f32 %v1418_v7 }
 0x207   : > { %v1648_v50 = vpop.eup %1647  ;;  %v919_v58 = vadd.f32 1.0, %v1646_v12  ;;  %1667 = vpow2.f32 %v1422_v9  ;;  %v780_v61 = vpop.f32.mrb[8].mxu1 }
 0x208   : > { %v1650_v15 = vpop.eup %1649  ;;  %v923_v6 = vadd.f32 1.0, %v1648_v50  ;;  %1669 = vpow2.f32 %v1423_v11  ;;  %v782_v14 = vpop.f32.mrb[9].mxu1  ;;  %v2098_v24 = vadd.f32 %v780_v61, %v2032_v20 }
 0x209   : > { %v1652_v16 = vpop.eup %1651  ;;  %1671 = vrcp.f32 %v919_v58  ;;  %v920_v17 = vadd.f32 1.0, %v1650_v15  ;;  %v784_v25 = vpop.f32.mrb[10].mxu1  ;;  %v2110_v51 = vadd.f32 %v782_v14, %v2034_v22 }
 0x20a   : > { %v1654_v28 = vpop.eup %1653  ;;  %1673 = vrcp.f32 %v923_v6  ;;  %v924_v30 = vadd.f32 1.0, %v1652_v16  ;;  %v786_v34 = vpop.f32.mrb[11].mxu1  ;;  %v1427_v29 = vmul.f32 -1.442695, %v2098_v24  ;;  %v2114_v55 = vadd.f32 %v784_v25, %v2032_v20 }
 0x20b   : > { %v1656_v36 = vpop.eup %1655  ;;  %1675 = vrcp.f32 %v920_v17  ;;  %v921_v37 = vadd.f32 1.0, %v1654_v28  ;;  %v2117_v62 = vadd.f32 %v786_v34, %v2034_v22  ;;  %v1428_v3 = vmul.f32 -1.442695, %v2110_v51 }
 0x20c   : > { %v1658_v40 = vpop.eup %1657  ;;  %v1011_v44 = vmul.f32 %v1656_v36, %v2037_v18  ;;  %1677 = vrcp.f32 %v924_v30  ;;  %v1429_v9 = vmul.f32 -1.442695, %v2114_v55 }
 0x20d   : > { %v1660_v46 = vpop.eup %1659  ;;  %v1012_v23 = vmul.f32 %v1658_v40, %v2040_v27  ;;  %1679 = vrcp.f32 %v921_v37  ;;  %v1430_v50 = vmul.f32 -1.442695, %v2117_v62 }
 0x20e   : > { %v1662_v47 = vpop.eup %1661  ;;  %v1013_v49 = vmul.f32 %v1660_v46, %v2044_v31  ;;  %1681 = vpow2.f32 %v1424_v32 }
 0x20f   : > { %v1664_v52 = vpop.eup %1663  ;;  %v1465_v53 = vpack.c.bf16 %v1012_v23, %v1011_v44  ;;  %v1014_v18 = vmul.f32 %v1662_v47, %v2048_v19  ;;  %1683 = vpow2.f32 %v1425_v39  ;;  %v790_v57 = vpop.f32.mrb[12].mxu1 }
 0x210   : > { %v1666_v27 = vpop.eup %1665  ;;  %v925_v60 = vadd.f32 1.0, %v1664_v52  ;;  %1685 = vpow2.f32 %v1426_v45  ;;  %v792_v31 = vpop.f32.mrb[13].mxu1  ;;  %v2123_v35 = vadd.f32 %v790_v57, %v2032_v20 }
 0x211   : > { %v1668_v0 = vpop.eup %1667  ;;  %1139 = vst [vmem:[%s2119_s18] sm:$0xff] %v1465_v53  ;;  %v1466_v33 = vpack.c.bf16 %v1014_v18, %v1013_v49  ;;  %v922_v19 = vadd.f32 1.0, %v1666_v27  ;;  %1687 = vpow2.f32 %v1427_v29  ;;  %v794_v41 = vpop.f32.mrb[14].mxu1  ;;  %v2127_v4 = vadd.f32 %v792_v31, %v2034_v22 }
 0x212   : > { %v1670_v1 = vpop.eup %1669  ;;  %1689 = vrcp.f32 %v925_v60  ;;  %v926_v2 = vadd.f32 1.0, %v1668_v0  ;;  %v796_v5 = vpop.f32.mrb[15].mxu1  ;;  %v1431_v15 = vmul.f32 -1.442695, %v2123_v35 }
 0x213   : > { %v1672_v7 = vpop.eup %1671  ;;  %1140 = vst [vmem:[%s2119_s18 + $0x8] sm:$0xff] %v1466_v33  ;;  %1691 = vrcp.f32 %v922_v19  ;;  %v927_v8 = vadd.f32 1.0, %v1670_v1  ;;  %v1432_v16 = vmul.f32 -1.442695, %v2127_v4  ;;  %v2142_v32 = vadd.f32 %v796_v5, %v2034_v22 }
 0x214   : > { %v1674_v11 = vpop.eup %1673  ;;  %v1015_v12 = vmul.f32 %v1672_v7, %v2053_v42  ;;  %1693 = vrcp.f32 %v926_v2  ;;  %v2139_v42 = vadd.f32 %v794_v41, %v2032_v20 }
 0x215   : > { %v1676_v58 = vpop.eup %1675  ;;  %v1019_v61 = vmul.f32 %v1674_v11, %v2056_v43  ;;  %1695 = vrcp.f32 %v927_v8  ;;  %v1434_v18 = vmul.f32 -1.442695, %v2142_v32 }
 0x216   : > { %v1678_v6 = vpop.eup %1677  ;;  %v1016_v14 = vmul.f32 %v1676_v58, %v2059_v21  ;;  %1697 = vpow2.f32 %v1428_v3  ;;  %v1433_v47 = vmul.f32 -1.442695, %v2139_v42 }
 0x217   : > { %v1680_v17 = vpop.eup %1679  ;;  %v1020_v25 = vmul.f32 %v1678_v6, %v2062_v26  ;;  %1699 = vpow2.f32 %v1429_v9  ;;  %v800_v28 = vpop.f32.mrb[16].mxu1 }
 0x218   : > { %v1682_v30 = vpop.eup %1681  ;;  %v1467_v43 = vpack.c.bf16 %v1016_v14, %v1015_v12  ;;  %1701 = vpow2.f32 %v1430_v50  ;;  %v802_v21 = vpop.f32.mrb[17].mxu1  ;;  %v2145_v26 = vadd.f32 %v800_v28, %v2032_v20  ;;  %v1017_v52 = vmul.f32 %v1680_v17, %v2067_v48 }
 0x219   : > { %v1684_v34 = vpop.eup %1683  ;;  %v1469_v36 = vpack.c.bf16 %v1020_v25, %v1019_v61  ;;  %v928_v37 = vadd.f32 1.0, %v1682_v30  ;;  %1703 = vpow2.f32 %v1431_v15  ;;  %v804_v39 = vpop.f32.mrb[18].mxu1  ;;  %v2149_v45 = vadd.f32 %v802_v21, %v2034_v22 }
 0x21a   : > { %v1686_v40 = vpop.eup %1685  ;;  %1141 = vst [vmem:[%s2119_s18 + $0x10] sm:$0xff] %v1467_v43  ;;  %v929_v44 = vadd.f32 1.0, %v1684_v34  ;;  %1705 = vpow2.f32 %v1432_v16  ;;  %v806_v46 = vpop.f32.mrb[19].mxu1  ;;  %v1435_v60 = vmul.f32 -1.442695, %v2145_v26 }
 0x21b   : > { %v1688_v23 = vpop.eup %1687  ;;  %1143 = vst [vmem:[%s2119_s18 + $0x20] sm:$0xff] %v1469_v36  ;;  %1707 = vrcp.f32 %v928_v37  ;;  %v930_v29 = vadd.f32 1.0, %v1686_v40  ;;  %v1436_v33 = vmul.f32 -1.442695, %v2149_v45  ;;  %v2164_v8 = vadd.f32 %v806_v46, %v2034_v22 }
 0x21c   : > { %v1690_v49 = vpop.eup %1689  ;;  %1709 = vrcp.f32 %v929_v44  ;;  %v931_v53 = vadd.f32 1.0, %v1688_v23 }
 0x21d   : > { %v1692_v57 = vpop.eup %1691  ;;  %v1021_v27 = vmul.f32 %v1690_v49, %v2073_v56  ;;  %1711 = vrcp.f32 %v930_v29  ;;  %v2161_v56 = vadd.f32 %v804_v39, %v2032_v20  ;;  %v1438_v30 = vmul.f32 -1.442695, %v2164_v8 }
 0x21e   : > { %v1694_v31 = vpop.eup %1693  ;;  %v1018_v0 = vmul.f32 %v1692_v57, %v2076_v59  ;;  %1713 = vrcp.f32 %v931_v53 }
 0x21f   : > { %v1696_v19 = vpop.eup %1695  ;;  %v1022_v48 = vmul.f32 %v1694_v31, %v2079_v63  ;;  %1715 = vpow2.f32 %v1433_v47  ;;  %v810_v41 = vpop.f32.mrb[20].mxu1  ;;  %v1437_v17 = vmul.f32 -1.442695, %v2161_v56 }
 0x220   : > { %v1698_v1 = vpop.eup %1697  ;;  %v1468_v2 = vpack.c.bf16 %v1018_v0, %v1017_v52  ;;  %1717 = vpow2.f32 %v1434_v18  ;;  %v812_v3 = vpop.f32.mrb[21].mxu1  ;;  %v2168_v12 = vadd.f32 %v810_v41, %v2032_v20  ;;  %v1023_v14 = vmul.f32 %v1696_v19, %v2082_v38 }
 0x221   : > { %v1700_v5 = vpop.eup %1699  ;;  %v1470_v7 = vpack.c.bf16 %v1022_v48, %v1021_v27  ;;  %v932_v59 = vadd.f32 1.0, %v1698_v1  ;;  %1719 = vpow2.f32 %v1435_v60  ;;  %v814_v9 = vpop.f32.mrb[22].mxu1  ;;  %v2172_v15 = vadd.f32 %v812_v3, %v2034_v22 }
 0x222   : > { %v1702_v11 = vpop.eup %1701  ;;  %1142 = vst [vmem:[%s2119_s18 + $0x18] sm:$0xff] %v1468_v2  ;;  %v933_v63 = vadd.f32 1.0, %v1700_v5  ;;  %1721 = vpow2.f32 %v1436_v33  ;;  %v816_v50 = vpop.f32.mrb[23].mxu1  ;;  %v1439_v34 = vmul.f32 -1.442695, %v2168_v12  ;;  %v2183_v46 = vadd.f32 %v814_v9, %v2032_v20 }
 0x223   : > { %v1704_v58 = vpop.eup %1703  ;;  %1144 = vst [vmem:[%s2119_s18 + $0x28] sm:$0xff] %v1470_v7  ;;  %1723 = vrcp.f32 %v932_v59  ;;  %v934_v61 = vadd.f32 1.0, %v1702_v11  ;;  %v1440_v38 = vmul.f32 -1.442695, %v2172_v15  ;;  %v2186_v23 = vadd.f32 %v816_v50, %v2034_v22 }
 0x224   : > { %v1706_v6 = vpop.eup %1705  ;;  %1725 = vrcp.f32 %v933_v63  ;;  %v935_v16 = vadd.f32 1.0, %v1704_v58  ;;  %v1441_v18 = vmul.f32 -1.442695, %v2183_v46 }
 0x225   : > { %v1708_v25 = vpop.eup %1707  ;;  %1727 = vrcp.f32 %v934_v61  ;;  %v936_v28 = vadd.f32 1.0, %v1706_v6  ;;  %v1442_v27 = vmul.f32 -1.442695, %v2186_v23 }
 0x226   : > { %v1710_v43 = vpop.eup %1709  ;;  %v1024_v21 = vmul.f32 %v1708_v25, %v2089_v13  ;;  %1729 = vrcp.f32 %v935_v16 }
 0x227   : > { %v1712_v36 = vpop.eup %1711  ;;  %v1025_v37 = vmul.f32 %v1710_v43, %v2092_v54  ;;  %1731 = vrcp.f32 %v936_v28 }
 0x228   : > { %v1714_v39 = vpop.eup %1713  ;;  %v1471_v40 = vpack.c.bf16 %v1024_v21, %v1023_v14  ;;  %v1026_v44 = vmul.f32 %v1712_v36, %v2095_v10  ;;  %1733 = vpow2.f32 %v1437_v17 }
 0x229   : > { %v1716_v13 = vpop.eup %1715  ;;  %1735 = vpow2.f32 %v1438_v30  ;;  %v1027_v10 = vmul.f32 %v1714_v39, %v2098_v24 }
 0x22a   : > { %v1718_v29 = vpop.eup %1717  ;;  %1145 = vst [vmem:[%s2119_s18 + $0x30] sm:$0xff] %v1471_v40  ;;  %v1472_v54 = vpack.c.bf16 %v1026_v44, %v1025_v37  ;;  %v937_v47 = vadd.f32 1.0, %v1716_v13  ;;  %1737 = vpow2.f32 %v1439_v34 }
 0x22b   : > { %v1720_v49 = vpop.eup %1719  ;;  %v938_v52 = vadd.f32 1.0, %v1718_v29  ;;  %1739 = vpow2.f32 %v1440_v38 }
 0x22c   : > { %v1722_v53 = vpop.eup %1721  ;;  %1146 = vst [vmem:[%s2119_s18 + $0x38] sm:$0xff] %v1472_v54  ;;  %1741 = vrcp.f32 %v937_v47  ;;  %v939_v20 = vadd.f32 1.0, %v1720_v49 }
 0x22d   : > { %v1724_v57 = vpop.eup %1723  ;;  %1743 = vrcp.f32 %v938_v52  ;;  %v940_v22 = vadd.f32 1.0, %v1722_v53 }
 0x22e   : > { %v1726_v60 = vpop.eup %1725  ;;  %v1028_v31 = vmul.f32 %v1724_v57, %v2110_v51  ;;  %1745 = vrcp.f32 %v939_v20 }
 0x22f   : > { %v1728_v0 = vpop.eup %1727  ;;  %v1029_v33 = vmul.f32 %v1726_v60, %v2114_v55  ;;  %1747 = vrcp.f32 %v940_v22 }
 0x230   : > { %v1730_v24 = vpop.eup %1729  ;;  %v1473_v19 = vpack.c.bf16 %v1028_v31, %v1027_v10  ;;  %v1030_v48 = vmul.f32 %v1728_v0, %v2117_v62  ;;  %1749 = vpow2.f32 %v1441_v18 }
 0x231   : > { %v1732_v41 = vpop.eup %1731  ;;  %v1031_v1 = vmul.f32 %v1730_v24, %v2123_v35  ;;  %1751 = vpow2.f32 %v1442_v27  ;;  %v1237_v49 = vld [vmem:[%s2119_s18 + $0x30] sm:$0xff] (%p1871_p6) }
 0x232   : > { %v1734_v2 = vpop.eup %1733  ;;  %1147 = vst [vmem:[%s2119_s18 + $0x40] sm:$0xff] %v1473_v19  ;;  %v1474_v3 = vpack.c.bf16 %v1030_v48, %v1029_v33  ;;  %v1032_v51 = vmul.f32 %v1732_v41, %v2127_v4  ;;  %1238 = vst [vmem:[%s1167_s10 + $0xf0] sm:$0xff] (%p1871_p6), %v1237_v49 }
 0x233   : > { %v1736_v5 = vpop.eup %1735  ;;  %v941_v7 = vadd.f32 1.0, %v1734_v2  ;;  %v1239_v52 = vld [vmem:[%s2119_s18 + $0x38] sm:$0xff] (%p1871_p6) }
 0x234   : > { %v1738_v55 = vpop.eup %1737  ;;  %1148 = vst [vmem:[%s2119_s18 + $0x48] sm:$0xff] %v1474_v3  ;;  %v1475_v59 = vpack.c.bf16 %v1032_v51, %v1031_v1  ;;  %v942_v9 = vadd.f32 1.0, %v1736_v5  ;;  %1240 = vst [vmem:[%s1167_s10 + $0x118] sm:$0xff] (%p1871_p6), %v1239_v52 }
 0x235   : > { %v1740_v11 = vpop.eup %1739  ;;  %1753 = vrcp.f32 %v941_v7  ;;  %v943_v62 = vadd.f32 1.0, %v1738_v55 }
 0x236   : > { %v1742_v63 = vpop.eup %1741  ;;  %1149 = vst [vmem:[%s2119_s18 + $0x50] sm:$0xff] %v1475_v59  ;;  %1755 = vrcp.f32 %v942_v9  ;;  %v944_v35 = vadd.f32 1.0, %v1740_v11 }
 0x237   : > { %v1744_v50 = vpop.eup %1743  ;;  %v1033_v58 = vmul.f32 %v1742_v63, %v2139_v42  ;;  %1757 = vrcp.f32 %v943_v62 }
 0x238   : > { %v1746_v4 = vpop.eup %1745  ;;  %v1034_v61 = vmul.f32 %v1744_v50, %v2142_v32  ;;  %1759 = vrcp.f32 %v944_v35 }
 0x239   : > { %v1748_v6 = vpop.eup %1747  ;;  %v1035_v14 = vmul.f32 %v1746_v4, %v2145_v26  ;;  %v1241_v53 = vld [vmem:[%s2119_s18 + $0x40] sm:$0xff] (%p1871_p6) }
 0x23a   : > { %v1750_v16 = vpop.eup %1749  ;;  %v1476_v17 = vpack.c.bf16 %v1034_v61, %v1033_v58  ;;  %v1036_v25 = vmul.f32 %v1748_v6, %v2149_v45  ;;  %1242 = vst [vmem:[%s1167_s10 + $0x140] sm:$0xff] (%p1871_p6), %v1241_v53 }
 0x23b   : > { %v1752_v28 = vpop.eup %1751  ;;  %v945_v30 = vadd.f32 1.0, %v1750_v16  ;;  %v1243_v10 = vld [vmem:[%s2119_s18 + $0x48] sm:$0xff] (%p1871_p6) }
 0x23c   : > { %1150 = vst [vmem:[%s2119_s18 + $0x58] sm:$0xff] %v1476_v17  ;;  %v1477_v43 = vpack.c.bf16 %v1036_v25, %v1035_v14  ;;  %v946_v21 = vadd.f32 1.0, %v1752_v28  ;;  %1244 = vst [vmem:[%s1167_s10 + $0x168] sm:$0xff] (%p1871_p6), %v1243_v10 }
 0x23d   : > { %1761 = vrcp.f32 %v945_v30  ;;  %v1245_v20 = vld [vmem:[%s2119_s18 + $0x50] sm:$0xff] (%p1871_p6) }
 0x23e   : > { %1151 = vst [vmem:[%s2119_s18 + $0x60] sm:$0xff] %v1477_v43  ;;  %1763 = vrcp.f32 %v946_v21  ;;  %1246 = vst [vmem:[%s1167_s10 + $0x190] sm:$0xff] (%p1871_p6), %v1245_v20 }
 0x23f   : > { %v1754_v42 = vpop.eup %1753 }
 0x240   : > { %v1756_v32 = vpop.eup %1755  ;;  %v1037_v34 = vmul.f32 %v1754_v42, %v2161_v56  ;;  %v1225_v56 = vld [vmem:[%s2119_s18] sm:$0xff] (%p1871_p6) }
 0x241   : > { %v1758_v26 = vpop.eup %1757  ;;  %v1038_v36 = vmul.f32 %v1756_v32, %v2164_v8  ;;  %v1227_v8 = vld [vmem:[%s2119_s18 + $0x8] sm:$0xff] (%p1871_p6)  ;;  %1226 = vst [vmem:[%s1167_s10] sm:$0xff] (%p1871_p6), %v1225_v56 }
 0x242   : > { %v1760_v37 = vpop.eup %1759  ;;  %v1039_v45 = vmul.f32 %v1758_v26, %v2168_v12  ;;  %v1229_v12 = vld [vmem:[%s2119_s18 + $0x10] sm:$0xff] (%p1871_p6)  ;;  %1228 = vst [vmem:[%s1167_s10 + $0x28] sm:$0xff] (%p1871_p6), %v1227_v8 }
 0x243   : > { %v1478_v38 = vpack.c.bf16 %v1038_v36, %v1037_v34  ;;  %v1040_v39 = vmul.f32 %v1760_v37, %v2172_v15  ;;  %v1231_v15 = vld [vmem:[%s2119_s18 + $0x18] sm:$0xff] (%p1871_p6)  ;;  %1230 = vst [vmem:[%s1167_s10 + $0x50] sm:$0xff] (%p1871_p6), %v1229_v12 }
 0x244   : > { %1232 = vst [vmem:[%s1167_s10 + $0x78] sm:$0xff] (%p1871_p6), %v1231_v15  ;;  %v1247_v18 = vld [vmem:[%s2119_s18 + $0x58] sm:$0xff] (%p1871_p6) }
 0x245   : > { %1152 = vst [vmem:[%s2119_s18 + $0x68] sm:$0xff] %v1478_v38  ;;  %v1479_v40 = vpack.c.bf16 %v1040_v39, %v1039_v45  ;;  %1248 = vst [vmem:[%s1167_s10 + $0x1b8] sm:$0xff] (%p1871_p6), %v1247_v18  ;;  %v1249_v57 = vld [vmem:[%s2119_s18 + $0x60] sm:$0xff] (%p1871_p6) }
 0x246   : > { %1250 = vst [vmem:[%s1167_s10 + $0x1e0] sm:$0xff] (%p1871_p6), %v1249_v57 }
 0x247   : > { %v1762_v44 = vpop.eup %1761  ;;  %1153 = vst [vmem:[%s2119_s18 + $0x70] sm:$0xff] %v1479_v40  ;;  %1161 = sbr.rel (!%p1871_p6) target bundleno = 598 (0x256), region = 82 }
 0x248   : > { %v1764_v13 = vpop.eup %1763  ;;  %v1041_v29 = vmul.f32 %v1762_v44, %v2183_v46  ;;  %v1233_v46 = vld [vmem:[%s2119_s18 + $0x20] sm:$0xff] (%p1871_p6) }
 0x249   : > { %v1042_v54 = vmul.f32 %v1764_v13, %v2186_v23  ;;  %v1235_v23 = vld [vmem:[%s2119_s18 + $0x28] sm:$0xff] (%p1871_p6)  ;;  %1234 = vst [vmem:[%s1167_s10 + $0xa0] sm:$0xff] (%p1871_p6), %v1233_v46 }
 0x24a   : > { %1236 = vst [vmem:[%s1167_s10 + $0xc8] sm:$0xff] (%p1871_p6), %v1235_v23 }
 0x24b   : > { %v1480_v47 = vpack.c.bf16 %v1042_v54, %v1041_v29 }
 0x24c   : > { %v1251_v22 = vld [vmem:[%s2119_s18 + $0x68] sm:$0xff] (%p1871_p6) }
 0x24d   : > { %1154 = vst [vmem:[%s2119_s18 + $0x78] sm:$0xff] %v1480_v47  ;;  %1252 = vst [vmem:[%s1167_s10 + $0x208] sm:$0xff] (%p1871_p6), %v1251_v22 }
 0x24e   : > { %v1253_v27 = vld [vmem:[%s2119_s18 + $0x70] sm:$0xff] }
 0x24f   : > { %1254 = vst [vmem:[%s1167_s10 + $0x230] sm:$0xff] %v1253_v27 }
 0x254   : > { %v1255_v60 = vld [vmem:[%s2119_s18 + $0x78] sm:$0xff] }
 0x255   : > { %1256 = vst [vmem:[%s1167_s10 + $0x258] sm:$0xff] %v1255_v60 }
 0x256 PF: > { %s15_s22 = sadd.s32 1, %s1803_s22   ;;  %s2260_s18 = smov %s1791_s19 }
 0x257   : > { %p12_p12 = scmp.ge.s32.totalorder %s15_s22, 7   ;;  %s2261_s19 = smov %s1876_s28 }
 0x258   : > { %s2262_s20 = smov %s1799_s21  ;;  %s2263_s21 = smov %s2265_s23 }
 0x259   :  { %14 = sbr.rel (!%p12_p12) target bundleno = 3 (0x3), region = 157 }

// kernel: modified_efficientnet_forward.3
= control target key start
LH: loop header
LB: loop body
LE: loop exit
PB: predicated region body
PF: predicated region fallthrough
CT: control target
= control target key end

     0   :  { %s16455_s24 = smov 0   ;;  %s21152_s0 = inlined_call_operand.vmem [shape: bf16[2,10,10,1280], index: 0, kind: input, shape index: {}]   ;;  %s21153_s1 = inlined_call_operand.vmem [shape: bf16[9,1280,128], index: 1, kind: input, shape index: {}]   ;;  %s21154_s2 = inlined_call_operand.vmem [shape: f32[1,128], index: 2, kind: input, shape index: {}]   ;;  %s21155_s3 = inlined_call_operand.vmem [shape: bf16[128,64], index: 3, kind: input, shape index: {}]   ;;  %s21156_s4 = inlined_call_operand.vmem [shape: f32[1,64], index: 4, kind: input, shape index: {}]   ;;  %s21157_s5 = inlined_call_operand.vmem [shape: bf16[64,128], index: 5, kind: input, shape index: {}]   ;;  %s21158_s6 = inlined_call_operand.vmem [shape: f32[1,128], index: 6, kind: input, shape index: {}]   ;;  %s21159_s7 = inlined_call_operand.vmem [shape: f32[2,8,128], index: 7, kind: output, shape index: {}]  }
   0x1 LB: > { %s11253_s25 = sadd.s32 4294967295, %s16411_s24   ;;  %p11257_p0 = scmp.ge.s32.totalorder %s16411_s24, 1  ;;  %s16411_s24 = sphi %s16455_s24, %s17_s24  }
   0x2   : > { %p237_p1 = scmp.lt.s32.totalorder %s16411_s24, 3 }
   0x4   : > { %p238_p2 = pnand %p11257_p0, %p237_p1 }
   0x6   : > { %241 = sbr.rel (%p238_p2) target bundleno = 1514 (0x5ea), region = 48 }
   0xd   : > { %v15453_v0 = vld [vmem:[%s21153_s1 + $0x2c0] sm:$0xff]   ;;  %v15457_v4 = vld [vmem:[%s21153_s1 + $0x2c8] sm:$0xff]   ;;  %v15461_v8 = vld [vmem:[%s21153_s1 + $0x2d0] sm:$0xff]   ;;  %p268_p3 = scmp.lt.s32.totalorder %s11253_s25, 1  ;;  %vm538_vm0 = vsmask.f32 3328 }
   0xe   : > { %v15454_v1 = vld [vmem:[%s21153_s1 + $0x340] sm:$0xff]   ;;  %13596 = vmatprep.subr.bf16.mxu0 %v15453_v0  ;;  %v15458_v5 = vld [vmem:[%s21153_s1 + $0x348] sm:$0xff]   ;;  %v15462_v9 = vld [vmem:[%s21153_s1 + $0x350] sm:$0xff]   ;;  %vm539_vm1 = vsmask.f32 7440  ;;  %v21344_v58 = vmov 0 }
   0xf   : > { %v15455_v2 = vld [vmem:[%s21153_s1 + $0x280] sm:$0xff]   ;;  %13636 = vmatprep.subr.bf16.mxu1 %v15454_v1  ;;  %v15459_v6 = vld [vmem:[%s21153_s1 + $0x288] sm:$0xff]   ;;  %v15463_v10 = vld [vmem:[%s21153_s1 + $0x290] sm:$0xff]   ;;  %s21697_s25 = smov (!%p268_p3, %s11253_s25), 1  ;;  %vm3272_vm3 = vcmask 1042432   ;;  %vm3273_vm4 = vcmask 1046532  }
  0x10   : > { %v15456_v3 = vld [vmem:[%s21153_s1 + $0x300] sm:$0xff]   ;;  %13597 = vmatpush3.bf16.msra.mxu0 %v15455_v2  ;;  %v15460_v7 = vld [vmem:[%s21153_s1 + $0x308] sm:$0xff]   ;;  %v15464_v11 = vld [vmem:[%s21153_s1 + $0x310] sm:$0xff]   ;;  %s15442_s13 = smul.u32 800, %s21697_s25  ;;  %vm16414_vm6 = vmmov 0   ;;  %vm11151_vm7 = vcmask 523264  }
  0x11   : > { %13637 = vmatpush3.bf16.msra.mxu1 %v15456_v3  ;;  %13598 = vmatprep.subr.bf16.mxu0 %v15457_v4  ;;  %v15465_v12 = vld [vmem:[%s21153_s1 + $0x2d8] sm:$0xff]   ;;  %v15469_v16 = vld [vmem:[%s21153_s1 + $0x2e0] sm:$0xff]   ;;  %v15473_v20 = vld [vmem:[%s21153_s1 + $0x2e8] sm:$0xff]   ;;  %s11259_s12 = sshll.u32 %s21697_s25, 3 }
  0x12   : > { %13638 = vmatprep.subr.bf16.mxu1 %v15458_v5  ;;  %v15466_v13 = vld [vmem:[%s21153_s1 + $0x358] sm:$0xff]   ;;  %v15470_v17 = vld [vmem:[%s21153_s1 + $0x360] sm:$0xff]   ;;  %v15474_v21 = vld [vmem:[%s21153_s1 + $0x368] sm:$0xff]   ;;  %s16563_s26 = scalar_lea.vmem %s21152_s0, %s15442_s13  ;;  %s276_s15 = scalar_lea.vmem %s21159_s7, %s11259_s12 }
  0x13   : > { %v15467_v14 = vld [vmem:[%s21153_s1 + $0x298] sm:$0xff]   ;;  %v15471_v18 = vld [vmem:[%s21153_s1 + $0x2a0] sm:$0xff]   ;;  %v15475_v22 = vld [vmem:[%s21153_s1 + $0x2a8] sm:$0xff]  }
  0x14   : > { %13599 = vmatpush3.bf16.msra.mxu0 %v15459_v6  ;;  %v15468_v15 = vld [vmem:[%s21153_s1 + $0x318] sm:$0xff]   ;;  %v15472_v19 = vld [vmem:[%s21153_s1 + $0x320] sm:$0xff]   ;;  %v15476_v23 = vld [vmem:[%s21153_s1 + $0x328] sm:$0xff]  }
  0x15   : > { %13639 = vmatpush3.bf16.msra.mxu1 %v15460_v7  ;;  %13600 = vmatprep.subr.bf16.mxu0 %v15461_v8  ;;  %v15477_v24 = vld [vmem:[%s21153_s1 + $0x2f0] sm:$0xff]   ;;  %v15481_v28 = vld [vmem:[%s21153_s1 + $0x2f8] sm:$0xff]   ;;  %v278_v32 = vld [vmem:[%s16563_s26] sm:$0xff] }
  0x16   : > { %13640 = vmatprep.subr.bf16.mxu1 %v15462_v9  ;;  %v15478_v25 = vld [vmem:[%s21153_s1 + $0x370] sm:$0xff]   ;;  %v15482_v29 = vld [vmem:[%s21153_s1 + $0x378] sm:$0xff]   ;;  %v283_v33 = vld [vmem:[%s16563_s26 + $0x28] sm:$0x11]  ;;  %v542_v37 = vshrl.u32 %v278_v32, 16  ;;  %v545_v38 = vshll.u32 %v278_v32, 16 }
  0x17   : > { %v15479_v26 = vld [vmem:[%s21153_s1 + $0x2b0] sm:$0xff]   ;;  %v15483_v30 = vld [vmem:[%s21153_s1 + $0x2b8] sm:$0xff]   ;;  %v298_v36 = vld [vmem:[%s16563_s26 + $0xa0] sm:$0xff]  ;;  %v551_v39 = vshll.u32 %v283_v33, 16 }
  0x18   : > { %13601 = vmatpush3.bf16.msra.mxu0 %v15463_v10  ;;  %v15480_v27 = vld [vmem:[%s21153_s1 + $0x330] sm:$0xff]   ;;  %v15484_v31 = vld [vmem:[%s21153_s1 + $0x338] sm:$0xff]   ;;  %v544_v41 = vrot.slane %v542_v37, 4  ;;  %v682_v44 = vshrl.u32 %v298_v36, 16  ;;  %v547_v45 = vrot.slane %v545_v38, 5  ;;  %v279_v47 = vld [vmem:[%s16563_s26 + $0x8] sm:$0xff] }
  0x19   : > { %13641 = vmatpush3.bf16.msra.mxu1 %v15464_v11  ;;  %13602 = vmatprep.subr.bf16.mxu0 %v15465_v12  ;;  %v288_v34 = vld [vmem:[%s16563_s26 + $0x50] sm:$0xff]  ;;  %v293_v35 = vld [vmem:[%s16563_s26 + $0x78] sm:$0x11]  ;;  %v303_v48 = vld [vmem:[%s16563_s26 + $0xc8] sm:$0x11]  ;;  %v553_v53 = vrot.slane %v551_v39, 5 }
  0x1a   : > { %13642 = vmatprep.subr.bf16.mxu1 %v15466_v13  ;;  %v612_v40 = vshrl.u32 %v288_v34, 16  ;;  %v615_v42 = vshll.u32 %v288_v34, 16  ;;  %v621_v43 = vshll.u32 %v293_v35, 16  ;;  %v284_v50 = vld [vmem:[%s16563_s26 + $0x30] sm:$0x11]  ;;  %v289_v51 = vld [vmem:[%s16563_s26 + $0x58] sm:$0xff]  ;;  %v548_v52 = vor.u32 %v547_v45, %v544_v41  ;;  %vm16585_vm2 = vmor %vm538_vm0, %vm539_vm1 }
  0x1b   : > { %v685_v55 = vshll.u32 %v298_v36, 16  ;;  %v294_v56 = vld [vmem:[%s16563_s26 + $0x80] sm:$0x11]  ;;  %v21345_v58 = vsel %vm16585_vm2, 4294967295, %v21344_v58  ;;  %v684_v60 = vrot.slane %v682_v44, 4  ;;  %v299_v61 = vld [vmem:[%s16563_s26 + $0xa8] sm:$0xff]  ;;  %vm17694_vm5 = vmor %vm3272_vm3, %vm3273_vm4 }
  0x1c   : > { %13603 = vmatpush3.bf16.msra.mxu0 %v15467_v14  ;;  %v614_v46 = vrot.slane %v612_v40, 4  ;;  %v617_v49 = vrot.slane %v615_v42, 5  ;;  %v623_v54 = vrot.slane %v621_v43, 5  ;;  %v15485_v57 = vld [vmem:[%s21153_s1 + $0x3c0] sm:$0xff]   ;;  %21346 = vst [vmem:[#allocation2_spill] sm:$0xff] %v21345_v58  ;;  %v556_v62 = vshrl.u32 %v279_v47, 16 }
  0x1d   : > { %13643 = vmatpush3.bf16.msra.mxu1 %v15468_v15  ;;  %13604 = vmatprep.subr.bf16.mxu0 %v15469_v16  ;;  %v559_v63 = vshll.u32 %v279_v47, 16  ;;  %v15486_v0 = vld [vmem:[%s21153_s1 + $0x440] sm:$0xff]   ;;  %v549_v1 = vrot.slane %v548_v52, 4  ;;  %v691_v2 = vshll.u32 %v303_v48, 16  ;;  %v565_v3 = vshll.u32 %v284_v50, 16  ;;  %v15491_v34 = vld [vmem:[%s21153_s1 + $0x388] sm:$0xff]  }
  0x1e   : > { %13644 = vmatprep.subr.bf16.mxu1 %v15470_v17  ;;  %v618_v59 = vor.u32 %v617_v49, %v614_v46  ;;  %v626_v4 = vshrl.u32 %v289_v51, 16  ;;  %v558_v6 = vrot.slane %v556_v62, 4  ;;  %v629_v8 = vshll.u32 %v289_v51, 16  ;;  %v304_v11 = vld [vmem:[%s16563_s26 + $0xd0] sm:$0x11]  ;;  %v15487_v14 = vld [vmem:[%s21153_s1 + $0x380] sm:$0xff]  }
  0x1f   : > { %v561_v7 = vrot.slane %v559_v63, 5  ;;  %v554_v9 = vsel %vm16585_vm2, %v549_v1, %v553_v53  ;;  %v687_v10 = vrot.slane %v685_v55, 5  ;;  %v567_v12 = vrot.slane %v565_v3, 5  ;;  %v15488_v33 = vld [vmem:[%s21153_s1 + $0x400] sm:$0xff]   ;;  %v15490_v37 = vld [vmem:[%s21153_s1 + $0x448] sm:$0xff]   ;;  %v308_v42 = vld [vmem:[%s16563_s26 + $0xf0] sm:$0xff] }
  0x20   : > { %13605 = vmatpush3.bf16.msra.mxu0 %v15471_v18  ;;  %v619_v5 = vrot.slane %v618_v59, 4  ;;  %v628_v13 = vrot.slane %v626_v4, 4  ;;  %v631_v17 = vrot.slane %v629_v8, 5  ;;  %v635_v18 = vshll.u32 %v294_v56, 16  ;;  %v313_v43 = vld [vmem:[%s16563_s26 + $0x118] sm:$0x11] }
  0x21   : > { %13645 = vmatpush3.bf16.msra.mxu1 %v15472_v19  ;;  %13606 = vmatprep.subr.bf16.mxu0 %v15473_v20  ;;  %v562_v16 = vor.u32 %v561_v7, %v558_v6  ;;  %v693_v35 = vrot.slane %v691_v2, 5  ;;  %v309_v44 = vld [vmem:[%s16563_s26 + $0xf8] sm:$0xff]  ;;  %v752_v45 = vshrl.u32 %v308_v42, 16  ;;  %v755_v46 = vshll.u32 %v308_v42, 16  ;;  %v314_v48 = vld [vmem:[%s16563_s26 + $0x120] sm:$0x11] }
  0x22   : > { %13646 = vmatprep.subr.bf16.mxu1 %v15474_v21  ;;  %v16601_v15 = vsel %vm16585_vm2, %v619_v5, %v623_v54  ;;  %v696_v21 = vshrl.u32 %v299_v61, 16  ;;  %v761_v47 = vshll.u32 %v313_v43, 16  ;;  %v766_v49 = vshrl.u32 %v309_v44, 16  ;;  %v15493_v53 = vld [vmem:[%s21153_s1 + $0x3d0] sm:$0xff]   ;;  %v15492_v54 = vld [vmem:[%s21153_s1 + $0x408] sm:$0xff]   ;;  %v15497_v8 = vld [vmem:[%s21153_s1 + $0x3d8] sm:$0xff]  }
  0x23   : > { %21347 = vst [vmem:[#allocation3_spill] sm:$0xff] %v16601_v15  ;;  %v11420_v19 = vcombine.low %v554_v9, %v16601_v15  ;;  %v11421_v20 = vcombine.high %v554_v9, %v16601_v15  ;;  %v769_v51 = vshll.u32 %v309_v44, 16  ;;  %v775_v52 = vshll.u32 %v314_v48, 16  ;;  %v15494_v63 = vld [vmem:[%s21153_s1 + $0x450] sm:$0xff]   ;;  %v15647_v58 = vld [vmem:[%s21153_s1 + $0x508] sm:$0xff]  }
  0x24   : > { %13607 = vmatpush3.bf16.msra.mxu0 %v15475_v22  ;;  %v15489_v22 = vld [vmem:[%s21153_s1 + $0x3c8] sm:$0xff]   ;;  %v754_v55 = vrot.slane %v752_v45, 4  ;;  %v757_v56 = vrot.slane %v755_v46, 5  ;;  %v763_v62 = vrot.slane %v761_v47, 5  ;;  %v15495_v2 = vld [vmem:[%s21153_s1 + $0x390] sm:$0xff]   ;;  %v15501_v45 = vld [vmem:[%s21153_s1 + $0x3e0] sm:$0xff]  }
  0x25   : > { %13647 = vmatpush3.bf16.msra.mxu1 %v15476_v23  ;;  %13608 = vmatprep.subr.bf16.mxu0 %v15477_v24  ;;  %v563_v23 = vrot.slane %v562_v16, 4  ;;  %v632_v24 = vor.u32 %v631_v17, %v628_v13  ;;  %v777_v1 = vrot.slane %v775_v52, 5  ;;  %v15496_v5 = vld [vmem:[%s21153_s1 + $0x410] sm:$0xff]  }
  0x26   : > { %13648 = vmatprep.subr.bf16.mxu1 %v15478_v25  ;;  %v637_v25 = vrot.slane %v635_v18, 5  ;;  %1934 = vmatprep.mubr.bf16.mxu0 %v11421_v20  ;;  %v15500_v18 = vld [vmem:[%s21153_s1 + $0x418] sm:$0xff]   ;;  %v323_v20 = vld [vmem:[%s16563_s26 + $0x168] sm:$0x11] }
  0x28   : > { %13609 = vmatpush3.bf16.msra.mxu0 %v15479_v26  ;;  %v688_v26 = vor.u32 %v687_v10, %v684_v60  ;;  %v771_v60 = vrot.slane %v769_v51, 5  ;;  %v15498_v10 = vld [vmem:[%s21153_s1 + $0x458] sm:$0xff]  }
  0x29   : > { %13649 = vmatpush3.bf16.msra.mxu1 %v15480_v27  ;;  %13610 = vmatprep.subr.bf16.mxu0 %v15481_v28  ;;  %v698_v27 = vrot.slane %v696_v21, 4  ;;  %v699_v28 = vshll.u32 %v299_v61, 16  ;;  %v758_v61 = vor.u32 %v757_v56, %v754_v55  ;;  %v328_v21 = vld [vmem:[%s16563_s26 + $0x190] sm:$0xff] }
  0x2a   : > { %13650 = vmatprep.subr.bf16.mxu1 %v15482_v29  ;;  %v568_v29 = vsel %vm16585_vm2, %v563_v23, %v567_v12  ;;  %v689_v38 = vrot.slane %v688_v26, 4  ;;  %v892_v26 = vshrl.u32 %v328_v21, 16 }
  0x2b   : > { %v701_v32 = vrot.slane %v699_v28, 5  ;;  %v759_v4 = vrot.slane %v758_v61, 4 }
  0x2c   : > { %13611 = vmatpush3.bf16.msra.mxu0 %v15483_v30  ;;  %v633_v30 = vrot.slane %v632_v24, 4  ;;  %v16643_v3 = vsel %vm16585_vm2, %v689_v38, %v693_v35  ;;  %v334_v35 = vld [vmem:[%s16563_s26 + $0x1c0] sm:$0x11] }
  0x2d   : > { %13651 = vmatpush3.bf16.msra.mxu1 %v15484_v31  ;;  %13676 = vmatprep.subr.bf16.mxu0 %v15485_v57  ;;  %v705_v31 = vshll.u32 %v304_v11, 16  ;;  %v702_v39 = vor.u32 %v701_v32, %v698_v27  ;;  %v768_v57 = vrot.slane %v766_v49, 4  ;;  %v16657_v9 = vsel %vm16585_vm2, %v759_v4, %v763_v62 }
  0x2e   : > { %13716 = vmatprep.subr.bf16.mxu1 %v15486_v0  ;;  %v16618_v36 = vsel %vm16585_vm2, %v633_v30, %v637_v25  ;;  %21348 = vst [vmem:[#allocation4_spill] sm:$0xff] %v16657_v9  ;;  %v16664_v11 = vcombine.high %v16643_v3, %v16657_v9  ;;  %v16672_v13 = vcombine.low %v16643_v3, %v16657_v9  ;;  %v831_v25 = vshll.u32 %v323_v20, 16  ;;  %v324_v30 = vld [vmem:[%s16563_s26 + $0x170] sm:$0x11]  ;;  %v338_v20 = vld [vmem:[%s16563_s26 + $0x1e0] sm:$0xff]  ;;  %v15659_v9 = vld [vmem:[%s21153_s1 + $0x518] sm:$0xff]  }
  0x2f   : > { %1935 = vmatmul.mubr.bf16.vlgmr.msra.gmra.mrb[0].mxu0 %v11420_v19  ;;  %v11422_v40 = vcombine.low %v568_v29, %v16618_v36  ;;  %v11423_v41 = vcombine.high %v568_v29, %v16618_v36  ;;  %v707_v50 = vrot.slane %v705_v31, 5  ;;  %v703_v59 = vrot.slane %v702_v39, 4  ;;  %v318_v19 = vld [vmem:[%s16563_s26 + $0x140] sm:$0xff]  ;;  %v319_v29 = vld [vmem:[%s16563_s26 + $0x148] sm:$0xff] }
  0x30   : > { %13677 = vmatpush3.bf16.msra.mxu0 %v15487_v14  ;;  %v772_v0 = vor.u32 %v771_v60, %v768_v57  ;;  %21349 = vst [vmem:[#allocation5_spill] sm:$0xff] %v16664_v11  ;;  %21351 = vst [vmem:[#allocation7_spill] sm:$0xff] %v16672_v13  ;;  %v15499_v14 = vld [vmem:[%s21153_s1 + $0x398] sm:$0xff]   ;;  %1942 = vmatprep.mubr.bf16.mxu0 %v16664_v11  ;;  %v822_v23 = vshrl.u32 %v318_v19, 16  ;;  %v825_v24 = vshll.u32 %v318_v19, 16  ;;  %v895_v27 = vshll.u32 %v328_v21, 16 }
  0x31   : > { %13678 = vmatprep.subr.bf16.mxu0 %v15489_v22  ;;  %1999 = vmatprep.mubr.bf16.mxu1 %v11423_v41  ;;  %v16650_v6 = vsel %vm16585_vm2, %v703_v59, %v707_v50  ;;  %v333_v22 = vld [vmem:[%s16563_s26 + $0x1b8] sm:$0x11]  ;;  %v839_v42 = vshll.u32 %v319_v29, 16  ;;  %v845_v43 = vshll.u32 %v324_v30, 16  ;;  %v915_v49 = vshll.u32 %v334_v35, 16  ;;  %v15502_v50 = vld [vmem:[%s21153_s1 + $0x460] sm:$0xff]  }
  0x32   : > { %2000 = vmatmul.mubr.bf16.vlgmr.msra.gmra.mrb[0].mxu1 %v11422_v40  ;;  %v773_v7 = vrot.slane %v772_v0, 4  ;;  %v901_v28 = vshll.u32 %v333_v22, 16  ;;  %v824_v31 = vrot.slane %v822_v23, 4  ;;  %v827_v32 = vrot.slane %v825_v24, 5  ;;  %v15503_v57 = vld [vmem:[%s21153_s1 + $0x3a0] sm:$0xff]   ;;  %v15508_v19 = vld [vmem:[%s21153_s1 + $0x428] sm:$0xff]  }
  0x33   : > { %13717 = vmatpush3.bf16.msra.mxu1 %v15488_v33  ;;  %v833_v33 = vrot.slane %v831_v25, 5  ;;  %v897_v38 = vrot.slane %v895_v27, 5  ;;  %v836_v40 = vshrl.u32 %v319_v29, 16  ;;  %v841_v52 = vrot.slane %v839_v42, 5  ;;  %v15504_v0 = vld [vmem:[%s21153_s1 + $0x420] sm:$0xff]   ;;  %v348_v24 = vld [vmem:[%s16563_s26 + $0x230] sm:$0xff] }
  0x34   : > { %13679 = vmatpush3.bf16.msra.mxu0 %v15491_v34  ;;  %13718 = vmatprep.subr.bf16.mxu1 %v15490_v37  ;;  %v16668_v12 = vsel %vm16585_vm2, %v773_v7, %v777_v1  ;;  %v329_v34 = vld [vmem:[%s16563_s26 + $0x198] sm:$0xff]  ;;  %v894_v37 = vrot.slane %v892_v26, 4  ;;  %v903_v39 = vrot.slane %v901_v28, 5  ;;  %v828_v41 = vor.u32 %v827_v32, %v824_v31  ;;  %v343_v21 = vld [vmem:[%s16563_s26 + $0x208] sm:$0x11] }
  0x35   : > { %13680 = vmatprep.subr.bf16.mxu0 %v15493_v53  ;;  %21350 = vst [vmem:[#allocation6_spill] sm:$0xff] %v16668_v12  ;;  %v16679_v16 = vcombine.high %v16650_v6, %v16668_v12  ;;  %v16683_v17 = vcombine.low %v16650_v6, %v16668_v12  ;;  %v906_v44 = vshrl.u32 %v329_v34, 16  ;;  %v838_v47 = vrot.slane %v836_v40, 4  ;;  %v353_v25 = vld [vmem:[%s16563_s26 + $0x258] sm:$0x11]  ;;  %v339_v28 = vld [vmem:[%s16563_s26 + $0x1e8] sm:$0xff] }
  0x36   : > { %v898_v46 = vor.u32 %v897_v38, %v894_v37  ;;  %v909_v48 = vshll.u32 %v329_v34, 16  ;;  %v829_v51 = vrot.slane %v828_v41, 4  ;;  %v847_v55 = vrot.slane %v845_v43, 5  ;;  %v349_v37 = vld [vmem:[%s16563_s26 + $0x238] sm:$0xff]  ;;  %v354_v38 = vld [vmem:[%s16563_s26 + $0x260] sm:$0x11] }
  0x37   : > { %13719 = vmatpush3.bf16.msra.mxu1 %v15492_v54  ;;  %21352 = vst [vmem:[#allocation8_spill] sm:$0xff] %v16679_v16  ;;  %21353 = vst [vmem:[#allocation9_spill] sm:$0xff] %v16683_v17  ;;  %2007 = vmatprep.mubr.bf16.mxu1 %v16679_v16  ;;  %v908_v53 = vrot.slane %v906_v44, 4  ;;  %v842_v60 = vor.u32 %v841_v52, %v838_v47  ;;  %v962_v26 = vshrl.u32 %v338_v20, 16  ;;  %v965_v27 = vshll.u32 %v338_v20, 16 }
  0x38   : > { %13681 = vmatpush3.bf16.msra.mxu0 %v15495_v2  ;;  %13720 = vmatprep.subr.bf16.mxu1 %v15494_v63  ;;  %v899_v54 = vrot.slane %v898_v46, 4  ;;  %v911_v56 = vrot.slane %v909_v48, 5  ;;  %v16711_v59 = vsel %vm16585_vm2, %v829_v51, %v833_v33  ;;  %v917_v63 = vrot.slane %v915_v49, 5  ;;  %v344_v33 = vld [vmem:[%s16563_s26 + $0x210] sm:$0x11] }
  0x39   : > { %13682 = vmatprep.subr.bf16.mxu0 %v15497_v8  ;;  %1943 = vmatmul.mubr.bf16.gmra.mrb[4].mxu0 %v16672_v13  ;;  %21354 = vst [vmem:[#allocation10_spill] sm:$0xff] %v16711_v59  ;;  %v843_v2 = vrot.slane %v842_v60, 4  ;;  %v15506_v8 = vld [vmem:[%s21153_s1 + $0x468] sm:$0xff]   ;;  %v971_v29 = vshll.u32 %v343_v21, 16  ;;  %v1032_v30 = vshrl.u32 %v348_v24, 16  ;;  %v1035_v31 = vshll.u32 %v348_v24, 16 }
  0x3a   : > { %2008 = vmatmul.mubr.bf16.gmra.mrb[4].mxu1 %v16683_v17  ;;  %v16715_v61 = vsel %vm16585_vm2, %v899_v54, %v903_v39  ;;  %v912_v62 = vor.u32 %v911_v56, %v908_v53  ;;  %v1041_v32 = vshll.u32 %v353_v25, 16  ;;  %v964_v34 = vrot.slane %v962_v26, 4  ;;  %v15509_v48 = vld [vmem:[%s21153_s1 + $0x3f0] sm:$0xff]   ;;  %v15513_v24 = vld [vmem:[%s21153_s1 + $0x3f8] sm:$0xff]  }
  0x3b   : > { %13721 = vmatpush3.bf16.msra.mxu1 %v15496_v5  ;;  %21355 = vst [vmem:[#allocation11_spill] sm:$0xff] %v16715_v61  ;;  %v16722_v1 = vcombine.high %v16711_v59, %v16715_v61  ;;  %v16726_v4 = vcombine.low %v16711_v59, %v16715_v61  ;;  %v15505_v5 = vld [vmem:[%s21153_s1 + $0x3e8] sm:$0xff]   ;;  %v967_v35 = vrot.slane %v965_v27, 5  ;;  %v976_v39 = vshrl.u32 %v339_v28, 16  ;;  %v15510_v53 = vld [vmem:[%s21153_s1 + $0x470] sm:$0xff]   ;;  %v15514_v26 = vld [vmem:[%s21153_s1 + $0x478] sm:$0xff]  }
  0x3c   : > { %13722 = vmatprep.subr.bf16.mxu1 %v15498_v10  ;;  %13683 = vmatpush3.bf16.msra.mxu0 %v15499_v14  ;;  %v913_v7 = vrot.slane %v912_v62, 4  ;;  %v16737_v10 = vsel %vm16585_vm2, %v843_v2, %v847_v55  ;;  %v15507_v14 = vld [vmem:[%s21153_s1 + $0x3a8] sm:$0xff]   ;;  %v973_v40 = vrot.slane %v971_v29, 5  ;;  %v1034_v41 = vrot.slane %v1032_v30, 4  ;;  %v15511_v56 = vld [vmem:[%s21153_s1 + $0x3b0] sm:$0xff]   ;;  %v15516_v30 = vld [vmem:[%s21153_s1 + $0x438] sm:$0xff]  }
  0x3d   : > { %13684 = vmatprep.subr.bf16.mxu0 %v15501_v45  ;;  %21356 = vst [vmem:[#allocation12_spill] sm:$0xff] %v16722_v1  ;;  %21357 = vst [vmem:[#allocation13_spill] sm:$0xff] %v16726_v4  ;;  %1950 = vmatprep.mubr.bf16.mxu0 %v16722_v1  ;;  %v1037_v42 = vrot.slane %v1035_v31, 5  ;;  %v1043_v43 = vrot.slane %v1041_v32, 5  ;;  %v968_v44 = vor.u32 %v967_v35, %v964_v34  ;;  %v978_v45 = vrot.slane %v976_v39, 4  ;;  %v280_v31 = vld [vmem:[%s16563_s26 + $0x10] sm:$0xff] }
  0x3e   : > { %21358 = vst [vmem:[#allocation14_spill] sm:$0xff] %v16737_v10  ;;  %v979_v46 = vshll.u32 %v339_v28, 16  ;;  %v985_v47 = vshll.u32 %v344_v33, 16  ;;  %v1049_v51 = vshll.u32 %v349_v37, 16  ;;  %v1055_v52 = vshll.u32 %v354_v38, 16  ;;  %v15515_v28 = vld [vmem:[%s21153_s1 + $0x3b8] sm:$0xff]  }
  0x3f   : > { %13723 = vmatpush3.bf16.msra.mxu1 %v15500_v18  ;;  %v16744_v18 = vsel %vm16585_vm2, %v913_v7, %v917_v63  ;;  %v1038_v49 = vor.u32 %v1037_v42, %v1034_v41  ;;  %v969_v54 = vrot.slane %v968_v44, 4  ;;  %v285_v32 = vld [vmem:[%s16563_s26 + $0x38] sm:$0x11]  ;;  %v290_v35 = vld [vmem:[%s16563_s26 + $0x60] sm:$0xff]  ;;  %v570_v38 = vshrl.u32 %v280_v31, 16 }
  0x40   : > { %13724 = vmatprep.subr.bf16.mxu1 %v15502_v50  ;;  %13685 = vmatpush3.bf16.msra.mxu0 %v15503_v57  ;;  %21359 = vst [vmem:[#allocation15_spill] sm:$0xff] %v16744_v18  ;;  %v16754_v22 = vcombine.high %v16737_v10, %v16744_v18  ;;  %v16758_v23 = vcombine.low %v16737_v10, %v16744_v18  ;;  %v1046_v50 = vshrl.u32 %v349_v37, 16  ;;  %v981_v55 = vrot.slane %v979_v46, 5  ;;  %v295_v37 = vld [vmem:[%s16563_s26 + $0x88] sm:$0x11]  ;;  %v15666_v61 = vld [vmem:[%s21153_s1 + $0x5e0] sm:$0xff]  }
  0x41   : > { %13686 = vmatprep.subr.bf16.mxu0 %v15505_v5  ;;  %1951 = vmatmul.mubr.bf16.gmra.mrb[8].mxu0 %v16726_v4  ;;  %v1039_v57 = vrot.slane %v1038_v49, 4  ;;  %v987_v60 = vrot.slane %v985_v47, 5  ;;  %v1051_v63 = vrot.slane %v1049_v51, 5  ;;  %v573_v39 = vshll.u32 %v280_v31, 16  ;;  %v296_v49 = vld [vmem:[%s16563_s26 + $0x90] sm:$0x11] }
  0x42   : > { %21360 = vst [vmem:[#allocation16_spill] sm:$0xff] %v16754_v22  ;;  %21361 = vst [vmem:[#allocation17_spill] sm:$0xff] %v16758_v23  ;;  %2015 = vmatprep.mubr.bf16.mxu1 %v16754_v22  ;;  %v1048_v62 = vrot.slane %v1046_v50, 4  ;;  %v982_v2 = vor.u32 %v981_v55, %v978_v45  ;;  %v579_v41 = vshll.u32 %v285_v32, 16  ;;  %v640_v42 = vshrl.u32 %v290_v35, 16 }
  0x43   : > { %13725 = vmatpush3.bf16.msra.mxu1 %v15504_v0  ;;  %v16779_v0 = vsel %vm16585_vm2, %v969_v54, %v973_v40  ;;  %v16783_v5 = vsel %vm16585_vm2, %v1039_v57, %v1043_v43  ;;  %v281_v40 = vld [vmem:[%s16563_s26 + $0x18] sm:$0xff]  ;;  %v643_v43 = vshll.u32 %v290_v35, 16  ;;  %v649_v44 = vshll.u32 %v295_v37, 16  ;;  %v286_v45 = vld [vmem:[%s16563_s26 + $0x40] sm:$0x11] }
  0x44   : > { %13726 = vmatprep.subr.bf16.mxu1 %v15506_v8  ;;  %13687 = vmatpush3.bf16.msra.mxu0 %v15507_v14  ;;  %21362 = vst [vmem:[#allocation18_spill] sm:$0xff] %v16779_v0  ;;  %21363 = vst [vmem:[#allocation19_spill] sm:$0xff] %v16783_v5  ;;  %v1052_v7 = vor.u32 %v1051_v63, %v1048_v62  ;;  %v1057_v8 = vrot.slane %v1055_v52, 5  ;;  %v15512_v14 = vld [vmem:[%s21153_s1 + $0x430] sm:$0xff]   ;;  %v983_v20 = vrot.slane %v982_v2, 4  ;;  %v572_v46 = vrot.slane %v570_v38, 4 }
  0x45   : > { %2016 = vmatmul.mubr.bf16.gmra.mrb[8].mxu1 %v16758_v23  ;;  %13688 = vmatprep.subr.bf16.mxu0 %v15509_v48  ;;  %v16794_v21 = vcombine.low %v16779_v0, %v16783_v5  ;;  %v575_v47 = vrot.slane %v573_v39, 5  ;;  %v291_v48 = vld [vmem:[%s16563_s26 + $0x68] sm:$0xff]  ;;  %v584_v50 = vshrl.u32 %v281_v40, 16  ;;  %v581_v51 = vrot.slane %v579_v41, 5  ;;  %v15517_v62 = vld [vmem:[%s21153_s1 + $0x4c0] sm:$0xff]  }
  0x46   : > { %v1053_v25 = vrot.slane %v1052_v7, 4  ;;  %v16805_v27 = vsel %vm16585_vm2, %v983_v20, %v987_v60  ;;  %v642_v52 = vrot.slane %v640_v42, 4  ;;  %v651_v54 = vrot.slane %v649_v44, 5  ;;  %v15519_v42 = vld [vmem:[%s21153_s1 + $0x480] sm:$0xff]   ;;  %v15521_v44 = vld [vmem:[%s21153_s1 + $0x4c8] sm:$0xff]  }
  0x47   : > { %13727 = vmatpush3.bf16.msra.mxu1 %v15508_v19  ;;  %v16790_v19 = vcombine.high %v16779_v0, %v16783_v5  ;;  %21365 = vst [vmem:[#allocation21_spill] sm:$0xff] %v16794_v21  ;;  %21366 = vst [vmem:[#allocation22_spill] sm:$0xff] %v16805_v27  ;;  %v576_v55 = vor.u32 %v575_v47, %v572_v46  ;;  %v587_v57 = vshll.u32 %v281_v40, 16  ;;  %v593_v60 = vshll.u32 %v286_v45, 16  ;;  %v15520_v46 = vld [vmem:[%s21153_s1] sm:$0xff]   ;;  %v15660_v5 = vld [vmem:[%s21153_s1 + $0x598] sm:$0xff]  }
  0x48   : > { %13728 = vmatprep.subr.bf16.mxu1 %v15510_v53  ;;  %13689 = vmatpush3.bf16.msra.mxu0 %v15511_v56  ;;  %v16812_v29 = vsel %vm16585_vm2, %v1053_v25, %v1057_v8  ;;  %v645_v53 = vrot.slane %v643_v43, 5  ;;  %v586_v56 = vrot.slane %v584_v50, 4  ;;  %v654_v2 = vshrl.u32 %v291_v48, 16  ;;  %v300_v50 = vld [vmem:[%s16563_s26 + $0xb0] sm:$0xff]  ;;  %v17769_v59 = vld [vmem:[%s16563_s26 + $0x38] sm:$0x11] }
  0x49   : > { %21364 = vst [vmem:[#allocation20_spill] sm:$0xff] %v16790_v19  ;;  %1958 = vmatprep.mubr.bf16.mxu0 %v16790_v19  ;;  %13690 = vmatprep.subr.bf16.mxu0 %v15513_v24  ;;  %21367 = vst [vmem:[#allocation23_spill] sm:$0xff] %v16812_v29  ;;  %v16822_v33 = vcombine.high %v16805_v27, %v16812_v29  ;;  %v16826_v34 = vcombine.low %v16805_v27, %v16812_v29  ;;  %v657_v7 = vshll.u32 %v291_v48, 16  ;;  %v15522_v48 = vld [vmem:[%s21153_s1 + $0x48] sm:$0xff]   ;;  %v15667_v27 = vld [vmem:[%s21153_s1 + $0x520] sm:$0xff]  }
  0x4a   : > { %1959 = vmatmul.mubr.bf16.gmra.mrb[12].mxu0 %v16794_v21  ;;  %v646_v63 = vor.u32 %v645_v53, %v642_v52  ;;  %v663_v8 = vshll.u32 %v296_v49, 16  ;;  %v577_v20 = vrot.slane %v576_v55, 4  ;;  %v589_v24 = vrot.slane %v587_v57, 5  ;;  %v15523_v49 = vld [vmem:[%s21153_s1 + $0x488] sm:$0xff]  }
  0x4b   : > { %13729 = vmatpush3.bf16.msra.mxu1 %v15512_v14  ;;  %21368 = vst [vmem:[#allocation24_spill] sm:$0xff] %v16822_v33  ;;  %21369 = vst [vmem:[#allocation25_spill] sm:$0xff] %v16826_v34  ;;  %2023 = vmatprep.mubr.bf16.mxu1 %v16822_v33  ;;  %v15518_v14 = vld [vmem:[%s21153_s1 + $0x40] sm:$0xff]   ;;  %v315_v55 = vld [vmem:[%s16563_s26 + $0x128] sm:$0x11]  ;;  %v713_v57 = vshll.u32 %v300_v50, 16 }
  0x4c   : > { %13730 = vmatprep.subr.bf16.mxu1 %v15514_v26  ;;  %13691 = vmatpush3.bf16.msra.mxu0 %v15515_v28  ;;  %v647_v25 = vrot.slane %v646_v63, 4  ;;  %v595_v26 = vrot.slane %v593_v60, 5  ;;  %v656_v28 = vrot.slane %v654_v2, 4  ;;  %v582_v31 = vsel %vm16585_vm2, %v577_v20, %v581_v51  ;;  %v305_v51 = vld [vmem:[%s16563_s26 + $0xd8] sm:$0x11] }
  0x4d   : > { %2024 = vmatmul.mubr.bf16.gmra.mrb[12].mxu1 %v16826_v34  ;;  %13756 = vmatprep.subr.bf16.mxu0 %v15517_v62  ;;  %v590_v32 = vor.u32 %v589_v24, %v586_v56  ;;  %v665_v38 = vrot.slane %v663_v8, 5  ;;  %v710_v56 = vshrl.u32 %v300_v50, 16  ;;  %v301_v60 = vld [vmem:[%s16563_s26 + $0xb8] sm:$0xff]  ;;  %v719_v62 = vshll.u32 %v305_v51, 16  ;;  %v306_v8 = vld [vmem:[%s16563_s26 + $0xe0] sm:$0x11] }
  0x4e   : > { %v16846_v35 = vsel %vm16585_vm2, %v647_v25, %v651_v54  ;;  %v310_v54 = vld [vmem:[%s16563_s26 + $0x100] sm:$0xff]  ;;  %v715_v24 = vrot.slane %v713_v57, 5  ;;  %v311_v25 = vld [vmem:[%s16563_s26 + $0x108] sm:$0xff]  ;;  %v15526_v51 = vld [vmem:[%s21153_s1 + $0x50] sm:$0xff]  }
  0x4f   : > { %13731 = vmatpush3.bf16.msra.mxu1 %v15516_v30  ;;  %v659_v30 = vrot.slane %v657_v7, 5  ;;  %21370 = vst [vmem:[#allocation26_spill] sm:$0xff] %v16846_v35  ;;  %v11424_v39 = vcombine.low %v582_v31, %v16846_v35  ;;  %v11425_v40 = vcombine.high %v582_v31, %v16846_v35  ;;  %v591_v41 = vrot.slane %v590_v32, 4  ;;  %v15635_v35 = vld [vmem:[%s21153_s1 + $0x1b8] sm:$0xff]  }
  0x50   : > { %13796 = vmatprep.subr.bf16.mxu1 %v15518_v14  ;;  %v780_v63 = vshrl.u32 %v310_v54, 16  ;;  %v783_v2 = vshll.u32 %v310_v54, 16  ;;  %v789_v7 = vshll.u32 %v315_v55, 16  ;;  %v15524_v14 = vld [vmem:[%s21153_s1 + $0x8] sm:$0xff]   ;;  %v712_v20 = vrot.slane %v710_v56, 4 }
  0x51   : > { %v660_v37 = vor.u32 %v659_v30, %v656_v28  ;;  %2064 = vmatprep.mubr.bf16.mxu0 %v11425_v40  ;;  %v596_v45 = vsel %vm16585_vm2, %v591_v41, %v595_v26  ;;  %v316_v26 = vld [vmem:[%s16563_s26 + $0x130] sm:$0x11]  ;;  %v724_v28 = vshrl.u32 %v301_v60, 16  ;;  %v721_v30 = vrot.slane %v719_v62, 5 }
  0x52   : > { %2065 = vmatmul.mubr.bf16.vlgmr.msra.gmra.mrb[16].mxu0 %v11424_v39  ;;  %v782_v31 = vrot.slane %v780_v63, 4  ;;  %v785_v32 = vrot.slane %v783_v2, 5  ;;  %v727_v40 = vshll.u32 %v301_v60, 16  ;;  %v733_v41 = vshll.u32 %v306_v8, 16  ;;  %v15528_v2 = vld [vmem:[%s21153_s1 + $0x10] sm:$0xff]  }
  0x53   : > { %v661_v43 = vrot.slane %v660_v37, 4  ;;  %13757 = vmatpush3.bf16.msra.mxu0 %v15519_v42  ;;  %v791_v37 = vrot.slane %v789_v7, 5  ;;  %v726_v39 = vrot.slane %v724_v28, 4  ;;  %v15525_v42 = vld [vmem:[%s21153_s1 + $0x4d0] sm:$0xff]   ;;  %v803_v50 = vshll.u32 %v316_v26, 16  ;;  %v15531_v28 = vld [vmem:[%s21153_s1 + $0x498] sm:$0xff]  }
  0x54   : > { %13758 = vmatprep.subr.bf16.mxu0 %v15521_v44  ;;  %v794_v44 = vshrl.u32 %v311_v25, 16  ;;  %v735_v54 = vrot.slane %v733_v41, 5  ;;  %v335_v41 = vld [vmem:[%s16563_s26 + $0x1c8] sm:$0x11] }
  0x55   : > { %v16863_v47 = vsel %vm16585_vm2, %v661_v43, %v665_v38  ;;  %v716_v38 = vor.u32 %v715_v24, %v712_v20  ;;  %v786_v43 = vor.u32 %v785_v32, %v782_v31  ;;  %v805_v63 = vrot.slane %v803_v50, 5  ;;  %v15529_v20 = vld [vmem:[%s21153_s1 + $0x4d8] sm:$0xff]   ;;  %v16935_v32 = vld [vmem:[%s16563_s26 + $0x150] sm:$0xff] }
  0x56   : > { %21371 = vst [vmem:[#allocation27_spill] sm:$0xff] %v16863_v47  ;;  %v11426_v52 = vcombine.low %v596_v45, %v16863_v47  ;;  %v11427_v53 = vcombine.high %v596_v45, %v16863_v47  ;;  %v797_v45 = vshll.u32 %v311_v25, 16  ;;  %v796_v55 = vrot.slane %v794_v44, 4  ;;  %v15530_v25 = vld [vmem:[%s21153_s1 + $0x58] sm:$0xff]   ;;  %v17615_v47 = vld [vmem:[%s16563_s26 + $0x120] sm:$0x11] }
  0x57   : > { %13759 = vmatpush3.bf16.msra.mxu0 %v15523_v49  ;;  %v15527_v49 = vld [vmem:[%s21153_s1 + $0x490] sm:$0xff]   ;;  %v15532_v31 = vld [vmem:[%s21153_s1 + $0x18] sm:$0xff]  }
  0x58   : > { %2129 = vmatprep.mubr.bf16.mxu1 %v11427_v53  ;;  %13760 = vmatprep.subr.bf16.mxu0 %v15525_v42  ;;  %v787_v53 = vrot.slane %v786_v43, 4  ;;  %v799_v56 = vrot.slane %v797_v45, 5  ;;  %v850_v42 = vshrl.u32 %v16935_v32, 16  ;;  %v853_v43 = vshll.u32 %v16935_v32, 16  ;;  %v321_v44 = vld [vmem:[%s16563_s26 + $0x158] sm:$0xff] }
  0x59   : > { %2130 = vmatmul.mubr.bf16.vlgmr.msra.gmra.mrb[16].mxu1 %v11426_v52  ;;  %v717_v52 = vrot.slane %v716_v38, 4 }
  0x5a   : > { %13797 = vmatpush3.bf16.msra.mxu1 %v15520_v46  ;;  %v729_v46 = vrot.slane %v727_v40, 5  ;;  %v16899_v60 = vsel %vm16585_vm2, %v787_v53, %v791_v37  ;;  %v800_v62 = vor.u32 %v799_v56, %v796_v55  ;;  %v325_v37 = vld [vmem:[%s16563_s26 + $0x178] sm:$0x11]  ;;  %v16947_v40 = vld [vmem:[%s16563_s26 + $0x1a0] sm:$0xff]  ;;  %v855_v53 = vrot.slane %v853_v43, 5 }
  0x5b   : > { %13798 = vmatprep.subr.bf16.mxu1 %v15522_v48  ;;  %v16895_v48 = vsel %vm16585_vm2, %v717_v52, %v721_v30  ;;  %13761 = vmatpush3.bf16.msra.mxu0 %v15527_v49  ;;  %21373 = vst [vmem:[#allocation29_spill] sm:$0xff] %v16899_v60  ;;  %v859_v45 = vshll.u32 %v325_v37, 16  ;;  %v920_v50 = vshrl.u32 %v16947_v40, 16  ;;  %v929_v52 = vshll.u32 %v335_v41, 16  ;;  %v336_v55 = vld [vmem:[%s16563_s26 + $0x1d0] sm:$0x11] }
  0x5c   : > { %21372 = vst [vmem:[#allocation28_spill] sm:$0xff] %v16895_v48  ;;  %v730_v57 = vor.u32 %v729_v46, %v726_v39  ;;  %v16906_v7 = vcombine.high %v16895_v48, %v16899_v60  ;;  %v801_v24 = vrot.slane %v800_v62, 4  ;;  %13762 = vmatprep.subr.bf16.mxu0 %v15529_v20  ;;  %v326_v46 = vld [vmem:[%s16563_s26 + $0x180] sm:$0x11]  ;;  %v852_v49 = vrot.slane %v850_v42, 4 }
  0x5d   : > { %v864_v56 = vshrl.u32 %v321_v44, 16  ;;  %v922_v62 = vrot.slane %v920_v50, 4  ;;  %v943_v42 = vshll.u32 %v336_v55, 16  ;;  %v15534_v43 = vld [vmem:[%s21153_s1 + $0x60] sm:$0xff]  }
  0x5e   : > { %13799 = vmatpush3.bf16.msra.mxu1 %v15524_v14  ;;  %21374 = vst [vmem:[#allocation30_spill] sm:$0xff] %v16906_v7  ;;  %v731_v8 = vrot.slane %v730_v57, 4  ;;  %v16910_v14 = vcombine.low %v16895_v48, %v16899_v60  ;;  %2072 = vmatprep.mubr.bf16.mxu0 %v16906_v7  ;;  %v16928_v30 = vsel %vm16585_vm2, %v801_v24, %v805_v63  ;;  %v861_v57 = vrot.slane %v859_v45, 5  ;;  %v17563_v60 = vld [vmem:[%s16563_s26 + $0xc8] sm:$0x11] }
  0x5f   : > { %13800 = vmatprep.subr.bf16.mxu1 %v15526_v51  ;;  %21377 = vst [vmem:[#allocation33_spill] sm:$0xff] %v16928_v30  ;;  %13763 = vmatpush3.bf16.msra.mxu0 %v15531_v28  ;;  %v923_v51 = vshll.u32 %v16947_v40, 16  ;;  %v866_v20 = vrot.slane %v864_v56, 4  ;;  %v867_v24 = vshll.u32 %v321_v44, 16  ;;  %v15533_v28 = vld [vmem:[%s21153_s1 + $0x4e0] sm:$0xff]  }
  0x60   : > { %21375 = vst [vmem:[#allocation31_spill] sm:$0xff] %v16910_v14  ;;  %v16921_v26 = vsel %vm16585_vm2, %v731_v8, %v735_v54  ;;  %2073 = vmatmul.mubr.bf16.gmra.mrb[20].mxu0 %v16910_v14  ;;  %v331_v54 = vld [vmem:[%s16563_s26 + $0x1a8] sm:$0xff]  ;;  %v856_v8 = vor.u32 %v855_v53, %v852_v49  ;;  %13764 = vmatprep.subr.bf16.mxu0 %v15533_v28  ;;  %v15535_v44 = vld [vmem:[%s21153_s1 + $0x4a0] sm:$0xff]  }
  0x61   : > { %21376 = vst [vmem:[#allocation32_spill] sm:$0xff] %v16921_v26  ;;  %v16940_v38 = vcombine.high %v16921_v26, %v16928_v30  ;;  %v16944_v39 = vcombine.low %v16921_v26, %v16928_v30  ;;  %v925_v63 = vrot.slane %v923_v51, 5  ;;  %v934_v37 = vshrl.u32 %v331_v54, 16  ;;  %v15617_v30 = vld [vmem:[%s21153_s1 + $0x1e0] sm:$0xff]   ;;  %v17627_v48 = vld [vmem:[%s16563_s26 + $0x168] sm:$0x11] }
  0x62   : > { %13801 = vmatpush3.bf16.msra.mxu1 %v15528_v2  ;;  %v931_v2 = vrot.slane %v929_v52, 5  ;;  %v937_v41 = vshll.u32 %v331_v54, 16  ;;  %v857_v45 = vrot.slane %v856_v8, 4  ;;  %v869_v50 = vrot.slane %v867_v24, 5  ;;  %v17639_v26 = vld [vmem:[%s16563_s26 + $0x1b8] sm:$0x11] }
  0x63   : > { %21378 = vst [vmem:[#allocation34_spill] sm:$0xff] %v16940_v38  ;;  %21379 = vst [vmem:[#allocation35_spill] sm:$0xff] %v16944_v39  ;;  %13802 = vmatprep.subr.bf16.mxu1 %v15530_v25  ;;  %2137 = vmatprep.mubr.bf16.mxu1 %v16940_v38  ;;  %v873_v25 = vshll.u32 %v326_v46, 16  ;;  %v936_v46 = vrot.slane %v934_v37, 4 }
  0x64   : > { %2138 = vmatmul.mubr.bf16.gmra.mrb[20].mxu1 %v16944_v39  ;;  %v939_v49 = vrot.slane %v937_v41, 5  ;;  %v16971_v53 = vsel %vm16585_vm2, %v857_v45, %v861_v57  ;;  %v870_v54 = vor.u32 %v869_v50, %v866_v20  ;;  %13765 = vmatpush3.bf16.msra.mxu0 %v15535_v44  ;;  %v15540_v41 = vld [vmem:[%s21153_s1 + $0x28] sm:$0xff]   ;;  %v17023_v44 = vld [vmem:[%s16563_s26 + $0x240] sm:$0xff] }
  0x65   : > { %v875_v52 = vrot.slane %v873_v25, 5  ;;  %21380 = vst [vmem:[#allocation36_spill] sm:$0xff] %v16971_v53  ;;  %v15538_v25 = vld [vmem:[%s21153_s1 + $0x68] sm:$0xff]  }
  0x66   : > { %13803 = vmatpush3.bf16.msra.mxu1 %v15532_v31  ;;  %v926_v31 = vor.u32 %v925_v63, %v922_v62  ;;  %v940_v56 = vor.u32 %v939_v49, %v936_v46  ;;  %v945_v62 = vrot.slane %v943_v42, 5  ;;  %v15536_v63 = vld [vmem:[%s21153_s1 + $0x20] sm:$0xff]   ;;  %v871_v57 = vrot.slane %v870_v54, 4  ;;  %v17011_v42 = vld [vmem:[%s16563_s26 + $0x1f0] sm:$0xff]  ;;  %v341_v49 = vld [vmem:[%s16563_s26 + $0x1f8] sm:$0xff] }
  0x67   : > { %13804 = vmatprep.subr.bf16.mxu1 %v15534_v43  ;;  %v345_v43 = vld [vmem:[%s16563_s26 + $0x218] sm:$0x11]  ;;  %v993_v46 = vshll.u32 %v17011_v42, 16  ;;  %v1004_v39 = vshrl.u32 %v341_v49, 16  ;;  %v1007_v23 = vshll.u32 %v341_v49, 16 }
  0x68   : > { %v927_v51 = vrot.slane %v926_v31, 4  ;;  %v941_v24 = vrot.slane %v940_v56, 4  ;;  %v16997_v28 = vsel %vm16585_vm2, %v871_v57, %v875_v52  ;;  %v15539_v31 = vld [vmem:[%s21153_s1 + $0x4a8] sm:$0xff]   ;;  %v990_v52 = vshrl.u32 %v17011_v42, 16  ;;  %v346_v57 = vld [vmem:[%s16563_s26 + $0x220] sm:$0x11] }
  0x69   : > { %21384 = vst [vmem:[#allocation40_spill] sm:$0xff] %v16997_v28  ;;  %v999_v54 = vshll.u32 %v345_v43, 16  ;;  %v1060_v56 = vshrl.u32 %v17023_v44, 16  ;;  %v1006_v33 = vrot.slane %v1004_v39, 4  ;;  %v15543_v39 = vld [vmem:[%s21153_s1 + $0x4b0] sm:$0xff]  }
  0x6a   : > { %v16975_v55 = vsel %vm16585_vm2, %v927_v51, %v931_v2  ;;  %v15537_v2 = vld [vmem:[%s21153_s1 + $0x4e8] sm:$0xff]   ;;  %13805 = vmatpush3.bf16.msra.mxu1 %v15536_v63  ;;  %v17004_v37 = vsel %vm16585_vm2, %v941_v24, %v945_v62  ;;  %v1063_v62 = vshll.u32 %v17023_v44, 16  ;;  %v995_v24 = vrot.slane %v993_v46, 5 }
  0x6b   : > { %21381 = vst [vmem:[#allocation37_spill] sm:$0xff] %v16975_v55  ;;  %v16982_v8 = vcombine.high %v16971_v53, %v16975_v55  ;;  %v16986_v20 = vcombine.low %v16971_v53, %v16975_v55  ;;  %13766 = vmatprep.subr.bf16.mxu0 %v15537_v2  ;;  %21385 = vst [vmem:[#allocation41_spill] sm:$0xff] %v17004_v37  ;;  %13806 = vmatprep.subr.bf16.mxu1 %v15538_v25  ;;  %v355_v51 = vld [vmem:[%s16563_s26 + $0x268] sm:$0x11]  ;;  %v992_v2 = vrot.slane %v990_v52, 4 }
  0x6c   : > { %v17016_v45 = vcombine.high %v16997_v28, %v17004_v37  ;;  %v17020_v50 = vcombine.low %v16997_v28, %v17004_v37  ;;  %13767 = vmatpush3.bf16.msra.mxu0 %v15539_v31  ;;  %v1069_v63 = vshll.u32 %v355_v51, 16  ;;  %v351_v25 = vld [vmem:[%s16563_s26 + $0x248] sm:$0xff]  ;;  %v356_v31 = vld [vmem:[%s16563_s26 + $0x270] sm:$0x11]  ;;  %v1001_v38 = vrot.slane %v999_v54, 5 }
  0x6d   : > { %21382 = vst [vmem:[#allocation38_spill] sm:$0xff] %v16982_v8  ;;  %21383 = vst [vmem:[#allocation39_spill] sm:$0xff] %v16986_v20  ;;  %2080 = vmatprep.mubr.bf16.mxu0 %v16982_v8  ;;  %v1062_v34 = vrot.slane %v1060_v56, 4  ;;  %v996_v43 = vor.u32 %v995_v24, %v992_v2  ;;  %v1013_v8 = vshll.u32 %v346_v57, 16  ;;  %v15541_v51 = vld [vmem:[%s21153_s1 + $0x4f0] sm:$0xff]   ;;  %v1074_v52 = vshrl.u32 %v351_v25, 16 }
  0x6e   : > { %2081 = vmatmul.mubr.bf16.gmra.mrb[24].mxu0 %v16986_v20  ;;  %21386 = vst [vmem:[#allocation42_spill] sm:$0xff] %v17016_v45  ;;  %21387 = vst [vmem:[#allocation43_spill] sm:$0xff] %v17020_v50  ;;  %13807 = vmatpush3.bf16.msra.mxu1 %v15540_v41  ;;  %v1065_v20 = vrot.slane %v1063_v62, 5  ;;  %v1071_v41 = vrot.slane %v1069_v63, 5  ;;  %v1077_v46 = vshll.u32 %v351_v25, 16  ;;  %v1083_v14 = vshll.u32 %v356_v31, 16 }
  0x6f   : > { %2145 = vmatprep.mubr.bf16.mxu1 %v17016_v45  ;;  %v997_v54 = vrot.slane %v996_v43, 4  ;;  %v1009_v56 = vrot.slane %v1007_v23, 5  ;;  %13768 = vmatprep.subr.bf16.mxu0 %v15541_v51  ;;  %v1015_v62 = vrot.slane %v1013_v8, 5  ;;  %v1076_v63 = vrot.slane %v1074_v52, 4  ;;  %v15546_v25 = vld [vmem:[%s21153_s1 + $0x78] sm:$0xff]   ;;  %v17087_v52 = vld [vmem:[%s16563_s26 + $0x20] sm:$0xff] }
  0x70   : > { %2146 = vmatmul.mubr.bf16.gmra.mrb[24].mxu1 %v17020_v50  ;;  %v1066_v45 = vor.u32 %v1065_v20, %v1062_v34  ;;  %v15542_v50 = vld [vmem:[%s21153_s1 + $0x70] sm:$0xff]   ;;  %v1079_v57 = vrot.slane %v1077_v46, 5  ;;  %13769 = vmatpush3.bf16.msra.mxu0 %v15543_v39  ;;  %v1085_v24 = vrot.slane %v1083_v14, 5  ;;  %v15545_v14 = vld [vmem:[%s21153_s1 + $0x4f8] sm:$0xff]   ;;  %v287_v46 = vld [vmem:[%s16563_s26 + $0x48] sm:$0x11] }
  0x71   : > { %13808 = vmatprep.subr.bf16.mxu1 %v15542_v50  ;;  %v17047_v34 = vsel %vm16585_vm2, %v997_v54, %v1001_v38  ;;  %v1010_v20 = vor.u32 %v1009_v56, %v1006_v33  ;;  %13770 = vmatprep.subr.bf16.mxu0 %v15545_v14  ;;  %v15548_v51 = vld [vmem:[%s21153_s1 + $0x38] sm:$0xff]   ;;  %v17091_v54 = vld [vmem:[%s16563_s26] sm:$0xff]  ;;  %v17094_v56 = vld [vmem:[%s16563_s26 + $0x50] sm:$0xff] }
  0x72   : > { %v1067_v49 = vrot.slane %v1066_v45, 4  ;;  %21388 = vst [vmem:[#allocation44_spill] sm:$0xff] %v17047_v34  ;;  %v1080_v23 = vor.u32 %v1079_v57, %v1076_v63  ;;  %v15544_v45 = vld [vmem:[%s21153_s1 + $0x30] sm:$0xff]   ;;  %v11541_v39 = vcombine.high %v17091_v54, %v17094_v56  ;;  %v297_v57 = vld [vmem:[%s16563_s26 + $0x98] sm:$0x11]  ;;  %v15623_v53 = vld [vmem:[%s21153_s1 + $0x1a8] sm:$0xff]  }
  0x73   : > { %v1011_v38 = vrot.slane %v1010_v20, 4  ;;  %13809 = vmatpush3.bf16.msra.mxu1 %v15544_v45  ;;  %v17107_v63 = vld [vmem:[%s16563_s26 + $0x70] sm:$0xff]  ;;  %v598_v20 = vshrl.u32 %v17087_v52, 16  ;;  %v607_v45 = vshll.u32 %v287_v46, 16  ;;  %v21447_v15 = vrot.slane %v17094_v56, 9 }
  0x74   : > { %v17051_v2 = vsel %vm16585_vm2, %v1067_v49, %v1071_v41  ;;  %v1081_v50 = vrot.slane %v1080_v23, 4  ;;  %v15547_v41 = vld [vmem:[%s21153_s1 + $0x4b8] sm:$0xff]   ;;  %13810 = vmatprep.subr.bf16.mxu1 %v15546_v25  ;;  %v601_v23 = vshll.u32 %v17087_v52, 16  ;;  %v671_v14 = vshll.u32 %v17107_v63, 16  ;;  %v17502_v28 = vld [vmem:[%s16563_s26 + $0x30] sm:$0x11] }
  0x75   : > { %21389 = vst [vmem:[#allocation45_spill] sm:$0xff] %v17051_v2  ;;  %v17058_v8 = vcombine.high %v17047_v34, %v17051_v2  ;;  %v17062_v33 = vcombine.low %v17047_v34, %v17051_v2  ;;  %v17073_v31 = vsel %vm16585_vm2, %v1011_v38, %v1015_v62  ;;  %13771 = vmatpush3.bf16.msra.mxu0 %v15547_v41  ;;  %v668_v38 = vshrl.u32 %v17107_v63, 16  ;;  %v15621_v34 = vld [vmem:[%s21153_s1 + $0x1e8] sm:$0xff]  }
  0x76   : > { %21392 = vst [vmem:[#allocation48_spill] sm:$0xff] %v17073_v31  ;;  %v17080_v43 = vsel %vm16585_vm2, %v1081_v50, %v1085_v24  ;;  %v15551_v24 = vld [vmem:[%s21153_s1 + $0xc0] sm:$0xff]   ;;  %v677_v50 = vshll.u32 %v297_v57, 16  ;;  %v600_v25 = vrot.slane %v598_v20, 4  ;;  %v603_v41 = vrot.slane %v601_v23, 5 }
  0x77   : > { %21390 = vst [vmem:[#allocation46_spill] sm:$0xff] %v17058_v8  ;;  %21391 = vst [vmem:[#allocation47_spill] sm:$0xff] %v17062_v33  ;;  %2088 = vmatprep.mubr.bf16.mxu0 %v17058_v8  ;;  %v17100_v49 = vcombine.high %v17073_v31, %v17080_v43  ;;  %v17104_v62 = vcombine.low %v17073_v31, %v17080_v43  ;;  %13811 = vmatpush3.bf16.msra.mxu1 %v15548_v51  ;;  %v673_v8 = vrot.slane %v671_v14, 5  ;;  %v15552_v51 = vld [vmem:[%s21153_s1 + $0x140] sm:$0xff]   ;;  %v15555_v14 = vld [vmem:[%s21153_s1 + $0xc8] sm:$0xff]  }
  0x78   : > { %21393 = vst [vmem:[#allocation49_spill] sm:$0xff] %v17080_v43  ;;  %2089 = vmatmul.mubr.bf16.gmra.mrb[28].mxu0 %v17062_v33  ;;  %13836 = vmatprep.subr.bf16.mxu0 %v15551_v24  ;;  %v670_v33 = vrot.slane %v668_v38, 4  ;;  %v604_v22 = vor.u32 %v603_v41, %v600_v25  ;;  %v609_v17 = vrot.slane %v607_v45, 5  ;;  %v679_v57 = vrot.slane %v677_v50, 5  ;;  %v15553_v45 = vld [vmem:[%s21153_s1 + $0x80] sm:$0xff]  }
  0x79   : > { %21394 = vst [vmem:[#allocation50_spill] sm:$0xff] %v17100_v49  ;;  %21395 = vst [vmem:[#allocation51_spill] sm:$0xff] %v17104_v62  ;;  %2153 = vmatprep.mubr.bf16.mxu1 %v17100_v49  ;;  %13876 = vmatprep.subr.bf16.mxu1 %v15552_v51  ;;  %v11540_v24 = vcombine.low %v17091_v54, %v17094_v56  ;;  %v17145_v50 = vld [vmem:[%s16563_s26 + $0xc0] sm:$0xff]  ;;  %v307_v25 = vld [vmem:[%s16563_s26 + $0xe8] sm:$0x11] }
  0x7a   : > { %2154 = vmatmul.mubr.bf16.gmra.mrb[28].mxu1 %v17104_v62  ;;  %v674_v46 = vor.u32 %v673_v8, %v670_v33  ;;  %v605_v20 = vrot.slane %v604_v22, 4  ;;  %v15554_v8 = vld [vmem:[%s21153_s1 + $0x100] sm:$0xff]   ;;  %v15556_v33 = vld [vmem:[%s21153_s1 + $0x148] sm:$0xff]   ;;  %v17152_v51 = vld [vmem:[%s16563_s26 + $0xf0] sm:$0xff]  ;;  %v747_v62 = vshll.u32 %v307_v25, 16 }
  0x7b   : > { %2939 = vmatprep.mubr.bf16.mxu1 %v11541_v39  ;;  %v17149_v41 = vld [vmem:[%s16563_s26 + $0xa0] sm:$0xff]  ;;  %v15558_v49 = vld [vmem:[%s21153_s1 + $0x108] sm:$0xff]  }
  0x7c   : > { %v675_v23 = vrot.slane %v674_v46, 4  ;;  %v610_v39 = vsel %vm16585_vm2, %v605_v20, %v609_v17  ;;  %v17156_v46 = vcombine.high %v17149_v41, %v17152_v51  ;;  %v317_v20 = vld [vmem:[%s16563_s26 + $0x138] sm:$0x11]  ;;  %v21456_v10 = vrot.slane %v17149_v41, 9 }
  0x7d   : > { %v817_v21 = vshll.u32 %v317_v20, 16  ;;  %v17181_v20 = vcombine.low %v17149_v41, %v17152_v51  ;;  %v15692_v41 = vld [vmem:[%s21153_s1 + $0x688] sm:$0xff]  }
  0x7e   : > { %v17134_v22 = vsel %vm16585_vm2, %v675_v23, %v679_v57  ;;  %21397 = vst [vmem:[#allocation53_spill] sm:$0xff] %v17156_v46  ;;  %v17159_v57 = vld [vmem:[%s16563_s26 + $0x110] sm:$0xff]  ;;  %v738_v23 = vshrl.u32 %v17145_v50, 16 }
  0x7f   : > { %21396 = vst [vmem:[#allocation52_spill] sm:$0xff] %v17134_v22  ;;  %v11428_v38 = vcombine.low %v610_v39, %v17134_v22  ;;  %v11429_v17 = vcombine.high %v610_v39, %v17134_v22  ;;  %v741_v39 = vshll.u32 %v17145_v50, 16  ;;  %v808_v7 = vshrl.u32 %v17159_v57, 16  ;;  %21398 = vst [vmem:[#allocation54_spill] sm:$0xff] %v17181_v20 }
  0x80   : > { %v811_v16 = vshll.u32 %v17159_v57, 16  ;;  %v740_v19 = vrot.slane %v738_v23, 4 }
  0x81   : > { %2194 = vmatprep.mubr.bf16.mxu0 %v11429_v17  ;;  %v743_v25 = vrot.slane %v741_v39, 5  ;;  %v749_v17 = vrot.slane %v747_v62, 5  ;;  %v810_v4 = vrot.slane %v808_v7, 4  ;;  %v819_v39 = vrot.slane %v817_v21, 5  ;;  %v15564_v7 = vld [vmem:[%s21153_s1 + $0x110] sm:$0xff]  }
  0x82   : > { %2940 = vmatmul.mubr.bf16.vlgmr.msra.gmra.mrb[32].mxu1 %v11540_v24  ;;  %2195 = vmatmul.mubr.bf16.vlgmr.msra.gmra.mrb[32].mxu0 %v11428_v38  ;;  %v15557_v24 = vld [vmem:[%s21153_s1 + $0x88] sm:$0xff]   ;;  %v813_v1 = vrot.slane %v811_v16, 5  ;;  %v17187_v16 = vld [vmem:[%s16563_s26 + $0x140] sm:$0xff]  ;;  %v17190_v62 = vld [vmem:[%s16563_s26 + $0x190] sm:$0xff] }
  0x83   : > { %13877 = vmatpush3.bf16.msra.mxu1 %v15554_v8  ;;  %v15562_v8 = vld [vmem:[%s21153_s1 + $0x150] sm:$0xff]   ;;  %13837 = vmatpush3.bf16.msra.mxu0 %v15553_v45  ;;  %v744_v38 = vor.u32 %v743_v25, %v740_v19  ;;  %v17194_v45 = vcombine.high %v17187_v16, %v17190_v62  ;;  %v15567_v25 = vld [vmem:[%s21153_s1 + $0x98] sm:$0xff]  }
  0x84   : > { %13878 = vmatprep.subr.bf16.mxu1 %v15556_v33  ;;  %2947 = vmatprep.mubr.bf16.mxu1 %v17156_v46  ;;  %v15561_v33 = vld [vmem:[%s21153_s1 + $0xd0] sm:$0xff]   ;;  %v814_v23 = vor.u32 %v813_v1, %v810_v4  ;;  %v15566_v4 = vld [vmem:[%s21153_s1 + $0x158] sm:$0xff]  }
  0x85   : > { %13838 = vmatprep.subr.bf16.mxu0 %v15555_v14  ;;  %21399 = vst [vmem:[#allocation55_spill] sm:$0xff] %v17194_v45  ;;  %v745_v19 = vrot.slane %v744_v38, 4  ;;  %v15565_v14 = vld [vmem:[%s21153_s1 + $0xd8] sm:$0xff]   ;;  %v17230_v38 = vld [vmem:[%s16563_s26 + $0x160] sm:$0xff] }
  0x86   : > { %v815_v1 = vrot.slane %v814_v23, 4  ;;  %v327_v23 = vld [vmem:[%s16563_s26 + $0x188] sm:$0x11] }
  0x87   : > { %13879 = vmatpush3.bf16.msra.mxu1 %v15558_v49  ;;  %v15563_v49 = vld [vmem:[%s21153_s1 + $0x90] sm:$0xff]   ;;  %13839 = vmatpush3.bf16.msra.mxu0 %v15557_v24  ;;  %v17204_v21 = vsel %vm16585_vm2, %v745_v19, %v749_v17  ;;  %v878_v19 = vshrl.u32 %v17230_v38, 16  ;;  %v887_v13 = vshll.u32 %v327_v23, 16  ;;  %v15571_v23 = vld [vmem:[%s21153_s1 + $0xe0] sm:$0xff]  }
  0x88   : > { %13880 = vmatprep.subr.bf16.mxu1 %v15562_v8  ;;  %21400 = vst [vmem:[#allocation56_spill] sm:$0xff] %v17204_v21  ;;  %13840 = vmatprep.subr.bf16.mxu0 %v15561_v33  ;;  %v17212_v24 = vsel %vm16585_vm2, %v815_v1, %v819_v39  ;;  %v15568_v8 = vld [vmem:[%s21153_s1 + $0x118] sm:$0xff]   ;;  %v17234_v39 = vld [vmem:[%s16563_s26 + $0x1b0] sm:$0xff]  ;;  %v881_v1 = vshll.u32 %v17230_v38, 16 }
  0x89   : > { %21401 = vst [vmem:[#allocation57_spill] sm:$0xff] %v17212_v24  ;;  %v17223_v17 = vcombine.high %v17204_v21, %v17212_v24  ;;  %v17227_v33 = vcombine.low %v17204_v21, %v17212_v24  ;;  %v948_v11 = vshrl.u32 %v17234_v39, 16  ;;  %v15574_v21 = vld [vmem:[%s21153_s1 + $0x120] sm:$0xff]   ;;  %v17678_v29 = vcombine.high %v17230_v38, %v17234_v39 }
  0x8a   : > { %2948 = vmatmul.mubr.bf16.gmra.mrb[36].mxu1 %v17181_v20  ;;  %v17244_v20 = vcombine.low %v17187_v16, %v17190_v62  ;;  %v883_v46 = vrot.slane %v881_v1, 5  ;;  %v15573_v1 = vld [vmem:[%s21153_s1 + $0xa0] sm:$0xff]  }
  0x8b   : > { %13881 = vmatpush3.bf16.msra.mxu1 %v15564_v7  ;;  %2955 = vmatprep.mubr.bf16.mxu1 %v17194_v45  ;;  %21402 = vst [vmem:[#allocation58_spill] sm:$0xff] %v17223_v17  ;;  %21403 = vst [vmem:[#allocation59_spill] sm:$0xff] %v17227_v33  ;;  %v337_v7 = vld [vmem:[%s16563_s26 + $0x1d8] sm:$0x11]  ;;  %v950_v24 = vrot.slane %v948_v11, 4  ;;  %v889_v11 = vrot.slane %v887_v13, 5 }
  0x8c   : > { %13882 = vmatprep.subr.bf16.mxu1 %v15566_v4  ;;  %13841 = vmatpush3.bf16.msra.mxu0 %v15563_v49  ;;  %v951_v4 = vshll.u32 %v17234_v39, 16  ;;  %v957_v45 = vshll.u32 %v337_v7, 16  ;;  %21404 = vst [vmem:[#allocation60_spill] sm:$0xff] %v17244_v20  ;;  %v880_v49 = vrot.slane %v878_v19, 4  ;;  %v17257_v7 = vld [vmem:[%s16563_s26 + $0x230] sm:$0xff]  ;;  %v15575_v13 = vld [vmem:[%s21153_s1 + $0xe8] sm:$0xff]  }
  0x8d   : > { %2202 = vmatprep.mubr.bf16.mxu0 %v17223_v17  ;;  %13842 = vmatprep.subr.bf16.mxu0 %v15565_v14  ;;  %v15572_v14 = vld [vmem:[%s21153_s1 + $0x160] sm:$0xff]   ;;  %21430 = vst [vmem:[#allocation86_spill] sm:$0xff] %v17678_v29 }
  0x8e   : > { %2203 = vmatmul.mubr.bf16.gmra.mrb[36].mxu0 %v17227_v33  ;;  %v17254_v17 = vld [vmem:[%s16563_s26 + $0x1e0] sm:$0xff]  ;;  %v884_v19 = vor.u32 %v883_v46, %v880_v49  ;;  %v959_v22 = vrot.slane %v957_v45, 5  ;;  %v15576_v45 = vld [vmem:[%s21153_s1 + $0x168] sm:$0xff]  }
  0x8f   : > { %13883 = vmatpush3.bf16.msra.mxu1 %v15568_v8  ;;  %v17261_v43 = vcombine.high %v17254_v17, %v17257_v7  ;;  %v953_v8 = vrot.slane %v951_v4, 5 }
  0x90   : > { %13843 = vmatpush3.bf16.msra.mxu0 %v15567_v25  ;;  %13884 = vmatprep.subr.bf16.mxu1 %v15572_v14  ;;  %v885_v2 = vrot.slane %v884_v19, 4  ;;  %v15577_v25 = vld [vmem:[%s21153_s1 + $0xa8] sm:$0xff]   ;;  %v17308_v14 = vld [vmem:[%s16563_s26 + $0x250] sm:$0xff]  ;;  %v17314_v19 = vld [vmem:[%s16563_s26 + $0x60] sm:$0xff] }
  0x91   : > { %21405 = vst [vmem:[#allocation61_spill] sm:$0xff] %v17261_v43  ;;  %v954_v33 = vor.u32 %v953_v8, %v950_v24  ;;  %13844 = vmatprep.subr.bf16.mxu0 %v15571_v23  ;;  %v347_v23 = vld [vmem:[%s16563_s26 + $0x228] sm:$0x11]  ;;  %v17311_v8 = vld [vmem:[%s16563_s26 + $0x10] sm:$0xff] }
  0x92   : > { %2956 = vmatmul.mubr.bf16.gmra.mrb[40].mxu1 %v17244_v20  ;;  %v17279_v24 = vsel %vm16585_vm2, %v885_v2, %v889_v11  ;;  %v17293_v2 = vcombine.low %v17254_v17, %v17257_v7  ;;  %v11545_v11 = vcombine.high %v17311_v8, %v17314_v19  ;;  %v1091_v20 = vshll.u32 %v17308_v14, 16 }
  0x93   : > { %2963 = vmatprep.mubr.bf16.mxu1 %v17261_v43  ;;  %v955_v46 = vrot.slane %v954_v33, 4  ;;  %13885 = vmatpush3.bf16.msra.mxu1 %v15574_v21  ;;  %21406 = vst [vmem:[#allocation62_spill] sm:$0xff] %v17279_v24  ;;  %v15578_v21 = vld [vmem:[%s21153_s1 + $0x128] sm:$0xff]   ;;  %v1088_v43 = vshrl.u32 %v17308_v14, 16 }
  0x94   : > { %13845 = vmatpush3.bf16.msra.mxu0 %v15573_v1  ;;  %13886 = vmatprep.subr.bf16.mxu1 %v15576_v45  ;;  %21408 = vst [vmem:[#allocation64_spill] sm:$0xff] %v17293_v2  ;;  %v357_v1 = vld [vmem:[%s16563_s26 + $0x278] sm:$0x11]  ;;  %v1027_v45 = vshll.u32 %v347_v23, 16  ;;  %v15582_v23 = vld [vmem:[%s21153_s1 + $0x170] sm:$0xff]  }
  0x95   : > { %v17286_v33 = vsel %vm16585_vm2, %v955_v46, %v959_v22  ;;  %13846 = vmatprep.subr.bf16.mxu0 %v15575_v13  ;;  %v17304_v22 = vld [vmem:[%s16563_s26 + $0x200] sm:$0xff]  ;;  %v1090_v31 = vrot.slane %v1088_v43, 4  ;;  %v15583_v43 = vld [vmem:[%s21153_s1 + $0xb0] sm:$0xff]  }
  0x96   : > { %21407 = vst [vmem:[#allocation63_spill] sm:$0xff] %v17286_v33  ;;  %v17297_v4 = vcombine.high %v17279_v24, %v17286_v33  ;;  %v17301_v49 = vcombine.low %v17279_v24, %v17286_v33  ;;  %v1018_v13 = vshrl.u32 %v17304_v22, 16  ;;  %v1021_v46 = vshll.u32 %v17304_v22, 16 }
  0x97   : > { %13887 = vmatpush3.bf16.msra.mxu1 %v15578_v21  ;;  %v1097_v33 = vshll.u32 %v357_v1, 16  ;;  %v15581_v21 = vld [vmem:[%s21153_s1 + $0xf0] sm:$0xff]   ;;  %v1029_v55 = vrot.slane %v1027_v45, 5  ;;  %v17367_v45 = vld [vmem:[%s16563_s26 + $0x8] sm:$0xff]  ;;  %v17753_v18 = vcombine.high %v17304_v22, %v17308_v14 }
  0x98   : > { %21409 = vst [vmem:[#allocation65_spill] sm:$0xff] %v17297_v4  ;;  %21410 = vst [vmem:[#allocation66_spill] sm:$0xff] %v17301_v49  ;;  %2210 = vmatprep.mubr.bf16.mxu0 %v17297_v4  ;;  %13847 = vmatpush3.bf16.msra.mxu0 %v15577_v25  ;;  %v1020_v24 = vrot.slane %v1018_v13, 4  ;;  %v1023_v37 = vrot.slane %v1021_v46, 5  ;;  %v1093_v4 = vrot.slane %v1091_v20, 5  ;;  %v15584_v46 = vld [vmem:[%s21153_s1 + $0x130] sm:$0xff]  }
  0x99   : > { %2211 = vmatmul.mubr.bf16.gmra.mrb[40].mxu0 %v17301_v49  ;;  %13848 = vmatprep.subr.bf16.mxu0 %v15581_v21  ;;  %v1099_v13 = vrot.slane %v1097_v33, 5  ;;  %v15587_v33 = vld [vmem:[%s21153_s1 + $0xb8] sm:$0xff]   ;;  %21436 = vst [vmem:[#allocation90_spill] sm:$0xff] %v17753_v18 }
  0x9a   : > { %2964 = vmatmul.mubr.bf16.gmra.mrb[44].mxu1 %v17293_v2  ;;  %v1024_v25 = vor.u32 %v1023_v37, %v1020_v24  ;;  %13888 = vmatprep.subr.bf16.mxu1 %v15582_v23  ;;  %v1094_v1 = vor.u32 %v1093_v4, %v1090_v31  ;;  %v15585_v37 = vld [vmem:[%s21153_s1 + $0xf8] sm:$0xff]   ;;  %v15605_v2 = vld [vmem:[%s21153_s1 + $0x1d0] sm:$0xff]  }
  0x9b   : > { %3069 = vmatprep.mubr.bf16.mxu1 %v11545_v11  ;;  %13889 = vmatpush3.bf16.msra.mxu1 %v15584_v46  ;;  %v15586_v24 = vld [vmem:[%s21153_s1 + $0x178] sm:$0xff]   ;;  %v17386_v46 = vld [vmem:[%s16563_s26 + $0x100] sm:$0xff] }
  0x9c   : > { %v1025_v49 = vrot.slane %v1024_v25, 4  ;;  %13849 = vmatpush3.bf16.msra.mxu0 %v15583_v43  ;;  %v1095_v20 = vrot.slane %v1094_v1, 4  ;;  %13890 = vmatprep.subr.bf16.mxu1 %v15586_v24  ;;  %v15588_v11 = vld [vmem:[%s21153_s1 + $0x138] sm:$0xff]   ;;  %v11544_v25 = vcombine.low %v17311_v8, %v17314_v19  ;;  %v15593_v43 = vld [vmem:[%s21153_s1 + $0x1c0] sm:$0xff]   ;;  %v15598_v24 = vld [vmem:[%s21153_s1 + $0x248] sm:$0xff]  }
  0x9d   : > { %13850 = vmatprep.subr.bf16.mxu0 %v15585_v37  ;;  %v17370_v21 = vld [vmem:[%s16563_s26 + $0x58] sm:$0xff]  ;;  %v15594_v1 = vld [vmem:[%s21153_s1 + $0x240] sm:$0xff]  }
  0x9e   : > { %v17346_v31 = vsel %vm16585_vm2, %v1025_v49, %v1029_v55  ;;  %v17353_v4 = vsel %vm16585_vm2, %v1095_v20, %v1099_v13  ;;  %v11543_v23 = vcombine.high %v17367_v45, %v17370_v21  ;;  %v17383_v13 = vld [vmem:[%s16563_s26 + $0xb0] sm:$0xff]  ;;  %v15596_v20 = vld [vmem:[%s21153_s1 + $0x200] sm:$0xff]  }
  0x9f   : > { %21411 = vst [vmem:[#allocation67_spill] sm:$0xff] %v17346_v31  ;;  %21412 = vst [vmem:[#allocation68_spill] sm:$0xff] %v17353_v4  ;;  %v17360_v55 = vcombine.high %v17346_v31, %v17353_v4  ;;  %v17364_v49 = vcombine.low %v17346_v31, %v17353_v4  ;;  %13891 = vmatpush3.bf16.msra.mxu1 %v15588_v11  ;;  %v17390_v37 = vcombine.high %v17383_v13, %v17386_v46  ;;  %v15611_v4 = vld [vmem:[%s21153_s1 + $0x198] sm:$0xff]  }
  0xa0   : > { %13851 = vmatpush3.bf16.msra.mxu0 %v15587_v33  ;;  %13956 = vmatprep.subr.bf16.mxu1 %v15594_v1  ;;  %v15595_v33 = vld [vmem:[%s21153_s1 + $0x180] sm:$0xff]   ;;  %v11542_v11 = vcombine.low %v17367_v45, %v17370_v21  ;;  %v17416_v1 = vld [vmem:[%s16563_s26 + $0xf8] sm:$0xff]  ;;  %v17483_v31 = vcombine.high %v17011_v42, %v17023_v44 }
  0xa1   : > { %21413 = vst [vmem:[#allocation69_spill] sm:$0xff] %v17360_v55  ;;  %21414 = vst [vmem:[#allocation70_spill] sm:$0xff] %v17364_v49  ;;  %2218 = vmatprep.mubr.bf16.mxu0 %v17360_v55  ;;  %13916 = vmatprep.subr.bf16.mxu0 %v15593_v43  ;;  %v17413_v43 = vld [vmem:[%s16563_s26 + $0xa8] sm:$0xff] }
  0xa2   : > { %21415 = vst [vmem:[#allocation71_spill] sm:$0xff] %v17390_v37  ;;  %2219 = vmatmul.mubr.bf16.gmra.mrb[44].mxu0 %v17364_v49  ;;  %3070 = vmatmul.mubr.bf16.vlgmr.msra.gmra.mrb[48].mxu1 %v11544_v25  ;;  %v15597_v25 = vld [vmem:[%s21153_s1 + $0x1c8] sm:$0xff]   ;;  %v15606_v49 = vld [vmem:[%s21153_s1 + $0x250] sm:$0xff]   ;;  %21422 = vst [vmem:[#allocation78_spill] sm:$0xff] %v17483_v31 }
  0xa3   : > { %3004 = vmatprep.mubr.bf16.mxu0 %v11543_v23  ;;  %13957 = vmatpush3.bf16.msra.mxu1 %v15596_v20  ;;  %v15600_v23 = vld [vmem:[%s21153_s1 + $0x208] sm:$0xff]   ;;  %v17420_v20 = vcombine.high %v17413_v43, %v17416_v1 }
  0xa4   : > { %3077 = vmatprep.mubr.bf16.mxu1 %v17390_v37  ;;  %13958 = vmatprep.subr.bf16.mxu1 %v15598_v24  ;;  %v17424_v24 = vcombine.low %v17383_v13, %v17386_v46  ;;  %v15599_v55 = vld [vmem:[%s21153_s1 + $0x188] sm:$0xff]   ;;  %v17434_v37 = vcombine.high %v16935_v32, %v16947_v40 }
  0xa5   : > { %21416 = vst [vmem:[#allocation72_spill] sm:$0xff] %v17420_v20 }
  0xa6   : > { %21417 = vst [vmem:[#allocation73_spill] sm:$0xff] %v17424_v24  ;;  %21418 = vst [vmem:[#allocation74_spill] sm:$0xff] %v17434_v37 }
  0xa7   : > { %13959 = vmatpush3.bf16.msra.mxu1 %v15600_v23  ;;  %v15608_v23 = vld [vmem:[%s21153_s1 + $0x210] sm:$0xff]  }
  0xa8   : > { %13960 = vmatprep.subr.bf16.mxu1 %v15606_v49  ;;  %v15610_v49 = vld [vmem:[%s21153_s1 + $0x258] sm:$0xff]  }
  0xaa   : > { %3005 = vmatmul.mubr.bf16.vlgmr.msra.gmra.mrb[48].mxu0 %v11542_v11  ;;  %3078 = vmatmul.mubr.bf16.gmra.mrb[52].mxu1 %v17424_v24  ;;  %v15607_v11 = vld [vmem:[%s21153_s1 + $0x190] sm:$0xff]   ;;  %v15609_v24 = vld [vmem:[%s21153_s1 + $0x1d8] sm:$0xff]  }
  0xab   : > { %13917 = vmatpush3.bf16.msra.mxu0 %v15595_v33  ;;  %3012 = vmatprep.mubr.bf16.mxu0 %v17420_v20  ;;  %v17453_v33 = vcombine.low %v17413_v43, %v17416_v1  ;;  %v17462_v20 = vld [vmem:[%s16563_s26 + $0x148] sm:$0xff] }
  0xac   : > { %13918 = vmatprep.subr.bf16.mxu0 %v15597_v25  ;;  %13961 = vmatpush3.bf16.msra.mxu1 %v15608_v23  ;;  %v15612_v25 = vld [vmem:[%s21153_s1 + $0x218] sm:$0xff]  }
  0xad   : > { %3085 = vmatprep.mubr.bf16.mxu1 %v17434_v37  ;;  %21419 = vst [vmem:[#allocation75_spill] sm:$0xff] %v17453_v33  ;;  %13962 = vmatprep.subr.bf16.mxu1 %v15610_v49  ;;  %v17465_v23 = vld [vmem:[%s16563_s26 + $0x198] sm:$0xff]  ;;  %v17473_v49 = vcombine.low %v16935_v32, %v16947_v40  ;;  %v15620_v32 = vld [vmem:[%s21153_s1 + $0x220] sm:$0xff]  }
  0xae   : > { %v17469_v37 = vcombine.high %v17462_v20, %v17465_v23  ;;  %v17494_v40 = vld [vmem:[%s16563_s26 + $0x78] sm:$0x11] }
  0xaf   : > { %13919 = vmatpush3.bf16.msra.mxu0 %v15599_v55  ;;  %21421 = vst [vmem:[#allocation77_spill] sm:$0xff] %v17473_v49  ;;  %v15618_v55 = vld [vmem:[%s21153_s1 + $0x260] sm:$0xff]  }
  0xb0   : > { %21420 = vst [vmem:[#allocation76_spill] sm:$0xff] %v17469_v37  ;;  %13920 = vmatprep.subr.bf16.mxu0 %v15605_v2  ;;  %13963 = vmatpush3.bf16.msra.mxu1 %v15612_v25  ;;  %v17486_v2 = vld [vmem:[%s16563_s26 + $0x28] sm:$0x11] }
  0xb1   : > { %13964 = vmatprep.subr.bf16.mxu1 %v15618_v55  ;;  %v15622_v25 = vld [vmem:[%s21153_s1 + $0x268] sm:$0xff]  }
  0xb2   : > { %3013 = vmatmul.mubr.bf16.gmra.mrb[52].mxu0 %v17453_v33  ;;  %3086 = vmatmul.mubr.bf16.gmra.mrb[56].mxu1 %v17473_v49  ;;  %v15624_v55 = vld [vmem:[%s21153_s1 + $0x228] sm:$0xff]   ;;  %v17541_v49 = vcombine.low %v17011_v42, %v17023_v44  ;;  %v15632_v42 = vld [vmem:[%s21153_s1 + $0x230] sm:$0xff]  }
  0xb3   : > { %13921 = vmatpush3.bf16.msra.mxu0 %v15607_v11  ;;  %3020 = vmatprep.mubr.bf16.mxu0 %v17469_v37  ;;  %v17510_v11 = vld [vmem:[%s16563_s26 + $0x80] sm:$0x11]  ;;  %v17529_v33 = vld [vmem:[%s16563_s26 + $0x1e8] sm:$0xff]  ;;  %v15631_v44 = vld [vmem:[%s21153_s1 + $0x1b0] sm:$0xff]  }
  0xb4   : > { %13922 = vmatprep.subr.bf16.mxu0 %v15609_v24  ;;  %v15619_v37 = vld [vmem:[%s21153_s1 + $0x1a0] sm:$0xff]   ;;  %13965 = vmatpush3.bf16.msra.mxu1 %v15620_v32  ;;  %v17519_v24 = vcombine.low %v17462_v20, %v17465_v23  ;;  %v17532_v32 = vld [vmem:[%s16563_s26 + $0x238] sm:$0xff]  ;;  %21425 = vst [vmem:[#allocation81_spill] sm:$0xff] %v17541_v49 }
  0xb5   : > { %3093 = vmatprep.mubr.bf16.mxu1 %v17483_v31  ;;  %13966 = vmatprep.subr.bf16.mxu1 %v15622_v25  ;;  %v17536_v31 = vcombine.high %v17529_v33, %v17532_v32  ;;  %v11549_v25 = vcombine.high %v17087_v52, %v17107_v63 }
  0xb6   : > { %21423 = vst [vmem:[#allocation79_spill] sm:$0xff] %v17519_v24 }
  0xb7   : > { %13923 = vmatpush3.bf16.msra.mxu0 %v15611_v4  ;;  %21424 = vst [vmem:[#allocation80_spill] sm:$0xff] %v17536_v31  ;;  %v15630_v4 = vld [vmem:[%s21153_s1 + $0x270] sm:$0xff]  }
  0xb8   : > { %13924 = vmatprep.subr.bf16.mxu0 %v15617_v30  ;;  %13967 = vmatpush3.bf16.msra.mxu1 %v15624_v55  ;;  %v15629_v55 = vld [vmem:[%s21153_s1 + $0x1f0] sm:$0xff]   ;;  %v17580_v30 = vcombine.low %v17529_v33, %v17532_v32 }
  0xb9   : > { %13968 = vmatprep.subr.bf16.mxu1 %v15630_v4  ;;  %v15634_v4 = vld [vmem:[%s21153_s1 + $0x278] sm:$0xff]  }
  0xba   : > { %3021 = vmatmul.mubr.bf16.gmra.mrb[56].mxu0 %v17519_v24  ;;  %3094 = vmatmul.mubr.bf16.gmra.mrb[60].mxu1 %v17541_v49  ;;  %21426 = vst [vmem:[#allocation82_spill] sm:$0xff] %v17580_v30  ;;  %v15636_v49 = vld [vmem:[%s21153_s1 + $0x238] sm:$0xff]  }
  0xbb   : > { %13925 = vmatpush3.bf16.msra.mxu0 %v15619_v37  ;;  %3028 = vmatprep.mubr.bf16.mxu0 %v17536_v31  ;;  %v17575_v31 = vld [vmem:[%s16563_s26 + $0x118] sm:$0x11]  ;;  %v15642_v37 = vld [vmem:[%s21153_s1 + $0x5c0] sm:$0xff]  }
  0xbc   : > { %13926 = vmatprep.subr.bf16.mxu0 %v15621_v34  ;;  %13969 = vmatpush3.bf16.msra.mxu1 %v15632_v42  ;;  %v17590_v42 = vld [vmem:[%s16563_s26 + $0x18] sm:$0xff]  ;;  %v17593_v34 = vld [vmem:[%s16563_s26 + $0x68] sm:$0xff] }
  0xbd   : > { %3199 = vmatprep.mubr.bf16.mxu1 %v11549_v25  ;;  %13970 = vmatprep.subr.bf16.mxu1 %v15634_v4  ;;  %v15633_v25 = vld [vmem:[%s21153_s1 + $0x1f8] sm:$0xff]   ;;  %v11547_v24 = vcombine.high %v17590_v42, %v17593_v34  ;;  %v17598_v4 = vld [vmem:[%s16563_s26 + $0xd0] sm:$0x11] }
  0xbf   : > { %13927 = vmatpush3.bf16.msra.mxu0 %v15623_v53  ;;  %v11548_v53 = vcombine.low %v17087_v52, %v17107_v63  ;;  %v15644_v63 = vld [vmem:[%s21153_s1 + $0x580] sm:$0xff]   ;;  %v15648_v52 = vld [vmem:[%s21153_s1 + $0x588] sm:$0xff]  }
  0xc0   : > { %13928 = vmatprep.subr.bf16.mxu0 %v15629_v55  ;;  %13971 = vmatpush3.bf16.msra.mxu1 %v15636_v49  ;;  %v17612_v55 = vcombine.high %v17145_v50, %v17159_v57  ;;  %v15641_v49 = vld [vmem:[%s21153_s1 + $0x540] sm:$0xff]  }
  0xc1   : > { %14036 = vmatprep.subr.bf16.mxu1 %v15642_v37  ;;  %v15646_v37 = vld [vmem:[%s21153_s1 + $0x5c8] sm:$0xff]  }
  0xc2   : > { %21427 = vst [vmem:[#allocation83_spill] sm:$0xff] %v17612_v55  ;;  %3029 = vmatmul.mubr.bf16.gmra.mrb[60].mxu0 %v17580_v30  ;;  %v17655_v30 = vld [vmem:[%s16563_s26 + $0x108] sm:$0xff] }
  0xc3   : > { %13929 = vmatpush3.bf16.msra.mxu0 %v15631_v44  ;;  %3134 = vmatprep.mubr.bf16.mxu0 %v11547_v24  ;;  %v15643_v24 = vld [vmem:[%s21153_s1 + $0x500] sm:$0xff]   ;;  %v15654_v44 = vld [vmem:[%s21153_s1 + $0x5d0] sm:$0xff]  }
  0xc4   : > { %13930 = vmatprep.subr.bf16.mxu0 %v15633_v25  ;;  %3200 = vmatmul.mubr.bf16.vlgmr.msra.gmra.mrb[64].mxu1 %v11548_v53  ;;  %v11546_v53 = vcombine.low %v17590_v42, %v17593_v34 }
  0xc5   : > { %14037 = vmatpush3.bf16.msra.mxu1 %v15644_v63  ;;  %3207 = vmatprep.mubr.bf16.mxu1 %v17612_v55  ;;  %v15645_v63 = vld [vmem:[%s21153_s1 + $0x548] sm:$0xff]   ;;  %v17652_v55 = vld [vmem:[%s16563_s26 + $0xb8] sm:$0xff] }
  0xc6   : > { %14038 = vmatprep.subr.bf16.mxu1 %v15646_v37  ;;  %v17659_v25 = vcombine.high %v17652_v55, %v17655_v30  ;;  %v17662_v37 = vld [vmem:[%s16563_s26 + $0x170] sm:$0x11] }
  0xc7   : > { %13931 = vmatpush3.bf16.msra.mxu0 %v15635_v35  ;;  %v17667_v35 = vcombine.low %v17145_v50, %v17159_v57  ;;  %v15656_v57 = vld [vmem:[%s21153_s1 + $0x590] sm:$0xff]  }
  0xc8   : > { %21428 = vst [vmem:[#allocation84_spill] sm:$0xff] %v17659_v25  ;;  %13996 = vmatprep.subr.bf16.mxu0 %v15641_v49  ;;  %v17681_v49 = vld [vmem:[%s16563_s26 + $0x1c0] sm:$0x11] }
  0xc9   : > { %21429 = vst [vmem:[#allocation85_spill] sm:$0xff] %v17667_v35  ;;  %14039 = vmatpush3.bf16.msra.mxu1 %v15648_v52  ;;  %v15653_v52 = vld [vmem:[%s21153_s1 + $0x550] sm:$0xff]  }
  0xca   : > { %3135 = vmatmul.mubr.bf16.vlgmr.msra.gmra.mrb[64].mxu0 %v11546_v53  ;;  %14040 = vmatprep.subr.bf16.mxu1 %v15654_v44  ;;  %v17699_v44 = vld [vmem:[%s16563_s26 + $0x208] sm:$0x11]  ;;  %v17712_v53 = vld [vmem:[%s16563_s26 + $0x258] sm:$0x11] }
  0xcb   : > { %13997 = vmatpush3.bf16.msra.mxu0 %v15643_v24  ;;  %3142 = vmatprep.mubr.bf16.mxu0 %v17659_v25  ;;  %v15658_v24 = vld [vmem:[%s21153_s1 + $0x5d8] sm:$0xff]   ;;  %v15655_v25 = vld [vmem:[%s21153_s1 + $0x510] sm:$0xff]  }
  0xcc   : > { %13998 = vmatprep.subr.bf16.mxu0 %v15645_v63  ;;  %3208 = vmatmul.mubr.bf16.gmra.mrb[68].mxu1 %v17667_v35  ;;  %v17717_v35 = vcombine.low %v17652_v55, %v17655_v30  ;;  %v17730_v63 = vld [vmem:[%s16563_s26 + $0x1a8] sm:$0xff] }
  0xcd   : > { %14041 = vmatpush3.bf16.msra.mxu1 %v15656_v57  ;;  %3215 = vmatprep.mubr.bf16.mxu1 %v17678_v29  ;;  %v15657_v57 = vld [vmem:[%s21153_s1 + $0x558] sm:$0xff]  }
  0xce   : > { %21433 = vst [vmem:[#allocation87_spill] sm:$0xff] %v17717_v35  ;;  %14042 = vmatprep.subr.bf16.mxu1 %v15658_v24  ;;  %v17727_v29 = vld [vmem:[%s16563_s26 + $0x158] sm:$0xff]  ;;  %v17737_v24 = vld [vmem:[%s16563_s26 + $0x210] sm:$0x11] }
  0xcf   : > { %13999 = vmatpush3.bf16.msra.mxu0 %v15647_v58  ;;  %v17734_v0 = vcombine.high %v17727_v29, %v17730_v63  ;;  %v17742_v58 = vcombine.low %v17230_v38, %v17234_v39  ;;  %v15668_v39 = vld [vmem:[%s21153_s1 + $0x5a0] sm:$0xff]   ;;  %v17782_v38 = vld [vmem:[%s16563_s26 + $0x88] sm:$0x11] }
  0xd0   : > { %14000 = vmatprep.subr.bf16.mxu0 %v15653_v52  ;;  %v17756_v52 = vld [vmem:[%s16563_s26 + $0x260] sm:$0x11] }
  0xd1   : > { %21434 = vst [vmem:[#allocation88_spill] sm:$0xff] %v17734_v0  ;;  %21435 = vst [vmem:[#allocation89_spill] sm:$0xff] %v17742_v58  ;;  %14043 = vmatpush3.bf16.msra.mxu1 %v15660_v5  ;;  %v15665_v5 = vld [vmem:[%s21153_s1 + $0x560] sm:$0xff]  }
  0xd2   : > { %3143 = vmatmul.mubr.bf16.gmra.mrb[68].mxu0 %v17717_v35  ;;  %14044 = vmatprep.subr.bf16.mxu1 %v15666_v61  ;;  %v15670_v61 = vld [vmem:[%s21153_s1 + $0x5e8] sm:$0xff]   ;;  %v21439_v35 = vrot.slane %v17367_v45, 9  ;;  %v17813_v45 = vld [vmem:[%s16563_s26 + $0x1f8] sm:$0xff] }
  0xd3   : > { %14001 = vmatpush3.bf16.msra.mxu0 %v15655_v25  ;;  %3150 = vmatprep.mubr.bf16.mxu0 %v17734_v0  ;;  %v15672_v25 = vld [vmem:[%s21153_s1 + $0x5a8] sm:$0xff]   ;;  %v21438_v0 = vrot.slane %v17502_v28, 5 }
  0xd4   : > { %14002 = vmatprep.subr.bf16.mxu0 %v15657_v57  ;;  %3216 = vmatmul.mubr.bf16.gmra.mrb[72].mxu1 %v17742_v58  ;;  %v17787_v58 = vcombine.low %v17727_v29, %v17730_v63  ;;  %v21441_v57 = vrot.slane %v17370_v21, 9  ;;  %v15669_v28 = vld [vmem:[%s21153_s1 + $0x568] sm:$0xff]   ;;  %v17823_v21 = vld [vmem:[%s16563_s26 + $0x40] sm:$0x11] }
  0xd5   : > { %14045 = vmatpush3.bf16.msra.mxu1 %v15668_v39  ;;  %3223 = vmatprep.mubr.bf16.mxu1 %v17753_v18  ;;  %v17798_v39 = vsel %vm17694_vm5, %v21439_v35, %v21438_v0  ;;  %v21440_v18 = vrot.slane %v17510_v11, 5  ;;  %v17816_v0 = vld [vmem:[%s16563_s26 + $0x248] sm:$0xff]  ;;  %v15678_v35 = vld [vmem:[%s21153_s1 + $0x5f0] sm:$0xff]  }
  0xd6   : > { %21437 = vst [vmem:[#allocation91_spill] sm:$0xff] %v17787_v58  ;;  %14046 = vmatprep.subr.bf16.mxu1 %v15670_v61  ;;  %v17820_v11 = vcombine.high %v17813_v45, %v17816_v0  ;;  %v15671_v61 = vld [vmem:[%s21153_s1 + $0x528] sm:$0xff]   ;;  %v17886_v56 = vcombine.low %v17813_v45, %v17816_v0 }
  0xd7   : > { %v17806_v12 = vsel %vm17694_vm5, %v21441_v57, %v21440_v18  ;;  %14003 = vmatpush3.bf16.msra.mxu0 %v15659_v9  ;;  %v17828_v9 = vcombine.low %v17304_v22, %v17308_v14  ;;  %v15680_v22 = vld [vmem:[%s21153_s1 + $0x5b0] sm:$0xff]   ;;  %v17853_v57 = vld [vmem:[%s16563_s26 + $0xd8] sm:$0x11]  ;;  %v21444_v14 = vrot.slane %v17486_v2, 5 }
  0xd8   : > { %21442 = vst [vmem:[#allocation92_spill] sm:$0xff] %v17820_v11  ;;  %14004 = vmatprep.subr.bf16.mxu0 %v15665_v5  ;;  %v11863_v18 = vcombine.high %v17798_v39, %v17806_v12  ;;  %v17840_v5 = vld [vmem:[%s16563_s26 + $0x90] sm:$0x11]  ;;  %21448 = vst [vmem:[#allocation94_spill] sm:$0xff] %v17886_v56 }
  0xd9   : > { %21443 = vst [vmem:[#allocation93_spill] sm:$0xff] %v17828_v9  ;;  %14047 = vmatpush3.bf16.msra.mxu1 %v15672_v25  ;;  %v15677_v25 = vld [vmem:[%s21153_s1 + $0x570] sm:$0xff]  }
  0xda   : > { %3151 = vmatmul.mubr.bf16.gmra.mrb[72].mxu0 %v17787_v58  ;;  %14048 = vmatprep.subr.bf16.mxu1 %v15678_v35  ;;  %v15682_v35 = vld [vmem:[%s21153_s1 + $0x5f8] sm:$0xff]   ;;  %v21446_v58 = vrot.slane %v17494_v40, 5  ;;  %v15679_v2 = vld [vmem:[%s21153_s1 + $0x530] sm:$0xff]   ;;  %v21449_v40 = vrot.slane %v17598_v4, 5 }
  0xdb   : > { %14005 = vmatpush3.bf16.msra.mxu0 %v15667_v27  ;;  %3158 = vmatprep.mubr.bf16.mxu0 %v17820_v11  ;;  %v21445_v27 = vrot.slane %v17091_v54, 9  ;;  %v17881_v54 = vld [vmem:[%s16563_s26 + $0x128] sm:$0x11] }
  0xdc   : > { %14006 = vmatprep.subr.bf16.mxu0 %v15669_v28  ;;  %3224 = vmatmul.mubr.bf16.gmra.mrb[76].mxu1 %v17828_v9  ;;  %v17874_v28 = vsel %vm17694_vm5, %v21447_v15, %v21446_v58  ;;  %v15684_v15 = vld [vmem:[%s21153_s1 + $0x5b8] sm:$0xff]   ;;  %v21450_v58 = vrot.slane %v17413_v43, 9  ;;  %v21455_v9 = vrot.slane %v17563_v60, 5 }
  0xdd   : > { %v17866_v11 = vsel %vm17694_vm5, %v21445_v27, %v21444_v14  ;;  %14049 = vmatpush3.bf16.msra.mxu1 %v15680_v22  ;;  %4333 = vmatprep.mubr.bf16.mxu1 %v11863_v18  ;;  %v21451_v22 = vrot.slane %v17615_v47, 5  ;;  %v21452_v27 = vrot.slane %v17416_v1, 9  ;;  %v15681_v43 = vld [vmem:[%s21153_s1 + $0x578] sm:$0xff]   ;;  %v11862_v1 = vcombine.low %v17798_v39, %v17806_v12  ;;  %v15688_v14 = vld [vmem:[%s21153_s1 + $0x680] sm:$0xff]  }
  0xde   : > { %14050 = vmatprep.subr.bf16.mxu1 %v15682_v35  ;;  %v17897_v18 = vsel %vm17694_vm5, %v21450_v58, %v21449_v40  ;;  %v11861_v4 = vcombine.high %v17866_v11, %v17874_v28  ;;  %v17914_v40 = vld [vmem:[%s16563_s26 + $0xe0] sm:$0x11]  ;;  %v17939_v58 = vld [vmem:[%s16563_s26 + $0x150] sm:$0xff]  ;;  %v17946_v47 = vld [vmem:[%s16563_s26 + $0x178] sm:$0x11] }
  0xdf   : > { %v17905_v35 = vsel %vm17694_vm5, %v21452_v27, %v21451_v22  ;;  %14007 = vmatpush3.bf16.msra.mxu0 %v15671_v61  ;;  %v15686_v61 = vld [vmem:[%s21153_s1 + $0x6c0] sm:$0xff]   ;;  %v15683_v22 = vld [vmem:[%s21153_s1 + $0x538] sm:$0xff]  }
  0xe0   : > { %21453 = vst [vmem:[#allocation95_spill] sm:$0xff] %v17905_v35  ;;  %14008 = vmatprep.subr.bf16.mxu0 %v15677_v25  ;;  %v17928_v27 = vcombine.high %v17897_v18, %v17905_v35  ;;  %v17931_v25 = vld [vmem:[%s16563_s26 + $0x130] sm:$0x11]  ;;  %v15687_v39 = vld [vmem:[%s21153_s1 + $0x600] sm:$0xff]  }
  0xe1   : > { %14051 = vmatpush3.bf16.msra.mxu1 %v15684_v15  ;;  %v15685_v15 = vld [vmem:[%s21153_s1 + $0x640] sm:$0xff]  }
  0xe2   : > { %21454 = vst [vmem:[#allocation96_spill] sm:$0xff] %v17928_v27  ;;  %3159 = vmatmul.mubr.bf16.gmra.mrb[76].mxu0 %v17886_v56  ;;  %14116 = vmatprep.subr.bf16.mxu1 %v15686_v61  ;;  %v15690_v61 = vld [vmem:[%s21153_s1 + $0x6c8] sm:$0xff]   ;;  %v21458_v56 = vrot.slane %v17152_v51, 9  ;;  %v21459_v51 = vrot.slane %v17662_v37, 5 }
  0xe3   : > { %14009 = vmatpush3.bf16.msra.mxu0 %v15679_v2  ;;  %4268 = vmatprep.mubr.bf16.mxu0 %v11861_v4  ;;  %v17958_v2 = vsel %vm17694_vm5, %v21456_v10, %v21455_v9  ;;  %v21457_v4 = vrot.slane %v17575_v31, 5  ;;  %v11860_v10 = vcombine.low %v17866_v11, %v17874_v28  ;;  %v21460_v31 = vrot.slane %v17462_v20, 9  ;;  %v15689_v20 = vld [vmem:[%s21153_s1 + $0x648] sm:$0xff]  }
  0xe4   : > { %14010 = vmatprep.subr.bf16.mxu0 %v15681_v43  ;;  %4334 = vmatmul.mubr.bf16.vlgmr.msra.gmra.mrb[80].mxu1 %v11862_v1 }
  0xe5   : > { %v17966_v43 = vsel %vm17694_vm5, %v21458_v56, %v21457_v4  ;;  %14117 = vmatpush3.bf16.msra.mxu1 %v15688_v14  ;;  %4341 = vmatprep.mubr.bf16.mxu1 %v17928_v27  ;;  %v17983_v9 = vsel %vm17694_vm5, %v21460_v31, %v21459_v51  ;;  %v21461_v14 = vrot.slane %v17681_v49, 5  ;;  %v21462_v56 = vrot.slane %v17465_v23, 9  ;;  %v15694_v49 = vld [vmem:[%s21153_s1 + $0x6d0] sm:$0xff]   ;;  %v15691_v31 = vld [vmem:[%s21153_s1 + $0x608] sm:$0xff]  }
  0xe6   : > { %14118 = vmatprep.subr.bf16.mxu1 %v15690_v61  ;;  %v17998_v37 = vcombine.high %v17958_v2, %v17966_v43  ;;  %v18002_v23 = vcombine.low %v17897_v18, %v17905_v35  ;;  %v21468_v27 = vrot.slane %v17639_v26, 5  ;;  %v21471_v26 = vrot.slane %v17737_v24, 5 }
  0xe7   : > { %v17991_v11 = vsel %vm17694_vm5, %v21462_v56, %v21461_v14  ;;  %14011 = vmatpush3.bf16.msra.mxu0 %v15683_v22  ;;  %v18019_v14 = vld [vmem:[%s16563_s26 + $0x1c8] sm:$0x11]  ;;  %v15696_v22 = vld [vmem:[%s21153_s1 + $0x690] sm:$0xff]   ;;  %v21467_v56 = vrot.slane %v17187_v16, 9 }
  0xe8   : > { %21463 = vst [vmem:[#allocation97_spill] sm:$0xff] %v17998_v37  ;;  %14076 = vmatprep.subr.bf16.mxu0 %v15685_v15  ;;  %21464 = vst [vmem:[#allocation98_spill] sm:$0xff] %v18002_v23  ;;  %v18016_v15 = vcombine.high %v17983_v9, %v17991_v11  ;;  %v15695_v16 = vld [vmem:[%s21153_s1 + $0x610] sm:$0xff]  }
  0xe9   : > { %14119 = vmatpush3.bf16.msra.mxu1 %v15692_v41  ;;  %v15693_v41 = vld [vmem:[%s21153_s1 + $0x650] sm:$0xff]  }
  0xea   : > { %21465 = vst [vmem:[#allocation99_spill] sm:$0xff] %v18016_v15  ;;  %4269 = vmatmul.mubr.bf16.vlgmr.msra.gmra.mrb[80].mxu0 %v11860_v10  ;;  %14120 = vmatprep.subr.bf16.mxu1 %v15694_v49  ;;  %v15698_v10 = vld [vmem:[%s21153_s1 + $0x6d8] sm:$0xff]   ;;  %v21466_v49 = vrot.slane %v17627_v48, 5  ;;  %v18051_v48 = vcombine.low %v17958_v2, %v17966_v43 }
  0xeb   : > { %14077 = vmatpush3.bf16.msra.mxu0 %v15687_v39  ;;  %4276 = vmatprep.mubr.bf16.mxu0 %v17998_v37  ;;  %v21469_v37 = vrot.slane %v17190_v62, 9  ;;  %v21472_v62 = vrot.slane %v17529_v33, 9 }
  0xec   : > { %14078 = vmatprep.subr.bf16.mxu0 %v15689_v20  ;;  %4342 = vmatmul.mubr.bf16.gmra.mrb[84].mxu1 %v18002_v23  ;;  %v18039_v39 = vsel %vm17694_vm5, %v21467_v56, %v21466_v49  ;;  %21470 = vst [vmem:[#allocation100_spill] sm:$0xff] %v18051_v48  ;;  %v15700_v56 = vld [vmem:[%s21153_s1 + $0x698] sm:$0xff]  }
  0xed   : > { %v18047_v20 = vsel %vm17694_vm5, %v21469_v37, %v21468_v27  ;;  %14121 = vmatpush3.bf16.msra.mxu1 %v15696_v22  ;;  %4349 = vmatprep.mubr.bf16.mxu1 %v18016_v15  ;;  %v18063_v27 = vsel %vm17694_vm5, %v21472_v62, %v21471_v26  ;;  %v21474_v22 = vrot.slane %v17532_v32, 9  ;;  %v18087_v32 = vld [vmem:[%s16563_s26 + $0x180] sm:$0x11]  ;;  %v15699_v62 = vld [vmem:[%s21153_s1 + $0x618] sm:$0xff]   ;;  %v21480_v26 = vrot.slane %v17712_v53, 5 }
  0xee   : > { %14122 = vmatprep.subr.bf16.mxu1 %v15698_v10  ;;  %v15697_v10 = vld [vmem:[%s21153_s1 + $0x658] sm:$0xff]   ;;  %v21481_v15 = vrot.slane %v17257_v7, 9  ;;  %v15708_v7 = vld [vmem:[%s21153_s1 + $0x6a8] sm:$0xff]   ;;  %v21483_v53 = vrot.slane %v17823_v21, 5 }
  0xef   : > { %14079 = vmatpush3.bf16.msra.mxu0 %v15691_v31  ;;  %v15705_v21 = vld [vmem:[%s21153_s1 + $0x668] sm:$0xff]  }
  0xf0   : > { %14080 = vmatprep.subr.bf16.mxu0 %v15693_v41 }
  0xf1   : > { %14123 = vmatpush3.bf16.msra.mxu1 %v15700_v56  ;;  %v15701_v56 = vld [vmem:[%s21153_s1 + $0x660] sm:$0xff]  }
  0xf2   : > { %4277 = vmatmul.mubr.bf16.gmra.mrb[84].mxu0 %v18051_v48 }
  0xf3   : > { %14081 = vmatpush3.bf16.msra.mxu0 %v15695_v16  ;;  %v21479_v16 = vrot.slane %v17254_v17, 9 }
  0xf4   : > { %14082 = vmatprep.subr.bf16.mxu0 %v15697_v10  ;;  %v18145_v10 = vsel %vm17694_vm5, %v21481_v15, %v21480_v26  ;;  %v21484_v15 = vrot.slane %v17590_v42, 9 }
  0xf6   : > { %v18164_v26 = vsel %vm17694_vm5, %v21484_v15, %v21483_v53 }
  0xf7   : > { %14083 = vmatpush3.bf16.msra.mxu0 %v15699_v62 }
  0xf8   : > { %14084 = vmatprep.subr.bf16.mxu0 %v15701_v56  ;;  %v15712_v56 = vld [vmem:[%s21153_s1 + $0x6b0] sm:$0xff]  }
 0x102   : > { %v13612_v1 = vpop.f32.mrb[0].mxu0 }
 0x103   : > { %v13613_v60 = vpop.f32.mrb[1].mxu0 }
 0x104   : > { %v13614_v61 = vadd.f32 %v13613_v60, %v13612_v1  ;;  %v13615_v4 = vpop.f32.mrb[2].mxu0  ;;  %v18008_v1 = vld [vmem:[%s16563_s26 + $0x1a0] sm:$0xff] }
 0x105   : > { %v13616_v51 = vpop.f32.mrb[3].mxu0 }
 0x106   : > { %v13617_v60 = vadd.f32 %v13616_v51, %v13615_v4  ;;  %v13652_v4 = vpop.f32.mrb[0].mxu1 }
 0x107   : > { %v13653_v51 = vpop.f32.mrb[1].mxu1 }
 0x108   : > { %v13654_v23 = vadd.f32 %v13653_v51, %v13652_v4  ;;  %v13655_v35 = vpop.f32.mrb[2].mxu1  ;;  %v21473_v4 = vrot.slane %v17756_v52, 5  ;;  %v18084_v52 = vcombine.high %v18039_v39, %v18047_v20 }
 0x109   : > { %v13656_v37 = vpop.f32.mrb[3].mxu1 }
 0x10a   : > { %v18074_v51 = vsel %vm17694_vm5, %v21474_v22, %v21473_v4  ;;  %v18077_v24 = vadd.f32 %v13654_v23, %v13614_v61  ;;  %v13657_v49 = vadd.f32 %v13656_v37, %v13655_v35  ;;  %21475 = vst [vmem:[#allocation101_spill] sm:$0xff] %v18084_v52  ;;  %v18092_v61 = vcombine.low %v17983_v9, %v17991_v11  ;;  %v15702_v35 = vld [vmem:[%s21153_s1 + $0x6e0] sm:$0xff]   ;;  %v18108_v37 = vld [vmem:[%s16563_s26 + $0x1d0] sm:$0x11]  ;;  %v18124_v23 = vld [vmem:[%s16563_s26 + $0x218] sm:$0x11] }
 0x10b   : > { %v18105_v41 = vcombine.high %v18063_v27, %v18074_v51  ;;  %14124 = vmatprep.subr.bf16.mxu1 %v15702_v35  ;;  %v18116_v22 = vld [vmem:[%s16563_s26 + $0x1f0] sm:$0xff]  ;;  %4284 = vmatprep.mubr.bf16.mxu0 %v18084_v52  ;;  %v15706_v35 = vld [vmem:[%s21153_s1 + $0x6e8] sm:$0xff]  }
 0x10c   : > { %21476 = vst [vmem:[#allocation102_spill] sm:$0xff] %v18092_v61  ;;  %v18098_v31 = vadd.f32 %v13657_v49, %v13617_v60  ;;  %v15704_v60 = vld [vmem:[%s21153_s1 + $0x6a0] sm:$0xff]   ;;  %4350 = vmatmul.mubr.bf16.gmra.mrb[88].mxu1 %v18092_v61  ;;  %v21478_v49 = vrot.slane %v17699_v44, 5  ;;  %v13618_v4 = vpop.f32.mrb[4].mxu0  ;;  %v18153_v44 = vcombine.low %v18039_v39, %v18047_v20 }
 0x10d   : > { %21477 = vst [vmem:[#allocation103_spill] sm:$0xff] %v18105_v41  ;;  %v15703_v61 = vld [vmem:[%s21153_s1 + $0x620] sm:$0xff]   ;;  %14125 = vmatpush3.bf16.msra.mxu1 %v15704_v60  ;;  %4357 = vmatprep.mubr.bf16.mxu1 %v18105_v41  ;;  %v13658_v17 = vpop.f32.mrb[4].mxu1  ;;  %v21485_v60 = vrot.slane %v17840_v5, 5  ;;  %v15710_v5 = vld [vmem:[%s21153_s1 + $0x6f0] sm:$0xff]  }
 0x10e   : > { %v18137_v33 = vsel %vm17694_vm5, %v21479_v16, %v21478_v49  ;;  %21482 = vst [vmem:[#allocation104_spill] sm:$0xff] %v18153_v44  ;;  %14126 = vmatprep.subr.bf16.mxu1 %v15706_v35  ;;  %v21486_v49 = vrot.slane %v17593_v34, 9  ;;  %v13619_v35 = vpop.f32.mrb[5].mxu0  ;;  %v13659_v15 = vpop.f32.mrb[5].mxu1  ;;  %v18183_v34 = vcombine.low %v18063_v27, %v18074_v51  ;;  %4285 = vmatmul.mubr.bf16.gmra.mrb[88].mxu0 %v18153_v44 }
 0x10f   : > { %v18179_v42 = vcombine.high %v18137_v33, %v18145_v10  ;;  %v13620_v53 = vadd.f32 %v13619_v35, %v13618_v4  ;;  %v13660_v62 = vadd.f32 %v13659_v15, %v13658_v17  ;;  %v13661_v35 = vpop.f32.mrb[6].mxu1  ;;  %14085 = vmatpush3.bf16.msra.mxu0 %v15703_v61  ;;  %v21491_v61 = vrot.slane %v17311_v8, 9  ;;  %v15711_v8 = vld [vmem:[%s21153_s1 + $0x630] sm:$0xff]  }
 0x110   : > { %v18172_v16 = vsel %vm17694_vm5, %v21486_v49, %v21485_v60  ;;  %21489 = vst [vmem:[#allocation107_spill] sm:$0xff] %v18183_v34  ;;  %v13621_v60 = vpop.f32.mrb[6].mxu0  ;;  %v15707_v49 = vld [vmem:[%s21153_s1 + $0x628] sm:$0xff]   ;;  %v13662_v52 = vpop.f32.mrb[7].mxu1  ;;  %14086 = vmatprep.subr.bf16.mxu0 %v15705_v21 }
 0x111   : > { %21487 = vst [vmem:[#allocation105_spill] sm:$0xff] %v18172_v16  ;;  %21488 = vst [vmem:[#allocation106_spill] sm:$0xff] %v18179_v42  ;;  %14127 = vmatpush3.bf16.msra.mxu1 %v15708_v7  ;;  %v11867_v4 = vcombine.high %v18164_v26, %v18172_v16  ;;  %v18197_v41 = vadd.f32 %v13660_v62, %v13620_v53  ;;  %v13622_v17 = vpop.f32.mrb[7].mxu0  ;;  %4292 = vmatprep.mubr.bf16.mxu0 %v18179_v42  ;;  %v15709_v7 = vld [vmem:[%s21153_s1 + $0x670] sm:$0xff]   ;;  %v21490_v53 = vrot.slane %v17769_v59, 5 }
 0x112   : > { %14128 = vmatprep.subr.bf16.mxu1 %v15710_v5  ;;  %v13623_v15 = vadd.f32 %v13622_v17, %v13621_v60  ;;  %v15714_v5 = vld [vmem:[%s21153_s1 + $0x6f8] sm:$0xff]   ;;  %v21492_v42 = vrot.slane %v17782_v38, 5  ;;  %v21493_v60 = vrot.slane %v17314_v19, 9  ;;  %v18224_v17 = vld [vmem:[%s16563_s26 + $0x240] sm:$0xff]  ;;  %v13663_v44 = vadd.f32 %v13662_v52, %v13661_v35  ;;  %v18235_v19 = vld [vmem:[%s16563_s26 + $0x268] sm:$0x11] }
 0x113   : > { %v18213_v62 = vsel %vm17694_vm5, %v21491_v61, %v21490_v53  ;;  %v18229_v59 = vcombine.low %v18137_v33, %v18145_v10  ;;  %v15716_v52 = vld [vmem:[%s21153_s1 + $0x6b8] sm:$0xff]   ;;  %v21496_v35 = vrot.slane %v17652_v55, 9  ;;  %14087 = vmatpush3.bf16.msra.mxu0 %v15707_v49  ;;  %v15722_v38 = vld [vmem:[%s21153_s1 + $0x7c8] sm:$0xff]  }
 0x114   : > { %4358 = vmatmul.mubr.bf16.gmra.mrb[92].mxu1 %v18183_v34  ;;  %v18221_v21 = vsel %vm17694_vm5, %v21493_v60, %v21492_v42  ;;  %v21495_v42 = vrot.slane %v17914_v40, 5  ;;  %v18258_v60 = vadd.f32 %v13663_v44, %v13623_v15  ;;  %v15713_v55 = vld [vmem:[%s21153_s1 + $0x678] sm:$0xff]   ;;  %14088 = vmatprep.subr.bf16.mxu0 %v15709_v7  ;;  %v15718_v44 = vld [vmem:[%s21153_s1 + $0x7c0] sm:$0xff]   ;;  %v13624_v49 = vpop.f32.mrb[8].mxu0 }
 0x115   : > { %21494 = vst [vmem:[#allocation108_spill] sm:$0xff] %v18229_v59  ;;  %14129 = vmatpush3.bf16.msra.mxu1 %v15712_v56  ;;  %4463 = vmatprep.mubr.bf16.mxu1 %v11867_v4  ;;  %v21498_v56 = vrot.slane %v17931_v25, 5  ;;  %v21499_v4 = vrot.slane %v17655_v30, 9  ;;  %v11865_v40 = vcombine.high %v18213_v62, %v18221_v21  ;;  %v11866_v25 = vcombine.low %v18164_v26, %v18172_v16  ;;  %v15715_v15 = vld [vmem:[%s21153_s1 + $0x638] sm:$0xff]   ;;  %v15720_v26 = vld [vmem:[%s21153_s1 + $0x780] sm:$0xff]  }
 0x116   : > { %14130 = vmatprep.subr.bf16.mxu1 %v15714_v5  ;;  %v18247_v53 = vsel %vm17694_vm5, %v21496_v35, %v21495_v42  ;;  %v18266_v42 = vld [vmem:[%s16563_s26 + $0x220] sm:$0x11]  ;;  %4293 = vmatmul.mubr.bf16.gmra.mrb[92].mxu0 %v18229_v59  ;;  %v21503_v5 = vrot.slane %v17383_v13, 9  ;;  %v18534_v59 = vld [vmem:[%s16563_s26 + $0x188] sm:$0x11] }
 0x117   : > { %21497 = vst [vmem:[#allocation109_spill] sm:$0xff] %v18247_v53  ;;  %v18255_v61 = vsel %vm17694_vm5, %v21499_v4, %v21498_v56  ;;  %v3409_v30 = vrot.slane %v18266_v42, 5  ;;  %v13625_v56 = vpop.f32.mrb[9].mxu0  ;;  %14089 = vmatpush3.bf16.msra.mxu0 %v15711_v8  ;;  %4398 = vmatprep.mubr.bf16.mxu0 %v11865_v40  ;;  %v21504_v8 = vrot.slane %v17881_v54, 5  ;;  %v21505_v40 = vrot.slane %v17386_v46, 9  ;;  %v15724_v46 = vld [vmem:[%s21153_s1 + $0x788] sm:$0xff]  }
 0x118   : > { %21500 = vst [vmem:[#allocation110_spill] sm:$0xff] %v18255_v61  ;;  %v18279_v35 = vcombine.high %v18247_v53, %v18255_v61  ;;  %v13626_v7 = vadd.f32 %v13625_v56, %v13624_v49  ;;  %v13627_v4 = vpop.f32.mrb[10].mxu0  ;;  %14090 = vmatprep.subr.bf16.mxu0 %v15713_v55  ;;  %v21506_v54 = vrot.slane %v18087_v32, 5  ;;  %v16360_v16 = vld [vmem:[%s16563_s26 + $0x278] sm:$0x11] }
 0x119   : > { %14131 = vmatpush3.bf16.msra.mxu1 %v15716_v52  ;;  %v15717_v52 = vld [vmem:[%s21153_s1 + $0x740] sm:$0xff]   ;;  %v13628_v34 = vpop.f32.mrb[11].mxu0  ;;  %v18305_v55 = vsel %vm17694_vm5, %v21505_v40, %v21504_v8  ;;  %v15726_v40 = vld [vmem:[%s21153_s1 + $0x7d0] sm:$0xff]  }
 0x11a   : > { %21501 = vst [vmem:[#allocation111_spill] sm:$0xff] %v18279_v35  ;;  %14196 = vmatprep.subr.bf16.mxu1 %v15718_v44  ;;  %v21502_v44 = vrot.slane %v17853_v57, 5  ;;  %v13629_v56 = vadd.f32 %v13628_v34, %v13627_v4  ;;  %v15719_v57 = vld [vmem:[%s21153_s1 + $0x700] sm:$0xff]   ;;  %v21507_v34 = vrot.slane %v17727_v29, 9  ;;  %v15721_v29 = vld [vmem:[%s21153_s1 + $0x748] sm:$0xff]  }
 0x11b   : > { %14091 = vmatpush3.bf16.msra.mxu0 %v15715_v15  ;;  %v11698_v15 = vrot.slane %v17816_v0, 9  ;;  %v15728_v0 = vld [vmem:[%s21153_s1 + $0x790] sm:$0xff]  }
 0x11c   : > { %4464 = vmatmul.mubr.bf16.vlgmr.msra.gmra.mrb[96].mxu1 %v11866_v25  ;;  %v18297_v49 = vsel %vm17694_vm5, %v21503_v5, %v21502_v44  ;;  %v13664_v25 = vpop.f32.mrb[8].mxu1  ;;  %v11864_v5 = vcombine.low %v18213_v62, %v18221_v21  ;;  %v18322_v4 = vsel %vm17694_vm5, %v21507_v34, %v21506_v54  ;;  %v21510_v44 = vrot.slane %v17730_v63, 9  ;;  %14156 = vmatprep.subr.bf16.mxu0 %v15717_v52  ;;  %v15723_v54 = vld [vmem:[%s21153_s1 + $0x708] sm:$0xff]   ;;  %v16338_v34 = vld [vmem:[%s16563_s26 + $0x270] sm:$0x11] }
 0x11d   : > { %14197 = vmatpush3.bf16.msra.mxu1 %v15720_v26  ;;  %4471 = vmatprep.mubr.bf16.mxu1 %v18279_v35  ;;  %v13665_v13 = vpop.f32.mrb[9].mxu1  ;;  %21508 = vst [vmem:[#allocation112_spill] sm:$0xff] %v18322_v4  ;;  %v21509_v26 = vrot.slane %v18108_v37, 5  ;;  %v18337_v32 = vcombine.high %v18297_v49, %v18305_v55  ;;  %v18341_v63 = vcombine.low %v18247_v53, %v18255_v61  ;;  %v16348_v35 = vld [vmem:[%s16563_s26 + $0x138] sm:$0x11]  ;;  %v3433_v53 = vrot.slane %v16360_v16, 5 }
 0x11e   : > { %14198 = vmatprep.subr.bf16.mxu1 %v15722_v38  ;;  %v13666_v38 = vadd.f32 %v13665_v13, %v13664_v25  ;;  %v13667_v8 = vpop.f32.mrb[10].mxu1  ;;  %4399 = vmatmul.mubr.bf16.vlgmr.msra.gmra.mrb[96].mxu0 %v11864_v5  ;;  %v15725_v5 = vld [vmem:[%s21153_s1 + $0x750] sm:$0xff]   ;;  %v15766_v16 = vld [vmem:[%s21153_s1 + $0x8d8] sm:$0xff]  }
 0x11f   : > { %v18330_v62 = vsel %vm17694_vm5, %v21510_v44, %v21509_v26  ;;  %21512 = vst [vmem:[#allocation114_spill] sm:$0xff] %v18337_v32  ;;  %v13668_v37 = vpop.f32.mrb[11].mxu1  ;;  %21513 = vst [vmem:[#allocation115_spill] sm:$0xff] %v18341_v63  ;;  %v3429_v26 = vrot.slane %v16338_v34, 5  ;;  %14157 = vmatpush3.bf16.msra.mxu0 %v15719_v57  ;;  %4406 = vmatprep.mubr.bf16.mxu0 %v18337_v32  ;;  %v21516_v57 = vrot.slane %v17939_v58, 9  ;;  %v21518_v34 = vrot.slane %v18008_v1, 9 }
 0x120   : > { %21511 = vst [vmem:[#allocation113_spill] sm:$0xff] %v18330_v62  ;;  %v18347_v25 = vadd.f32 %v13666_v38, %v13626_v7  ;;  %v13669_v13 = vadd.f32 %v13668_v37, %v13667_v8  ;;  %v18354_v52 = vcombine.high %v18322_v4, %v18330_v62  ;;  %v18361_v7 = vld [vmem:[%s16563_s26 + $0x20] sm:$0xff]  ;;  %14158 = vmatprep.subr.bf16.mxu0 %v15721_v29  ;;  %v21515_v37 = vrot.slane %v17946_v47, 5  ;;  %v18395_v44 = vld [vmem:[%s16563_s26 + $0x70] sm:$0xff]  ;;  %v18403_v58 = vld [vmem:[%s16563_s26 + $0x98] sm:$0x11] }
 0x121   : > { %14199 = vmatpush3.bf16.msra.mxu1 %v15724_v46  ;;  %v18371_v46 = vld [vmem:[%s16563_s26 + $0x48] sm:$0x11]  ;;  %v15727_v47 = vld [vmem:[%s21153_s1 + $0x710] sm:$0xff]   ;;  %v18408_v1 = vcombine.low %v18297_v49, %v18305_v55  ;;  %v3353_v32 = vrot.slane %v16348_v35, 5  ;;  %v21536_v48 = vrot.slane %v18395_v44, 9 }
 0x122   : > { %21514 = vst [vmem:[#allocation116_spill] sm:$0xff] %v18354_v52  ;;  %14200 = vmatprep.subr.bf16.mxu1 %v15726_v40  ;;  %v18364_v38 = vadd.f32 %v13669_v13, %v13629_v56  ;;  %v15730_v56 = vld [vmem:[%s21153_s1 + $0x7d8] sm:$0xff]   ;;  %v18384_v40 = vsel %vm17694_vm5, %v21516_v57, %v21515_v37  ;;  %v21517_v13 = vrot.slane %v18019_v14, 5  ;;  %v21520_v57 = vrot.slane %v17813_v45, 9  ;;  %v15736_v14 = vld [vmem:[%s21153_s1 + $0x7a0] sm:$0xff]  }
 0x123   : > { %21519 = vst [vmem:[#allocation117_spill] sm:$0xff] %v18408_v1  ;;  %v15732_v37 = vld [vmem:[%s21153_s1 + $0x798] sm:$0xff]   ;;  %14159 = vmatpush3.bf16.msra.mxu0 %v15723_v54  ;;  %v18434_v45 = vcombine.low %v18322_v4, %v18330_v62 }
 0x124   : > { %4472 = vmatmul.mubr.bf16.gmra.mrb[100].mxu1 %v18341_v63  ;;  %v18392_v29 = vsel %vm17694_vm5, %v21518_v34, %v21517_v13  ;;  %v18423_v13 = vsel %vm17694_vm5, %v11698_v15, %v3429_v26  ;;  %v13630_v34 = vpop.f32.mrb[12].mxu0  ;;  %14160 = vmatprep.subr.bf16.mxu0 %v15725_v5  ;;  %v15731_v26 = vld [vmem:[%s21153_s1 + $0x718] sm:$0xff]   ;;  %v21526_v63 = vrot.slane %v18124_v23, 5  ;;  %v15735_v23 = vld [vmem:[%s21153_s1 + $0x720] sm:$0xff]  }
 0x125   : > { %14201 = vmatpush3.bf16.msra.mxu1 %v15728_v0  ;;  %4479 = vmatprep.mubr.bf16.mxu1 %v18354_v52  ;;  %v18419_v0 = vsel %vm17694_vm5, %v21520_v57, %v3409_v30  ;;  %21522 = vst [vmem:[#allocation119_spill] sm:$0xff] %v18423_v13  ;;  %v18430_v8 = vcombine.high %v18384_v40, %v18392_v29  ;;  %v13631_v42 = vpop.f32.mrb[13].mxu0  ;;  %21524 = vst [vmem:[#allocation121_spill] sm:$0xff] %v18434_v45  ;;  %v15734_v30 = vld [vmem:[%s21153_s1 + $0x7e0] sm:$0xff]   ;;  %v13670_v52 = vpop.f32.mrb[12].mxu1 }
 0x126   : > { %14202 = vmatprep.subr.bf16.mxu1 %v15730_v56  ;;  %21521 = vst [vmem:[#allocation118_spill] sm:$0xff] %v18419_v0  ;;  %v15729_v56 = vld [vmem:[%s21153_s1 + $0x758] sm:$0xff]   ;;  %v13632_v15 = vadd.f32 %v13631_v42, %v13630_v34  ;;  %v13633_v54 = vpop.f32.mrb[14].mxu0  ;;  %v18444_v57 = vcombine.high %v18419_v0, %v18423_v13  ;;  %4407 = vmatmul.mubr.bf16.gmra.mrb[100].mxu0 %v18408_v1  ;;  %v13671_v42 = vpop.f32.mrb[13].mxu1 }
 0x127   : > { %21523 = vst [vmem:[#allocation120_spill] sm:$0xff] %v18430_v8  ;;  %v13634_v5 = vpop.f32.mrb[15].mxu0  ;;  %14161 = vmatpush3.bf16.msra.mxu0 %v15727_v47  ;;  %4414 = vmatprep.mubr.bf16.mxu0 %v18430_v8  ;;  %v21529_v8 = vrot.slane %v18224_v17, 9  ;;  %v13673_v1 = vpop.f32.mrb[14].mxu1  ;;  %v15740_v17 = vld [vmem:[%s21153_s1 + $0x7a8] sm:$0xff]  }
 0x128   : > { %21525 = vst [vmem:[#allocation122_spill] sm:$0xff] %v18444_v57  ;;  %v13635_v34 = vadd.f32 %v13634_v5, %v13633_v54  ;;  %14162 = vmatprep.subr.bf16.mxu0 %v15729_v56  ;;  %v21527_v54 = vrot.slane %v18116_v22, 9  ;;  %v21528_v5 = vrot.slane %v18235_v19, 5  ;;  %v13674_v22 = vpop.f32.mrb[15].mxu1  ;;  %v18480_v19 = vcombine.low %v18384_v40, %v18392_v29  ;;  %v13692_v35 = vpop.f32.mrb[16].mxu0 }
 0x129   : > { %14203 = vmatpush3.bf16.msra.mxu1 %v15732_v37  ;;  %v15733_v37 = vld [vmem:[%s21153_s1 + $0x760] sm:$0xff]  }
 0x12a   : > { %14204 = vmatprep.subr.bf16.mxu1 %v15734_v30  ;;  %v15738_v30 = vld [vmem:[%s21153_s1 + $0x7e8] sm:$0xff]   ;;  %v18464_v47 = vsel %vm17694_vm5, %v21527_v54, %v21526_v63  ;;  %v18472_v56 = vsel %vm17694_vm5, %v21529_v8, %v21528_v5  ;;  %21530 = vst [vmem:[#allocation123_spill] sm:$0xff] %v18480_v19  ;;  %v18486_v63 = vld [vmem:[%s16563_s26 + $0xc0] sm:$0xff] }
 0x12b   : > { %14163 = vmatpush3.bf16.msra.mxu0 %v15731_v26  ;;  %v18499_v54 = vld [vmem:[%s16563_s26 + $0xe8] sm:$0x11]  ;;  %v16347_v5 = vld [vmem:[%s16563_s26 + $0xa0] sm:$0xff]  ;;  %v15744_v26 = vld [vmem:[%s21153_s1 + $0x7b0] sm:$0xff]  }
 0x12c   : > { %4480 = vmatmul.mubr.bf16.gmra.mrb[104].mxu1 %v18434_v45  ;;  %v13672_v45 = vadd.f32 %v13671_v42, %v13670_v52  ;;  %v15737_v42 = vld [vmem:[%s21153_s1 + $0x768] sm:$0xff]   ;;  %14164 = vmatprep.subr.bf16.mxu0 %v15733_v37  ;;  %v16346_v52 = vld [vmem:[%s16563_s26 + $0x50] sm:$0xff]  ;;  %v13732_v62 = vpop.f32.mrb[16].mxu1 }
 0x12d   : > { %14205 = vmatpush3.bf16.msra.mxu1 %v15736_v14  ;;  %4487 = vmatprep.mubr.bf16.mxu1 %v18444_v57  ;;  %v13675_v14 = vadd.f32 %v13674_v22, %v13673_v1  ;;  %v15742_v1 = vld [vmem:[%s21153_s1 + $0x7f0] sm:$0xff]   ;;  %v15739_v37 = vld [vmem:[%s21153_s1 + $0x728] sm:$0xff]   ;;  %v12141_v57 = vcombine.high %v16346_v52, %v16347_v5  ;;  %v13733_v4 = vpop.f32.mrb[17].mxu1 }
 0x12e   : > { %14206 = vmatprep.subr.bf16.mxu1 %v15738_v30  ;;  %v18489_v8 = vadd.f32 %v13672_v45, %v13632_v15  ;;  %v18496_v30 = vcombine.high %v18464_v47, %v18472_v56  ;;  %v18504_v45 = vcombine.low %v18419_v0, %v18423_v13  ;;  %v18510_v15 = vld [vmem:[%s16563_s26 + $0x110] sm:$0xff]  ;;  %4415 = vmatmul.mubr.bf16.gmra.mrb[104].mxu0 %v18480_v19  ;;  %v21535_v19 = vrot.slane %v18403_v58, 5  ;;  %v15748_v58 = vld [vmem:[%s21153_s1 + $0x7b8] sm:$0xff]   ;;  %v16352_v0 = vld [vmem:[%s16563_s26 + $0x140] sm:$0xff] }
 0x12f   : > { %v18513_v22 = vadd.f32 %v13675_v14, %v13635_v34  ;;  %v18526_v34 = vld [vmem:[%s16563_s26 + $0x160] sm:$0xff]  ;;  %14165 = vmatpush3.bf16.msra.mxu0 %v15735_v23  ;;  %v21533_v14 = vrot.slane %v18371_v46, 5  ;;  %v21534_v23 = vrot.slane %v18361_v7, 9  ;;  %v13693_v7 = vpop.f32.mrb[17].mxu0  ;;  %v18562_v46 = vcombine.low %v18464_v47, %v18472_v56 }
 0x130   : > { %21531 = vst [vmem:[#allocation124_spill] sm:$0xff] %v18496_v30  ;;  %21532 = vst [vmem:[#allocation125_spill] sm:$0xff] %v18504_v45  ;;  %4422 = vmatprep.mubr.bf16.mxu0 %v18496_v30  ;;  %14166 = vmatprep.subr.bf16.mxu0 %v15737_v42  ;;  %v18555_v42 = vsel %vm17694_vm5, %v21536_v48, %v21535_v19  ;;  %v13694_v48 = vadd.f32 %v13693_v7, %v13692_v35  ;;  %v13695_v19 = vpop.f32.mrb[18].mxu0  ;;  %v16351_v7 = vld [vmem:[%s16563_s26 + $0xf0] sm:$0xff] }
 0x131   : > { %14207 = vmatpush3.bf16.msra.mxu1 %v15740_v17  ;;  %v15741_v17 = vld [vmem:[%s21153_s1 + $0x770] sm:$0xff]   ;;  %v18547_v30 = vsel %vm17694_vm5, %v21534_v23, %v21533_v14  ;;  %21537 = vst [vmem:[#allocation126_spill] sm:$0xff] %v18562_v46  ;;  %v13696_v14 = vpop.f32.mrb[19].mxu0  ;;  %v12140_v23 = vcombine.low %v16346_v52, %v16347_v5  ;;  %v12151_v61 = vcombine.high %v16351_v7, %v16352_v0  ;;  %v15754_v52 = vld [vmem:[%s21153_s1 + $0x880] sm:$0xff]  }
 0x132   : > { %14208 = vmatprep.subr.bf16.mxu1 %v15742_v1  ;;  %v15746_v1 = vld [vmem:[%s21153_s1 + $0x7f8] sm:$0xff]   ;;  %v2067_v13 = vadd.f32 %v13694_v48, %v18077_v24  ;;  %v13697_v35 = vadd.f32 %v13696_v14, %v13695_v19  ;;  %v13734_v5 = vadd.f32 %v13733_v4, %v13732_v62  ;;  %v21538_v48 = vrot.slane %v18499_v54, 5  ;;  %v18607_v54 = vld [vmem:[%s16563_s26 + $0x1b0] sm:$0xff] }
 0x133   : > { %14167 = vmatpush3.bf16.msra.mxu0 %v15739_v37  ;;  %v15747_v37 = vld [vmem:[%s21153_s1 + $0x738] sm:$0xff]   ;;  %v21539_v19 = vrot.slane %v18486_v63, 9  ;;  %v21540_v4 = vrot.slane %v18510_v15, 9 }
 0x134   : > { %4488 = vmatmul.mubr.bf16.gmra.mrb[108].mxu1 %v18504_v45  ;;  %v15743_v45 = vld [vmem:[%s21153_s1 + $0x730] sm:$0xff]   ;;  %14168 = vmatprep.subr.bf16.mxu0 %v15741_v17  ;;  %v2070_v24 = vadd.f32 %v13697_v35, %v18098_v31  ;;  %v13735_v17 = vpop.f32.mrb[18].mxu1  ;;  %v15756_v31 = vld [vmem:[%s21153_s1 + $0x8c8] sm:$0xff]   ;;  %v16354_v35 = vld [vmem:[%s16563_s26 + $0x1d8] sm:$0x11] }
 0x135   : > { %14209 = vmatpush3.bf16.msra.mxu1 %v15744_v26  ;;  %5337 = vmatprep.mubr.bf16.mxu1 %v12141_v57  ;;  %v15745_v26 = vld [vmem:[%s21153_s1 + $0x778] sm:$0xff]   ;;  %v11869_v57 = vcombine.high %v18547_v30, %v18555_v42  ;;  %v18595_v14 = vsel %vm17694_vm5, %v21539_v19, %v21538_v48  ;;  %v18604_v62 = vsel %vm17694_vm5, %v21540_v4, %v3353_v32  ;;  %v3393_v48 = vrot.slane %v16354_v35, 5  ;;  %v16357_v4 = vld [vmem:[%s16563_s26 + $0x250] sm:$0xff] }
 0x136   : > { %14210 = vmatprep.subr.bf16.mxu1 %v15746_v1  ;;  %v15752_v1 = vld [vmem:[%s21153_s1 + $0x8c0] sm:$0xff]   ;;  %4423 = vmatmul.mubr.bf16.gmra.mrb[108].mxu0 %v18562_v46  ;;  %21541 = vst [vmem:[#allocation127_spill] sm:$0xff] %v18604_v62  ;;  %v11868_v32 = vcombine.low %v18547_v30, %v18555_v42  ;;  %v18632_v30 = vcombine.high %v18595_v14, %v18604_v62  ;;  %v16358_v35 = vld [vmem:[%s16563_s26 + $0x190] sm:$0xff] }
 0x137   : > { %14169 = vmatpush3.bf16.msra.mxu0 %v15743_v45  ;;  %4528 = vmatprep.mubr.bf16.mxu0 %v11869_v57  ;;  %v11689_v45 = vrot.slane %v18607_v54, 9  ;;  %v18610_v57 = vadd.f32 %v13734_v5, %v2067_v13  ;;  %v15758_v13 = vld [vmem:[%s21153_s1 + $0x888] sm:$0xff]   ;;  %v18622_v5 = vld [vmem:[%s16563_s26 + $0x200] sm:$0xff] }
 0x138   : > { %14170 = vmatprep.subr.bf16.mxu0 %v15745_v26  ;;  %21542 = vst [vmem:[#allocation128_spill] sm:$0xff] %v18632_v30 }
 0x139   : > { %14211 = vmatpush3.bf16.msra.mxu1 %v15748_v58  ;;  %v15751_v58 = vld [vmem:[%s21153_s1 + $0x840] sm:$0xff]  }
 0x13a   : > { %14276 = vmatprep.subr.bf16.mxu1 %v15752_v1  ;;  %v13736_v1 = vpop.f32.mrb[19].mxu1 }
 0x13b   : > { %v13737_v26 = vadd.f32 %v13736_v1, %v13735_v17  ;;  %14171 = vmatpush3.bf16.msra.mxu0 %v15747_v37  ;;  %v11699_v37 = vrot.slane %v16357_v4, 9  ;;  %v16359_v17 = vld [vmem:[%s16563_s26 + $0x1e0] sm:$0xff]  ;;  %v18668_v4 = vsel %vm17694_vm5, %v11689_v45, %v3393_v48  ;;  %v13738_v48 = vpop.f32.mrb[20].mxu1 }
 0x13c   : > { %5338 = vmatmul.mubr.bf16.vlgmr.msra.gmra.mrb[112].mxu1 %v12140_v23  ;;  %v15753_v23 = vld [vmem:[%s21153_s1 + $0x800] sm:$0xff]   ;;  %14236 = vmatprep.subr.bf16.mxu0 %v15751_v58  ;;  %v12161_v46 = vcombine.high %v16358_v35, %v16359_v17  ;;  %v15761_v58 = vld [vmem:[%s21153_s1 + $0x850] sm:$0xff]   ;;  %21546 = vst [vmem:[#allocation130_spill] sm:$0xff] %v18668_v4 }
 0x13d   : > { %14277 = vmatpush3.bf16.msra.mxu1 %v15754_v52  ;;  %5345 = vmatprep.mubr.bf16.mxu1 %v12151_v61  ;;  %v18625_v19 = vadd.f32 %v13737_v26, %v2070_v24  ;;  %v15755_v61 = vld [vmem:[%s21153_s1 + $0x848] sm:$0xff]   ;;  %v15762_v24 = vld [vmem:[%s21153_s1 + $0x8d0] sm:$0xff]  }
 0x13e   : > { %14278 = vmatprep.subr.bf16.mxu1 %v15756_v31  ;;  %v18635_v52 = vld [vmem:[%s16563_s26 + $0x228] sm:$0x11]  ;;  %v12150_v31 = vcombine.low %v16351_v7, %v16352_v0  ;;  %4529 = vmatmul.mubr.bf16.vlgmr.msra.gmra.mrb[112].mxu0 %v11868_v32  ;;  %v15764_v0 = vld [vmem:[%s21153_s1 + $0x890] sm:$0xff]   ;;  %v13698_v7 = vpop.f32.mrb[20].mxu0  ;;  %v21543_v32 = vrot.slane %v18534_v59, 5  ;;  %v18675_v59 = vcombine.low %v18595_v14, %v18604_v62 }
 0x13f   : > { %v15757_v26 = vld [vmem:[%s21153_s1 + $0x808] sm:$0xff]   ;;  %14237 = vmatpush3.bf16.msra.mxu0 %v15753_v23  ;;  %4536 = vmatprep.mubr.bf16.mxu0 %v18632_v30  ;;  %v16371_v62 = vld [vmem:[%s16563_s26 + $0x1f0] sm:$0xff] }
 0x140   : > { %14238 = vmatprep.subr.bf16.mxu0 %v15755_v61  ;;  %v15763_v61 = vld [vmem:[%s21153_s1 + $0x810] sm:$0xff]   ;;  %21547 = vst [vmem:[#allocation131_spill] sm:$0xff] %v18675_v59 }
 0x141   : > { %14279 = vmatpush3.bf16.msra.mxu1 %v15758_v13  ;;  %v13699_v13 = vpop.f32.mrb[21].mxu0 }
 0x142   : > { %14280 = vmatprep.subr.bf16.mxu1 %v15762_v24  ;;  %v21544_v24 = vrot.slane %v18526_v34, 9  ;;  %v13700_v1 = vadd.f32 %v13699_v13, %v13698_v7  ;;  %v13701_v30 = vpop.f32.mrb[22].mxu0  ;;  %v13739_v13 = vpop.f32.mrb[21].mxu1 }
 0x143   : > { %14239 = vmatpush3.bf16.msra.mxu0 %v15757_v26  ;;  %v15767_v26 = vld [vmem:[%s21153_s1 + $0x818] sm:$0xff]  }
 0x144   : > { %5346 = vmatmul.mubr.bf16.gmra.mrb[116].mxu1 %v12150_v31  ;;  %v18664_v23 = vsel %vm17694_vm5, %v21544_v24, %v21543_v32  ;;  %v13702_v31 = vpop.f32.mrb[23].mxu0  ;;  %v15768_v32 = vld [vmem:[%s21153_s1 + $0x898] sm:$0xff]   ;;  %v2075_v45 = vadd.f32 %v13700_v1, %v18197_v41  ;;  %14240 = vmatprep.subr.bf16.mxu0 %v15761_v58  ;;  %v15772_v24 = vld [vmem:[%s21153_s1 + $0x8e0] sm:$0xff]   ;;  %v13740_v1 = vadd.f32 %v13739_v13, %v13738_v48  ;;  %v21549_v48 = vrot.slane %v18635_v52, 5 }
 0x145   : > { %21545 = vst [vmem:[#allocation129_spill] sm:$0xff] %v18664_v23  ;;  %14281 = vmatpush3.bf16.msra.mxu1 %v15764_v0  ;;  %5353 = vmatprep.mubr.bf16.mxu1 %v12161_v46  ;;  %v13703_v7 = vadd.f32 %v13702_v31, %v13701_v30  ;;  %v15765_v0 = vld [vmem:[%s21153_s1 + $0x858] sm:$0xff]   ;;  %v18686_v46 = vcombine.high %v18664_v23, %v18668_v4  ;;  %v13741_v30 = vpop.f32.mrb[22].mxu1 }
 0x146   : > { %14282 = vmatprep.subr.bf16.mxu1 %v15766_v16  ;;  %v12160_v16 = vcombine.low %v16358_v35, %v16359_v17  ;;  %v13742_v31 = vpop.f32.mrb[23].mxu1  ;;  %4537 = vmatmul.mubr.bf16.gmra.mrb[116].mxu0 %v18675_v59  ;;  %v15774_v17 = vld [vmem:[%s21153_s1 + $0x8a0] sm:$0xff]   ;;  %v18699_v35 = vadd.f32 %v13740_v1, %v2075_v45  ;;  %v21550_v45 = vrot.slane %v18622_v5, 9  ;;  %v18727_v52 = vcombine.low %v18664_v23, %v18668_v4 }
 0x147   : > { %21548 = vst [vmem:[#allocation132_spill] sm:$0xff] %v18686_v46  ;;  %v2078_v41 = vadd.f32 %v13703_v7, %v18258_v60  ;;  %v13743_v58 = vadd.f32 %v13742_v31, %v13741_v30  ;;  %14241 = vmatpush3.bf16.msra.mxu0 %v15763_v61  ;;  %4544 = vmatprep.mubr.bf16.mxu0 %v18686_v46  ;;  %v15771_v60 = vld [vmem:[%s21153_s1 + $0x860] sm:$0xff]   ;;  %v13704_v31 = vpop.f32.mrb[24].mxu0 }
 0x148   : > { %14242 = vmatprep.subr.bf16.mxu0 %v15765_v0  ;;  %v18714_v61 = vsel %vm17694_vm5, %v21550_v45, %v21549_v48  ;;  %v18718_v7 = vsel %vm17694_vm5, %v11699_v37, %v3433_v53  ;;  %v15773_v0 = vld [vmem:[%s21153_s1 + $0x820] sm:$0xff]   ;;  %21553 = vst [vmem:[#allocation135_spill] sm:$0xff] %v18727_v52  ;;  %v13705_v48 = vpop.f32.mrb[25].mxu0 }
 0x149   : > { %14283 = vmatpush3.bf16.msra.mxu1 %v15768_v32  ;;  %v15776_v32 = vld [vmem:[%s21153_s1 + $0x8e8] sm:$0xff]   ;;  %21551 = vst [vmem:[#allocation133_spill] sm:$0xff] %v18714_v61  ;;  %21552 = vst [vmem:[#allocation134_spill] sm:$0xff] %v18718_v7  ;;  %v18720_v13 = vadd.f32 %v13743_v58, %v2078_v41  ;;  %v18734_v53 = vcombine.high %v18714_v61, %v18718_v7  ;;  %v18737_v37 = vld [vmem:[%s16563_s26 + $0x280] sm:$0xff]  ;;  %v13706_v45 = vadd.f32 %v13705_v48, %v13704_v31  ;;  %v13707_v46 = vpop.f32.mrb[26].mxu0 }
 0x14a   : > { %14284 = vmatprep.subr.bf16.mxu1 %v15772_v24  ;;  %v15775_v24 = vld [vmem:[%s21153_s1 + $0x868] sm:$0xff]   ;;  %v16361_v41 = vld [vmem:[%s16563_s26 + $0x230] sm:$0xff] }
 0x14b   : > { %14243 = vmatpush3.bf16.msra.mxu0 %v15767_v26  ;;  %21554 = vst [vmem:[#allocation136_spill] sm:$0xff] %v18734_v53  ;;  %v12171_v1 = vcombine.high %v16361_v41, %v18737_v37  ;;  %v12170_v30 = vcombine.low %v16361_v41, %v18737_v37  ;;  %v15782_v26 = vld [vmem:[%s21153_s1 + $0x8f0] sm:$0xff]   ;;  %v13708_v41 = vpop.f32.mrb[27].mxu0  ;;  %v2083_v59 = vadd.f32 %v13706_v45, %v18347_v25 }
 0x14c   : > { %5354 = vmatmul.mubr.bf16.gmra.mrb[120].mxu1 %v12160_v16  ;;  %v15778_v16 = vld [vmem:[%s21153_s1 + $0x8a8] sm:$0xff]   ;;  %14244 = vmatprep.subr.bf16.mxu0 %v15771_v60  ;;  %v16363_v58 = vld [vmem:[%s16563_s26 + $0xb0] sm:$0xff]  ;;  %v13709_v31 = vadd.f32 %v13708_v41, %v13707_v46 }
 0x14d   : > { %14285 = vmatpush3.bf16.msra.mxu1 %v15774_v17  ;;  %v16362_v17 = vld [vmem:[%s16563_s26 + $0x60] sm:$0xff]  ;;  %v15777_v60 = vld [vmem:[%s21153_s1 + $0x828] sm:$0xff]   ;;  %5361 = vmatprep.mubr.bf16.mxu1 %v12171_v1  ;;  %v13744_v1 = vpop.f32.mrb[24].mxu1 }
 0x14e   : > { %14286 = vmatprep.subr.bf16.mxu1 %v15776_v32  ;;  %v12145_v32 = vcombine.high %v16362_v17, %v16363_v58  ;;  %4545 = vmatmul.mubr.bf16.gmra.mrb[120].mxu0 %v18727_v52  ;;  %v15781_v52 = vld [vmem:[%s21153_s1 + $0x870] sm:$0xff]   ;;  %v13745_v48 = vpop.f32.mrb[25].mxu1  ;;  %v2086_v25 = vadd.f32 %v13709_v31, %v18364_v38  ;;  %v16365_v41 = vld [vmem:[%s16563_s26 + $0xa8] sm:$0xff]  ;;  %v15794_v31 = vld [vmem:[%s21153_s1 + $0x9c0] sm:$0xff]  }
 0x14f   : > { %14245 = vmatpush3.bf16.msra.mxu0 %v15773_v0  ;;  %4552 = vmatprep.mubr.bf16.mxu0 %v18734_v53  ;;  %v15786_v0 = vld [vmem:[%s21153_s1 + $0x8f8] sm:$0xff]   ;;  %v13746_v45 = vadd.f32 %v13745_v48, %v13744_v1  ;;  %v13747_v46 = vpop.f32.mrb[26].mxu1  ;;  %v16367_v48 = vld [vmem:[%s16563_s26 + $0x150] sm:$0xff] }
 0x150   : > { %14246 = vmatprep.subr.bf16.mxu0 %v15775_v24  ;;  %v18767_v24 = vcombine.low %v18714_v61, %v18718_v7  ;;  %v13748_v7 = vpop.f32.mrb[27].mxu1 }
 0x151   : > { %14287 = vmatpush3.bf16.msra.mxu1 %v15778_v16  ;;  %v15784_v16 = vld [vmem:[%s21153_s1 + $0x8b0] sm:$0xff]   ;;  %v18781_v38 = vadd.f32 %v13746_v45, %v2083_v59  ;;  %v13749_v1 = vadd.f32 %v13748_v7, %v13747_v46  ;;  %v15796_v59 = vld [vmem:[%s21153_s1 + $0x980] sm:$0xff]   ;;  %v16368_v45 = vld [vmem:[%s16563_s26 + $0xf8] sm:$0xff] }
 0x152   : > { %14288 = vmatprep.subr.bf16.mxu1 %v15782_v26  ;;  %21555 = vst [vmem:[#allocation137_spill] sm:$0xff] %v18767_v24  ;;  %v15788_v26 = vld [vmem:[%s21153_s1 + $0x8b8] sm:$0xff]   ;;  %v15793_v7 = vld [vmem:[%s21153_s1 + $0x940] sm:$0xff]   ;;  %v16369_v46 = vld [vmem:[%s16563_s26 + $0x148] sm:$0xff] }
 0x153   : > { %14247 = vmatpush3.bf16.msra.mxu0 %v15777_v60  ;;  %v12144_v60 = vcombine.low %v16362_v17, %v16363_v58  ;;  %v18792_v61 = vadd.f32 %v13749_v1, %v2086_v25  ;;  %v15798_v17 = vld [vmem:[%s21153_s1 + $0x9c8] sm:$0xff]  }
 0x154   : > { %5362 = vmatmul.mubr.bf16.gmra.mrb[124].mxu1 %v12170_v30  ;;  %v15783_v30 = vld [vmem:[%s21153_s1 + $0x830] sm:$0xff]   ;;  %14248 = vmatprep.subr.bf16.mxu0 %v15781_v52  ;;  %v16366_v52 = vld [vmem:[%s16563_s26 + $0x100] sm:$0xff]  ;;  %v15800_v25 = vld [vmem:[%s21153_s1 + $0x988] sm:$0xff]  }
 0x155   : > { %5467 = vmatprep.mubr.bf16.mxu1 %v12145_v32  ;;  %14289 = vmatpush3.bf16.msra.mxu1 %v15784_v16  ;;  %v16364_v32 = vld [vmem:[%s16563_s26 + $0x58] sm:$0xff]  ;;  %v12155_v4 = vcombine.high %v16366_v52, %v16367_v48  ;;  %v12154_v1 = vcombine.low %v16366_v52, %v16367_v48  ;;  %v15808_v52 = vld [vmem:[%s21153_s1 + $0x990] sm:$0xff]  }
 0x156   : > { %14290 = vmatprep.subr.bf16.mxu1 %v15786_v0  ;;  %v12143_v53 = vcombine.high %v16364_v32, %v16365_v41  ;;  %v15785_v16 = vld [vmem:[%s21153_s1 + $0x878] sm:$0xff]   ;;  %4553 = vmatmul.mubr.bf16.gmra.mrb[124].mxu0 %v18767_v24  ;;  %v12142_v58 = vcombine.low %v16364_v32, %v16365_v41  ;;  %v15797_v32 = vld [vmem:[%s21153_s1 + $0x948] sm:$0xff]   ;;  %v16370_v24 = vld [vmem:[%s16563_s26 + $0x1a0] sm:$0xff] }
 0x157   : > { %v15787_v0 = vld [vmem:[%s21153_s1 + $0x838] sm:$0xff]   ;;  %14249 = vmatpush3.bf16.msra.mxu0 %v15783_v30  ;;  %v13710_v30 = vpop.f32.mrb[28].mxu0 }
 0x158   : > { %5402 = vmatprep.mubr.bf16.mxu0 %v12143_v53  ;;  %14250 = vmatprep.subr.bf16.mxu0 %v15785_v16  ;;  %v15795_v53 = vld [vmem:[%s21153_s1 + $0x900] sm:$0xff]   ;;  %v13711_v16 = vpop.f32.mrb[29].mxu0 }
 0x159   : > { %14291 = vmatpush3.bf16.msra.mxu1 %v15788_v26  ;;  %v12153_v26 = vcombine.high %v16368_v45, %v16369_v46  ;;  %v13712_v41 = vadd.f32 %v13711_v16, %v13710_v30  ;;  %v12165_v30 = vcombine.high %v16370_v24, %v16371_v62 }
 0x15a   : > { %14356 = vmatprep.subr.bf16.mxu1 %v15794_v31 }
 0x15b   : > { %14251 = vmatpush3.bf16.msra.mxu0 %v15787_v0  ;;  %v15799_v0 = vld [vmem:[%s21153_s1 + $0x908] sm:$0xff]  }
 0x15c   : > { %5468 = vmatmul.mubr.bf16.vlgmr.msra.gmra.mrb[128].mxu1 %v12144_v60  ;;  %14316 = vmatprep.subr.bf16.mxu0 %v15793_v7  ;;  %v15806_v60 = vld [vmem:[%s21153_s1 + $0x9d0] sm:$0xff]   ;;  %v13750_v7 = vpop.f32.mrb[28].mxu1 }
 0x15d   : > { %14357 = vmatpush3.bf16.msra.mxu1 %v15796_v59  ;;  %5475 = vmatprep.mubr.bf16.mxu1 %v12155_v4  ;;  %v13713_v4 = vpop.f32.mrb[30].mxu0  ;;  %v2091_v59 = vadd.f32 %v13712_v41, %v18489_v8  ;;  %v13751_v48 = vpop.f32.mrb[29].mxu1  ;;  %v12152_v41 = vcombine.low %v16368_v45, %v16369_v46  ;;  %v15809_v45 = vld [vmem:[%s21153_s1 + $0x958] sm:$0xff]  }
 0x15e   : > { %14358 = vmatprep.subr.bf16.mxu1 %v15798_v17  ;;  %v13714_v31 = vpop.f32.mrb[31].mxu0  ;;  %5403 = vmatmul.mubr.bf16.vlgmr.msra.gmra.mrb[128].mxu0 %v12142_v58  ;;  %v15805_v58 = vld [vmem:[%s21153_s1 + $0x950] sm:$0xff]   ;;  %v13753_v16 = vpop.f32.mrb[30].mxu1 }
 0x15f   : > { %v13715_v17 = vadd.f32 %v13714_v31, %v13713_v4  ;;  %14317 = vmatpush3.bf16.msra.mxu0 %v15795_v53  ;;  %5410 = vmatprep.mubr.bf16.mxu0 %v12153_v26  ;;  %v15810_v53 = vld [vmem:[%s21153_s1 + $0x9d8] sm:$0xff]   ;;  %v13754_v26 = vpop.f32.mrb[31].mxu1  ;;  %v16373_v31 = vld [vmem:[%s16563_s26 + $0x1e8] sm:$0xff] }
 0x160   : > { %14318 = vmatprep.subr.bf16.mxu0 %v15797_v32  ;;  %v15807_v32 = vld [vmem:[%s21153_s1 + $0x910] sm:$0xff]  }
 0x161   : > { %14359 = vmatpush3.bf16.msra.mxu1 %v15800_v25  ;;  %v2094_v8 = vadd.f32 %v13715_v17, %v18513_v22  ;;  %v13752_v25 = vadd.f32 %v13751_v48, %v13750_v7  ;;  %v15812_v22 = vld [vmem:[%s21153_s1 + $0x998] sm:$0xff]   ;;  %v5639_v17 = vshrl.u32 %v18737_v37, 16  ;;  %v15820_v48 = vld [vmem:[%s21153_s1 + $0x9a0] sm:$0xff]  }
 0x162   : > { %14360 = vmatprep.subr.bf16.mxu1 %v15806_v60  ;;  %v13755_v60 = vadd.f32 %v13754_v26, %v13753_v16  ;;  %v15822_v16 = vld [vmem:[%s21153_s1 + $0x9e8] sm:$0xff]   ;;  %v15819_v26 = vld [vmem:[%s21153_s1 + $0x920] sm:$0xff]  }
 0x163   : > { %v18836_v4 = vadd.f32 %v13752_v25, %v2091_v59  ;;  %14319 = vmatpush3.bf16.msra.mxu0 %v15799_v0  ;;  %v12164_v59 = vcombine.low %v16370_v24, %v16371_v62  ;;  %v15818_v0 = vld [vmem:[%s21153_s1 + $0x9e0] sm:$0xff]  }
 0x164   : > { %5476 = vmatmul.mubr.bf16.gmra.mrb[132].mxu1 %v12154_v1  ;;  %v16372_v1 = vld [vmem:[%s16563_s26 + $0x198] sm:$0xff]  ;;  %14320 = vmatprep.subr.bf16.mxu0 %v15805_v58  ;;  %v18846_v46 = vadd.f32 %v13755_v60, %v2094_v8  ;;  %v15817_v24 = vld [vmem:[%s21153_s1 + $0x960] sm:$0xff]   ;;  %v13772_v58 = vpop.f32.mrb[32].mxu0  ;;  %v15824_v60 = vld [vmem:[%s21153_s1 + $0x9a8] sm:$0xff]  }
 0x165   : > { %14361 = vmatpush3.bf16.msra.mxu1 %v15808_v52  ;;  %5483 = vmatprep.mubr.bf16.mxu1 %v12165_v30  ;;  %v12163_v7 = vcombine.high %v16372_v1, %v16373_v31  ;;  %v15811_v30 = vld [vmem:[%s21153_s1 + $0x918] sm:$0xff]   ;;  %v13812_v52 = vpop.f32.mrb[32].mxu1  ;;  %v13773_v25 = vpop.f32.mrb[33].mxu0 }
 0x166   : > { %14362 = vmatprep.subr.bf16.mxu1 %v15810_v53  ;;  %5411 = vmatmul.mubr.bf16.gmra.mrb[132].mxu0 %v12152_v41  ;;  %v13813_v62 = vpop.f32.mrb[33].mxu1  ;;  %v12162_v53 = vcombine.low %v16372_v1, %v16373_v31  ;;  %v13774_v41 = vadd.f32 %v13773_v25, %v13772_v58  ;;  %v18874_v1 = vld [vmem:[%s16563_s26 + $0x290] sm:$0xff] }
 0x167   : > { %14321 = vmatpush3.bf16.msra.mxu0 %v15807_v32  ;;  %5418 = vmatprep.mubr.bf16.mxu0 %v12163_v7  ;;  %v13814_v8 = vadd.f32 %v13813_v62, %v13812_v52  ;;  %v13775_v32 = vpop.f32.mrb[34].mxu0  ;;  %v13815_v7 = vpop.f32.mrb[34].mxu1  ;;  %v16374_v52 = vld [vmem:[%s16563_s26 + $0x238] sm:$0xff]  ;;  %v16375_v62 = vld [vmem:[%s16563_s26 + $0x240] sm:$0xff] }
 0x168   : > { %14322 = vmatprep.subr.bf16.mxu0 %v15809_v45  ;;  %v18871_v45 = vld [vmem:[%s16563_s26 + $0x288] sm:$0xff]  ;;  %v12175_v58 = vcombine.high %v16375_v62, %v18874_v1  ;;  %v13816_v25 = vpop.f32.mrb[35].mxu1  ;;  %v12174_v23 = vcombine.low %v16375_v62, %v18874_v1 }
 0x169   : > { %14363 = vmatpush3.bf16.msra.mxu1 %v15812_v22  ;;  %v13776_v22 = vpop.f32.mrb[35].mxu0  ;;  %v13818_v31 = vpop.f32.mrb[36].mxu1 }
 0x16a   : > { %14364 = vmatprep.subr.bf16.mxu1 %v15818_v0  ;;  %v15821_v0 = vld [vmem:[%s21153_s1 + $0x968] sm:$0xff]  }
 0x16b   : > { %14323 = vmatpush3.bf16.msra.mxu0 %v15811_v30  ;;  %v13777_v30 = vadd.f32 %v13776_v22, %v13775_v32 }
 0x16c   : > { %5484 = vmatmul.mubr.bf16.gmra.mrb[136].mxu1 %v12164_v59  ;;  %14324 = vmatprep.subr.bf16.mxu0 %v15817_v24  ;;  %v2197_v59 = vadd.f32 %v13774_v41, %v18610_v57  ;;  %v15830_v24 = vld [vmem:[%s21153_s1 + $0x9f0] sm:$0xff]   ;;  %v18889_v57 = vrot.slane %v5639_v17, 4  ;;  %v15823_v41 = vld [vmem:[%s21153_s1 + $0x928] sm:$0xff]  }
 0x16d   : > { %14365 = vmatpush3.bf16.msra.mxu1 %v15820_v48  ;;  %v12173_v48 = vcombine.high %v16374_v52, %v18871_v45  ;;  %v2200_v32 = vadd.f32 %v13777_v30, %v18625_v19  ;;  %v15832_v17 = vld [vmem:[%s21153_s1 + $0x9b0] sm:$0xff]   ;;  %5491 = vmatprep.mubr.bf16.mxu1 %v12175_v58  ;;  %v5653_v30 = vshrl.u32 %v18871_v45, 16  ;;  %v16376_v58 = vld [vmem:[%s16563_s26 + $0x68] sm:$0xff] }
 0x16e   : > { %14366 = vmatprep.subr.bf16.mxu1 %v15822_v16  ;;  %v13817_v16 = vadd.f32 %v13816_v25, %v13815_v7  ;;  %5419 = vmatmul.mubr.bf16.gmra.mrb[136].mxu0 %v12162_v53  ;;  %v18895_v22 = vadd.f32 %v13814_v8, %v2197_v59  ;;  %v12149_v7 = vcombine.high %v18395_v44, %v18486_v63  ;;  %v13819_v53 = vpop.f32.mrb[37].mxu1  ;;  %v15829_v19 = vld [vmem:[%s21153_s1 + $0x970] sm:$0xff]   ;;  %v15834_v44 = vld [vmem:[%s21153_s1 + $0x9f8] sm:$0xff]  }
 0x16f   : > { %14325 = vmatpush3.bf16.msra.mxu0 %v15819_v26  ;;  %5426 = vmatprep.mubr.bf16.mxu0 %v12173_v48  ;;  %v13820_v8 = vadd.f32 %v13819_v53, %v13818_v31  ;;  %v12172_v59 = vcombine.low %v16374_v52, %v18871_v45  ;;  %v15836_v48 = vld [vmem:[%s21153_s1 + $0x9b8] sm:$0xff]   ;;  %v15842_v53 = vld [vmem:[%s21153_s1 + $0xac0] sm:$0xff]  }
 0x170   : > { %14326 = vmatprep.subr.bf16.mxu0 %v15821_v0  ;;  %v18902_v62 = vadd.f32 %v13817_v16, %v2200_v32  ;;  %v15831_v0 = vld [vmem:[%s21153_s1 + $0x930] sm:$0xff]   ;;  %v16377_v25 = vld [vmem:[%s16563_s26 + $0xb8] sm:$0xff] }
 0x171   : > { %14367 = vmatpush3.bf16.msra.mxu1 %v15824_v60  ;;  %v13821_v60 = vpop.f32.mrb[38].mxu1  ;;  %v12147_v52 = vcombine.high %v16376_v58, %v16377_v25 }
 0x172   : > { %14368 = vmatprep.subr.bf16.mxu1 %v15830_v24  ;;  %v13822_v26 = vpop.f32.mrb[39].mxu1  ;;  %v15833_v24 = vld [vmem:[%s21153_s1 + $0x978] sm:$0xff]  }
 0x173   : > { %v13823_v31 = vadd.f32 %v13822_v26, %v13821_v60  ;;  %14327 = vmatpush3.bf16.msra.mxu0 %v15823_v41  ;;  %v15835_v60 = vld [vmem:[%s21153_s1 + $0x938] sm:$0xff]  }
 0x174   : > { %5492 = vmatmul.mubr.bf16.gmra.mrb[140].mxu1 %v12174_v23  ;;  %v13778_v23 = vpop.f32.mrb[36].mxu0  ;;  %14328 = vmatprep.subr.bf16.mxu0 %v15829_v19 }
 0x175   : > { %14369 = vmatpush3.bf16.msra.mxu1 %v15832_v17  ;;  %5597 = vmatprep.mubr.bf16.mxu1 %v12149_v7  ;;  %v13779_v16 = vpop.f32.mrb[37].mxu0  ;;  %v16378_v17 = vld [vmem:[%s16563_s26 + $0x70] sm:$0xff] }
 0x176   : > { %14370 = vmatprep.subr.bf16.mxu1 %v15834_v44  ;;  %v13780_v32 = vadd.f32 %v13779_v16, %v13778_v23  ;;  %v13781_v7 = vpop.f32.mrb[38].mxu0  ;;  %v12148_v41 = vcombine.low %v16378_v17, %v18486_v63  ;;  %5427 = vmatmul.mubr.bf16.gmra.mrb[140].mxu0 %v12172_v59  ;;  %v12159_v44 = vcombine.high %v18510_v15, %v18526_v34  ;;  %v15844_v63 = vld [vmem:[%s21153_s1 + $0xa80] sm:$0xff]   ;;  %v13824_v16 = vpop.f32.mrb[40].mxu1  ;;  %v16379_v17 = vld [vmem:[%s16563_s26 + $0x108] sm:$0xff] }
 0x177   : > { %v13782_v19 = vpop.f32.mrb[39].mxu0  ;;  %14329 = vmatpush3.bf16.msra.mxu0 %v15831_v0  ;;  %5532 = vmatprep.mubr.bf16.mxu0 %v12147_v52  ;;  %v15841_v59 = vld [vmem:[%s21153_s1 + $0xa40] sm:$0xff]  }
 0x178   : > { %v2205_v26 = vadd.f32 %v13780_v32, %v18699_v35  ;;  %v13783_v23 = vadd.f32 %v13782_v19, %v13781_v7  ;;  %14330 = vmatprep.subr.bf16.mxu0 %v15833_v24  ;;  %v15846_v35 = vld [vmem:[%s21153_s1 + $0xac8] sm:$0xff]   ;;  %v12146_v24 = vcombine.low %v16376_v58, %v16377_v25  ;;  %v15843_v32 = vld [vmem:[%s21153_s1 + $0xa00] sm:$0xff]  }
 0x179   : > { %14371 = vmatpush3.bf16.msra.mxu1 %v15836_v48  ;;  %v13825_v48 = vpop.f32.mrb[41].mxu1  ;;  %v15848_v7 = vld [vmem:[%s21153_s1 + $0xa88] sm:$0xff]  }
 0x17a   : > { %14436 = vmatprep.subr.bf16.mxu1 %v15842_v53  ;;  %v2208_v15 = vadd.f32 %v13783_v23, %v18720_v13  ;;  %v18941_v34 = vadd.f32 %v13820_v8, %v2205_v26  ;;  %v13826_v0 = vadd.f32 %v13825_v48, %v13824_v16  ;;  %v13827_v52 = vpop.f32.mrb[42].mxu1  ;;  %v21556_v53 = vshll.u32 %v18737_v37, 16  ;;  %v16381_v26 = vld [vmem:[%s16563_s26 + $0x110] sm:$0xff]  ;;  %v16382_v23 = vld [vmem:[%s16563_s26 + $0x160] sm:$0xff] }
 0x17b   : > { %v13828_v13 = vpop.f32.mrb[43].mxu1  ;;  %14331 = vmatpush3.bf16.msra.mxu0 %v15835_v60  ;;  %v15847_v60 = vld [vmem:[%s21153_s1 + $0xa08] sm:$0xff]   ;;  %v15854_v16 = vld [vmem:[%s21153_s1 + $0xad0] sm:$0xff]   ;;  %v5655_v37 = vrot.slane %v5653_v30, 4 }
 0x17c   : > { %5598 = vmatmul.mubr.bf16.vlgmr.msra.gmra.mrb[144].mxu1 %v12148_v41  ;;  %v18949_v8 = vadd.f32 %v13823_v31, %v2208_v15  ;;  %v16380_v41 = vld [vmem:[%s16563_s26 + $0x158] sm:$0xff]  ;;  %v13829_v25 = vadd.f32 %v13828_v13, %v13827_v52  ;;  %v5644_v19 = vrot.slane %v21556_v53, 5  ;;  %14396 = vmatprep.subr.bf16.mxu0 %v15841_v59  ;;  %v5656_v31 = vshll.u32 %v18871_v45, 16  ;;  %v13784_v59 = vpop.f32.mrb[40].mxu0  ;;  %v15853_v48 = vld [vmem:[%s21153_s1 + $0xa50] sm:$0xff]  }
 0x17d   : > { %14437 = vmatpush3.bf16.msra.mxu1 %v15844_v63  ;;  %5605 = vmatprep.mubr.bf16.mxu1 %v12159_v44  ;;  %v12157_v58 = vcombine.high %v16379_v17, %v16380_v41  ;;  %v15845_v44 = vld [vmem:[%s21153_s1 + $0xa48] sm:$0xff]   ;;  %v12158_v63 = vcombine.low %v16381_v26, %v16382_v23  ;;  %v12169_v45 = vcombine.high %v18607_v54, %v18622_v5  ;;  %v13785_v15 = vpop.f32.mrb[41].mxu0  ;;  %v15855_v26 = vld [vmem:[%s21153_s1 + $0xa10] sm:$0xff]  }
 0x17e   : > { %14438 = vmatprep.subr.bf16.mxu1 %v15846_v35  ;;  %5533 = vmatmul.mubr.bf16.vlgmr.msra.gmra.mrb[144].mxu0 %v12146_v24  ;;  %v15856_v35 = vld [vmem:[%s21153_s1 + $0xa90] sm:$0xff]   ;;  %v13786_v52 = vadd.f32 %v13785_v15, %v13784_v59  ;;  %v13787_v30 = vpop.f32.mrb[42].mxu0  ;;  %v5658_v24 = vrot.slane %v5656_v31, 5  ;;  %v5645_v31 = vor.u32 %v5644_v19, %v18889_v57  ;;  %v16383_v23 = vld [vmem:[%s16563_s26 + $0x1a8] sm:$0xff] }
 0x17f   : > { %14397 = vmatpush3.bf16.msra.mxu0 %v15843_v32  ;;  %5540 = vmatprep.mubr.bf16.mxu0 %v12157_v58  ;;  %v13788_v13 = vpop.f32.mrb[43].mxu0  ;;  %v15858_v32 = vld [vmem:[%s21153_s1 + $0xad8] sm:$0xff]  }
 0x180   : > { %14398 = vmatprep.subr.bf16.mxu0 %v15845_v44  ;;  %v2213_v58 = vadd.f32 %v13786_v52, %v18781_v38  ;;  %v13789_v53 = vadd.f32 %v13788_v13, %v13787_v30  ;;  %v13830_v44 = vpop.f32.mrb[44].mxu1  ;;  %v15866_v52 = vld [vmem:[%s21153_s1 + $0xae0] sm:$0xff]  }
 0x181   : > { %14439 = vmatpush3.bf16.msra.mxu1 %v15848_v7  ;;  %v12156_v7 = vcombine.low %v16379_v17, %v16380_v41  ;;  %v15860_v17 = vld [vmem:[%s21153_s1 + $0xa98] sm:$0xff]   ;;  %v13831_v41 = vpop.f32.mrb[45].mxu1  ;;  %v15867_v13 = vld [vmem:[%s21153_s1 + $0xa20] sm:$0xff]  }
 0x182   : > { %14440 = vmatprep.subr.bf16.mxu1 %v15854_v16  ;;  %v2216_v16 = vadd.f32 %v13789_v53, %v18792_v61  ;;  %v18992_v59 = vadd.f32 %v13826_v0, %v2213_v58  ;;  %v13832_v57 = vadd.f32 %v13831_v41, %v13830_v44  ;;  %v13833_v19 = vpop.f32.mrb[46].mxu1  ;;  %v15859_v61 = vld [vmem:[%s21153_s1 + $0xa18] sm:$0xff]   ;;  %v15872_v41 = vld [vmem:[%s21153_s1 + $0xaa8] sm:$0xff]  }
 0x183   : > { %14399 = vmatpush3.bf16.msra.mxu0 %v15847_v60  ;;  %v5659_v60 = vor.u32 %v5658_v24, %v5655_v37  ;;  %v13834_v15 = vpop.f32.mrb[47].mxu1  ;;  %v13790_v24 = vpop.f32.mrb[44].mxu0 }
 0x184   : > { %5606 = vmatmul.mubr.bf16.gmra.mrb[148].mxu1 %v12158_v63  ;;  %v16384_v63 = vld [vmem:[%s16563_s26 + $0x1f8] sm:$0xff]  ;;  %14400 = vmatprep.subr.bf16.mxu0 %v15853_v48  ;;  %v19002_v30 = vadd.f32 %v13829_v25, %v2216_v16  ;;  %v13835_v0 = vadd.f32 %v13834_v15, %v13833_v19  ;;  %v19007_v48 = vrot.slane %v5645_v31, 4  ;;  %v15865_v25 = vld [vmem:[%s21153_s1 + $0xa60] sm:$0xff]   ;;  %v13892_v53 = vpop.f32.mrb[48].mxu1  ;;  %v15869_v31 = vld [vmem:[%s21153_s1 + $0xa68] sm:$0xff]   ;;  %v5670_v16 = vshll.u32 %v18874_v1, 16 }
 0x185   : > { %14441 = vmatpush3.bf16.msra.mxu1 %v15856_v35  ;;  %5613 = vmatprep.mubr.bf16.mxu1 %v12169_v45  ;;  %v12167_v38 = vcombine.high %v16383_v23, %v16384_v63  ;;  %v15857_v45 = vld [vmem:[%s21153_s1 + $0xa58] sm:$0xff]   ;;  %v12168_v35 = vcombine.low %v18607_v54, %v18622_v5  ;;  %v15868_v54 = vld [vmem:[%s21153_s1 + $0xaa0] sm:$0xff]   ;;  %v5667_v5 = vshrl.u32 %v18874_v1, 16  ;;  %v19016_v37 = vrot.slane %v5659_v60, 4  ;;  %v15871_v60 = vld [vmem:[%s21153_s1 + $0xa28] sm:$0xff]  }
 0x186   : > { %14442 = vmatprep.subr.bf16.mxu1 %v15858_v32  ;;  %5541 = vmatmul.mubr.bf16.gmra.mrb[148].mxu0 %v12156_v7  ;;  %v15870_v7 = vld [vmem:[%s21153_s1 + $0xae8] sm:$0xff]   ;;  %v13791_v32 = vpop.f32.mrb[45].mxu0  ;;  %v12166_v58 = vcombine.low %v16383_v23, %v16384_v63  ;;  %v19031_v23 = vld [vmem:[%s16563_s26 + $0x298] sm:$0xff]  ;;  %v362_v63 = vld [vmem:[%s16563_s26 + $0x2a0] sm:$0xff]  ;;  %v12423_v1 = vcombine.high %v16618_v36, %v16650_v6 }
 0x187   : > { %14401 = vmatpush3.bf16.msra.mxu0 %v15855_v26  ;;  %5548 = vmatprep.mubr.bf16.mxu0 %v12167_v38  ;;  %v13792_v26 = vadd.f32 %v13791_v32, %v13790_v24  ;;  %v13793_v44 = vpop.f32.mrb[46].mxu0  ;;  %v13893_v38 = vpop.f32.mrb[49].mxu1 }
 0x188   : > { %14402 = vmatprep.subr.bf16.mxu0 %v15857_v45  ;;  %v13894_v15 = vadd.f32 %v13893_v38, %v13892_v53 }
 0x189   : > { %14443 = vmatpush3.bf16.msra.mxu1 %v15860_v17  ;;  %v13794_v17 = vpop.f32.mrb[47].mxu0  ;;  %v2221_v45 = vadd.f32 %v13792_v26, %v18836_v4  ;;  %v15878_v4 = vld [vmem:[%s21153_s1 + $0xaf0] sm:$0xff]  }
 0x18a   : > { %14444 = vmatprep.subr.bf16.mxu1 %v15866_v52  ;;  %v13795_v19 = vadd.f32 %v13794_v17, %v13793_v44  ;;  %v16385_v52 = vld [vmem:[%s16563_s26 + $0x248] sm:$0xff]  ;;  %v5669_v44 = vrot.slane %v5667_v5, 4  ;;  %v15880_v17 = vld [vmem:[%s21153_s1 + $0xab0] sm:$0xff]  }
 0x18b   : > { %14403 = vmatpush3.bf16.msra.mxu0 %v15859_v61  ;;  %v12177_v61 = vcombine.high %v16385_v52, %v19031_v23  ;;  %v19048_v53 = vadd.f32 %v13832_v57, %v2221_v45  ;;  %v15879_v57 = vld [vmem:[%s21153_s1 + $0xa30] sm:$0xff]   ;;  %v12176_v5 = vcombine.low %v16385_v52, %v19031_v23 }
 0x18c   : > { %5614 = vmatmul.mubr.bf16.gmra.mrb[152].mxu1 %v12168_v35  ;;  %14404 = vmatprep.subr.bf16.mxu0 %v15865_v25  ;;  %v13895_v35 = vpop.f32.mrb[50].mxu1  ;;  %v2224_v32 = vadd.f32 %v13795_v19, %v18846_v46  ;;  %v13852_v46 = vpop.f32.mrb[48].mxu0 }
 0x18d   : > { %14445 = vmatpush3.bf16.msra.mxu1 %v15868_v54  ;;  %v16386_v54 = vld [vmem:[%s16563_s26 + $0x250] sm:$0xff]  ;;  %v13896_v24 = vpop.f32.mrb[51].mxu1 }
 0x18e   : > { %14446 = vmatprep.subr.bf16.mxu1 %v15870_v7  ;;  %5549 = vmatmul.mubr.bf16.gmra.mrb[152].mxu0 %v12166_v58  ;;  %v12179_v25 = vcombine.high %v16386_v54, %v362_v63  ;;  %v12178_v7 = vcombine.low %v16386_v54, %v362_v63  ;;  %v13897_v26 = vadd.f32 %v13896_v24, %v13895_v35  ;;  %v15877_v58 = vld [vmem:[%s21153_s1 + $0xa70] sm:$0xff]   ;;  %v13853_v63 = vpop.f32.mrb[49].mxu0  ;;  %v13898_v45 = vpop.f32.mrb[52].mxu1  ;;  %v15881_v35 = vld [vmem:[%s21153_s1 + $0xa78] sm:$0xff]  }
 0x18f   : > { %14405 = vmatpush3.bf16.msra.mxu0 %v15867_v13  ;;  %5556 = vmatprep.mubr.bf16.mxu0 %v12177_v61  ;;  %v19056_v38 = vadd.f32 %v13835_v0, %v2224_v32  ;;  %v5681_v13 = vshrl.u32 %v19031_v23, 16  ;;  %v13854_v0 = vadd.f32 %v13853_v63, %v13852_v46  ;;  %v21557_v61 = vld [vmem:[#allocation3_spill] sm:$0xff]  ;;  %v15884_v24 = vld [vmem:[%s21153_s1 + $0xab8] sm:$0xff]   ;;  %v15886_v63 = vld [vmem:[%s21153_s1 + $0xbc0] sm:$0xff]  }
 0x190   : > { %14406 = vmatprep.subr.bf16.mxu0 %v15869_v31  ;;  %5621 = vmatprep.mubr.bf16.mxu1 %v12179_v25  ;;  %v15882_v31 = vld [vmem:[%s21153_s1 + $0xaf8] sm:$0xff]   ;;  %v12421_v52 = vcombine.high %v21557_v61, %v16643_v3 }
 0x191   : > { %14447 = vmatpush3.bf16.msra.mxu1 %v15872_v41  ;;  %v5672_v41 = vrot.slane %v5670_v16, 5  ;;  %v13855_v16 = vpop.f32.mrb[50].mxu0  ;;  %v3007_v54 = vadd.f32 %v13854_v0, %v18895_v22  ;;  %v15888_v0 = vld [vmem:[%s21153_s1 + $0xb80] sm:$0xff]  }
 0x192   : > { %14448 = vmatprep.subr.bf16.mxu1 %v15878_v4  ;;  %v13856_v19 = vpop.f32.mrb[51].mxu0  ;;  %v15883_v4 = vld [vmem:[%s21153_s1 + $0xa38] sm:$0xff]  }
 0x193   : > { %14407 = vmatpush3.bf16.msra.mxu0 %v15871_v60  ;;  %v13857_v25 = vadd.f32 %v13856_v19, %v13855_v16  ;;  %v12422_v60 = vcombine.low %v16618_v36, %v16650_v6  ;;  %v19081_v22 = vadd.f32 %v13894_v15, %v3007_v54  ;;  %v15885_v6 = vld [vmem:[%s21153_s1 + $0xb40] sm:$0xff]   ;;  %v12420_v16 = vcombine.low %v21557_v61, %v16643_v3  ;;  %v15890_v54 = vld [vmem:[%s21153_s1 + $0xbc8] sm:$0xff]  }
 0x194   : > { %5622 = vmatmul.mubr.bf16.gmra.mrb[156].mxu1 %v12178_v7  ;;  %14408 = vmatprep.subr.bf16.mxu0 %v15877_v58  ;;  %v13899_v7 = vpop.f32.mrb[53].mxu1  ;;  %v5673_v58 = vor.u32 %v5672_v41, %v5669_v44  ;;  %v21559_v44 = vld [vmem:[#allocation6_spill] sm:$0xff]  ;;  %v15892_v3 = vld [vmem:[%s21153_s1 + $0xb88] sm:$0xff]  }
 0x195   : > { %14449 = vmatpush3.bf16.msra.mxu1 %v15880_v17  ;;  %6536 = vmatprep.mubr.bf16.mxu1 %v12423_v1  ;;  %v13900_v1 = vadd.f32 %v13899_v7, %v13898_v45  ;;  %v13901_v32 = vpop.f32.mrb[54].mxu1  ;;  %v3010_v17 = vadd.f32 %v13857_v25, %v18902_v62  ;;  %v21560_v61 = vld [vmem:[#allocation10_spill] sm:$0xff]  ;;  %v21561_v7 = vld [vmem:[#allocation4_spill] sm:$0xff] }
 0x196   : > { %14450 = vmatprep.subr.bf16.mxu1 %v15882_v31  ;;  %5557 = vmatmul.mubr.bf16.gmra.mrb[156].mxu0 %v12176_v5  ;;  %v13902_v46 = vpop.f32.mrb[55].mxu1  ;;  %v21558_v5 = vld [vmem:[#allocation14_spill] sm:$0xff]  ;;  %v19102_v19 = vrot.slane %v5673_v58, 4  ;;  %v15891_v58 = vld [vmem:[%s21153_s1 + $0xb08] sm:$0xff]  }
 0x197   : > { %14409 = vmatpush3.bf16.msra.mxu0 %v15879_v57  ;;  %6471 = vmatprep.mubr.bf16.mxu0 %v12421_v52  ;;  %v13903_v36 = vadd.f32 %v13902_v46, %v13901_v32  ;;  %v12433_v41 = vcombine.high %v21559_v44, %v21558_v5  ;;  %v19092_v15 = vadd.f32 %v13897_v26, %v3010_v17  ;;  %v13858_v57 = vpop.f32.mrb[52].mxu0  ;;  %v15887_v31 = vld [vmem:[%s21153_s1 + $0xb00] sm:$0xff]   ;;  %v15889_v52 = vld [vmem:[%s21153_s1 + $0xb48] sm:$0xff]   ;;  %v13904_v25 = vpop.f32.mrb[56].mxu1 }
 0x198   : > { %14410 = vmatprep.subr.bf16.mxu0 %v15881_v35  ;;  %v13859_v45 = vpop.f32.mrb[53].mxu0  ;;  %v13905_v17 = vpop.f32.mrb[57].mxu1 }
 0x199   : > { %14451 = vmatpush3.bf16.msra.mxu1 %v15884_v24  ;;  %v13860_v35 = vadd.f32 %v13859_v45, %v13858_v57  ;;  %v13861_v26 = vpop.f32.mrb[54].mxu0  ;;  %v13906_v46 = vadd.f32 %v13905_v17, %v13904_v25  ;;  %v15894_v57 = vld [vmem:[%s21153_s1 + $0xbd0] sm:$0xff]  }
 0x19a   : > { %14516 = vmatprep.subr.bf16.mxu1 %v15886_v63  ;;  %v13862_v24 = vpop.f32.mrb[55].mxu0  ;;  %v13907_v63 = vpop.f32.mrb[58].mxu1 }
 0x19b   : > { %14411 = vmatpush3.bf16.msra.mxu0 %v15883_v4  ;;  %v3015_v4 = vadd.f32 %v13860_v35, %v18941_v34  ;;  %v13863_v32 = vadd.f32 %v13862_v24, %v13861_v26  ;;  %v21562_v35 = vld [vmem:[#allocation22_spill] sm:$0xff] }
 0x19c   : > { %6537 = vmatmul.mubr.bf16.vlgmr.msra.gmra.mrb[160].mxu1 %v12422_v60  ;;  %14476 = vmatprep.subr.bf16.mxu0 %v15885_v6  ;;  %v12431_v60 = vcombine.high %v21561_v7, %v21560_v61  ;;  %v12432_v6 = vcombine.low %v21559_v44, %v21558_v5  ;;  %v21563_v5 = vld [vmem:[#allocation15_spill] sm:$0xff] }
 0x19d   : > { %14517 = vmatpush3.bf16.msra.mxu1 %v15888_v0  ;;  %6544 = vmatprep.mubr.bf16.mxu1 %v12433_v41  ;;  %v3018_v41 = vadd.f32 %v13863_v32, %v18949_v8  ;;  %v19125_v34 = vadd.f32 %v13900_v1, %v3015_v4  ;;  %v13908_v0 = vpop.f32.mrb[59].mxu1  ;;  %v12443_v44 = vcombine.high %v21563_v5, %v21562_v35  ;;  %v15896_v8 = vld [vmem:[%s21153_s1 + $0xb90] sm:$0xff]   ;;  %v21565_v32 = vld [vmem:[#allocation11_spill] sm:$0xff] }
 0x19e   : > { %14518 = vmatprep.subr.bf16.mxu1 %v15890_v54  ;;  %6472 = vmatmul.mubr.bf16.vlgmr.msra.gmra.mrb[160].mxu0 %v12420_v16  ;;  %v15893_v16 = vld [vmem:[%s21153_s1 + $0xb50] sm:$0xff]   ;;  %v13909_v45 = vadd.f32 %v13908_v0, %v13907_v63  ;;  %v13864_v54 = vpop.f32.mrb[56].mxu0 }
 0x19f   : > { %14477 = vmatpush3.bf16.msra.mxu0 %v15887_v31  ;;  %6479 = vmatprep.mubr.bf16.mxu0 %v12431_v60  ;;  %v19132_v26 = vadd.f32 %v13903_v36, %v3018_v41  ;;  %v13865_v1 = vpop.f32.mrb[57].mxu0  ;;  %v12430_v31 = vcombine.low %v21561_v7, %v21560_v61  ;;  %v15897_v36 = vld [vmem:[%s21153_s1 + $0xb58] sm:$0xff]   ;;  %v13910_v60 = vpop.f32.mrb[60].mxu1  ;;  %v21564_v7 = vld [vmem:[#allocation18_spill] sm:$0xff] }
 0x1a0   : > { %14478 = vmatprep.subr.bf16.mxu0 %v15889_v52  ;;  %v15895_v52 = vld [vmem:[%s21153_s1 + $0xb10] sm:$0xff]   ;;  %v13866_v25 = vadd.f32 %v13865_v1, %v13864_v54  ;;  %v13867_v24 = vpop.f32.mrb[58].mxu0  ;;  %v15900_v61 = vld [vmem:[%s21153_s1 + $0xb98] sm:$0xff]   ;;  %v12441_v17 = vcombine.high %v21565_v32, %v21564_v7  ;;  %v15902_v54 = vld [vmem:[%s21153_s1 + $0xbe0] sm:$0xff]  }
 0x1a1   : > { %14519 = vmatpush3.bf16.msra.mxu1 %v15892_v3  ;;  %v15898_v3 = vld [vmem:[%s21153_s1 + $0xbd8] sm:$0xff]   ;;  %v13868_v4 = vpop.f32.mrb[59].mxu0  ;;  %v15901_v1 = vld [vmem:[%s21153_s1 + $0xb60] sm:$0xff]  }
 0x1a2   : > { %14520 = vmatprep.subr.bf16.mxu1 %v15894_v57  ;;  %v13869_v63 = vadd.f32 %v13868_v4, %v13867_v24  ;;  %v13911_v57 = vpop.f32.mrb[61].mxu1 }
 0x1a3   : > { %14479 = vmatpush3.bf16.msra.mxu0 %v15891_v58  ;;  %v3023_v58 = vadd.f32 %v13866_v25, %v18992_v59  ;;  %v13912_v41 = vadd.f32 %v13911_v57, %v13910_v60  ;;  %v13913_v0 = vpop.f32.mrb[62].mxu1 }
 0x1a4   : > { %6545 = vmatmul.mubr.bf16.gmra.mrb[164].mxu1 %v12432_v6  ;;  %14480 = vmatprep.subr.bf16.mxu0 %v15893_v16  ;;  %v15899_v6 = vld [vmem:[%s21153_s1 + $0xb18] sm:$0xff]   ;;  %v12442_v16 = vcombine.low %v21563_v5, %v21562_v35  ;;  %v13870_v35 = vpop.f32.mrb[60].mxu0  ;;  %v12440_v5 = vcombine.low %v21565_v32, %v21564_v7 }
 0x1a5   : > { %14521 = vmatpush3.bf16.msra.mxu1 %v15896_v8  ;;  %6552 = vmatprep.mubr.bf16.mxu1 %v12443_v44  ;;  %v3026_v44 = vadd.f32 %v13869_v63, %v19002_v30  ;;  %v19163_v59 = vadd.f32 %v13906_v46, %v3023_v58  ;;  %v13914_v8 = vpop.f32.mrb[63].mxu1  ;;  %v15904_v30 = vld [vmem:[%s21153_s1 + $0xba0] sm:$0xff]   ;;  %v13871_v46 = vpop.f32.mrb[61].mxu0  ;;  %v19192_v63 = vld [vmem:[%s16563_s26 + $0x2a8] sm:$0x11] }
 0x1a6   : > { %14522 = vmatprep.subr.bf16.mxu1 %v15898_v3  ;;  %6480 = vmatmul.mubr.bf16.gmra.mrb[164].mxu0 %v12430_v31  ;;  %v13915_v31 = vadd.f32 %v13914_v8, %v13913_v0  ;;  %v13872_v24 = vadd.f32 %v13871_v46, %v13870_v35  ;;  %v15906_v3 = vld [vmem:[%s21153_s1 + $0xbe8] sm:$0xff]   ;;  %v13972_v60 = vpop.f32.mrb[64].mxu1  ;;  %v5648_v0 = vshll.u32 %v19192_v63, 16  ;;  %v15910_v46 = vld [vmem:[%s21153_s1 + $0xbf0] sm:$0xff]  }
 0x1a7   : > { %14481 = vmatpush3.bf16.msra.mxu0 %v15895_v52  ;;  %6487 = vmatprep.mubr.bf16.mxu0 %v12441_v17  ;;  %v19168_v25 = vadd.f32 %v13909_v45, %v3026_v44  ;;  %v15903_v52 = vld [vmem:[%s21153_s1 + $0xb20] sm:$0xff]   ;;  %v15905_v45 = vld [vmem:[%s21153_s1 + $0xb68] sm:$0xff]   ;;  %v13973_v58 = vpop.f32.mrb[65].mxu1 }
 0x1a8   : > { %14482 = vmatprep.subr.bf16.mxu0 %v15897_v36  ;;  %v13873_v36 = vpop.f32.mrb[62].mxu0  ;;  %v3031_v7 = vadd.f32 %v13872_v24, %v19048_v53  ;;  %v15907_v17 = vld [vmem:[%s21153_s1 + $0xb28] sm:$0xff]   ;;  %v13975_v57 = vpop.f32.mrb[66].mxu1  ;;  %v5650_v35 = vrot.slane %v5648_v0, 5 }
 0x1a9   : > { %14523 = vmatpush3.bf16.msra.mxu1 %v15900_v61  ;;  %v13874_v4 = vpop.f32.mrb[63].mxu0  ;;  %v15908_v61 = vld [vmem:[%s21153_s1 + $0xba8] sm:$0xff]  }
 0x1aa   : > { %14524 = vmatprep.subr.bf16.mxu1 %v15902_v54  ;;  %v13875_v32 = vadd.f32 %v13874_v4, %v13873_v36  ;;  %v15909_v54 = vld [vmem:[%s21153_s1 + $0xb70] sm:$0xff]   ;;  %v19200_v44 = vadd.f32 %v13912_v41, %v3031_v7  ;;  %v13932_v24 = vpop.f32.mrb[64].mxu0  ;;  %v21568_v0 = vld [vmem:[#allocation23_spill] sm:$0xff] }
 0x1ab   : > { %14483 = vmatpush3.bf16.msra.mxu0 %v15899_v6  ;;  %v13974_v6 = vadd.f32 %v13973_v58, %v13972_v60  ;;  %v15912_v41 = vld [vmem:[%s21153_s1 + $0xbb0] sm:$0xff]   ;;  %v15914_v58 = vld [vmem:[%s21153_s1 + $0xbf8] sm:$0xff]  }
 0x1ac   : > { %6553 = vmatmul.mubr.bf16.gmra.mrb[168].mxu1 %v12442_v16  ;;  %14484 = vmatprep.subr.bf16.mxu0 %v15901_v1  ;;  %v364_v16 = vld [vmem:[%s16563_s26 + $0x2b0] sm:$0x11]  ;;  %v3034_v53 = vadd.f32 %v13875_v32, %v19056_v38  ;;  %v13976_v1 = vpop.f32.mrb[67].mxu1 }
 0x1ad   : > { %14525 = vmatpush3.bf16.msra.mxu1 %v15904_v30  ;;  %v5662_v8 = vshll.u32 %v364_v16, 16  ;;  %v13977_v30 = vadd.f32 %v13976_v1, %v13975_v57  ;;  %v15911_v38 = vld [vmem:[%s21153_s1 + $0xb30] sm:$0xff]  }
 0x1ae   : > { %14526 = vmatprep.subr.bf16.mxu1 %v15906_v3  ;;  %6488 = vmatmul.mubr.bf16.gmra.mrb[168].mxu0 %v12440_v5  ;;  %v19205_v5 = vadd.f32 %v13915_v31, %v3034_v53  ;;  %v19216_v3 = vsel %vm16585_vm2, %v19007_v48, %v5650_v35  ;;  %v15913_v31 = vld [vmem:[%s21153_s1 + $0xb78] sm:$0xff]   ;;  %v13978_v53 = vpop.f32.mrb[68].mxu1 }
 0x1af   : > { %14485 = vmatpush3.bf16.msra.mxu0 %v15903_v52  ;;  %v5664_v36 = vrot.slane %v5662_v8, 5  ;;  %v13933_v52 = vpop.f32.mrb[65].mxu0  ;;  %v21569_v8 = vld [vmem:[#allocation28_spill] sm:$0xff] }
 0x1b0   : > { %14486 = vmatprep.subr.bf16.mxu0 %v15905_v45  ;;  %v13934_v60 = vadd.f32 %v13933_v52, %v13932_v24  ;;  %v13935_v4 = vpop.f32.mrb[66].mxu0  ;;  %v15915_v24 = vld [vmem:[%s21153_s1 + $0xb38] sm:$0xff]   ;;  %v21571_v52 = vld [vmem:[#allocation32_spill] sm:$0xff] }
 0x1b1   : > { %14527 = vmatpush3.bf16.msra.mxu1 %v15908_v61  ;;  %v21567_v61 = vld [vmem:[#allocation19_spill] sm:$0xff]  ;;  %v19226_v32 = vsel %vm16585_vm2, %v19016_v37, %v5664_v36  ;;  %v13936_v57 = vpop.f32.mrb[67].mxu0  ;;  %v21570_v37 = vld [vmem:[#allocation26_spill] sm:$0xff]  ;;  %v13979_v36 = vpop.f32.mrb[69].mxu1  ;;  %v16214_v45 = vld [vmem:[%s21153_s1 + $0x14b8] sm:$0xff]  }
 0x1b2   : > { %14528 = vmatprep.subr.bf16.mxu1 %v15910_v46  ;;  %v12451_v7 = vcombine.high %v21567_v61, %v19216_v3  ;;  %v12450_v48 = vcombine.low %v21567_v61, %v19216_v3  ;;  %v12453_v16 = vcombine.high %v21568_v0, %v19226_v32  ;;  %v12425_v1 = vcombine.high %v21570_v37, %v21569_v8  ;;  %v21572_v61 = vld [vmem:[#allocation27_spill] sm:$0xff] }
 0x1b3   : > { %14487 = vmatpush3.bf16.msra.mxu0 %v15907_v17  ;;  %v12452_v17 = vcombine.low %v21568_v0, %v19226_v32  ;;  %v3137_v35 = vadd.f32 %v13934_v60, %v19081_v22  ;;  %v13937_v46 = vadd.f32 %v13936_v57, %v13935_v4  ;;  %v12427_v62 = vcombine.high %v21572_v61, %v21571_v52  ;;  %v13981_v0 = vpop.f32.mrb[70].mxu1 }
 0x1b4   : > { %14488 = vmatprep.subr.bf16.mxu0 %v15909_v54  ;;  %6495 = vmatprep.mubr.bf16.mxu0 %v12451_v7  ;;  %v15916_v54 = vld [vmem:[%s21153_s1 + $0xbb8] sm:$0xff]   ;;  %v13982_v4 = vpop.f32.mrb[71].mxu1  ;;  %v15917_v7 = vld [vmem:[%s21153_s1 + $0xc40] sm:$0xff]   ;;  %v19259_v57 = vrot.slane %v5681_v13, 4 }
 0x1b5   : > { %14529 = vmatpush3.bf16.msra.mxu1 %v15912_v41  ;;  %6560 = vmatprep.mubr.bf16.mxu1 %v12453_v16  ;;  %v13980_v41 = vadd.f32 %v13979_v36, %v13978_v53  ;;  %v3140_v22 = vadd.f32 %v13937_v46, %v19092_v15  ;;  %v19249_v60 = vadd.f32 %v13974_v6, %v3137_v35  ;;  %v13938_v6 = vpop.f32.mrb[68].mxu0  ;;  %v13984_v46 = vpop.f32.mrb[72].mxu1  ;;  %v21573_v36 = vld [vmem:[#allocation36_spill] sm:$0xff] }
 0x1b6   : > { %14530 = vmatprep.subr.bf16.mxu1 %v15914_v58  ;;  %6496 = vmatmul.mubr.bf16.gmra.mrb[172].mxu0 %v12450_v48  ;;  %v13983_v48 = vadd.f32 %v13982_v4, %v13981_v0  ;;  %v15918_v58 = vld [vmem:[%s21153_s1 + $0xcc0] sm:$0xff]   ;;  %v12424_v16 = vcombine.low %v21570_v37, %v21569_v8  ;;  %v15922_v8 = vld [vmem:[%s21153_s1 + $0xcc8] sm:$0xff]   ;;  %v13985_v0 = vpop.f32.mrb[73].mxu1  ;;  %v21576_v4 = vld [vmem:[#allocation33_spill] sm:$0xff] }
 0x1b7   : > { %6561 = vmatmul.mubr.bf16.gmra.mrb[172].mxu1 %v12452_v17  ;;  %14489 = vmatpush3.bf16.msra.mxu0 %v15911_v38  ;;  %v19261_v15 = vadd.f32 %v13977_v30, %v3140_v22  ;;  %v15919_v38 = vld [vmem:[%s21153_s1 + $0xc00] sm:$0xff]   ;;  %v12426_v30 = vcombine.low %v21572_v61, %v21571_v52  ;;  %v21574_v52 = vld [vmem:[#allocation29_spill] sm:$0xff]  ;;  %v21575_v22 = vld [vmem:[#allocation40_spill] sm:$0xff] }
 0x1b8   : > { %14490 = vmatprep.subr.bf16.mxu0 %v15913_v31  ;;  %6601 = vmatprep.mubr.bf16.mxu0 %v12425_v1  ;;  %v13939_v31 = vpop.f32.mrb[69].mxu0  ;;  %v15920_v17 = vld [vmem:[%s21153_s1 + $0xc80] sm:$0xff]   ;;  %v12435_v61 = vcombine.high %v21574_v52, %v21573_v36 }
 0x1b9   : > { %14531 = vmatpush3.bf16.msra.mxu1 %v15916_v54  ;;  %6666 = vmatprep.mubr.bf16.mxu1 %v12427_v62  ;;  %v13940_v13 = vadd.f32 %v13939_v31, %v13938_v6  ;;  %v13941_v53 = vpop.f32.mrb[70].mxu0  ;;  %v15921_v62 = vld [vmem:[%s21153_s1 + $0xc48] sm:$0xff]   ;;  %v13986_v6 = vadd.f32 %v13985_v0, %v13984_v46  ;;  %v13987_v31 = vpop.f32.mrb[74].mxu1 }
 0x1ba   : > { %14596 = vmatprep.subr.bf16.mxu1 %v15918_v58  ;;  %v13942_v1 = vpop.f32.mrb[71].mxu0  ;;  %v15924_v54 = vld [vmem:[%s21153_s1 + $0xc88] sm:$0xff]  }
 0x1bb   : > { %14491 = vmatpush3.bf16.msra.mxu0 %v15915_v24  ;;  %v3145_v37 = vadd.f32 %v13940_v13, %v19125_v34  ;;  %v13943_v35 = vadd.f32 %v13942_v1, %v13941_v53  ;;  %v15923_v24 = vld [vmem:[%s21153_s1 + $0xc08] sm:$0xff]   ;;  %v13988_v13 = vpop.f32.mrb[75].mxu1  ;;  %v15926_v53 = vld [vmem:[%s21153_s1 + $0xcd0] sm:$0xff]  }
 0x1bc   : > { %14556 = vmatprep.subr.bf16.mxu0 %v15917_v7  ;;  %v12437_v7 = vcombine.high %v21576_v4, %v21575_v22  ;;  %v13990_v0 = vpop.f32.mrb[76].mxu1 }
 0x1bd   : > { %v3148_v34 = vadd.f32 %v13943_v35, %v19132_v26  ;;  %v19291_v58 = vadd.f32 %v13980_v41, %v3145_v37  ;;  %v13944_v26 = vpop.f32.mrb[72].mxu0  ;;  %v13989_v41 = vadd.f32 %v13988_v13, %v13987_v31  ;;  %v15929_v35 = vld [vmem:[%s21153_s1 + $0xc58] sm:$0xff]   ;;  %v21579_v31 = vld [vmem:[#allocation48_spill] sm:$0xff] }
 0x1be   : > { %6602 = vmatmul.mubr.bf16.vlgmr.msra.gmra.mrb[176].mxu0 %v12424_v16  ;;  %v15925_v16 = vld [vmem:[%s21153_s1 + $0xc50] sm:$0xff]  }
 0x1bf   : > { %6667 = vmatmul.mubr.bf16.vlgmr.msra.gmra.mrb[176].mxu1 %v12426_v30  ;;  %14557 = vmatpush3.bf16.msra.mxu0 %v15919_v38  ;;  %v19299_v1 = vadd.f32 %v13983_v48, %v3148_v34  ;;  %v15927_v38 = vld [vmem:[%s21153_s1 + $0xc10] sm:$0xff]   ;;  %v13945_v30 = vpop.f32.mrb[73].mxu0  ;;  %v13991_v34 = vpop.f32.mrb[77].mxu1 }
 0x1c0   : > { %14597 = vmatpush3.bf16.msra.mxu1 %v15920_v17  ;;  %14558 = vmatprep.subr.bf16.mxu0 %v15921_v62  ;;  %v12434_v17 = vcombine.low %v21574_v52, %v21573_v36  ;;  %v15928_v62 = vld [vmem:[%s21153_s1 + $0xc90] sm:$0xff]   ;;  %v13946_v37 = vadd.f32 %v13945_v30, %v13944_v26  ;;  %v13947_v48 = vpop.f32.mrb[74].mxu0  ;;  %v15930_v36 = vld [vmem:[%s21153_s1 + $0xcd8] sm:$0xff]   ;;  %v13992_v26 = vadd.f32 %v13991_v34, %v13990_v0  ;;  %v13993_v30 = vpop.f32.mrb[78].mxu1 }
 0x1c1   : > { %14598 = vmatprep.subr.bf16.mxu1 %v15922_v8  ;;  %6609 = vmatprep.mubr.bf16.mxu0 %v12435_v61  ;;  %v12436_v8 = vcombine.low %v21576_v4, %v21575_v22  ;;  %v13948_v46 = vpop.f32.mrb[75].mxu0  ;;  %v21577_v22 = vld [vmem:[#allocation44_spill] sm:$0xff]  ;;  %v21578_v4 = vld [vmem:[#allocation37_spill] sm:$0xff] }
 0x1c2   : > { %6674 = vmatprep.mubr.bf16.mxu1 %v12437_v7  ;;  %v3153_v52 = vadd.f32 %v13946_v37, %v19163_v59  ;;  %v13949_v61 = vadd.f32 %v13948_v46, %v13947_v48  ;;  %v12445_v7 = vcombine.high %v21578_v4, %v21577_v22  ;;  %v13994_v37 = vpop.f32.mrb[79].mxu1  ;;  %v15934_v48 = vld [vmem:[%s21153_s1 + $0xce0] sm:$0xff]  }
 0x1c3   : > { %14559 = vmatpush3.bf16.msra.mxu0 %v15923_v24  ;;  %v15931_v24 = vld [vmem:[%s21153_s1 + $0xc18] sm:$0xff]  }
 0x1c4   : > { %14599 = vmatpush3.bf16.msra.mxu1 %v15924_v54  ;;  %14560 = vmatprep.subr.bf16.mxu0 %v15925_v16  ;;  %v15932_v54 = vld [vmem:[%s21153_s1 + $0xc98] sm:$0xff]   ;;  %v3156_v59 = vadd.f32 %v13949_v61, %v19168_v25  ;;  %v13950_v25 = vpop.f32.mrb[76].mxu0  ;;  %v14052_v61 = vpop.f32.mrb[80].mxu1 }
 0x1c5   : > { %14600 = vmatprep.subr.bf16.mxu1 %v15926_v53  ;;  %v21580_v16 = vld [vmem:[#allocation41_spill] sm:$0xff]  ;;  %v19329_v53 = vadd.f32 %v13986_v6, %v3153_v52  ;;  %v13995_v6 = vadd.f32 %v13994_v37, %v13993_v30  ;;  %v15940_v30 = vld [vmem:[%s21153_s1 + $0xca8] sm:$0xff]   ;;  %v366_v37 = vld [vmem:[%s16563_s26 + $0x2c0] sm:$0x11] }
 0x1c6   : > { %6610 = vmatmul.mubr.bf16.gmra.mrb[180].mxu0 %v12434_v17  ;;  %v12447_v13 = vcombine.high %v21580_v16, %v21579_v31  ;;  %v15933_v17 = vld [vmem:[%s21153_s1 + $0xc60] sm:$0xff]   ;;  %v19337_v46 = vadd.f32 %v13989_v41, %v3156_v59 }
 0x1c7   : > { %6675 = vmatmul.mubr.bf16.gmra.mrb[180].mxu1 %v12436_v8  ;;  %14561 = vmatpush3.bf16.msra.mxu0 %v15927_v38  ;;  %v15935_v38 = vld [vmem:[%s21153_s1 + $0xc20] sm:$0xff]   ;;  %v13951_v8 = vpop.f32.mrb[77].mxu0 }
 0x1c8   : > { %14601 = vmatpush3.bf16.msra.mxu1 %v15928_v62  ;;  %14562 = vmatprep.subr.bf16.mxu0 %v15929_v35  ;;  %v12444_v62 = vcombine.low %v21578_v4, %v21577_v22  ;;  %v15936_v35 = vld [vmem:[%s21153_s1 + $0xca0] sm:$0xff]   ;;  %v13952_v52 = vadd.f32 %v13951_v8, %v13950_v25  ;;  %v13953_v41 = vpop.f32.mrb[78].mxu0  ;;  %v15937_v22 = vld [vmem:[%s21153_s1 + $0xc68] sm:$0xff]   ;;  %v21581_v8 = vshll.u32 %v19031_v23, 16  ;;  %v15943_v23 = vld [vmem:[%s21153_s1 + $0xc30] sm:$0xff]  }
 0x1c9   : > { %14602 = vmatprep.subr.bf16.mxu1 %v15930_v36  ;;  %6617 = vmatprep.mubr.bf16.mxu0 %v12445_v7  ;;  %v12446_v36 = vcombine.low %v21580_v16, %v21579_v31  ;;  %v13954_v0 = vpop.f32.mrb[79].mxu0  ;;  %v14053_v7 = vpop.f32.mrb[81].mxu1  ;;  %v15938_v4 = vld [vmem:[%s21153_s1 + $0xce8] sm:$0xff]  }
 0x1ca   : > { %6682 = vmatprep.mubr.bf16.mxu1 %v12447_v13  ;;  %v13955_v34 = vadd.f32 %v13954_v0, %v13953_v41  ;;  %v14054_v31 = vadd.f32 %v14053_v7, %v14052_v61  ;;  %v14055_v16 = vpop.f32.mrb[82].mxu1 }
 0x1cb   : > { %14563 = vmatpush3.bf16.msra.mxu0 %v15931_v24  ;;  %v3161_v24 = vadd.f32 %v13952_v52, %v19200_v44  ;;  %v14056_v44 = vpop.f32.mrb[83].mxu1  ;;  %v14012_v52 = vpop.f32.mrb[80].mxu0 }
 0x1cc   : > { %14603 = vmatpush3.bf16.msra.mxu1 %v15932_v54  ;;  %14564 = vmatprep.subr.bf16.mxu0 %v15933_v17  ;;  %v15939_v54 = vld [vmem:[%s21153_s1 + $0xc28] sm:$0xff]   ;;  %v3164_v13 = vadd.f32 %v13955_v34, %v19205_v5  ;;  %v19366_v17 = vld [vmem:[%s16563_s26 + $0x2b8] sm:$0x11]  ;;  %v5686_v5 = vrot.slane %v21581_v8, 5  ;;  %v14013_v41 = vpop.f32.mrb[81].mxu0  ;;  %v21584_v8 = vld [vmem:[#allocation56_spill] sm:$0xff] }
 0x1cd   : > { %14604 = vmatprep.subr.bf16.mxu1 %v15934_v48  ;;  %v19360_v59 = vadd.f32 %v13992_v26, %v3161_v24  ;;  %v14057_v48 = vadd.f32 %v14056_v44, %v14055_v16  ;;  %v5676_v25 = vshll.u32 %v19366_v17, 16  ;;  %v5690_v26 = vshll.u32 %v366_v37, 16  ;;  %v14058_v37 = vpop.f32.mrb[84].mxu1 }
 0x1ce   : > { %6618 = vmatmul.mubr.bf16.gmra.mrb[184].mxu0 %v12444_v62  ;;  %v19375_v62 = vadd.f32 %v13995_v6, %v3164_v13  ;;  %v5687_v61 = vor.u32 %v5686_v5, %v19259_v57  ;;  %v14014_v7 = vadd.f32 %v14013_v41, %v14012_v52  ;;  %v15944_v6 = vld [vmem:[%s21153_s1 + $0xcb0] sm:$0xff]   ;;  %v21582_v13 = vld [vmem:[#allocation45_spill] sm:$0xff] }
 0x1cf   : > { %6683 = vmatmul.mubr.bf16.gmra.mrb[184].mxu1 %v12446_v36  ;;  %14565 = vmatpush3.bf16.msra.mxu0 %v15935_v38  ;;  %v15941_v38 = vld [vmem:[%s21153_s1 + $0xc70] sm:$0xff]   ;;  %v5678_v36 = vrot.slane %v5676_v25, 5  ;;  %v5692_v0 = vrot.slane %v5690_v26, 5  ;;  %v14059_v25 = vpop.f32.mrb[85].mxu1  ;;  %v21586_v52 = vld [vmem:[#allocation49_spill] sm:$0xff] }
 0x1d0   : > { %14605 = vmatpush3.bf16.msra.mxu1 %v15936_v35  ;;  %14566 = vmatprep.subr.bf16.mxu0 %v15937_v22  ;;  %v15942_v35 = vld [vmem:[%s21153_s1 + $0xcf0] sm:$0xff]   ;;  %v14015_v22 = vpop.f32.mrb[82].mxu0  ;;  %v5688_v57 = vrot.slane %v5687_v61, 4  ;;  %v19392_v34 = vadd.f32 %v14054_v31, %v14014_v7  ;;  %v15946_v31 = vld [vmem:[%s21153_s1 + $0xcf8] sm:$0xff]  }
 0x1d1   : > { %14606 = vmatprep.subr.bf16.mxu1 %v15938_v4  ;;  %v14016_v4 = vpop.f32.mrb[83].mxu0  ;;  %v19390_v24 = vsel %vm16585_vm2, %v19102_v19, %v5678_v36  ;;  %v21585_v5 = vld [vmem:[#allocation52_spill] sm:$0xff]  ;;  %v14061_v36 = vpop.f32.mrb[86].mxu1  ;;  %v15947_v61 = vld [vmem:[%s21153_s1 + $0xc38] sm:$0xff]  }
 0x1d2   : > { %v14017_v16 = vadd.f32 %v14016_v4, %v14015_v22  ;;  %v12455_v44 = vcombine.high %v21582_v13, %v19390_v24  ;;  %v19403_v19 = vsel %vm16585_vm2, %v5688_v57, %v5692_v0  ;;  %v12429_v26 = vcombine.high %v21585_v5, %v21584_v8  ;;  %v14062_v7 = vpop.f32.mrb[87].mxu1  ;;  %v14018_v4 = vpop.f32.mrb[84].mxu0  ;;  %v15949_v57 = vld [vmem:[%s21153_s1 + $0xd40] sm:$0xff]  }
 0x1d3   : > { %14567 = vmatpush3.bf16.msra.mxu0 %v15939_v54  ;;  %v12454_v54 = vcombine.low %v21582_v13, %v19390_v24  ;;  %21583 = vst [vmem:[#allocation3_spill] sm:$0xff] %v19403_v19  ;;  %v12456_v41 = vcombine.low %v21586_v52, %v19403_v19  ;;  %v14060_v0 = vadd.f32 %v14059_v25, %v14058_v37 }
 0x1d4   : > { %14607 = vmatpush3.bf16.msra.mxu1 %v15940_v30  ;;  %14568 = vmatprep.subr.bf16.mxu0 %v15941_v38  ;;  %v15945_v30 = vld [vmem:[%s21153_s1 + $0xc78] sm:$0xff]   ;;  %v19410_v38 = vadd.f32 %v14057_v48, %v14017_v16  ;;  %v12706_v22 = vcombine.high %v17874_v28, %v17958_v2  ;;  %v14019_v16 = vpop.f32.mrb[85].mxu0  ;;  %v12428_v37 = vcombine.low %v21585_v5, %v21584_v8 }
 0x1d5   : > { %14608 = vmatprep.subr.bf16.mxu1 %v15942_v35  ;;  %6625 = vmatprep.mubr.bf16.mxu0 %v12455_v44  ;;  %v12457_v35 = vcombine.high %v21586_v52, %v19403_v19  ;;  %v15948_v48 = vld [vmem:[%s21153_s1 + $0xcb8] sm:$0xff]   ;;  %v14020_v13 = vadd.f32 %v14019_v16, %v14018_v4  ;;  %v14021_v44 = vpop.f32.mrb[86].mxu0  ;;  %v15952_v52 = vld [vmem:[%s21153_s1 + $0xd80] sm:$0xff]   ;;  %v12705_v8 = vcombine.low %v17874_v28, %v17958_v2  ;;  %v15955_v28 = vld [vmem:[%s21153_s1 + $0xd08] sm:$0xff]  }
 0x1d6   : > { %6626 = vmatmul.mubr.bf16.gmra.mrb[188].mxu0 %v12454_v54  ;;  %v14022_v54 = vpop.f32.mrb[87].mxu0  ;;  %v12716_v4 = vcombine.high %v17966_v43, %v18039_v39 }
 0x1d7   : > { %14569 = vmatpush3.bf16.msra.mxu0 %v15943_v23  ;;  %6690 = vmatprep.mubr.bf16.mxu1 %v12457_v35  ;;  %v14063_v23 = vadd.f32 %v14062_v7, %v14061_v36  ;;  %v19435_v25 = vadd.f32 %v14060_v0, %v14020_v13  ;;  %v21587_v35 = vld [vmem:[#allocation62_spill] sm:$0xff]  ;;  %v15954_v7 = vld [vmem:[%s21153_s1 + $0xdc8] sm:$0xff]   ;;  %v15957_v13 = vld [vmem:[%s21153_s1 + $0xd50] sm:$0xff]  }
 0x1d8   : > { %14609 = vmatpush3.bf16.msra.mxu1 %v15944_v6  ;;  %14570 = vmatprep.subr.bf16.mxu0 %v15945_v30  ;;  %v15950_v6 = vld [vmem:[%s21153_s1 + $0xdc0] sm:$0xff]  }
 0x1d9   : > { %6691 = vmatmul.mubr.bf16.gmra.mrb[188].mxu1 %v12456_v41  ;;  %14610 = vmatprep.subr.bf16.mxu1 %v15946_v31  ;;  %v15951_v30 = vld [vmem:[%s21153_s1 + $0xd00] sm:$0xff]   ;;  %v14023_v31 = vadd.f32 %v14022_v54, %v14021_v44  ;;  %v21588_v41 = vld [vmem:[#allocation57_spill] sm:$0xff] }
 0x1da   : > { %6731 = vmatprep.mubr.bf16.mxu0 %v12429_v26  ;;  %7560 = vmatprep.mubr.bf16.mxu1 %v12706_v22  ;;  %v12439_v36 = vcombine.high %v21588_v41, %v21587_v35 }
 0x1db   : > { %14571 = vmatpush3.bf16.msra.mxu0 %v15947_v61  ;;  %v15953_v61 = vld [vmem:[%s21153_s1 + $0xd48] sm:$0xff]   ;;  %v19447_v0 = vadd.f32 %v14063_v23, %v14023_v31  ;;  %v12438_v31 = vcombine.low %v21588_v41, %v21587_v35  ;;  %v15961_v41 = vld [vmem:[%s21153_s1 + $0xd58] sm:$0xff]  }
 0x1dc   : > { %14611 = vmatpush3.bf16.msra.mxu1 %v15948_v48  ;;  %14636 = vmatprep.subr.bf16.mxu0 %v15949_v57  ;;  %v15956_v23 = vld [vmem:[%s21153_s1 + $0xd88] sm:$0xff]  }
 0x1dd   : > { %14676 = vmatprep.subr.bf16.mxu1 %v15950_v6 }
 0x1de   : > { %6732 = vmatmul.mubr.bf16.vlgmr.msra.gmra.mrb[192].mxu0 %v12428_v37  ;;  %v15958_v37 = vld [vmem:[%s21153_s1 + $0xdd0] sm:$0xff]  }
 0x1df   : > { %v14064_v26 = vpop.f32.mrb[88].mxu1  ;;  %14637 = vmatpush3.bf16.msra.mxu0 %v15951_v30  ;;  %6739 = vmatprep.mubr.bf16.mxu0 %v12439_v36 }
 0x1e0   : > { %v14065_v5 = vpop.f32.mrb[89].mxu1  ;;  %14638 = vmatprep.subr.bf16.mxu0 %v15953_v61  ;;  %v21589_v61 = vld [vmem:[#allocation67_spill] sm:$0xff] }
 0x1e1   : > { %v14066_v48 = vadd.f32 %v14065_v5, %v14064_v26  ;;  %v14067_v22 = vpop.f32.mrb[90].mxu1  ;;  %v14024_v57 = vpop.f32.mrb[88].mxu0  ;;  %7561 = vmatmul.mubr.bf16.vlgmr.msra.gmra.mrb[192].mxu1 %v12705_v8  ;;  %v15959_v26 = vld [vmem:[%s21153_s1 + $0xd10] sm:$0xff]  }
 0x1e2   : > { %v14068_v2 = vpop.f32.mrb[91].mxu1  ;;  %v14025_v6 = vpop.f32.mrb[89].mxu0  ;;  %14677 = vmatpush3.bf16.msra.mxu1 %v15952_v52  ;;  %7568 = vmatprep.mubr.bf16.mxu1 %v12716_v4  ;;  %v15960_v8 = vld [vmem:[%s21153_s1 + $0xd90] sm:$0xff]   ;;  %v12715_v4 = vcombine.low %v17966_v43, %v18039_v39  ;;  %v15963_v43 = vld [vmem:[%s21153_s1 + $0xd18] sm:$0xff]  }
 0x1e3   : > { %v14069_v16 = vadd.f32 %v14068_v2, %v14067_v22  ;;  %v14026_v44 = vadd.f32 %v14025_v6, %v14024_v57  ;;  %v14027_v54 = vpop.f32.mrb[90].mxu0  ;;  %14678 = vmatprep.subr.bf16.mxu1 %v15954_v7  ;;  %14639 = vmatpush3.bf16.msra.mxu0 %v15955_v28  ;;  %v21590_v22 = vld [vmem:[#allocation63_spill] sm:$0xff]  ;;  %v15962_v2 = vld [vmem:[%s21153_s1 + $0xdd8] sm:$0xff]   ;;  %v12726_v6 = vcombine.high %v18047_v20, %v18137_v33 }
 0x1e4   : > { %v14028_v30 = vpop.f32.mrb[91].mxu0  ;;  %v12449_v7 = vcombine.high %v21590_v22, %v21589_v61  ;;  %14640 = vmatprep.subr.bf16.mxu0 %v15957_v13 }
 0x1e5   : > { %v19471_v36 = vadd.f32 %v14066_v48, %v14026_v44  ;;  %v14029_v52 = vadd.f32 %v14028_v30, %v14027_v54  ;;  %v15965_v54 = vld [vmem:[%s21153_s1 + $0xd60] sm:$0xff]  }
 0x1e6   : > { %14679 = vmatpush3.bf16.msra.mxu1 %v15956_v23  ;;  %6740 = vmatmul.mubr.bf16.gmra.mrb[196].mxu0 %v12438_v31  ;;  %v15966_v31 = vld [vmem:[%s21153_s1 + $0xde0] sm:$0xff]  }
 0x1e7   : > { %v14070_v5 = vpop.f32.mrb[92].mxu1  ;;  %v19483_v48 = vadd.f32 %v14069_v16, %v14029_v52  ;;  %14680 = vmatprep.subr.bf16.mxu1 %v15958_v37  ;;  %14641 = vmatpush3.bf16.msra.mxu0 %v15959_v26  ;;  %v15964_v16 = vld [vmem:[%s21153_s1 + $0xd98] sm:$0xff]   ;;  %v12448_v52 = vcombine.low %v21590_v22, %v21589_v61  ;;  %v15969_v61 = vld [vmem:[%s21153_s1 + $0xd68] sm:$0xff]  }
 0x1e8   : > { %v14071_v35 = vpop.f32.mrb[93].mxu1  ;;  %6747 = vmatprep.mubr.bf16.mxu0 %v12449_v7  ;;  %14642 = vmatprep.subr.bf16.mxu0 %v15961_v41  ;;  %v12725_v41 = vcombine.low %v18047_v20, %v18137_v33  ;;  %v15971_v20 = vld [vmem:[%s21153_s1 + $0xd28] sm:$0xff]   ;;  %v19526_v33 = vld [vmem:[%s16563_s26 + $0x2a0] sm:$0xff] }
 0x1e9   : > { %v14072_v28 = vadd.f32 %v14071_v35, %v14070_v5  ;;  %v14073_v57 = vpop.f32.mrb[94].mxu1  ;;  %v14030_v23 = vpop.f32.mrb[92].mxu0  ;;  %7569 = vmatmul.mubr.bf16.gmra.mrb[196].mxu1 %v12715_v4  ;;  %v15967_v5 = vld [vmem:[%s21153_s1 + $0xd20] sm:$0xff]  }
 0x1ea   : > { %v14074_v39 = vpop.f32.mrb[95].mxu1  ;;  %v14031_v44 = vpop.f32.mrb[93].mxu0  ;;  %14681 = vmatpush3.bf16.msra.mxu1 %v15960_v8  ;;  %7576 = vmatprep.mubr.bf16.mxu1 %v12726_v6  ;;  %v15968_v4 = vld [vmem:[%s21153_s1 + $0xda0] sm:$0xff]  }
 0x1eb   : > { %v14075_v13 = vadd.f32 %v14074_v39, %v14073_v57  ;;  %v14032_v37 = vadd.f32 %v14031_v44, %v14030_v23  ;;  %v14033_v30 = vpop.f32.mrb[94].mxu0  ;;  %14682 = vmatprep.subr.bf16.mxu1 %v15962_v2  ;;  %14643 = vmatpush3.bf16.msra.mxu0 %v15963_v43  ;;  %v15970_v2 = vld [vmem:[%s21153_s1 + $0xde8] sm:$0xff]   ;;  %v5695_v43 = vshrl.u32 %v19526_v33, 16  ;;  %v16388_v44 = vld [vmem:[%s16563_s26 + $0x280] sm:$0xff] }
 0x1ec   : > { %v14034_v26 = vpop.f32.mrb[95].mxu0  ;;  %14644 = vmatprep.subr.bf16.mxu0 %v15965_v54  ;;  %v15972_v23 = vld [vmem:[%s21153_s1 + $0xda8] sm:$0xff]   ;;  %v12540_v54 = vrot.slane %v16388_v44, 9 }
 0x1ed   : > { %v19507_v7 = vadd.f32 %v14072_v28, %v14032_v37  ;;  %v14035_v8 = vadd.f32 %v14034_v26, %v14033_v30  ;;  %v6779_v37 = vrot.slane %v19192_v63, 5  ;;  %v15973_v63 = vld [vmem:[%s21153_s1 + $0xd70] sm:$0xff]  }
 0x1ee   : > { %14683 = vmatpush3.bf16.msra.mxu1 %v15964_v16  ;;  %6748 = vmatmul.mubr.bf16.gmra.mrb[200].mxu0 %v12448_v52  ;;  %v19533_v16 = vld [vmem:[%s16563_s26 + $0x2c8] sm:$0x11] }
 0x1ef   : > { %v14132_v35 = vpop.f32.mrb[96].mxu1  ;;  %v19517_v28 = vadd.f32 %v14075_v13, %v14035_v8  ;;  %14684 = vmatprep.subr.bf16.mxu1 %v15966_v31  ;;  %14645 = vmatpush3.bf16.msra.mxu0 %v15967_v5  ;;  %v5698_v13 = vshll.u32 %v19526_v33, 16  ;;  %v5697_v31 = vrot.slane %v5695_v43, 4  ;;  %v5704_v26 = vshll.u32 %v19533_v16, 16 }
 0x1f0   : > { %v14133_v22 = vpop.f32.mrb[97].mxu1  ;;  %14646 = vmatprep.subr.bf16.mxu0 %v15969_v61 }
 0x1f1   : > { %v14134_v57 = vadd.f32 %v14133_v22, %v14132_v35  ;;  %v14135_v6 = vpop.f32.mrb[98].mxu1  ;;  %v14092_v39 = vpop.f32.mrb[96].mxu0  ;;  %7577 = vmatmul.mubr.bf16.gmra.mrb[200].mxu1 %v12725_v41  ;;  %v5700_v35 = vrot.slane %v5698_v13, 5  ;;  %v19541_v22 = vsel %vm17694_vm5, %v12540_v54, %v6779_v37  ;;  %v15974_v41 = vld [vmem:[%s21153_s1 + $0xdf0] sm:$0xff]   ;;  %v5706_v43 = vrot.slane %v5704_v26, 5  ;;  %v15977_v26 = vld [vmem:[%s21153_s1 + $0xd78] sm:$0xff]  }
 0x1f2   : > { %v14093_v30 = vpop.f32.mrb[97].mxu0  ;;  %v14136_v52 = vpop.f32.mrb[99].mxu1  ;;  %14685 = vmatpush3.bf16.msra.mxu1 %v15968_v4  ;;  %v12736_v4 = vcombine.high %v18145_v10, %v19541_v22  ;;  %v12735_v37 = vcombine.low %v18145_v10, %v19541_v22  ;;  %v15978_v10 = vld [vmem:[%s21153_s1 + $0xdf8] sm:$0xff]  }
 0x1f3   : > { %v14094_v5 = vadd.f32 %v14093_v30, %v14092_v39  ;;  %v14095_v8 = vpop.f32.mrb[98].mxu0  ;;  %v14137_v19 = vadd.f32 %v14136_v52, %v14135_v6  ;;  %14686 = vmatprep.subr.bf16.mxu1 %v15970_v2  ;;  %14647 = vmatpush3.bf16.msra.mxu0 %v15971_v20  ;;  %v5701_v44 = vor.u32 %v5700_v35, %v5697_v31  ;;  %v15975_v6 = vld [vmem:[%s21153_s1 + $0xd30] sm:$0xff]  }
 0x1f4   : > { %v14096_v61 = vpop.f32.mrb[99].mxu0  ;;  %7584 = vmatprep.mubr.bf16.mxu1 %v12736_v4  ;;  %14648 = vmatprep.subr.bf16.mxu0 %v15973_v63  ;;  %v15976_v2 = vld [vmem:[%s21153_s1 + $0xdb0] sm:$0xff]  }
 0x1f5   : > { %v4401_v39 = vadd.f32 %v14094_v5, %v19392_v34  ;;  %v14097_v13 = vadd.f32 %v14096_v61, %v14095_v8  ;;  %v12710_v34 = vcombine.high %v18221_v21, %v18297_v49  ;;  %v5702_v31 = vrot.slane %v5701_v44, 4 }
 0x1f6   : > { %14687 = vmatpush3.bf16.msra.mxu1 %v15972_v23  ;;  %v15979_v23 = vld [vmem:[%s21153_s1 + $0xd38] sm:$0xff]  }
 0x1f7   : > { %v14138_v54 = vpop.f32.mrb[100].mxu1  ;;  %v4404_v20 = vadd.f32 %v14097_v13, %v19410_v38  ;;  %v19566_v5 = vadd.f32 %v14134_v57, %v4401_v39  ;;  %14688 = vmatprep.subr.bf16.mxu1 %v15974_v41  ;;  %v19573_v35 = vsel %vm16585_vm2, %v5702_v31, %v5706_v43  ;;  %14649 = vmatpush3.bf16.msra.mxu0 %v15975_v6  ;;  %v21591_v57 = vld [vmem:[#allocation68_spill] sm:$0xff]  ;;  %v15980_v43 = vld [vmem:[%s21153_s1 + $0xdb8] sm:$0xff]  }
 0x1f8   : > { %v14139_v30 = vpop.f32.mrb[101].mxu1  ;;  %v12459_v41 = vcombine.high %v21591_v57, %v19573_v35  ;;  %v12458_v61 = vcombine.low %v21591_v57, %v19573_v35  ;;  %14650 = vmatprep.subr.bf16.mxu0 %v15977_v26  ;;  %v12708_v39 = vcombine.high %v17806_v12, %v17897_v18 }
 0x1f9   : > { %v14140_v52 = vadd.f32 %v14139_v30, %v14138_v54  ;;  %v14141_v8 = vpop.f32.mrb[102].mxu1  ;;  %v14098_v38 = vpop.f32.mrb[100].mxu0  ;;  %v19578_v63 = vadd.f32 %v14137_v19, %v4404_v20  ;;  %7585 = vmatmul.mubr.bf16.gmra.mrb[204].mxu1 %v12735_v37  ;;  %v15981_v37 = vld [vmem:[%s21153_s1 + $0xe40] sm:$0xff]  }
 0x1fa   : > { %v14099_v4 = vpop.f32.mrb[101].mxu0  ;;  %14689 = vmatpush3.bf16.msra.mxu1 %v15976_v2  ;;  %7690 = vmatprep.mubr.bf16.mxu1 %v12710_v34  ;;  %v14142_v44 = vpop.f32.mrb[103].mxu1  ;;  %v15982_v2 = vld [vmem:[%s21153_s1 + $0xec0] sm:$0xff]   ;;  %v12709_v34 = vcombine.low %v18221_v21, %v18297_v49 }
 0x1fb   : > { %v14100_v13 = vadd.f32 %v14099_v4, %v14098_v38  ;;  %v14101_v19 = vpop.f32.mrb[102].mxu0  ;;  %6755 = vmatprep.mubr.bf16.mxu0 %v12459_v41  ;;  %14690 = vmatprep.subr.bf16.mxu1 %v15978_v10  ;;  %v14143_v54 = vadd.f32 %v14142_v44, %v14141_v8  ;;  %v12720_v10 = vcombine.high %v18305_v55, %v18384_v40  ;;  %v15983_v21 = vld [vmem:[%s21153_s1 + $0xe00] sm:$0xff]  }
 0x1fc   : > { %v14102_v6 = vpop.f32.mrb[103].mxu0  ;;  %6756 = vmatmul.mubr.bf16.gmra.mrb[204].mxu0 %v12458_v61 }
 0x1fd   : > { %v4409_v30 = vadd.f32 %v14100_v13, %v19435_v25  ;;  %v14103_v20 = vadd.f32 %v14102_v6, %v14101_v19  ;;  %14651 = vmatpush3.bf16.msra.mxu0 %v15979_v23  ;;  %7625 = vmatprep.mubr.bf16.mxu0 %v12708_v39  ;;  %v15984_v25 = vld [vmem:[%s21153_s1 + $0xe80] sm:$0xff]   ;;  %v12707_v23 = vcombine.low %v17806_v12, %v17897_v18  ;;  %v15985_v39 = vld [vmem:[%s21153_s1 + $0xe48] sm:$0xff]  }
 0x1fe   : > { %14691 = vmatpush3.bf16.msra.mxu1 %v15980_v43  ;;  %14716 = vmatprep.subr.bf16.mxu0 %v15981_v37  ;;  %v21592_v13 = vld [vmem:[#allocation95_spill] sm:$0xff] }
 0x1ff   : > { %v14144_v31 = vpop.f32.mrb[104].mxu1  ;;  %v4412_v8 = vadd.f32 %v14103_v20, %v19447_v0  ;;  %v19604_v41 = vadd.f32 %v14140_v52, %v4409_v30  ;;  %14756 = vmatprep.subr.bf16.mxu1 %v15982_v2  ;;  %v15986_v0 = vld [vmem:[%s21153_s1 + $0xec8] sm:$0xff]   ;;  %v12718_v19 = vcombine.high %v21592_v13, %v17983_v9  ;;  %v15990_v20 = vld [vmem:[%s21153_s1 + $0xed0] sm:$0xff]  }
 0x200   : > { %v14145_v26 = vpop.f32.mrb[105].mxu1  ;;  %v15988_v18 = vld [vmem:[%s21153_s1 + $0xe88] sm:$0xff]  }
 0x201   : > { %v14146_v38 = vadd.f32 %v14145_v26, %v14144_v31  ;;  %v14147_v57 = vpop.f32.mrb[106].mxu1  ;;  %v14104_v61 = vpop.f32.mrb[104].mxu0  ;;  %v19614_v43 = vadd.f32 %v14143_v54, %v4412_v8  ;;  %7691 = vmatmul.mubr.bf16.vlgmr.msra.gmra.mrb[208].mxu1 %v12709_v34  ;;  %v15987_v6 = vld [vmem:[%s21153_s1 + $0xe08] sm:$0xff]   ;;  %v12719_v31 = vcombine.low %v18305_v55, %v18384_v40  ;;  %v15989_v34 = vld [vmem:[%s21153_s1 + $0xe50] sm:$0xff]   ;;  %v12730_v40 = vcombine.high %v18392_v29, %v18464_v47 }
 0x202   : > { %v14148_v49 = vpop.f32.mrb[107].mxu1  ;;  %v14105_v52 = vpop.f32.mrb[105].mxu0  ;;  %14757 = vmatpush3.bf16.msra.mxu1 %v15984_v25  ;;  %7698 = vmatprep.mubr.bf16.mxu1 %v12720_v10  ;;  %v15992_v8 = vld [vmem:[%s21153_s1 + $0xe90] sm:$0xff]  }
 0x203   : > { %v14149_v4 = vadd.f32 %v14148_v49, %v14147_v57  ;;  %v14106_v44 = vadd.f32 %v14105_v52, %v14104_v61  ;;  %v14107_v12 = vpop.f32.mrb[106].mxu0  ;;  %14758 = vmatprep.subr.bf16.mxu1 %v15986_v0  ;;  %v15991_v55 = vld [vmem:[%s21153_s1 + $0xe10] sm:$0xff]   ;;  %v15993_v52 = vld [vmem:[%s21153_s1 + $0xe58] sm:$0xff]  }
 0x204   : > { %v14108_v54 = vpop.f32.mrb[107].mxu0  ;;  %7626 = vmatmul.mubr.bf16.vlgmr.msra.gmra.mrb[208].mxu0 %v12707_v23  ;;  %v15994_v23 = vld [vmem:[%s21153_s1 + $0xed8] sm:$0xff]  }
 0x205   : > { %v14109_v37 = vadd.f32 %v14108_v54, %v14107_v12  ;;  %v4417_v30 = vadd.f32 %v14106_v44, %v19471_v36  ;;  %14717 = vmatpush3.bf16.msra.mxu0 %v15983_v21  ;;  %7633 = vmatprep.mubr.bf16.mxu0 %v12718_v19  ;;  %v15995_v19 = vld [vmem:[%s21153_s1 + $0xe18] sm:$0xff]   ;;  %v19670_v54 = vld [vmem:[%s16563_s26 + $0x288] sm:$0xff] }
 0x206   : > { %14718 = vmatprep.subr.bf16.mxu0 %v15985_v39  ;;  %14759 = vmatpush3.bf16.msra.mxu1 %v15988_v18 }
 0x207   : > { %v14150_v2 = vpop.f32.mrb[108].mxu1  ;;  %v19636_v10 = vadd.f32 %v14146_v38, %v4417_v30  ;;  %v4420_v36 = vadd.f32 %v14109_v37, %v19483_v48  ;;  %14760 = vmatprep.subr.bf16.mxu1 %v15990_v20  ;;  %v12717_v48 = vcombine.low %v21592_v13, %v17983_v9  ;;  %v15996_v13 = vld [vmem:[%s21153_s1 + $0xe98] sm:$0xff]   ;;  %v12541_v37 = vrot.slane %v19670_v54, 9  ;;  %v15997_v20 = vld [vmem:[%s21153_s1 + $0xe60] sm:$0xff]  }
 0x208   : > { %v14151_v26 = vpop.f32.mrb[109].mxu1  ;;  %v12729_v30 = vcombine.low %v18392_v29, %v18464_v47  ;;  %v15999_v29 = vld [vmem:[%s21153_s1 + $0xe20] sm:$0xff]  }
 0x209   : > { %v14152_v25 = vadd.f32 %v14151_v26, %v14150_v2  ;;  %v14153_v57 = vpop.f32.mrb[110].mxu1  ;;  %v19647_v49 = vadd.f32 %v14149_v4, %v4420_v36  ;;  %v14110_v38 = vpop.f32.mrb[108].mxu0  ;;  %14719 = vmatpush3.bf16.msra.mxu0 %v15987_v6  ;;  %7699 = vmatmul.mubr.bf16.gmra.mrb[212].mxu1 %v12719_v31  ;;  %v12728_v4 = vcombine.high %v17991_v11, %v18063_v27  ;;  %v15998_v6 = vld [vmem:[%s21153_s1 + $0xee0] sm:$0xff]   ;;  %v16390_v2 = vld [vmem:[%s16563_s26 + $0x2b0] sm:$0x11] }
 0x20a   : > { %v14154_v21 = vpop.f32.mrb[111].mxu1  ;;  %v14111_v0 = vpop.f32.mrb[109].mxu0  ;;  %14720 = vmatprep.subr.bf16.mxu0 %v15989_v34  ;;  %14761 = vmatpush3.bf16.msra.mxu1 %v15992_v8  ;;  %v6783_v31 = vrot.slane %v16390_v2, 5  ;;  %v16000_v26 = vld [vmem:[%s21153_s1 + $0xea0] sm:$0xff]   ;;  %v16391_v36 = vld [vmem:[%s16563_s26 + $0x290] sm:$0xff] }
 0x20b   : > { %v14155_v61 = vadd.f32 %v14154_v21, %v14153_v57  ;;  %v14112_v9 = vadd.f32 %v14111_v0, %v14110_v38  ;;  %v14113_v39 = vpop.f32.mrb[110].mxu0  ;;  %14762 = vmatprep.subr.bf16.mxu1 %v15994_v23  ;;  %7706 = vmatprep.mubr.bf16.mxu1 %v12730_v40  ;;  %v12542_v8 = vrot.slane %v16391_v36, 9  ;;  %v16002_v40 = vld [vmem:[%s21153_s1 + $0xee8] sm:$0xff]  }
 0x20c   : > { %v14114_v44 = vpop.f32.mrb[111].mxu0  ;;  %7634 = vmatmul.mubr.bf16.gmra.mrb[212].mxu0 %v12717_v48  ;;  %v19691_v47 = vsel %vm17694_vm5, %v12541_v37, %v6783_v31  ;;  %v16001_v48 = vld [vmem:[%s21153_s1 + $0xe68] sm:$0xff]  }
 0x20d   : > { %v14115_v12 = vadd.f32 %v14114_v44, %v14113_v39  ;;  %v4425_v18 = vadd.f32 %v14112_v9, %v19507_v7  ;;  %14721 = vmatpush3.bf16.msra.mxu0 %v15991_v55  ;;  %7641 = vmatprep.mubr.bf16.mxu0 %v12728_v4  ;;  %v16004_v23 = vld [vmem:[%s21153_s1 + $0xea8] sm:$0xff]   ;;  %v16006_v39 = vld [vmem:[%s21153_s1 + $0xef0] sm:$0xff]  }
 0x20e   : > { %14722 = vmatprep.subr.bf16.mxu0 %v15993_v52  ;;  %14763 = vmatpush3.bf16.msra.mxu1 %v15996_v13  ;;  %v16003_v0 = vld [vmem:[%s21153_s1 + $0xe28] sm:$0xff]   ;;  %v16005_v44 = vld [vmem:[%s21153_s1 + $0xe70] sm:$0xff]  }
 0x20f   : > { %v19679_v7 = vadd.f32 %v14152_v25, %v4425_v18  ;;  %v4428_v34 = vadd.f32 %v14115_v12, %v19517_v28  ;;  %14764 = vmatprep.subr.bf16.mxu1 %v15998_v6  ;;  %v6787_v25 = vrot.slane %v19366_v17, 5  ;;  %v12727_v28 = vcombine.low %v17991_v11, %v18063_v27  ;;  %v14212_v13 = vpop.f32.mrb[112].mxu1  ;;  %v16008_v6 = vld [vmem:[%s21153_s1 + $0xeb0] sm:$0xff]  }
 0x210   : > { %v12738_v17 = vcombine.high %v18074_v51, %v19691_v47  ;;  %v14213_v12 = vpop.f32.mrb[113].mxu1 }
 0x211   : > { %v19694_v57 = vadd.f32 %v14155_v61, %v4428_v34  ;;  %v14172_v55 = vpop.f32.mrb[112].mxu0  ;;  %14723 = vmatpush3.bf16.msra.mxu0 %v15995_v19  ;;  %7707 = vmatmul.mubr.bf16.gmra.mrb[216].mxu1 %v12729_v30  ;;  %v19708_v38 = vsel %vm17694_vm5, %v12542_v8, %v6787_v25  ;;  %v19734_v37 = vadd.f32 %v14213_v12, %v14212_v13  ;;  %v14215_v30 = vpop.f32.mrb[114].mxu1  ;;  %v16010_v34 = vld [vmem:[%s21153_s1 + $0xef8] sm:$0xff]   ;;  %v21596_v13 = vld [vmem:[#allocation127_spill] sm:$0xff] }
 0x212   : > { %v14173_v21 = vpop.f32.mrb[113].mxu0  ;;  %14724 = vmatprep.subr.bf16.mxu0 %v15997_v20  ;;  %14765 = vmatpush3.bf16.msra.mxu1 %v16000_v26  ;;  %v12740_v61 = vcombine.high %v18472_v56, %v19708_v38  ;;  %v12739_v19 = vcombine.low %v18472_v56, %v19708_v38  ;;  %v16007_v56 = vld [vmem:[%s21153_s1 + $0xe30] sm:$0xff]   ;;  %v14216_v20 = vpop.f32.mrb[115].mxu1  ;;  %v16009_v8 = vld [vmem:[%s21153_s1 + $0xe78] sm:$0xff]  }
 0x213   : > { %v14174_v11 = vadd.f32 %v14173_v21, %v14172_v55  ;;  %v14175_v27 = vpop.f32.mrb[114].mxu0  ;;  %14766 = vmatprep.subr.bf16.mxu1 %v16002_v40  ;;  %v19749_v26 = vadd.f32 %v14216_v20, %v14215_v30  ;;  %v16012_v55 = vld [vmem:[%s21153_s1 + $0xeb8] sm:$0xff]  }
 0x214   : > { %v14176_v52 = vpop.f32.mrb[115].mxu0  ;;  %7642 = vmatmul.mubr.bf16.gmra.mrb[216].mxu0 %v12727_v28  ;;  %7714 = vmatprep.mubr.bf16.mxu1 %v12740_v61  ;;  %v16011_v40 = vld [vmem:[%s21153_s1 + $0xe38] sm:$0xff]   ;;  %v16013_v61 = vld [vmem:[%s21153_s1 + $0xf40] sm:$0xff]  }
 0x215   : > { %v4531_v4 = vadd.f32 %v14174_v11, %v19566_v5  ;;  %v14177_v9 = vadd.f32 %v14176_v52, %v14175_v27  ;;  %14725 = vmatpush3.bf16.msra.mxu0 %v15999_v29  ;;  %7649 = vmatprep.mubr.bf16.mxu0 %v12738_v17  ;;  %v21593_v29 = vld [vmem:[#allocation109_spill] sm:$0xff]  ;;  %v16014_v11 = vld [vmem:[%s21153_s1 + $0xfc0] sm:$0xff]  }
 0x216   : > { %14726 = vmatprep.subr.bf16.mxu0 %v16001_v48  ;;  %14767 = vmatpush3.bf16.msra.mxu1 %v16004_v23  ;;  %v12713_v23 = vcombine.low %v18555_v42, %v18595_v14 }
 0x217   : > { %v19728_v18 = vadd.f32 %v4531_v4, %v19249_v60  ;;  %v4534_v5 = vadd.f32 %v14177_v9, %v19578_v63  ;;  %14768 = vmatprep.subr.bf16.mxu1 %v16006_v39  ;;  %v12714_v60 = vcombine.high %v18555_v42, %v18595_v14  ;;  %v12737_v63 = vcombine.low %v18074_v51, %v19691_v47  ;;  %v14218_v27 = vpop.f32.mrb[116].mxu1  ;;  %v16016_v4 = vld [vmem:[%s21153_s1 + $0xf80] sm:$0xff]   ;;  %v21595_v14 = vld [vmem:[#allocation129_spill] sm:$0xff] }
 0x218   : > { %v16015_v42 = vld [vmem:[%s21153_s1 + $0xf00] sm:$0xff]  }
 0x219   : > { %v19742_v2 = vadd.f32 %v4534_v5, %v19261_v15  ;;  %v14178_v31 = vpop.f32.mrb[116].mxu0  ;;  %14727 = vmatpush3.bf16.msra.mxu0 %v16003_v0  ;;  %7715 = vmatmul.mubr.bf16.gmra.mrb[220].mxu1 %v12739_v19  ;;  %v21594_v15 = vld [vmem:[#allocation105_spill] sm:$0xff]  ;;  %v14219_v0 = vpop.f32.mrb[117].mxu1  ;;  %v16018_v5 = vld [vmem:[%s21153_s1 + $0xfc8] sm:$0xff]  }
 0x21a   : > { %v14179_v36 = vpop.f32.mrb[117].mxu0  ;;  %v12712_v25 = vcombine.high %v21594_v15, %v21593_v29  ;;  %14728 = vmatprep.subr.bf16.mxu0 %v16005_v44  ;;  %14769 = vmatpush3.bf16.msra.mxu1 %v16008_v6  ;;  %v19778_v9 = vadd.f32 %v14219_v0, %v14218_v27  ;;  %v14221_v39 = vpop.f32.mrb[118].mxu1  ;;  %v16023_v27 = vld [vmem:[%s21153_s1 + $0xf10] sm:$0xff]  }
 0x21b   : > { %v14180_v51 = vadd.f32 %v14179_v36, %v14178_v31  ;;  %v14181_v28 = vpop.f32.mrb[118].mxu0  ;;  %14770 = vmatprep.subr.bf16.mxu1 %v16010_v34  ;;  %7820 = vmatprep.mubr.bf16.mxu1 %v12714_v60  ;;  %v14222_v19 = vpop.f32.mrb[119].mxu1  ;;  %v21597_v60 = vld [vmem:[#allocation112_spill] sm:$0xff]  ;;  %v16020_v34 = vld [vmem:[%s21153_s1 + $0xf88] sm:$0xff]  }
 0x21c   : > { %v14182_v21 = vpop.f32.mrb[119].mxu0  ;;  %7650 = vmatmul.mubr.bf16.gmra.mrb[220].mxu0 %v12737_v63  ;;  %v19793_v6 = vadd.f32 %v14222_v19, %v14221_v39  ;;  %v16019_v36 = vld [vmem:[%s21153_s1 + $0xf08] sm:$0xff]   ;;  %v16026_v39 = vld [vmem:[%s21153_s1 + $0xfd8] sm:$0xff]  }
 0x21d   : > { %v4539_v48 = vadd.f32 %v14180_v51, %v19604_v41  ;;  %v14183_v17 = vadd.f32 %v14182_v21, %v14181_v28  ;;  %14729 = vmatpush3.bf16.msra.mxu0 %v16007_v56  ;;  %7755 = vmatprep.mubr.bf16.mxu0 %v12712_v25  ;;  %v16017_v56 = vld [vmem:[%s21153_s1 + $0xf48] sm:$0xff]   ;;  %v16022_v25 = vld [vmem:[%s21153_s1 + $0xfd0] sm:$0xff]   ;;  %v12723_v28 = vcombine.low %v21596_v13, %v21595_v14 }
 0x21e   : > { %14730 = vmatprep.subr.bf16.mxu0 %v16009_v8  ;;  %14771 = vmatpush3.bf16.msra.mxu1 %v16012_v55  ;;  %v16021_v55 = vld [vmem:[%s21153_s1 + $0xf50] sm:$0xff]  }
 0x21f   : > { %v19772_v52 = vadd.f32 %v4539_v48, %v19291_v58  ;;  %v4542_v41 = vadd.f32 %v14183_v17, %v19614_v43  ;;  %14836 = vmatprep.subr.bf16.mxu1 %v16014_v11  ;;  %v12724_v58 = vcombine.high %v21596_v13, %v21595_v14  ;;  %v12711_v43 = vcombine.low %v21594_v15, %v21593_v29  ;;  %v14224_v51 = vpop.f32.mrb[120].mxu1  ;;  %v16024_v48 = vld [vmem:[%s21153_s1 + $0xf90] sm:$0xff]   ;;  %v16025_v13 = vld [vmem:[%s21153_s1 + $0xf58] sm:$0xff]  }
 0x221   : > { %v19786_v44 = vadd.f32 %v4542_v41, %v19299_v1  ;;  %v14184_v12 = vpop.f32.mrb[120].mxu0  ;;  %14731 = vmatpush3.bf16.msra.mxu0 %v16011_v40  ;;  %7821 = vmatmul.mubr.bf16.vlgmr.msra.gmra.mrb[224].mxu1 %v12713_v23  ;;  %v21598_v1 = vld [vmem:[#allocation110_spill] sm:$0xff]  ;;  %v14225_v40 = vpop.f32.mrb[121].mxu1  ;;  %v21599_v23 = vld [vmem:[#allocation133_spill] sm:$0xff] }
 0x222   : > { %v14185_v30 = vpop.f32.mrb[121].mxu0  ;;  %v12722_v20 = vcombine.high %v21598_v1, %v21597_v60  ;;  %14796 = vmatprep.subr.bf16.mxu0 %v16013_v61  ;;  %14837 = vmatpush3.bf16.msra.mxu1 %v16016_v4  ;;  %v19822_v17 = vadd.f32 %v14225_v40, %v14224_v51  ;;  %v14227_v11 = vpop.f32.mrb[122].mxu1  ;;  %v21600_v61 = vld [vmem:[#allocation130_spill] sm:$0xff] }
 0x223   : > { %v14186_v63 = vadd.f32 %v14185_v30, %v14184_v12  ;;  %v14187_v31 = vpop.f32.mrb[122].mxu0  ;;  %14838 = vmatprep.subr.bf16.mxu1 %v16018_v5  ;;  %7828 = vmatprep.mubr.bf16.mxu1 %v12724_v58  ;;  %v14228_v0 = vpop.f32.mrb[123].mxu1  ;;  %v21601_v58 = vld [vmem:[#allocation118_spill] sm:$0xff]  ;;  %v16028_v5 = vld [vmem:[%s21153_s1 + $0xf98] sm:$0xff]  }
 0x224   : > { %v14188_v8 = vpop.f32.mrb[123].mxu0  ;;  %7756 = vmatmul.mubr.bf16.vlgmr.msra.gmra.mrb[224].mxu0 %v12711_v43  ;;  %v16027_v30 = vld [vmem:[%s21153_s1 + $0xf18] sm:$0xff]   ;;  %v16031_v51 = vld [vmem:[%s21153_s1 + $0xf20] sm:$0xff]  }
 0x225   : > { %v4547_v29 = vadd.f32 %v14186_v63, %v19636_v10  ;;  %v14189_v15 = vadd.f32 %v14188_v8, %v14187_v31  ;;  %14797 = vmatpush3.bf16.msra.mxu0 %v16015_v42  ;;  %7763 = vmatprep.mubr.bf16.mxu0 %v12722_v20  ;;  %v19837_v42 = vadd.f32 %v14228_v0, %v14227_v11  ;;  %v16030_v20 = vld [vmem:[%s21153_s1 + $0xfe0] sm:$0xff]   ;;  %v19888_v0 = vld [vmem:[%s16563_s26 + $0x298] sm:$0xff] }
 0x226   : > { %14798 = vmatprep.subr.bf16.mxu0 %v16017_v56  ;;  %14839 = vmatpush3.bf16.msra.mxu1 %v16020_v34  ;;  %v12733_v31 = vcombine.low %v21600_v61, %v21599_v23  ;;  %v16029_v34 = vld [vmem:[%s21153_s1 + $0xf60] sm:$0xff]  }
 0x227   : > { %v19816_v21 = vadd.f32 %v4547_v29, %v19329_v53  ;;  %v4550_v10 = vadd.f32 %v14189_v15, %v19647_v49  ;;  %14840 = vmatprep.subr.bf16.mxu1 %v16022_v25  ;;  %v12734_v53 = vcombine.high %v21600_v61, %v21599_v23  ;;  %v12721_v49 = vcombine.low %v21598_v1, %v21597_v60  ;;  %v14230_v63 = vpop.f32.mrb[124].mxu1  ;;  %v16032_v29 = vld [vmem:[%s21153_s1 + $0xfa0] sm:$0xff]  }
 0x229   : > { %v19830_v41 = vadd.f32 %v4550_v10, %v19337_v46  ;;  %v14190_v4 = vpop.f32.mrb[124].mxu0  ;;  %14799 = vmatpush3.bf16.msra.mxu0 %v16019_v36  ;;  %7829 = vmatmul.mubr.bf16.gmra.mrb[228].mxu1 %v12723_v28  ;;  %v21602_v46 = vld [vmem:[#allocation113_spill] sm:$0xff]  ;;  %v14231_v36 = vpop.f32.mrb[125].mxu1  ;;  %v16033_v10 = vld [vmem:[%s21153_s1 + $0xf68] sm:$0xff]  }
 0x22a   : > { %v14191_v14 = vpop.f32.mrb[125].mxu0  ;;  %v12732_v19 = vcombine.high %v21602_v46, %v21601_v58  ;;  %14800 = vmatprep.subr.bf16.mxu0 %v16021_v55  ;;  %14841 = vmatpush3.bf16.msra.mxu1 %v16024_v48  ;;  %v19866_v15 = vadd.f32 %v14231_v36, %v14230_v63  ;;  %v14233_v25 = vpop.f32.mrb[126].mxu1  ;;  %v16034_v48 = vld [vmem:[%s21153_s1 + $0xfe8] sm:$0xff]  }
 0x22b   : > { %v14192_v43 = vadd.f32 %v14191_v14, %v14190_v4  ;;  %v14193_v12 = vpop.f32.mrb[126].mxu0  ;;  %14842 = vmatprep.subr.bf16.mxu1 %v16026_v39  ;;  %7836 = vmatprep.mubr.bf16.mxu1 %v12734_v53  ;;  %v14234_v28 = vpop.f32.mrb[127].mxu1  ;;  %v16393_v4 = vld [vmem:[%s16563_s26 + $0x2c0] sm:$0x11] }
 0x22c   : > { %v14194_v56 = vpop.f32.mrb[127].mxu0  ;;  %7764 = vmatmul.mubr.bf16.gmra.mrb[228].mxu0 %v12721_v49  ;;  %v19876_v40 = vadd.f32 %v14234_v28, %v14233_v25  ;;  %v12543_v49 = vrot.slane %v19888_v0, 9  ;;  %v6791_v39 = vrot.slane %v16393_v4, 5 }
 0x22d   : > { %v4555_v60 = vadd.f32 %v14192_v43, %v19679_v7  ;;  %v14195_v1 = vadd.f32 %v14194_v56, %v14193_v12  ;;  %14801 = vmatpush3.bf16.msra.mxu0 %v16023_v27  ;;  %7771 = vmatprep.mubr.bf16.mxu0 %v12732_v19  ;;  %v16036_v27 = vld [vmem:[%s21153_s1 + $0xfa8] sm:$0xff]   ;;  %v6795_v19 = vrot.slane %v19533_v16, 5 }
 0x22e   : > { %14802 = vmatprep.subr.bf16.mxu0 %v16025_v13  ;;  %14843 = vmatpush3.bf16.msra.mxu1 %v16028_v5  ;;  %v16035_v12 = vld [vmem:[%s21153_s1 + $0xf28] sm:$0xff]  }
 0x22f   : > { %v19860_v8 = vadd.f32 %v4555_v60, %v19360_v59  ;;  %v4558_v7 = vadd.f32 %v14195_v1, %v19694_v57  ;;  %14844 = vmatprep.subr.bf16.mxu1 %v16030_v20  ;;  %v12731_v57 = vcombine.low %v21602_v46, %v21601_v58  ;;  %v14292_v11 = vpop.f32.mrb[128].mxu1  ;;  %v12544_v46 = vrot.slane %v19526_v33, 9  ;;  %v21603_v60 = vld [vmem:[#allocation119_spill] sm:$0xff] }
 0x230   : > { %v14293_v53 = vpop.f32.mrb[129].mxu1 }
 0x231   : > { %v19872_v59 = vadd.f32 %v4558_v7, %v19375_v62  ;;  %v14252_v55 = vpop.f32.mrb[128].mxu0  ;;  %14803 = vmatpush3.bf16.msra.mxu0 %v16027_v30  ;;  %7837 = vmatmul.mubr.bf16.gmra.mrb[232].mxu1 %v12733_v31  ;;  %v14294_v13 = vadd.f32 %v14293_v53, %v14292_v11  ;;  %v14295_v58 = vpop.f32.mrb[130].mxu1  ;;  %v19900_v30 = vsel %vm17694_vm5, %v12543_v49, %v6791_v39  ;;  %v16037_v7 = vld [vmem:[%s21153_s1 + $0xf70] sm:$0xff]   ;;  %v16043_v53 = vld [vmem:[%s21153_s1 + $0xf38] sm:$0xff]  }
 0x232   : > { %v14253_v62 = vpop.f32.mrb[129].mxu0  ;;  %14804 = vmatprep.subr.bf16.mxu0 %v16029_v34  ;;  %14845 = vmatpush3.bf16.msra.mxu1 %v16032_v29  ;;  %v14296_v56 = vpop.f32.mrb[131].mxu1  ;;  %v12742_v1 = vcombine.high %v21603_v60, %v19900_v30  ;;  %v19906_v33 = vsel %vm17694_vm5, %v12544_v46, %v6795_v19  ;;  %v21604_v34 = vld [vmem:[#allocation134_spill] sm:$0xff]  ;;  %v16044_v49 = vld [vmem:[%s21153_s1 + $0xfb8] sm:$0xff]   ;;  %v21605_v39 = vld [vmem:[#allocation72_spill] sm:$0xff] }
 0x233   : > { %v14254_v23 = vadd.f32 %v14253_v62, %v14252_v55  ;;  %v14255_v61 = vpop.f32.mrb[130].mxu0  ;;  %14846 = vmatprep.subr.bf16.mxu1 %v16034_v48  ;;  %v14297_v16 = vadd.f32 %v14296_v56, %v14295_v58  ;;  %v12744_v36 = vcombine.high %v21604_v34, %v19906_v33  ;;  %v12743_v25 = vcombine.low %v21604_v34, %v19906_v33  ;;  %v16042_v62 = vld [vmem:[%s21153_s1 + $0xff8] sm:$0xff]   ;;  %v21607_v34 = vld [vmem:[#allocation75_spill] sm:$0xff] }
 0x234   : > { %v14256_v14 = vpop.f32.mrb[131].mxu0  ;;  %7772 = vmatmul.mubr.bf16.gmra.mrb[232].mxu0 %v12731_v57  ;;  %v12741_v55 = vcombine.low %v21603_v60, %v19900_v30  ;;  %v21606_v19 = vld [vmem:[#allocation53_spill] sm:$0xff] }
 0x235   : > { %v5405_v43 = vadd.f32 %v14254_v23, %v19734_v37  ;;  %v14257_v5 = vadd.f32 %v14256_v14, %v14255_v61  ;;  %14805 = vmatpush3.bf16.msra.mxu0 %v16031_v51  ;;  %v16038_v37 = vld [vmem:[%s21153_s1 + $0xff0] sm:$0xff]   ;;  %7779 = vmatprep.mubr.bf16.mxu0 %v12742_v1  ;;  %v16041_v23 = vld [vmem:[%s21153_s1 + $0xf78] sm:$0xff]   ;;  %v16048_v1 = vld [vmem:[%s21153_s1 + $0x1080] sm:$0xff]  }
 0x236   : > { %14806 = vmatprep.subr.bf16.mxu0 %v16033_v10  ;;  %14847 = vmatpush3.bf16.msra.mxu1 %v16036_v27  ;;  %v16040_v51 = vld [vmem:[%s21153_s1 + $0xfb0] sm:$0xff]  }
 0x237   : > { %v14298_v20 = vpop.f32.mrb[132].mxu1  ;;  %v5408_v63 = vadd.f32 %v14257_v5, %v19749_v26  ;;  %v19912_v31 = vadd.f32 %v14294_v13, %v5405_v43  ;;  %14848 = vmatprep.subr.bf16.mxu1 %v16038_v37  ;;  %7844 = vmatprep.mubr.bf16.mxu1 %v12744_v36  ;;  %v16039_v10 = vld [vmem:[%s21153_s1 + $0xf30] sm:$0xff]   ;;  %v16046_v43 = vld [vmem:[%s21153_s1 + $0x10c0] sm:$0xff]  }
 0x238   : > { %v14299_v29 = vpop.f32.mrb[133].mxu1 }
 0x239   : > { %v14300_v26 = vadd.f32 %v14299_v29, %v14298_v20  ;;  %v14301_v28 = vpop.f32.mrb[134].mxu1  ;;  %v19924_v57 = vadd.f32 %v14297_v16, %v5408_v63  ;;  %v14258_v48 = vpop.f32.mrb[132].mxu0  ;;  %14807 = vmatpush3.bf16.msra.mxu0 %v16035_v12  ;;  %7845 = vmatmul.mubr.bf16.gmra.mrb[236].mxu1 %v12743_v25  ;;  %v16049_v25 = vld [vmem:[%s21153_s1 + $0x1048] sm:$0xff]  }
 0x23a   : > { %v14259_v11 = vpop.f32.mrb[133].mxu0  ;;  %14808 = vmatprep.subr.bf16.mxu0 %v16037_v7  ;;  %14849 = vmatpush3.bf16.msra.mxu1 %v16040_v51  ;;  %v14302_v14 = vpop.f32.mrb[135].mxu1  ;;  %v16050_v7 = vld [vmem:[%s21153_s1 + $0x10c8] sm:$0xff]  }
 0x23b   : > { %v14260_v27 = vadd.f32 %v14259_v11, %v14258_v48  ;;  %v14261_v61 = vpop.f32.mrb[134].mxu0  ;;  %14850 = vmatprep.subr.bf16.mxu1 %v16042_v62  ;;  %8634 = vmatprep.mubr.bf16.mxu1 %v21605_v39  ;;  %v14303_v46 = vadd.f32 %v14302_v14, %v14301_v28  ;;  %v16052_v28 = vld [vmem:[%s21153_s1 + $0x1088] sm:$0xff]   ;;  %v21609_v11 = vld [vmem:[#allocation54_spill] sm:$0xff] }
 0x23c   : > { %v14262_v4 = vpop.f32.mrb[135].mxu0  ;;  %7780 = vmatmul.mubr.bf16.gmra.mrb[236].mxu0 %v12741_v55 }
 0x23d   : > { %v5413_v13 = vadd.f32 %v14260_v27, %v19778_v9  ;;  %v14263_v58 = vadd.f32 %v14262_v4, %v14261_v61  ;;  %14809 = vmatpush3.bf16.msra.mxu0 %v16039_v10  ;;  %8569 = vmatprep.mubr.bf16.mxu0 %v21606_v19  ;;  %v16045_v9 = vld [vmem:[%s21153_s1 + $0x1040] sm:$0xff]   ;;  %v21608_v10 = vld [vmem:[#allocation76_spill] sm:$0xff]  ;;  %v21610_v61 = vld [vmem:[#allocation55_spill] sm:$0xff] }
 0x23e   : > { %14810 = vmatprep.subr.bf16.mxu0 %v16041_v23  ;;  %14851 = vmatpush3.bf16.msra.mxu1 %v16044_v49 }
 0x23f   : > { %v14304_v12 = vpop.f32.mrb[136].mxu1  ;;  %v5416_v5 = vadd.f32 %v14263_v58, %v19793_v6  ;;  %v19950_v56 = vadd.f32 %v14300_v26, %v5413_v13  ;;  %14916 = vmatprep.subr.bf16.mxu1 %v16046_v43  ;;  %v16047_v6 = vld [vmem:[%s21153_s1 + $0x1000] sm:$0xff]   ;;  %v16051_v26 = vld [vmem:[%s21153_s1 + $0x1008] sm:$0xff]   ;;  %v16056_v13 = vld [vmem:[%s21153_s1 + $0x1090] sm:$0xff]  }
 0x240   : > { %v14305_v60 = vpop.f32.mrb[137].mxu1 }
 0x241   : > { %v14306_v16 = vadd.f32 %v14305_v60, %v14304_v12  ;;  %v14307_v37 = vpop.f32.mrb[138].mxu1  ;;  %v19958_v20 = vadd.f32 %v14303_v46, %v5416_v5  ;;  %v14264_v63 = vpop.f32.mrb[136].mxu0  ;;  %14811 = vmatpush3.bf16.msra.mxu0 %v16043_v53  ;;  %8635 = vmatmul.mubr.bf16.vlgmr.msra.gmra.mrb[240].mxu1 %v21607_v34  ;;  %v16054_v53 = vld [vmem:[%s21153_s1 + $0x10d0] sm:$0xff]   ;;  %v21611_v12 = vld [vmem:[#allocation79_spill] sm:$0xff] }
 0x242   : > { %v14265_v36 = vpop.f32.mrb[137].mxu0  ;;  %14876 = vmatprep.subr.bf16.mxu0 %v16045_v9  ;;  %14917 = vmatpush3.bf16.msra.mxu1 %v16048_v1  ;;  %v14308_v48 = vpop.f32.mrb[139].mxu1  ;;  %v16058_v9 = vld [vmem:[%s21153_s1 + $0x10d8] sm:$0xff]   ;;  %v21612_v34 = vld [vmem:[#allocation80_spill] sm:$0xff] }
 0x243   : > { %v14266_v29 = vadd.f32 %v14265_v36, %v14264_v63  ;;  %v14267_v51 = vpop.f32.mrb[138].mxu0  ;;  %14918 = vmatprep.subr.bf16.mxu1 %v16050_v7  ;;  %8642 = vmatprep.mubr.bf16.mxu1 %v21608_v10  ;;  %v14309_v23 = vadd.f32 %v14308_v48, %v14307_v37  ;;  %v16057_v1 = vld [vmem:[%s21153_s1 + $0x1058] sm:$0xff]   ;;  %v21613_v7 = vld [vmem:[#allocation60_spill] sm:$0xff] }
 0x244   : > { %v14268_v55 = vpop.f32.mrb[139].mxu0  ;;  %8570 = vmatmul.mubr.bf16.vlgmr.msra.gmra.mrb[240].mxu0 %v21609_v11  ;;  %v16059_v37 = vld [vmem:[%s21153_s1 + $0x1018] sm:$0xff]  }
 0x245   : > { %v5421_v62 = vadd.f32 %v14266_v29, %v19822_v17  ;;  %v14269_v27 = vadd.f32 %v14268_v55, %v14267_v51  ;;  %14877 = vmatpush3.bf16.msra.mxu0 %v16047_v6  ;;  %8577 = vmatprep.mubr.bf16.mxu0 %v21610_v61  ;;  %v16053_v17 = vld [vmem:[%s21153_s1 + $0x1050] sm:$0xff]   ;;  %v16060_v6 = vld [vmem:[%s21153_s1 + $0x1098] sm:$0xff]  }
 0x246   : > { %14878 = vmatprep.subr.bf16.mxu0 %v16049_v25  ;;  %14919 = vmatpush3.bf16.msra.mxu1 %v16052_v28  ;;  %v16062_v28 = vld [vmem:[%s21153_s1 + $0x10e0] sm:$0xff]  }
 0x247   : > { %v14310_v49 = vpop.f32.mrb[140].mxu1  ;;  %v5424_v4 = vadd.f32 %v14269_v27, %v19837_v42  ;;  %v19984_v39 = vadd.f32 %v14306_v16, %v5421_v62  ;;  %14920 = vmatprep.subr.bf16.mxu1 %v16054_v53  ;;  %v16055_v42 = vld [vmem:[%s21153_s1 + $0x1010] sm:$0xff]   ;;  %v16064_v62 = vld [vmem:[%s21153_s1 + $0x10a0] sm:$0xff]  }
 0x248   : > { %v14311_v14 = vpop.f32.mrb[141].mxu1 }
 0x249   : > { %v14312_v58 = vadd.f32 %v14311_v14, %v14310_v49  ;;  %v14313_v46 = vpop.f32.mrb[142].mxu1  ;;  %v19992_v19 = vadd.f32 %v14309_v23, %v5424_v4  ;;  %v14270_v43 = vpop.f32.mrb[140].mxu0  ;;  %14879 = vmatpush3.bf16.msra.mxu0 %v16051_v26  ;;  %8643 = vmatmul.mubr.bf16.gmra.mrb[244].mxu1 %v21611_v12  ;;  %v21614_v26 = vld [vmem:[#allocation61_spill] sm:$0xff]  ;;  %v21615_v49 = vld [vmem:[#allocation82_spill] sm:$0xff]  ;;  %v20045_v12 = vld [vmem:[%s16563_s26 + $0x2d0] sm:$0xff] }
 0x24a   : > { %v14271_v5 = vpop.f32.mrb[141].mxu0  ;;  %14880 = vmatprep.subr.bf16.mxu0 %v16053_v17  ;;  %14921 = vmatpush3.bf16.msra.mxu1 %v16056_v13  ;;  %v14314_v36 = vpop.f32.mrb[143].mxu1  ;;  %v16066_v17 = vld [vmem:[%s21153_s1 + $0x10e8] sm:$0xff]  }
 0x24b   : > { %v14272_v60 = vadd.f32 %v14271_v5, %v14270_v43  ;;  %v14273_v16 = vpop.f32.mrb[142].mxu0  ;;  %14922 = vmatprep.subr.bf16.mxu1 %v16058_v9  ;;  %8650 = vmatprep.mubr.bf16.mxu1 %v21612_v34  ;;  %v14315_v51 = vadd.f32 %v14314_v36, %v14313_v46  ;;  %v16065_v13 = vld [vmem:[%s21153_s1 + $0x1068] sm:$0xff]   ;;  %v21616_v9 = vld [vmem:[#allocation64_spill] sm:$0xff] }
 0x24c   : > { %v14274_v63 = vpop.f32.mrb[143].mxu0  ;;  %8578 = vmatmul.mubr.bf16.gmra.mrb[244].mxu0 %v21613_v7  ;;  %v16067_v46 = vld [vmem:[%s21153_s1 + $0x1028] sm:$0xff]  }
 0x24d   : > { %v5429_v29 = vadd.f32 %v14272_v60, %v19866_v15  ;;  %v14275_v25 = vadd.f32 %v14274_v63, %v14273_v16  ;;  %14881 = vmatpush3.bf16.msra.mxu0 %v16055_v42  ;;  %8585 = vmatprep.mubr.bf16.mxu0 %v21614_v26  ;;  %v16061_v15 = vld [vmem:[%s21153_s1 + $0x1060] sm:$0xff]   ;;  %v16068_v42 = vld [vmem:[%s21153_s1 + $0x10a8] sm:$0xff]   ;;  %v16074_v26 = vld [vmem:[%s21153_s1 + $0x10f0] sm:$0xff]  }
 0x24e   : > { %14882 = vmatprep.subr.bf16.mxu0 %v16057_v1  ;;  %14923 = vmatpush3.bf16.msra.mxu1 %v16060_v6  ;;  %v16394_v16 = vld [vmem:[%s16563_s26 + $0x280] sm:$0xff]  ;;  %v20052_v6 = vld [vmem:[%s16563_s26 + $0x2d8] sm:$0xff] }
 0x24f   : > { %v14372_v55 = vpop.f32.mrb[144].mxu1  ;;  %v5432_v10 = vadd.f32 %v14275_v25, %v19876_v40  ;;  %v20018_v48 = vadd.f32 %v14312_v58, %v5429_v29  ;;  %14924 = vmatprep.subr.bf16.mxu1 %v16062_v28  ;;  %v16063_v40 = vld [vmem:[%s21153_s1 + $0x1020] sm:$0xff]   ;;  %v12988_v36 = vcombine.high %v19670_v54, %v20052_v6  ;;  %v12987_v7 = vcombine.low %v19670_v54, %v20052_v6  ;;  %v16073_v29 = vld [vmem:[%s21153_s1 + $0x1070] sm:$0xff]  }
 0x250   : > { %v14373_v11 = vpop.f32.mrb[145].mxu1  ;;  %v16075_v54 = vld [vmem:[%s21153_s1 + $0x1030] sm:$0xff]  }
 0x251   : > { %v14374_v27 = vadd.f32 %v14373_v11, %v14372_v55  ;;  %v14375_v23 = vpop.f32.mrb[146].mxu1  ;;  %v20026_v61 = vadd.f32 %v14315_v51, %v5432_v10  ;;  %v14332_v53 = vpop.f32.mrb[144].mxu0  ;;  %14883 = vmatpush3.bf16.msra.mxu0 %v16059_v37  ;;  %8651 = vmatmul.mubr.bf16.gmra.mrb[248].mxu1 %v21615_v49  ;;  %v12986_v37 = vcombine.high %v16394_v16, %v20045_v12 }
 0x252   : > { %v14333_v4 = vpop.f32.mrb[145].mxu0  ;;  %14884 = vmatprep.subr.bf16.mxu0 %v16061_v15  ;;  %14925 = vmatpush3.bf16.msra.mxu1 %v16064_v62  ;;  %v14376_v5 = vpop.f32.mrb[147].mxu1  ;;  %v16076_v62 = vld [vmem:[%s21153_s1 + $0x10b0] sm:$0xff]  }
 0x253   : > { %v14334_v14 = vadd.f32 %v14333_v4, %v14332_v53  ;;  %v14335_v58 = vpop.f32.mrb[146].mxu0  ;;  %14926 = vmatprep.subr.bf16.mxu1 %v16066_v17  ;;  %v14377_v63 = vadd.f32 %v14376_v5, %v14375_v23  ;;  %8658 = vmatprep.mubr.bf16.mxu1 %v12988_v36  ;;  %v16077_v53 = vld [vmem:[%s21153_s1 + $0x1078] sm:$0xff]   ;;  %v21618_v5 = vld [vmem:[#allocation71_spill] sm:$0xff] }
 0x254   : > { %v14336_v43 = vpop.f32.mrb[147].mxu0  ;;  %8586 = vmatmul.mubr.bf16.gmra.mrb[248].mxu0 %v21616_v9  ;;  %v16078_v4 = vld [vmem:[%s21153_s1 + $0x10f8] sm:$0xff]   ;;  %v16081_v9 = vld [vmem:[%s21153_s1 + $0x1140] sm:$0xff]  }
 0x255   : > { %v5535_v60 = vadd.f32 %v14334_v14, %v19912_v31  ;;  %v14337_v1 = vadd.f32 %v14336_v43, %v14335_v58  ;;  %14885 = vmatpush3.bf16.msra.mxu0 %v16063_v40  ;;  %8593 = vmatprep.mubr.bf16.mxu0 %v12986_v37  ;;  %v16079_v14 = vld [vmem:[%s21153_s1 + $0x1038] sm:$0xff]   ;;  %v21617_v58 = vld [vmem:[#allocation84_spill] sm:$0xff] }
 0x256   : > { %14886 = vmatprep.subr.bf16.mxu0 %v16065_v13  ;;  %14927 = vmatpush3.bf16.msra.mxu1 %v16068_v42 }
 0x257   : > { %v14378_v34 = vpop.f32.mrb[148].mxu1  ;;  %v5538_v25 = vadd.f32 %v14337_v1, %v19924_v57  ;;  %v5600_v51 = vadd.f32 %v14374_v27, %v5535_v60  ;;  %v12985_v57 = vcombine.low %v16394_v16, %v20045_v12  ;;  %14928 = vmatprep.subr.bf16.mxu1 %v16074_v26  ;;  %v16082_v16 = vld [vmem:[%s21153_s1 + $0x11c0] sm:$0xff]  }
 0x258   : > { %v14379_v31 = vpop.f32.mrb[149].mxu1 }
 0x259   : > { %v14380_v28 = vadd.f32 %v14379_v31, %v14378_v34  ;;  %v14381_v55 = vpop.f32.mrb[150].mxu1  ;;  %v20069_v15 = vadd.f32 %v5600_v51, %v19728_v18  ;;  %v5603_v11 = vadd.f32 %v14377_v63, %v5538_v25  ;;  %v14338_v27 = vpop.f32.mrb[148].mxu0  ;;  %14887 = vmatpush3.bf16.msra.mxu0 %v16067_v46  ;;  %8659 = vmatmul.mubr.bf16.gmra.mrb[252].mxu1 %v12987_v7  ;;  %v16083_v34 = vld [vmem:[%s21153_s1 + $0x1100] sm:$0xff]   ;;  %v21619_v51 = vld [vmem:[#allocation87_spill] sm:$0xff] }
 0x25a   : > { %v14382_v10 = vpop.f32.mrb[151].mxu1  ;;  %v14339_v40 = vpop.f32.mrb[149].mxu0  ;;  %14888 = vmatprep.subr.bf16.mxu0 %v16073_v29  ;;  %14929 = vmatpush3.bf16.msra.mxu1 %v16076_v62  ;;  %v21620_v62 = vld [vmem:[#allocation88_spill] sm:$0xff] }
 0x25b   : > { %v14383_v23 = vadd.f32 %v14382_v10, %v14381_v55  ;;  %v20079_v18 = vadd.f32 %v5603_v11, %v19742_v2  ;;  %v14340_v49 = vadd.f32 %v14339_v40, %v14338_v27  ;;  %v14341_v17 = vpop.f32.mrb[150].mxu0  ;;  %8764 = vmatprep.mubr.bf16.mxu1 %v21617_v58  ;;  %14930 = vmatprep.subr.bf16.mxu1 %v16078_v4  ;;  %v16080_v2 = vld [vmem:[%s21153_s1 + $0x10b8] sm:$0xff]   ;;  %v16087_v11 = vld [vmem:[%s21153_s1 + $0x1108] sm:$0xff]   ;;  %v16089_v4 = vld [vmem:[%s21153_s1 + $0x1150] sm:$0xff]  }
 0x25c   : > { %v14342_v13 = vpop.f32.mrb[151].mxu0  ;;  %8594 = vmatmul.mubr.bf16.gmra.mrb[252].mxu0 %v12985_v57  ;;  %v21621_v27 = vld [vmem:[#allocation73_spill] sm:$0xff] }
 0x25d   : > { %v5543_v46 = vadd.f32 %v14340_v49, %v19950_v56  ;;  %v14343_v42 = vadd.f32 %v14342_v13, %v14341_v17  ;;  %14889 = vmatpush3.bf16.msra.mxu0 %v16075_v54  ;;  %8699 = vmatprep.mubr.bf16.mxu0 %v21618_v5  ;;  %v16086_v54 = vld [vmem:[%s21153_s1 + $0x11c8] sm:$0xff]   ;;  %v21622_v49 = vld [vmem:[#allocation74_spill] sm:$0xff]  ;;  %v16090_v13 = vld [vmem:[%s21153_s1 + $0x11d0] sm:$0xff]  }
 0x25e   : > { %14890 = vmatprep.subr.bf16.mxu0 %v16077_v53  ;;  %14931 = vmatpush3.bf16.msra.mxu1 %v16080_v2  ;;  %v16091_v2 = vld [vmem:[%s21153_s1 + $0x1110] sm:$0xff]  }
 0x25f   : > { %v14384_v43 = vpop.f32.mrb[152].mxu1  ;;  %v5546_v1 = vadd.f32 %v14343_v42, %v19958_v20  ;;  %v5608_v56 = vadd.f32 %v14380_v28, %v5543_v46  ;;  %14996 = vmatprep.subr.bf16.mxu1 %v16082_v16  ;;  %v16084_v20 = vld [vmem:[%s21153_s1 + $0x1180] sm:$0xff]   ;;  %v16085_v28 = vld [vmem:[%s21153_s1 + $0x1148] sm:$0xff]   ;;  %v16093_v16 = vld [vmem:[%s21153_s1 + $0x1158] sm:$0xff]  }
 0x260   : > { %v14385_v60 = vpop.f32.mrb[153].mxu1 }
 0x261   : > { %v14386_v37 = vadd.f32 %v14385_v60, %v14384_v43  ;;  %v14387_v63 = vpop.f32.mrb[154].mxu1  ;;  %v20104_v7 = vadd.f32 %v5608_v56, %v19772_v52  ;;  %v5611_v29 = vadd.f32 %v14383_v23, %v5546_v1  ;;  %v14344_v31 = vpop.f32.mrb[152].mxu0  ;;  %14891 = vmatpush3.bf16.msra.mxu0 %v16079_v14  ;;  %8765 = vmatmul.mubr.bf16.vlgmr.msra.gmra.mrb[0].mxu1 %v21619_v51  ;;  %v16088_v23 = vld [vmem:[%s21153_s1 + $0x1188] sm:$0xff]  }
 0x262   : > { %v14388_v36 = vpop.f32.mrb[155].mxu1  ;;  %v14345_v26 = vpop.f32.mrb[153].mxu0  ;;  %14956 = vmatprep.subr.bf16.mxu0 %v16081_v9  ;;  %14997 = vmatpush3.bf16.msra.mxu1 %v16084_v20  ;;  %v21623_v1 = vld [vmem:[#allocation91_spill] sm:$0xff]  ;;  %v21624_v20 = vld [vmem:[#allocation92_spill] sm:$0xff] }
 0x263   : > { %v14389_v25 = vadd.f32 %v14388_v36, %v14387_v63  ;;  %v20114_v55 = vadd.f32 %v5611_v29, %v19786_v44  ;;  %v14346_v52 = vadd.f32 %v14345_v26, %v14344_v31  ;;  %v14347_v10 = vpop.f32.mrb[154].mxu0  ;;  %8772 = vmatprep.mubr.bf16.mxu1 %v21620_v62  ;;  %14998 = vmatprep.subr.bf16.mxu1 %v16086_v54  ;;  %v16094_v63 = vld [vmem:[%s21153_s1 + $0x11d8] sm:$0xff]  }
 0x264   : > { %v14348_v57 = vpop.f32.mrb[155].mxu0  ;;  %8700 = vmatmul.mubr.bf16.vlgmr.msra.gmra.mrb[0].mxu0 %v21621_v27  ;;  %v16095_v36 = vld [vmem:[%s21153_s1 + $0x1118] sm:$0xff]   ;;  %v16099_v27 = vld [vmem:[%s21153_s1 + $0x1120] sm:$0xff]  }
 0x265   : > { %v5551_v44 = vadd.f32 %v14346_v52, %v19984_v39  ;;  %v14349_v40 = vadd.f32 %v14348_v57, %v14347_v10  ;;  %14957 = vmatpush3.bf16.msra.mxu0 %v16083_v34  ;;  %8707 = vmatprep.mubr.bf16.mxu0 %v21622_v49  ;;  %v21625_v31 = vld [vmem:[#allocation77_spill] sm:$0xff]  ;;  %v16097_v52 = vld [vmem:[%s21153_s1 + $0x1160] sm:$0xff]  }
 0x266   : > { %14958 = vmatprep.subr.bf16.mxu0 %v16085_v28  ;;  %14999 = vmatpush3.bf16.msra.mxu1 %v16088_v23  ;;  %v21626_v28 = vld [vmem:[#allocation78_spill] sm:$0xff] }
 0x267   : > { %v14390_v53 = vpop.f32.mrb[156].mxu1  ;;  %v5554_v14 = vadd.f32 %v14349_v40, %v19992_v19  ;;  %v5616_v39 = vadd.f32 %v14386_v37, %v5551_v44  ;;  %15000 = vmatprep.subr.bf16.mxu1 %v16090_v13  ;;  %v16092_v19 = vld [vmem:[%s21153_s1 + $0x1190] sm:$0xff]   ;;  %v16102_v13 = vld [vmem:[%s21153_s1 + $0x11e8] sm:$0xff]  }
 0x268   : > { %v14391_v17 = vpop.f32.mrb[157].mxu1 }
 0x269   : > { %v14392_v58 = vadd.f32 %v14391_v17, %v14390_v53  ;;  %v14393_v46 = vpop.f32.mrb[158].mxu1  ;;  %v20140_v43 = vadd.f32 %v5616_v39, %v19816_v21  ;;  %v5619_v5 = vadd.f32 %v14389_v25, %v5554_v14  ;;  %v14350_v9 = vpop.f32.mrb[156].mxu0  ;;  %14959 = vmatpush3.bf16.msra.mxu0 %v16087_v11  ;;  %8773 = vmatmul.mubr.bf16.gmra.mrb[4].mxu1 %v21623_v1  ;;  %v16096_v25 = vld [vmem:[%s21153_s1 + $0x1198] sm:$0xff]   ;;  %v16098_v11 = vld [vmem:[%s21153_s1 + $0x11e0] sm:$0xff]   ;;  %v16101_v14 = vld [vmem:[%s21153_s1 + $0x1168] sm:$0xff]  }
 0x26a   : > { %v14394_v42 = vpop.f32.mrb[159].mxu1  ;;  %v14351_v56 = vpop.f32.mrb[157].mxu0  ;;  %14960 = vmatprep.subr.bf16.mxu0 %v16089_v4  ;;  %15001 = vmatpush3.bf16.msra.mxu1 %v16092_v19  ;;  %v21627_v4 = vld [vmem:[#allocation94_spill] sm:$0xff] }
 0x26b   : > { %v14395_v60 = vadd.f32 %v14394_v42, %v14393_v46  ;;  %v20150_v37 = vadd.f32 %v5619_v5, %v19830_v41  ;;  %v14352_v21 = vadd.f32 %v14351_v56, %v14350_v9  ;;  %v14353_v34 = vpop.f32.mrb[158].mxu0  ;;  %8780 = vmatprep.mubr.bf16.mxu1 %v21624_v20  ;;  %15002 = vmatprep.subr.bf16.mxu1 %v16094_v63  ;;  %v16103_v46 = vld [vmem:[%s21153_s1 + $0x1128] sm:$0xff]   ;;  %v21628_v42 = vld [vmem:[#allocation81_spill] sm:$0xff]  ;;  %v20201_v9 = vld [vmem:[%s16563_s26 + $0x2e0] sm:$0xff]  ;;  %v8871_v56 = vshrl.u32 %v20045_v12, 16 }
 0x26c   : > { %v14354_v29 = vpop.f32.mrb[159].mxu0  ;;  %8708 = vmatmul.mubr.bf16.gmra.mrb[4].mxu0 %v21625_v31 }
 0x26d   : > { %v5559_v41 = vadd.f32 %v14352_v21, %v20018_v48  ;;  %v14355_v51 = vadd.f32 %v14354_v29, %v14353_v34  ;;  %14961 = vmatpush3.bf16.msra.mxu0 %v16091_v2  ;;  %8715 = vmatprep.mubr.bf16.mxu0 %v21626_v28  ;;  %v16395_v21 = vld [vmem:[%s16563_s26 + $0x290] sm:$0xff] }
 0x26e   : > { %14962 = vmatprep.subr.bf16.mxu0 %v16093_v16  ;;  %15003 = vmatpush3.bf16.msra.mxu1 %v16096_v25  ;;  %v8874_v16 = vshll.u32 %v20045_v12, 16  ;;  %v12990_v63 = vcombine.high %v16395_v21, %v20201_v9  ;;  %v16109_v29 = vld [vmem:[%s21153_s1 + $0x1170] sm:$0xff]   ;;  %v12989_v28 = vcombine.low %v16395_v21, %v20201_v9 }
 0x26f   : > { %v14452_v26 = vpop.f32.mrb[160].mxu1  ;;  %v5562_v10 = vadd.f32 %v14355_v51, %v20026_v61  ;;  %v5624_v48 = vadd.f32 %v14392_v58, %v5559_v41  ;;  %15004 = vmatprep.subr.bf16.mxu1 %v16098_v11  ;;  %v16100_v61 = vld [vmem:[%s21153_s1 + $0x11a0] sm:$0xff]   ;;  %v16110_v41 = vld [vmem:[%s21153_s1 + $0x11f0] sm:$0xff]   ;;  %v16113_v11 = vld [vmem:[%s21153_s1 + $0x1178] sm:$0xff]  }
 0x270   : > { %v14453_v54 = vpop.f32.mrb[161].mxu1  ;;  %v16128_v12 = vld [vmem:[%s21153_s1 + $0x1290] sm:$0xff]  }
 0x271   : > { %v14454_v57 = vadd.f32 %v14453_v54, %v14452_v26  ;;  %v14455_v62 = vpop.f32.mrb[162].mxu1  ;;  %v20176_v23 = vadd.f32 %v5624_v48, %v19860_v8  ;;  %v5627_v40 = vadd.f32 %v14395_v60, %v5562_v10  ;;  %v14412_v53 = vpop.f32.mrb[160].mxu0  ;;  %14963 = vmatpush3.bf16.msra.mxu0 %v16095_v36  ;;  %8781 = vmatmul.mubr.bf16.gmra.mrb[8].mxu1 %v21627_v4  ;;  %v371_v60 = vld [vmem:[%s16563_s26 + $0x2e8] sm:$0xff] }
 0x272   : > { %v14456_v44 = vpop.f32.mrb[163].mxu1  ;;  %v14413_v17 = vpop.f32.mrb[161].mxu0  ;;  %14964 = vmatprep.subr.bf16.mxu0 %v16097_v52  ;;  %15005 = vmatpush3.bf16.msra.mxu1 %v16100_v61  ;;  %v12991_v34 = vcombine.low %v19888_v0, %v371_v60  ;;  %v12992_v36 = vcombine.high %v19888_v0, %v371_v60  ;;  %v16111_v0 = vld [vmem:[%s21153_s1 + $0x1130] sm:$0xff]   ;;  %v21629_v61 = vld [vmem:[#allocation5_spill] sm:$0xff]  ;;  %v16120_v60 = vld [vmem:[%s21153_s1 + $0x1280] sm:$0xff]  }
 0x273   : > { %v14457_v49 = vadd.f32 %v14456_v44, %v14455_v62  ;;  %v20186_v8 = vadd.f32 %v5627_v40, %v19872_v59  ;;  %v14414_v39 = vadd.f32 %v14413_v17, %v14412_v53  ;;  %v14415_v58 = vpop.f32.mrb[162].mxu0  ;;  %15006 = vmatprep.subr.bf16.mxu1 %v16102_v13  ;;  %v16104_v59 = vld [vmem:[%s21153_s1 + $0x11a8] sm:$0xff]   ;;  %v16112_v52 = vld [vmem:[%s21153_s1 + $0x11b0] sm:$0xff]   ;;  %v16114_v62 = vld [vmem:[%s21153_s1 + $0x11f8] sm:$0xff]  }
 0x274   : > { %v14416_v2 = vpop.f32.mrb[163].mxu0  ;;  %8716 = vmatmul.mubr.bf16.gmra.mrb[8].mxu0 %v21628_v42  ;;  %8788 = vmatprep.mubr.bf16.mxu1 %v12992_v36  ;;  %v16115_v44 = vld [vmem:[%s21153_s1 + $0x1138] sm:$0xff]   ;;  %v16121_v36 = vld [vmem:[%s21153_s1 + $0x1248] sm:$0xff]  }
 0x275   : > { %v20195_v5 = vadd.f32 %v14454_v57, %v14414_v39  ;;  %v14417_v19 = vadd.f32 %v14416_v2, %v14415_v58  ;;  %14965 = vmatpush3.bf16.msra.mxu0 %v16099_v27  ;;  %8723 = vmatprep.mubr.bf16.mxu0 %v12990_v63  ;;  %v16117_v39 = vld [vmem:[%s21153_s1 + $0x1240] sm:$0xff]   ;;  %v21631_v63 = vld [vmem:[#allocation7_spill] sm:$0xff] }
 0x276   : > { %14966 = vmatprep.subr.bf16.mxu0 %v16101_v14  ;;  %15007 = vmatpush3.bf16.msra.mxu1 %v16104_v59  ;;  %v21630_v14 = vld [vmem:[#allocation83_spill] sm:$0xff]  ;;  %v16119_v59 = vld [vmem:[%s21153_s1 + $0x1200] sm:$0xff]  }
 0x277   : > { %v14458_v1 = vpop.f32.mrb[164].mxu1  ;;  %v20213_v31 = vadd.f32 %v14457_v49, %v14417_v19  ;;  %15008 = vmatprep.subr.bf16.mxu1 %v16110_v41  ;;  %v16116_v49 = vld [vmem:[%s21153_s1 + $0x11b8] sm:$0xff]  }
 0x278   : > { %v14459_v20 = vpop.f32.mrb[165].mxu1 }
 0x279   : > { %v14460_v25 = vadd.f32 %v14459_v20, %v14458_v1  ;;  %v14461_v51 = vpop.f32.mrb[166].mxu1  ;;  %v14418_v54 = vpop.f32.mrb[164].mxu0  ;;  %14967 = vmatpush3.bf16.msra.mxu0 %v16103_v46  ;;  %8789 = vmatmul.mubr.bf16.gmra.mrb[12].mxu1 %v12991_v34  ;;  %v16118_v46 = vld [vmem:[%s21153_s1 + $0x12c0] sm:$0xff]   ;;  %v16122_v20 = vld [vmem:[%s21153_s1 + $0x12c8] sm:$0xff]  }
 0x27a   : > { %v14462_v26 = vpop.f32.mrb[167].mxu1  ;;  %v14419_v48 = vpop.f32.mrb[165].mxu0  ;;  %14968 = vmatprep.subr.bf16.mxu0 %v16109_v29  ;;  %15009 = vmatpush3.bf16.msra.mxu1 %v16112_v52  ;;  %v16124_v52 = vld [vmem:[%s21153_s1 + $0x1288] sm:$0xff]  }
 0x27b   : > { %v14463_v10 = vadd.f32 %v14462_v26, %v14461_v51  ;;  %v14420_v57 = vadd.f32 %v14419_v48, %v14418_v54  ;;  %v14421_v27 = vpop.f32.mrb[166].mxu0  ;;  %9643 = vmatprep.mubr.bf16.mxu1 %v21629_v61  ;;  %15010 = vmatprep.subr.bf16.mxu1 %v16114_v62  ;;  %v21633_v26 = vld [vmem:[#allocation85_spill] sm:$0xff]  ;;  %v21634_v48 = vld [vmem:[#allocation86_spill] sm:$0xff] }
 0x27c   : > { %v14422_v40 = vpop.f32.mrb[167].mxu0  ;;  %8724 = vmatmul.mubr.bf16.gmra.mrb[12].mxu0 %v12989_v28  ;;  %v21635_v61 = vld [vmem:[#allocation13_spill] sm:$0xff] }
 0x27d   : > { %v20235_v53 = vadd.f32 %v14460_v25, %v14420_v57  ;;  %v14423_v4 = vadd.f32 %v14422_v40, %v14421_v27  ;;  %14969 = vmatpush3.bf16.msra.mxu0 %v16111_v0  ;;  %8829 = vmatprep.mubr.bf16.mxu0 %v21630_v14  ;;  %v16123_v25 = vld [vmem:[%s21153_s1 + $0x1208] sm:$0xff]   ;;  %v21632_v0 = vld [vmem:[#allocation12_spill] sm:$0xff]  ;;  %v8876_v57 = vrot.slane %v8874_v16, 5  ;;  %v8888_v40 = vshll.u32 %v20052_v6, 16 }
 0x27e   : > { %14970 = vmatprep.subr.bf16.mxu0 %v16113_v11  ;;  %15011 = vmatpush3.bf16.msra.mxu1 %v16116_v49  ;;  %v16125_v11 = vld [vmem:[%s21153_s1 + $0x1250] sm:$0xff]  }
 0x27f   : > { %v14464_v17 = vpop.f32.mrb[168].mxu1  ;;  %v20244_v58 = vadd.f32 %v14463_v10, %v14423_v4  ;;  %15076 = vmatprep.subr.bf16.mxu1 %v16118_v46  ;;  %v8873_v10 = vrot.slane %v8871_v56, 4  ;;  %v16126_v27 = vld [vmem:[%s21153_s1 + $0x12d0] sm:$0xff]   ;;  %v8885_v56 = vshrl.u32 %v20052_v6, 16  ;;  %v16130_v46 = vld [vmem:[%s21153_s1 + $0x12d8] sm:$0xff]  }
 0x280   : > { %v14465_v13 = vpop.f32.mrb[169].mxu1  ;;  %v16164_v6 = vld [vmem:[%s21153_s1 + $0x13d8] sm:$0xff]  }
 0x281   : > { %v14466_v2 = vadd.f32 %v14465_v13, %v14464_v17  ;;  %v14467_v42 = vpop.f32.mrb[170].mxu1  ;;  %v14424_v1 = vpop.f32.mrb[168].mxu0  ;;  %14971 = vmatpush3.bf16.msra.mxu0 %v16115_v44  ;;  %9644 = vmatmul.mubr.bf16.vlgmr.msra.gmra.mrb[16].mxu1 %v21631_v63  ;;  %v16127_v44 = vld [vmem:[%s21153_s1 + $0x1210] sm:$0xff]   ;;  %v16132_v63 = vld [vmem:[%s21153_s1 + $0x1298] sm:$0xff]  }
 0x282   : > { %v14468_v19 = vpop.f32.mrb[171].mxu1  ;;  %v14425_v34 = vpop.f32.mrb[169].mxu0  ;;  %15036 = vmatprep.subr.bf16.mxu0 %v16117_v39  ;;  %15077 = vmatpush3.bf16.msra.mxu1 %v16120_v60  ;;  %v16129_v39 = vld [vmem:[%s21153_s1 + $0x1258] sm:$0xff]   ;;  %v8877_v60 = vor.u32 %v8876_v57, %v8873_v10 }
 0x283   : > { %v14469_v21 = vadd.f32 %v14468_v19, %v14467_v42  ;;  %v14426_v29 = vadd.f32 %v14425_v34, %v14424_v1  ;;  %v14427_v41 = vpop.f32.mrb[170].mxu0  ;;  %9651 = vmatprep.mubr.bf16.mxu1 %v21632_v0  ;;  %15078 = vmatprep.subr.bf16.mxu1 %v16122_v20  ;;  %v21636_v19 = vld [vmem:[#allocation20_spill] sm:$0xff]  ;;  %v21637_v1 = vld [vmem:[#allocation89_spill] sm:$0xff] }
 0x284   : > { %v14428_v51 = vpop.f32.mrb[171].mxu0  ;;  %8830 = vmatmul.mubr.bf16.vlgmr.msra.gmra.mrb[16].mxu0 %v21633_v26  ;;  %v8878_v0 = vrot.slane %v8877_v60, 4  ;;  %v21639_v10 = vld [vmem:[#allocation21_spill] sm:$0xff] }
 0x285   : > { %v20267_v28 = vadd.f32 %v14466_v2, %v14426_v29  ;;  %v14429_v54 = vadd.f32 %v14428_v51, %v14427_v41  ;;  %15037 = vmatpush3.bf16.msra.mxu0 %v16119_v59  ;;  %8837 = vmatprep.mubr.bf16.mxu0 %v21634_v48  ;;  %v16131_v59 = vld [vmem:[%s21153_s1 + $0x1218] sm:$0xff]   ;;  %v16133_v29 = vld [vmem:[%s21153_s1 + $0x1260] sm:$0xff]  }
 0x286   : > { %15038 = vmatprep.subr.bf16.mxu0 %v16121_v36  ;;  %15079 = vmatpush3.bf16.msra.mxu1 %v16124_v52  ;;  %v16134_v51 = vld [vmem:[%s21153_s1 + $0x12e0] sm:$0xff]  }
 0x287   : > { %v20280_v62 = vadd.f32 %v14469_v21, %v14429_v54  ;;  %15080 = vmatprep.subr.bf16.mxu1 %v16126_v27  ;;  %v16135_v52 = vld [vmem:[%s21153_s1 + $0x1220] sm:$0xff]   ;;  %v16137_v27 = vld [vmem:[%s21153_s1 + $0x1268] sm:$0xff]  }
 0x288   : > { %v16136_v48 = vld [vmem:[%s21153_s1 + $0x12a0] sm:$0xff]  }
 0x289   : > { %v14430_v16 = vpop.f32.mrb[172].mxu0  ;;  %15039 = vmatpush3.bf16.msra.mxu0 %v16123_v25  ;;  %9652 = vmatmul.mubr.bf16.gmra.mrb[20].mxu1 %v21635_v61  ;;  %v21638_v25 = vld [vmem:[#allocation90_spill] sm:$0xff]  ;;  %v21640_v61 = vld [vmem:[#allocation93_spill] sm:$0xff] }
 0x28a   : > { %v14470_v49 = vpop.f32.mrb[172].mxu1  ;;  %v14431_v4 = vpop.f32.mrb[173].mxu0  ;;  %15040 = vmatprep.subr.bf16.mxu0 %v16125_v11  ;;  %15081 = vmatpush3.bf16.msra.mxu1 %v16128_v12  ;;  %v16138_v12 = vld [vmem:[%s21153_s1 + $0x12e8] sm:$0xff]  }
 0x28b   : > { %v14432_v17 = vadd.f32 %v14431_v4, %v14430_v16  ;;  %v14471_v14 = vpop.f32.mrb[173].mxu1  ;;  %v14433_v2 = vpop.f32.mrb[174].mxu0  ;;  %9659 = vmatprep.mubr.bf16.mxu1 %v21636_v19  ;;  %15082 = vmatprep.subr.bf16.mxu1 %v16130_v46  ;;  %v16139_v4 = vld [vmem:[%s21153_s1 + $0x1228] sm:$0xff]   ;;  %v20341_v46 = vld [vmem:[%s16563_s26 + $0x2f0] sm:$0xff]  ;;  %v16396_v19 = vld [vmem:[%s16563_s26 + $0x2a0] sm:$0xff] }
 0x28c   : > { %v14472_v13 = vadd.f32 %v14471_v14, %v14470_v49  ;;  %v14473_v42 = vpop.f32.mrb[174].mxu1  ;;  %8838 = vmatmul.mubr.bf16.gmra.mrb[20].mxu0 %v21637_v1  ;;  %v14434_v34 = vpop.f32.mrb[175].mxu0  ;;  %v16140_v14 = vld [vmem:[%s21153_s1 + $0x12a8] sm:$0xff]   ;;  %v12994_v60 = vcombine.high %v16396_v19, %v20341_v46 }
 0x28d   : > { %15041 = vmatpush3.bf16.msra.mxu0 %v16127_v44  ;;  %v14474_v36 = vpop.f32.mrb[175].mxu1  ;;  %v14435_v20 = vadd.f32 %v14434_v34, %v14433_v2  ;;  %8845 = vmatprep.mubr.bf16.mxu0 %v21638_v25  ;;  %v373_v2 = vld [vmem:[%s16563_s26 + $0x2f8] sm:$0x11]  ;;  %v16144_v25 = vld [vmem:[%s21153_s1 + $0x12f0] sm:$0xff]  }
 0x28e   : > { %v20305_v21 = vadd.f32 %v14472_v13, %v14432_v17  ;;  %15042 = vmatprep.subr.bf16.mxu0 %v16129_v39  ;;  %v14475_v41 = vadd.f32 %v14474_v36, %v14473_v42  ;;  %15083 = vmatpush3.bf16.msra.mxu1 %v16132_v63  ;;  %v20344_v42 = vrot.slane %v8885_v56, 4  ;;  %v8880_v1 = vshll.u32 %v373_v2, 16  ;;  %v16143_v36 = vld [vmem:[%s21153_s1 + $0x1270] sm:$0xff]  }
 0x28f   : > { %15084 = vmatprep.subr.bf16.mxu1 %v16134_v51  ;;  %v12993_v56 = vcombine.low %v16396_v19, %v20341_v46  ;;  %v21641_v2 = vld [vmem:[#allocation8_spill] sm:$0xff] }
 0x290   : > { %v20317_v26 = vadd.f32 %v14475_v41, %v14435_v20  ;;  %v8882_v20 = vrot.slane %v8880_v1, 5 }
 0x291   : > { %v14492_v54 = vpop.f32.mrb[176].mxu0  ;;  %15043 = vmatpush3.bf16.msra.mxu0 %v16131_v59  ;;  %9660 = vmatmul.mubr.bf16.gmra.mrb[24].mxu1 %v21639_v10  ;;  %v16146_v10 = vld [vmem:[%s21153_s1 + $0x12b0] sm:$0xff]  }
 0x292   : > { %v14493_v11 = vpop.f32.mrb[177].mxu0  ;;  %15044 = vmatprep.subr.bf16.mxu0 %v16133_v29  ;;  %15085 = vmatpush3.bf16.msra.mxu1 %v16136_v48  ;;  %v14532_v16 = vpop.f32.mrb[176].mxu1 }
 0x293   : > { %v14494_v57 = vadd.f32 %v14493_v11, %v14492_v54  ;;  %v14495_v44 = vpop.f32.mrb[178].mxu0  ;;  %15086 = vmatprep.subr.bf16.mxu1 %v16138_v12  ;;  %v14533_v13 = vpop.f32.mrb[177].mxu1 }
 0x294   : > { %8846 = vmatmul.mubr.bf16.gmra.mrb[24].mxu0 %v21640_v61  ;;  %v14496_v17 = vpop.f32.mrb[179].mxu0  ;;  %v14535_v59 = vpop.f32.mrb[178].mxu1 }
 0x295   : > { %v6604_v49 = vadd.f32 %v14494_v57, %v20195_v5  ;;  %15045 = vmatpush3.bf16.msra.mxu0 %v16135_v52  ;;  %v14497_v39 = vadd.f32 %v14496_v17, %v14495_v44  ;;  %v14534_v5 = vadd.f32 %v14533_v13, %v14532_v16  ;;  %v14536_v34 = vpop.f32.mrb[179].mxu1  ;;  %8853 = vmatprep.mubr.bf16.mxu0 %v12994_v60  ;;  %v16147_v44 = vld [vmem:[%s21153_s1 + $0x1278] sm:$0xff]   ;;  %v16152_v60 = vld [vmem:[%s21153_s1 + $0x13c0] sm:$0xff]  }
 0x296   : > { %15046 = vmatprep.subr.bf16.mxu0 %v16137_v27  ;;  %15087 = vmatpush3.bf16.msra.mxu1 %v16140_v14  ;;  %v14537_v41 = vadd.f32 %v14536_v34, %v14535_v59  ;;  %v8883_v52 = vsel %vm16585_vm2, %v8878_v0, %v8882_v20  ;;  %v16148_v0 = vld [vmem:[%s21153_s1 + $0x12f8] sm:$0xff]   ;;  %v21642_v59 = vld [vmem:[#allocation30_spill] sm:$0xff] }
 0x297   : > { %v6607_v63 = vadd.f32 %v14497_v39, %v20213_v31  ;;  %v20352_v29 = vadd.f32 %v14534_v5, %v6604_v49  ;;  %v16145_v31 = vld [vmem:[%s21153_s1 + $0x1230] sm:$0xff]   ;;  %15088 = vmatprep.subr.bf16.mxu1 %v16144_v25  ;;  %v13235_v11 = vcombine.low %v19216_v3, %v8883_v52  ;;  %v13236_v57 = vcombine.high %v19216_v3, %v8883_v52  ;;  %v16149_v3 = vld [vmem:[%s21153_s1 + $0x1238] sm:$0xff]   ;;  %v16153_v34 = vld [vmem:[%s21153_s1 + $0x1300] sm:$0xff]  }
 0x298   : > { %v16155_v25 = vld [vmem:[%s21153_s1 + $0x1348] sm:$0xff]  }
 0x299   : > { %15047 = vmatpush3.bf16.msra.mxu0 %v16139_v4  ;;  %v14498_v51 = vpop.f32.mrb[180].mxu0  ;;  %v20363_v54 = vadd.f32 %v14537_v41, %v6607_v63  ;;  %9667 = vmatprep.mubr.bf16.mxu1 %v13236_v57  ;;  %v16150_v4 = vld [vmem:[%s21153_s1 + $0x12b8] sm:$0xff]   ;;  %v16156_v52 = vld [vmem:[%s21153_s1 + $0x13c8] sm:$0xff]  }
 0x29a   : > { %15048 = vmatprep.subr.bf16.mxu0 %v16143_v36  ;;  %v14499_v48 = vpop.f32.mrb[181].mxu0  ;;  %15089 = vmatpush3.bf16.msra.mxu1 %v16146_v10  ;;  %v14538_v16 = vpop.f32.mrb[180].mxu1 }
 0x29b   : > { %v14500_v27 = vadd.f32 %v14499_v48, %v14498_v51  ;;  %v14501_v12 = vpop.f32.mrb[182].mxu0  ;;  %9668 = vmatmul.mubr.bf16.gmra.mrb[28].mxu1 %v13235_v11  ;;  %v14539_v14 = vpop.f32.mrb[181].mxu1  ;;  %15090 = vmatprep.subr.bf16.mxu1 %v16148_v0  ;;  %v21643_v51 = vld [vmem:[#allocation9_spill] sm:$0xff]  ;;  %v16157_v11 = vld [vmem:[%s21153_s1 + $0x1308] sm:$0xff]  }
 0x29c   : > { %8854 = vmatmul.mubr.bf16.gmra.mrb[28].mxu0 %v12993_v56  ;;  %v14502_v49 = vpop.f32.mrb[183].mxu0  ;;  %v14540_v39 = vadd.f32 %v14539_v14, %v14538_v16  ;;  %v14541_v13 = vpop.f32.mrb[182].mxu1  ;;  %9773 = vmatprep.mubr.bf16.mxu1 %v21642_v59  ;;  %v16160_v14 = vld [vmem:[%s21153_s1 + $0x13d0] sm:$0xff]  }
 0x29d   : > { %15049 = vmatpush3.bf16.msra.mxu0 %v16145_v31  ;;  %v6612_v61 = vadd.f32 %v14500_v27, %v20235_v53  ;;  %v14503_v17 = vadd.f32 %v14502_v49, %v14501_v12  ;;  %9708 = vmatprep.mubr.bf16.mxu0 %v21641_v2  ;;  %v16151_v53 = vld [vmem:[%s21153_s1 + $0x1340] sm:$0xff]   ;;  %v14542_v19 = vpop.f32.mrb[183].mxu1  ;;  %v21644_v27 = vld [vmem:[#allocation16_spill] sm:$0xff]  ;;  %v16158_v12 = vld [vmem:[%s21153_s1 + $0x1388] sm:$0xff]  }
 0x29e   : > { %15050 = vmatprep.subr.bf16.mxu0 %v16147_v44  ;;  %15091 = vmatpush3.bf16.msra.mxu1 %v16150_v4  ;;  %v14543_v63 = vadd.f32 %v14542_v19, %v14541_v13  ;;  %v21645_v44 = vld [vmem:[#allocation31_spill] sm:$0xff]  ;;  %v16159_v49 = vld [vmem:[%s21153_s1 + $0x1350] sm:$0xff]  }
 0x29f   : > { %v6615_v5 = vadd.f32 %v14503_v17, %v20244_v58  ;;  %v20392_v1 = vadd.f32 %v14540_v39, %v6612_v61  ;;  %15156 = vmatprep.subr.bf16.mxu1 %v16152_v60  ;;  %v16154_v58 = vld [vmem:[%s21153_s1 + $0x1380] sm:$0xff]   ;;  %v16161_v2 = vld [vmem:[%s21153_s1 + $0x1310] sm:$0xff]   ;;  %v16163_v60 = vld [vmem:[%s21153_s1 + $0x1358] sm:$0xff]  }
 0x2a1   : > { %15051 = vmatpush3.bf16.msra.mxu0 %v16149_v3  ;;  %v14504_v36 = vpop.f32.mrb[184].mxu0  ;;  %v20400_v20 = vadd.f32 %v14543_v63, %v6615_v5  ;;  %v21647_v63 = vld [vmem:[#allocation17_spill] sm:$0xff] }
 0x2a2   : > { %15116 = vmatprep.subr.bf16.mxu0 %v16151_v53  ;;  %v14505_v56 = vpop.f32.mrb[185].mxu0  ;;  %v14544_v10 = vpop.f32.mrb[184].mxu1  ;;  %v8890_v53 = vrot.slane %v8888_v40, 5 }
 0x2a3   : > { %v14506_v41 = vadd.f32 %v14505_v56, %v14504_v36  ;;  %v14507_v31 = vpop.f32.mrb[186].mxu0  ;;  %9774 = vmatmul.mubr.bf16.vlgmr.msra.gmra.mrb[32].mxu1 %v21645_v44  ;;  %v14545_v16 = vpop.f32.mrb[185].mxu1  ;;  %v21648_v56 = vld [vmem:[#allocation24_spill] sm:$0xff] }
 0x2a4   : > { %9709 = vmatmul.mubr.bf16.vlgmr.msra.gmra.mrb[32].mxu0 %v21643_v51  ;;  %v14508_v57 = vpop.f32.mrb[187].mxu0  ;;  %15157 = vmatpush3.bf16.msra.mxu1 %v16154_v58  ;;  %v14546_v61 = vadd.f32 %v14545_v16, %v14544_v10  ;;  %v14547_v3 = vpop.f32.mrb[186].mxu1  ;;  %v16165_v58 = vld [vmem:[%s21153_s1 + $0x1318] sm:$0xff]   ;;  %v16167_v10 = vld [vmem:[%s21153_s1 + $0x1360] sm:$0xff]  }
 0x2a5   : > { %15117 = vmatpush3.bf16.msra.mxu0 %v16153_v34  ;;  %v6620_v48 = vadd.f32 %v14506_v41, %v20267_v28  ;;  %9716 = vmatprep.mubr.bf16.mxu0 %v21644_v27  ;;  %v14509_v0 = vadd.f32 %v14508_v57, %v14507_v31  ;;  %v21646_v28 = vld [vmem:[#allocation38_spill] sm:$0xff]  ;;  %v14548_v17 = vpop.f32.mrb[187].mxu1  ;;  %v21649_v41 = vld [vmem:[#allocation39_spill] sm:$0xff]  ;;  %v16166_v31 = vld [vmem:[%s21153_s1 + $0x1398] sm:$0xff]  }
 0x2a6   : > { %15118 = vmatprep.subr.bf16.mxu0 %v16155_v25  ;;  %9781 = vmatprep.mubr.bf16.mxu1 %v21646_v28  ;;  %v14549_v13 = vadd.f32 %v14548_v17, %v14547_v3  ;;  %v21650_v27 = vld [vmem:[#allocation46_spill] sm:$0xff] }
 0x2a7   : > { %15158 = vmatprep.subr.bf16.mxu1 %v16156_v52  ;;  %v6623_v4 = vadd.f32 %v14509_v0, %v20280_v62  ;;  %v20426_v39 = vadd.f32 %v14546_v61, %v6620_v48  ;;  %v16162_v62 = vld [vmem:[%s21153_s1 + $0x1390] sm:$0xff]   ;;  %v16170_v3 = vld [vmem:[%s21153_s1 + $0x13a0] sm:$0xff]  }
 0x2a8   : > { %15159 = vmatpush3.bf16.msra.mxu1 %v16158_v12  ;;  %v16169_v12 = vld [vmem:[%s21153_s1 + $0x1320] sm:$0xff]  }
 0x2a9   : > { %15119 = vmatpush3.bf16.msra.mxu0 %v16157_v11  ;;  %v14510_v5 = vpop.f32.mrb[188].mxu0  ;;  %v20436_v59 = vadd.f32 %v14549_v13, %v6623_v4  ;;  %15160 = vmatprep.subr.bf16.mxu1 %v16160_v14  ;;  %v21651_v14 = vld [vmem:[#allocation25_spill] sm:$0xff] }
 0x2aa   : > { %15120 = vmatprep.subr.bf16.mxu0 %v16159_v49  ;;  %v14511_v19 = vpop.f32.mrb[189].mxu0  ;;  %v8891_v49 = vor.u32 %v8890_v53, %v20344_v42  ;;  %v16173_v42 = vld [vmem:[%s21153_s1 + $0x1328] sm:$0xff]  }
 0x2ab   : > { %v14512_v34 = vadd.f32 %v14511_v19, %v14510_v5  ;;  %v14513_v40 = vpop.f32.mrb[190].mxu0  ;;  %9782 = vmatmul.mubr.bf16.gmra.mrb[36].mxu1 %v21649_v41  ;;  %v21652_v5 = vld [vmem:[#allocation47_spill] sm:$0xff] }
 0x2ac   : > { %9717 = vmatmul.mubr.bf16.gmra.mrb[36].mxu0 %v21647_v63  ;;  %v14550_v36 = vpop.f32.mrb[188].mxu1  ;;  %v14514_v51 = vpop.f32.mrb[191].mxu0  ;;  %15161 = vmatpush3.bf16.msra.mxu1 %v16162_v62 }
 0x2ad   : > { %15121 = vmatpush3.bf16.msra.mxu0 %v16161_v2  ;;  %9724 = vmatprep.mubr.bf16.mxu0 %v21648_v56  ;;  %v6628_v25 = vadd.f32 %v14512_v34, %v20305_v21  ;;  %v14551_v52 = vpop.f32.mrb[189].mxu1  ;;  %v14515_v48 = vadd.f32 %v14514_v51, %v14513_v40  ;;  %v16168_v21 = vld [vmem:[%s21153_s1 + $0x13e0] sm:$0xff]   ;;  %v16172_v2 = vld [vmem:[%s21153_s1 + $0x13e8] sm:$0xff]   ;;  %v8902_v56 = vshll.u32 %v20201_v9, 16 }
 0x2ae   : > { %15122 = vmatprep.subr.bf16.mxu0 %v16163_v60  ;;  %v14552_v11 = vadd.f32 %v14551_v52, %v14550_v36  ;;  %v14553_v57 = vpop.f32.mrb[190].mxu1  ;;  %9789 = vmatprep.mubr.bf16.mxu1 %v21650_v27  ;;  %v16174_v60 = vld [vmem:[%s21153_s1 + $0x13a8] sm:$0xff]   ;;  %v20489_v34 = vld [vmem:[%s16563_s26 + $0x300] sm:$0x11] }
 0x2af   : > { %15162 = vmatprep.subr.bf16.mxu1 %v16164_v6  ;;  %v14554_v44 = vpop.f32.mrb[191].mxu1  ;;  %v6631_v0 = vadd.f32 %v14515_v48, %v20317_v26  ;;  %v16171_v26 = vld [vmem:[%s21153_s1 + $0x1368] sm:$0xff]   ;;  %v8892_v6 = vrot.slane %v8891_v49, 4  ;;  %v8894_v36 = vshll.u32 %v20489_v34, 16  ;;  %v8904_v48 = vrot.slane %v8902_v56, 5  ;;  %v16179_v49 = vld [vmem:[%s21153_s1 + $0x1378] sm:$0xff]  }
 0x2b0   : > { %v20465_v16 = vadd.f32 %v14552_v11, %v6628_v25  ;;  %v14555_v61 = vadd.f32 %v14554_v44, %v14553_v57  ;;  %15163 = vmatpush3.bf16.msra.mxu1 %v16166_v31  ;;  %v375_v40 = vld [vmem:[%s16563_s26 + $0x308] sm:$0x11]  ;;  %v16175_v31 = vld [vmem:[%s21153_s1 + $0x1370] sm:$0xff]  }
 0x2b1   : > { %15123 = vmatpush3.bf16.msra.mxu0 %v16165_v58  ;;  %v14572_v28 = vpop.f32.mrb[192].mxu0  ;;  %15164 = vmatprep.subr.bf16.mxu1 %v16168_v21  ;;  %v8899_v58 = vshrl.u32 %v20201_v9, 16  ;;  %v8908_v41 = vshll.u32 %v375_v40, 16  ;;  %v8896_v52 = vrot.slane %v8894_v36, 5  ;;  %v16177_v21 = vld [vmem:[%s21153_s1 + $0x1330] sm:$0xff]   ;;  %v16184_v40 = vld [vmem:[%s21153_s1 + $0x14c0] sm:$0xff]  }
 0x2b2   : > { %15124 = vmatprep.subr.bf16.mxu0 %v16167_v10  ;;  %v20471_v4 = vadd.f32 %v14555_v61, %v6631_v0  ;;  %v14573_v17 = vpop.f32.mrb[193].mxu0  ;;  %v16178_v0 = vld [vmem:[%s21153_s1 + $0x13b0] sm:$0xff]  }
 0x2b3   : > { %v14574_v13 = vadd.f32 %v14573_v17, %v14572_v28  ;;  %v14575_v62 = vpop.f32.mrb[194].mxu0  ;;  %9790 = vmatmul.mubr.bf16.gmra.mrb[40].mxu1 %v21652_v5  ;;  %v8901_v10 = vrot.slane %v8899_v58, 4  ;;  %v8910_v11 = vrot.slane %v8908_v41, 5  ;;  %v16182_v5 = vld [vmem:[%s21153_s1 + $0x13b8] sm:$0xff]   ;;  %v21654_v41 = vld [vmem:[#allocation58_spill] sm:$0xff] }
 0x2b4   : > { %9725 = vmatmul.mubr.bf16.gmra.mrb[40].mxu0 %v21651_v14  ;;  %v14576_v53 = vpop.f32.mrb[195].mxu0  ;;  %15165 = vmatpush3.bf16.msra.mxu1 %v16170_v3  ;;  %v14612_v51 = vpop.f32.mrb[192].mxu1 }
 0x2b5   : > { %15125 = vmatpush3.bf16.msra.mxu0 %v16169_v12  ;;  %v6734_v19 = vadd.f32 %v14574_v13, %v20352_v29  ;;  %v14577_v63 = vadd.f32 %v14576_v53, %v14575_v62  ;;  %15166 = vmatprep.subr.bf16.mxu1 %v16172_v2  ;;  %v8905_v27 = vor.u32 %v8904_v48, %v8901_v10  ;;  %v16181_v13 = vld [vmem:[%s21153_s1 + $0x1338] sm:$0xff]   ;;  %v14613_v62 = vpop.f32.mrb[193].mxu1 }
 0x2b6   : > { %15126 = vmatprep.subr.bf16.mxu0 %v16171_v26 }
 0x2b7   : > { %v20496_v29 = vadd.f32 %v6734_v19, %v20069_v15  ;;  %v6737_v25 = vadd.f32 %v14577_v63, %v20363_v54  ;;  %v16176_v15 = vld [vmem:[%s21153_s1 + $0x13f0] sm:$0xff]   ;;  %v8897_v54 = vsel %vm16585_vm2, %v8892_v6, %v8896_v52  ;;  %v8906_v28 = vrot.slane %v8905_v27, 4  ;;  %v14615_v19 = vpop.f32.mrb[194].mxu1  ;;  %v21653_v63 = vld [vmem:[#allocation34_spill] sm:$0xff]  ;;  %v16187_v52 = vld [vmem:[%s21153_s1 + $0x1448] sm:$0xff]  }
 0x2b8   : > { %15167 = vmatpush3.bf16.msra.mxu1 %v16174_v60  ;;  %v13237_v12 = vcombine.low %v19226_v32, %v8897_v54  ;;  %v16183_v6 = vld [vmem:[%s21153_s1 + $0x1440] sm:$0xff]  }
 0x2b9   : > { %15127 = vmatpush3.bf16.msra.mxu0 %v16173_v42  ;;  %v20503_v57 = vadd.f32 %v6737_v25, %v20079_v18  ;;  %v14578_v9 = vpop.f32.mrb[196].mxu0  ;;  %v13238_v18 = vcombine.high %v19226_v32, %v8897_v54  ;;  %15168 = vmatprep.subr.bf16.mxu1 %v16176_v15  ;;  %v16180_v32 = vld [vmem:[%s21153_s1 + $0x13f8] sm:$0xff]   ;;  %v8911_v14 = vsel %vm16585_vm2, %v8906_v28, %v8910_v11  ;;  %v16185_v25 = vld [vmem:[%s21153_s1 + $0x1400] sm:$0xff]   ;;  %v21655_v15 = vld [vmem:[#allocation35_spill] sm:$0xff] }
 0x2ba   : > { %15128 = vmatprep.subr.bf16.mxu0 %v16175_v31  ;;  %v14579_v44 = vpop.f32.mrb[197].mxu0  ;;  %v13239_v42 = vcombine.low %v19390_v24, %v8911_v14 }
 0x2bb   : > { %v14580_v61 = vadd.f32 %v14579_v44, %v14578_v9  ;;  %v14581_v3 = vpop.f32.mrb[198].mxu0  ;;  %9732 = vmatprep.mubr.bf16.mxu0 %v13238_v18  ;;  %v16186_v9 = vld [vmem:[%s21153_s1 + $0x1480] sm:$0xff]  }
 0x2bc   : > { %v14582_v26 = vpop.f32.mrb[199].mxu0  ;;  %9733 = vmatmul.mubr.bf16.gmra.mrb[44].mxu0 %v13237_v12  ;;  %15169 = vmatpush3.bf16.msra.mxu1 %v16178_v0  ;;  %v16188_v0 = vld [vmem:[%s21153_s1 + $0x14c8] sm:$0xff]  }
 0x2bd   : > { %15129 = vmatpush3.bf16.msra.mxu0 %v16177_v21  ;;  %v6742_v17 = vadd.f32 %v14580_v61, %v20392_v1  ;;  %v14583_v2 = vadd.f32 %v14582_v26, %v14581_v3  ;;  %v13240_v1 = vcombine.high %v19390_v24, %v8911_v14  ;;  %15170 = vmatprep.subr.bf16.mxu1 %v16180_v32  ;;  %v16189_v21 = vld [vmem:[%s21153_s1 + $0x1408] sm:$0xff]   ;;  %v16192_v32 = vld [vmem:[%s21153_s1 + $0x14d0] sm:$0xff]  }
 0x2be   : > { %15130 = vmatprep.subr.bf16.mxu0 %v16179_v49  ;;  %9838 = vmatprep.mubr.bf16.mxu0 %v21653_v63  ;;  %v20543_v24 = vadd.f32 %v14613_v62, %v14612_v51  ;;  %v16195_v62 = vld [vmem:[%s21153_s1 + $0x1458] sm:$0xff]  }
 0x2bf   : > { %v20533_v53 = vadd.f32 %v6742_v17, %v20104_v7  ;;  %v6745_v60 = vadd.f32 %v14583_v2, %v20400_v20  ;;  %v14616_v7 = vpop.f32.mrb[195].mxu1  ;;  %9797 = vmatprep.mubr.bf16.mxu1 %v13240_v1  ;;  %v21657_v17 = vld [vmem:[#allocation59_spill] sm:$0xff]  ;;  %v21658_v2 = vld [vmem:[#allocation65_spill] sm:$0xff] }
 0x2c0   : > { %v20548_v58 = vadd.f32 %v14616_v7, %v14615_v19  ;;  %9798 = vmatmul.mubr.bf16.gmra.mrb[44].mxu1 %v13239_v42  ;;  %v14618_v11 = vpop.f32.mrb[196].mxu1  ;;  %v21659_v19 = vld [vmem:[#allocation43_spill] sm:$0xff]  ;;  %v16197_v7 = vld [vmem:[%s21153_s1 + $0x1418] sm:$0xff]  }
 0x2c1   : > { %15131 = vmatpush3.bf16.msra.mxu0 %v16181_v13  ;;  %v14584_v36 = vpop.f32.mrb[200].mxu0  ;;  %v20551_v20 = vadd.f32 %v6745_v60, %v20114_v55  ;;  %15171 = vmatpush3.bf16.msra.mxu1 %v16182_v5  ;;  %v14619_v54 = vpop.f32.mrb[197].mxu1  ;;  %v16194_v60 = vld [vmem:[%s21153_s1 + $0x1490] sm:$0xff]  }
 0x2c2   : > { %15196 = vmatprep.subr.bf16.mxu0 %v16183_v6  ;;  %v14585_v56 = vpop.f32.mrb[201].mxu0  ;;  %9903 = vmatprep.mubr.bf16.mxu1 %v21654_v41  ;;  %v20573_v12 = vadd.f32 %v14619_v54, %v14618_v11  ;;  %v14621_v18 = vpop.f32.mrb[198].mxu1  ;;  %v16198_v41 = vld [vmem:[%s21153_s1 + $0x1498] sm:$0xff]  }
 0x2c3   : > { %v14586_v31 = vadd.f32 %v14585_v56, %v14584_v36  ;;  %v14587_v51 = vpop.f32.mrb[202].mxu0  ;;  %15236 = vmatprep.subr.bf16.mxu1 %v16184_v40  ;;  %v14622_v61 = vpop.f32.mrb[199].mxu1  ;;  %v16196_v36 = vld [vmem:[%s21153_s1 + $0x14d8] sm:$0xff]  }
 0x2c4   : > { %v14588_v10 = vpop.f32.mrb[203].mxu0  ;;  %9839 = vmatmul.mubr.bf16.vlgmr.msra.gmra.mrb[48].mxu0 %v21655_v15  ;;  %v20587_v28 = vadd.f32 %v14622_v61, %v14621_v18  ;;  %v14624_v49 = vpop.f32.mrb[200].mxu1  ;;  %v16201_v15 = vld [vmem:[%s21153_s1 + $0x1420] sm:$0xff]   ;;  %v16203_v18 = vld [vmem:[%s21153_s1 + $0x1468] sm:$0xff]  }
 0x2c5   : > { %v6750_v55 = vadd.f32 %v14586_v31, %v20426_v39  ;;  %v14589_v48 = vadd.f32 %v14588_v10, %v14587_v51  ;;  %15197 = vmatpush3.bf16.msra.mxu0 %v16185_v25  ;;  %v21656_v39 = vld [vmem:[#allocation42_spill] sm:$0xff]  ;;  %v14625_v26 = vpop.f32.mrb[201].mxu1 }
 0x2c6   : > { %9846 = vmatprep.mubr.bf16.mxu0 %v21656_v39  ;;  %15198 = vmatprep.subr.bf16.mxu0 %v16187_v52  ;;  %v20596_v14 = vadd.f32 %v14625_v26, %v14624_v49  ;;  %v14627_v13 = vpop.f32.mrb[202].mxu1  ;;  %v21660_v31 = vld [vmem:[#allocation50_spill] sm:$0xff]  ;;  %v16204_v49 = vld [vmem:[%s21153_s1 + $0x14e8] sm:$0xff]  }
 0x2c7   : > { %v20566_v27 = vadd.f32 %v6750_v55, %v20140_v43  ;;  %v6753_v44 = vadd.f32 %v14589_v48, %v20436_v59  ;;  %v16190_v43 = vld [vmem:[%s21153_s1 + $0x1488] sm:$0xff]   ;;  %v16191_v59 = vld [vmem:[%s21153_s1 + $0x1450] sm:$0xff]   ;;  %v14628_v42 = vpop.f32.mrb[203].mxu1  ;;  %v16199_v51 = vld [vmem:[%s21153_s1 + $0x1460] sm:$0xff]  }
 0x2c8   : > { %9904 = vmatmul.mubr.bf16.vlgmr.msra.gmra.mrb[48].mxu1 %v21657_v17  ;;  %v20602_v1 = vadd.f32 %v14628_v42, %v14627_v13  ;;  %v21661_v52 = vld [vmem:[#allocation66_spill] sm:$0xff] }
 0x2c9   : > { %v20582_v3 = vadd.f32 %v6753_v44, %v20150_v37  ;;  %15237 = vmatpush3.bf16.msra.mxu1 %v16186_v9  ;;  %15199 = vmatpush3.bf16.msra.mxu0 %v16189_v21  ;;  %v16193_v37 = vld [vmem:[%s21153_s1 + $0x1410] sm:$0xff]   ;;  %v16200_v48 = vld [vmem:[%s21153_s1 + $0x14e0] sm:$0xff]   ;;  %v21662_v44 = vld [vmem:[#allocation69_spill] sm:$0xff] }
 0x2ca   : > { %15238 = vmatprep.subr.bf16.mxu1 %v16188_v0  ;;  %9911 = vmatprep.mubr.bf16.mxu1 %v21658_v2  ;;  %v16202_v0 = vld [vmem:[%s21153_s1 + $0x14a0] sm:$0xff]  }
 0x2cb   : > { %15200 = vmatprep.subr.bf16.mxu0 %v16191_v59 }
 0x2cc   : > { %v14630_v5 = vpop.f32.mrb[204].mxu1  ;;  %9847 = vmatmul.mubr.bf16.gmra.mrb[52].mxu0 %v21659_v19 }
 0x2cd   : > { %15239 = vmatpush3.bf16.msra.mxu1 %v16190_v43  ;;  %15201 = vmatpush3.bf16.msra.mxu0 %v16193_v37  ;;  %v14631_v11 = vpop.f32.mrb[205].mxu1  ;;  %v20655_v37 = vld [vmem:[%s16563_s26 + $0x310] sm:$0x11] }
 0x2ce   : > { %15240 = vmatprep.subr.bf16.mxu1 %v16192_v32  ;;  %15202 = vmatprep.subr.bf16.mxu0 %v16195_v62  ;;  %v20629_v9 = vadd.f32 %v14631_v11, %v14630_v5  ;;  %v14633_v54 = vpop.f32.mrb[206].mxu1  ;;  %v16205_v32 = vld [vmem:[%s21153_s1 + $0x1428] sm:$0xff]  }
 0x2cf   : > { %v14590_v63 = vpop.f32.mrb[204].mxu0  ;;  %9854 = vmatprep.mubr.bf16.mxu0 %v21660_v31  ;;  %v14634_v39 = vpop.f32.mrb[207].mxu1  ;;  %v21664_v31 = vld [vmem:[#allocation70_spill] sm:$0xff] }
 0x2d0   : > { %v14591_v6 = vpop.f32.mrb[205].mxu0  ;;  %9912 = vmatmul.mubr.bf16.gmra.mrb[52].mxu1 %v21661_v52  ;;  %v20642_v61 = vadd.f32 %v14634_v39, %v14633_v54 }
 0x2d1   : > { %v14592_v40 = vadd.f32 %v14591_v6, %v14590_v63  ;;  %v14593_v56 = vpop.f32.mrb[206].mxu0  ;;  %15241 = vmatpush3.bf16.msra.mxu1 %v16194_v60  ;;  %15203 = vmatpush3.bf16.msra.mxu0 %v16197_v7  ;;  %v8922_v60 = vshll.u32 %v20655_v37, 16  ;;  %v377_v63 = vld [vmem:[%s16563_s26 + $0x318] sm:$0x11]  ;;  %v16206_v6 = vld [vmem:[%s21153_s1 + $0x14a8] sm:$0xff]  }
 0x2d2   : > { %v14594_v25 = vpop.f32.mrb[207].mxu0  ;;  %15242 = vmatprep.subr.bf16.mxu1 %v16196_v36  ;;  %9919 = vmatprep.mubr.bf16.mxu1 %v21662_v44  ;;  %v8927_v36 = vshrl.u32 %v20341_v46, 16 }
 0x2d3   : > { %v6758_v10 = vadd.f32 %v14592_v40, %v20465_v16  ;;  %v14595_v55 = vadd.f32 %v14594_v25, %v14593_v56  ;;  %15204 = vmatprep.subr.bf16.mxu0 %v16199_v51  ;;  %v8930_v56 = vshll.u32 %v20341_v46, 16 }
 0x2d5   : > { %v20632_v21 = vadd.f32 %v6758_v10, %v20176_v23  ;;  %v6761_v16 = vadd.f32 %v14595_v55, %v20471_v4  ;;  %v14692_v23 = vpop.f32.mrb[208].mxu1  ;;  %v21663_v4 = vld [vmem:[#allocation51_spill] sm:$0xff]  ;;  %15243 = vmatpush3.bf16.msra.mxu1 %v16198_v41  ;;  %15205 = vmatpush3.bf16.msra.mxu0 %v16201_v15  ;;  %v8936_v41 = vshll.u32 %v377_v63, 16  ;;  %v8924_v55 = vrot.slane %v8922_v60, 5 }
 0x2d6   : > { %9855 = vmatmul.mubr.bf16.gmra.mrb[56].mxu0 %v21663_v4  ;;  %v14693_v26 = vpop.f32.mrb[209].mxu1  ;;  %15244 = vmatprep.subr.bf16.mxu1 %v16200_v48  ;;  %v8929_v48 = vrot.slane %v8927_v36, 4  ;;  %v8932_v11 = vrot.slane %v8930_v56, 5 }
 0x2d7   : > { %v20645_v43 = vadd.f32 %v6761_v16, %v20186_v8  ;;  %v14652_v59 = vpop.f32.mrb[208].mxu0  ;;  %v20658_v8 = vld [vmem:[%s16563_s26 + $0x2e8] sm:$0xff]  ;;  %15206 = vmatprep.subr.bf16.mxu0 %v16203_v18  ;;  %v14694_v42 = vadd.f32 %v14693_v26, %v14692_v23  ;;  %v14695_v5 = vpop.f32.mrb[210].mxu1  ;;  %v8938_v15 = vrot.slane %v8936_v41, 5  ;;  %v16207_v16 = vld [vmem:[%s21153_s1 + $0x1470] sm:$0xff]  }
 0x2d8   : > { %v14653_v17 = vpop.f32.mrb[209].mxu0  ;;  %v8913_v13 = vshrl.u32 %v20658_v8, 16  ;;  %v8916_v19 = vshll.u32 %v20658_v8, 16  ;;  %v14696_v25 = vpop.f32.mrb[211].mxu1  ;;  %9920 = vmatmul.mubr.bf16.gmra.mrb[56].mxu1 %v21664_v31  ;;  %v16209_v23 = vld [vmem:[%s21153_s1 + $0x1430] sm:$0xff]  }
 0x2d9   : > { %v14654_v2 = vadd.f32 %v14653_v17, %v14652_v59  ;;  %v14655_v62 = vpop.f32.mrb[210].mxu0  ;;  %15245 = vmatpush3.bf16.msra.mxu1 %v16202_v0  ;;  %15207 = vmatpush3.bf16.msra.mxu0 %v16205_v32  ;;  %v14697_v54 = vadd.f32 %v14696_v25, %v14695_v5  ;;  %v8933_v0 = vor.u32 %v8932_v11, %v8929_v48  ;;  %v16211_v32 = vld [vmem:[%s21153_s1 + $0x1478] sm:$0xff]   ;;  %v16217_v11 = vld [vmem:[%s21153_s1 + $0x15c0] sm:$0xff]  }
 0x2da   : > { %v14656_v7 = vpop.f32.mrb[211].mxu0  ;;  %v8915_v40 = vrot.slane %v8913_v13, 4  ;;  %v8918_v10 = vrot.slane %v8916_v19, 5  ;;  %15246 = vmatprep.subr.bf16.mxu1 %v16204_v49  ;;  %15208 = vmatprep.subr.bf16.mxu0 %v16207_v16  ;;  %v21665_v19 = vld [vmem:[#allocation3_spill] sm:$0xff]  ;;  %v16213_v25 = vld [vmem:[%s21153_s1 + $0x1438] sm:$0xff]  }
 0x2db   : > { %v7628_v51 = vadd.f32 %v14654_v2, %v20543_v24  ;;  %v14657_v52 = vadd.f32 %v14656_v7, %v14655_v62  ;;  %v16208_v24 = vld [vmem:[%s21153_s1 + $0x14f0] sm:$0xff]   ;;  %v8934_v13 = vrot.slane %v8933_v0, 4 }
 0x2dc   : > { %v8919_v39 = vor.u32 %v8918_v10, %v8915_v40  ;;  %v14698_v18 = vpop.f32.mrb[212].mxu1 }
 0x2dd   : > { %v7631_v46 = vadd.f32 %v14657_v52, %v20548_v58  ;;  %v20675_v44 = vadd.f32 %v14694_v42, %v7628_v51  ;;  %v14699_v4 = vpop.f32.mrb[213].mxu1  ;;  %v16210_v58 = vld [vmem:[%s21153_s1 + $0x14b0] sm:$0xff]   ;;  %15247 = vmatpush3.bf16.msra.mxu1 %v16206_v6  ;;  %15209 = vmatpush3.bf16.msra.mxu0 %v16209_v23  ;;  %v8939_v7 = vsel %vm16585_vm2, %v8934_v13, %v8938_v15  ;;  %v16212_v6 = vld [vmem:[%s21153_s1 + $0x14f8] sm:$0xff]   ;;  %v16221_v13 = vld [vmem:[%s21153_s1 + $0x15c8] sm:$0xff]  }
 0x2de   : > { %v8920_v59 = vrot.slane %v8919_v39, 4  ;;  %v14700_v26 = vadd.f32 %v14699_v4, %v14698_v18  ;;  %15248 = vmatprep.subr.bf16.mxu1 %v16208_v24  ;;  %15210 = vmatprep.subr.bf16.mxu0 %v16211_v32  ;;  %v13243_v36 = vcombine.low %v19573_v35, %v8939_v7  ;;  %v13244_v56 = vcombine.high %v19573_v35, %v8939_v7  ;;  %v14701_v51 = vpop.f32.mrb[214].mxu1  ;;  %v21667_v39 = vld [vmem:[#allocation96_spill] sm:$0xff]  ;;  %v16216_v18 = vld [vmem:[%s21153_s1 + $0x1500] sm:$0xff]   ;;  %v16222_v7 = vld [vmem:[%s21153_s1 + $0x1588] sm:$0xff]  }
 0x2df   : > { %v20683_v17 = vadd.f32 %v14697_v54, %v7631_v46  ;;  %v14658_v49 = vpop.f32.mrb[212].mxu0  ;;  %v14702_v52 = vpop.f32.mrb[215].mxu1  ;;  %v21666_v54 = vld [vmem:[#allocation97_spill] sm:$0xff]  ;;  %v16218_v4 = vld [vmem:[%s21153_s1 + $0x1580] sm:$0xff]  }
 0x2e0   : > { %v14659_v2 = vpop.f32.mrb[213].mxu0  ;;  %v8925_v62 = vsel %vm16585_vm2, %v8920_v59, %v8924_v55  ;;  %9927 = vmatprep.mubr.bf16.mxu1 %v13244_v56  ;;  %v16215_v55 = vld [vmem:[%s21153_s1 + $0x1540] sm:$0xff]  }
 0x2e1   : > { %v14660_v42 = vadd.f32 %v14659_v2, %v14658_v49  ;;  %v14661_v5 = vpop.f32.mrb[214].mxu0  ;;  %v13241_v60 = vcombine.low %v21665_v19, %v8925_v62  ;;  %v13242_v63 = vcombine.high %v21665_v19, %v8925_v62  ;;  %15249 = vmatpush3.bf16.msra.mxu1 %v16210_v58  ;;  %15211 = vmatpush3.bf16.msra.mxu0 %v16213_v25  ;;  %v16219_v49 = vld [vmem:[%s21153_s1 + $0x1548] sm:$0xff]   ;;  %v21668_v62 = vld [vmem:[#allocation100_spill] sm:$0xff] }
 0x2e2   : > { %v14662_v40 = vpop.f32.mrb[215].mxu0  ;;  %9928 = vmatmul.mubr.bf16.gmra.mrb[60].mxu1 %v13243_v36  ;;  %15250 = vmatprep.subr.bf16.mxu1 %v16212_v6  ;;  %v16225_v25 = vld [vmem:[%s21153_s1 + $0x15d0] sm:$0xff]  }
 0x2e3   : > { %v7636_v41 = vadd.f32 %v14660_v42, %v20573_v12  ;;  %v14663_v31 = vadd.f32 %v14662_v40, %v14661_v5  ;;  %9862 = vmatprep.mubr.bf16.mxu0 %v13242_v63  ;;  %v14703_v12 = vadd.f32 %v14702_v52, %v14701_v51  ;;  %10737 = vmatprep.mubr.bf16.mxu1 %v21667_v39  ;;  %v16220_v42 = vld [vmem:[%s21153_s1 + $0x1508] sm:$0xff]   ;;  %v21669_v63 = vld [vmem:[#allocation98_spill] sm:$0xff]  ;;  %v21672_v39 = vld [vmem:[#allocation104_spill] sm:$0xff] }
 0x2e4   : > { %9863 = vmatmul.mubr.bf16.gmra.mrb[60].mxu0 %v13241_v60  ;;  %v14704_v48 = vpop.f32.mrb[216].mxu1  ;;  %15276 = vmatprep.subr.bf16.mxu0 %v16215_v55  ;;  %v21671_v51 = vld [vmem:[#allocation99_spill] sm:$0xff] }
 0x2e5   : > { %v7639_v10 = vadd.f32 %v14663_v31, %v20587_v28  ;;  %v20710_v35 = vadd.f32 %v14700_v26, %v7636_v41  ;;  %v14705_v15 = vpop.f32.mrb[217].mxu1  ;;  %10672 = vmatprep.mubr.bf16.mxu0 %v21666_v54  ;;  %15251 = vmatpush3.bf16.msra.mxu1 %v16214_v45  ;;  %v21670_v41 = vld [vmem:[#allocation101_spill] sm:$0xff]  ;;  %v16224_v45 = vld [vmem:[%s21153_s1 + $0x1510] sm:$0xff]  }
 0x2e6   : > { %v14706_v46 = vadd.f32 %v14705_v15, %v14704_v48  ;;  %15316 = vmatprep.subr.bf16.mxu1 %v16217_v11  ;;  %v14707_v26 = vpop.f32.mrb[218].mxu1  ;;  %v16227_v11 = vld [vmem:[%s21153_s1 + $0x1558] sm:$0xff]  }
 0x2e7   : > { %v20719_v16 = vadd.f32 %v14703_v12, %v7639_v10  ;;  %v14664_v28 = vpop.f32.mrb[216].mxu0  ;;  %v14708_v2 = vpop.f32.mrb[219].mxu1  ;;  %v16226_v12 = vld [vmem:[%s21153_s1 + $0x1590] sm:$0xff]  }
 0x2e8   : > { %v14665_v24 = vpop.f32.mrb[217].mxu0  ;;  %v14709_v19 = vadd.f32 %v14708_v2, %v14707_v26  ;;  %v16233_v2 = vld [vmem:[%s21153_s1 + $0x15e0] sm:$0xff]  }
 0x2e9   : > { %v14666_v0 = vadd.f32 %v14665_v24, %v14664_v28  ;;  %v14667_v23 = vpop.f32.mrb[218].mxu0  ;;  %v16229_v28 = vld [vmem:[%s21153_s1 + $0x15d8] sm:$0xff]  }
 0x2ea   : > { %v14668_v59 = vpop.f32.mrb[219].mxu0  ;;  %10738 = vmatmul.mubr.bf16.vlgmr.msra.gmra.mrb[64].mxu1 %v21669_v63  ;;  %v16228_v24 = vld [vmem:[%s21153_s1 + $0x1518] sm:$0xff]   ;;  %v16234_v63 = vld [vmem:[%s21153_s1 + $0x15a0] sm:$0xff]  }
 0x2eb   : > { %v7644_v58 = vadd.f32 %v14666_v0, %v20596_v14  ;;  %v14669_v32 = vadd.f32 %v14668_v59, %v14667_v23  ;;  %15317 = vmatpush3.bf16.msra.mxu1 %v16218_v4  ;;  %10745 = vmatprep.mubr.bf16.mxu1 %v21671_v51  ;;  %v21673_v4 = vld [vmem:[#allocation102_spill] sm:$0xff]  ;;  %v16230_v59 = vld [vmem:[%s21153_s1 + $0x1598] sm:$0xff]  }
 0x2ec   : > { %10673 = vmatmul.mubr.bf16.vlgmr.msra.gmra.mrb[64].mxu0 %v21668_v62  ;;  %v14710_v60 = vpop.f32.mrb[220].mxu1  ;;  %15318 = vmatprep.subr.bf16.mxu1 %v16221_v13  ;;  %v21674_v13 = vld [vmem:[#allocation106_spill] sm:$0xff] }
 0x2ed   : > { %v7647_v5 = vadd.f32 %v14669_v32, %v20602_v1  ;;  %v20740_v14 = vadd.f32 %v14706_v46, %v7644_v58  ;;  %15277 = vmatpush3.bf16.msra.mxu0 %v16216_v18  ;;  %v14711_v6 = vpop.f32.mrb[221].mxu1  ;;  %v16223_v1 = vld [vmem:[%s21153_s1 + $0x1550] sm:$0xff]   ;;  %10680 = vmatprep.mubr.bf16.mxu0 %v21670_v41 }
 0x2ee   : > { %15278 = vmatprep.subr.bf16.mxu0 %v16219_v49  ;;  %v14712_v56 = vadd.f32 %v14711_v6, %v14710_v60  ;;  %v14713_v54 = vpop.f32.mrb[222].mxu1  ;;  %v16398_v41 = vld [vmem:[%s16563_s26 + $0x2d0] sm:$0xff] }
 0x2ef   : > { %v20746_v40 = vadd.f32 %v14709_v19, %v7647_v5  ;;  %v14670_v36 = vpop.f32.mrb[220].mxu0  ;;  %15319 = vmatpush3.bf16.msra.mxu1 %v16222_v7  ;;  %v14714_v46 = vpop.f32.mrb[223].mxu1  ;;  %v16232_v5 = vld [vmem:[%s21153_s1 + $0x1520] sm:$0xff]  }
 0x2f0   : > { %v14671_v31 = vpop.f32.mrb[221].mxu0  ;;  %15320 = vmatprep.subr.bf16.mxu1 %v16225_v25  ;;  %v14715_v0 = vadd.f32 %v14714_v46, %v14713_v54  ;;  %v13325_v25 = vrot.slane %v16398_v41, 9  ;;  %v21677_v46 = vld [vmem:[#allocation107_spill] sm:$0xff]  ;;  %v16246_v41 = vld [vmem:[%s21153_s1 + $0x15b8] sm:$0xff]  }
 0x2f1   : > { %v14672_v52 = vadd.f32 %v14671_v31, %v14670_v36  ;;  %v14673_v10 = vpop.f32.mrb[222].mxu0  ;;  %15279 = vmatpush3.bf16.msra.mxu0 %v16220_v42  ;;  %v21675_v42 = vld [vmem:[#allocation103_spill] sm:$0xff]  ;;  %v16399_v31 = vld [vmem:[%s16563_s26 + $0x2f8] sm:$0x11] }
 0x2f2   : > { %v14674_v55 = vpop.f32.mrb[223].mxu0  ;;  %15280 = vmatprep.subr.bf16.mxu0 %v16223_v1  ;;  %10746 = vmatmul.mubr.bf16.gmra.mrb[68].mxu1 %v21673_v4  ;;  %v16235_v1 = vld [vmem:[%s21153_s1 + $0x1568] sm:$0xff]   ;;  %v9951_v51 = vrot.slane %v16399_v31, 5 }
 0x2f3   : > { %v7652_v48 = vadd.f32 %v14672_v52, %v20629_v9  ;;  %v14675_v15 = vadd.f32 %v14674_v55, %v14673_v10  ;;  %15321 = vmatpush3.bf16.msra.mxu1 %v16226_v12  ;;  %10753 = vmatprep.mubr.bf16.mxu1 %v21675_v42  ;;  %v16237_v52 = vld [vmem:[%s21153_s1 + $0x15e8] sm:$0xff]   ;;  %v9955_v12 = vrot.slane %v20489_v34, 5  ;;  %v16242_v42 = vld [vmem:[%s21153_s1 + $0x15b0] sm:$0xff]  }
 0x2f4   : > { %10681 = vmatmul.mubr.bf16.gmra.mrb[68].mxu0 %v21672_v39  ;;  %v14772_v23 = vpop.f32.mrb[224].mxu1  ;;  %15322 = vmatprep.subr.bf16.mxu1 %v16229_v28  ;;  %v9952_v54 = vsel %vm17694_vm5, %v13325_v25, %v9951_v51  ;;  %v16238_v34 = vld [vmem:[%s21153_s1 + $0x15a8] sm:$0xff]  }
 0x2f5   : > { %v7655_v9 = vadd.f32 %v14675_v15, %v20642_v61  ;;  %v20774_v18 = vadd.f32 %v14712_v56, %v7652_v48  ;;  %15281 = vmatpush3.bf16.msra.mxu0 %v16224_v45  ;;  %v14773_v58 = vpop.f32.mrb[225].mxu1  ;;  %v16231_v61 = vld [vmem:[%s21153_s1 + $0x1560] sm:$0xff]   ;;  %10688 = vmatprep.mubr.bf16.mxu0 %v21674_v13  ;;  %v16236_v45 = vld [vmem:[%s21153_s1 + $0x1528] sm:$0xff]   ;;  %v21676_v48 = vld [vmem:[#allocation108_spill] sm:$0xff]  ;;  %v13491_v39 = vcombine.high %v19541_v22, %v9952_v54 }
 0x2f6   : > { %15282 = vmatprep.subr.bf16.mxu0 %v16227_v11  ;;  %v14774_v26 = vadd.f32 %v14773_v58, %v14772_v23  ;;  %v14775_v56 = vpop.f32.mrb[226].mxu1  ;;  %v16239_v23 = vld [vmem:[%s21153_s1 + $0x1570] sm:$0xff]  }
 0x2f7   : > { %v20780_v49 = vadd.f32 %v14715_v0, %v7655_v9  ;;  %v14732_v32 = vpop.f32.mrb[224].mxu0  ;;  %15323 = vmatpush3.bf16.msra.mxu1 %v16230_v59  ;;  %v14776_v55 = vpop.f32.mrb[227].mxu1  ;;  %v16241_v58 = vld [vmem:[%s21153_s1 + $0x15f0] sm:$0xff]  }
 0x2f8   : > { %v14733_v62 = vpop.f32.mrb[225].mxu0  ;;  %15324 = vmatprep.subr.bf16.mxu1 %v16233_v2  ;;  %v14777_v28 = vadd.f32 %v14776_v55, %v14775_v56 }
 0x2f9   : > { %v14734_v19 = vadd.f32 %v14733_v62, %v14732_v32  ;;  %v14735_v60 = vpop.f32.mrb[226].mxu0  ;;  %15283 = vmatpush3.bf16.msra.mxu0 %v16228_v24  ;;  %v13490_v32 = vcombine.low %v19541_v22, %v9952_v54  ;;  %v16240_v62 = vld [vmem:[%s21153_s1 + $0x1530] sm:$0xff]  }
 0x2fa   : > { %v14736_v7 = vpop.f32.mrb[227].mxu0  ;;  %15284 = vmatprep.subr.bf16.mxu0 %v16231_v61  ;;  %10754 = vmatmul.mubr.bf16.gmra.mrb[72].mxu1 %v21677_v46 }
 0x2fb   : > { %v7758_v6 = vadd.f32 %v14734_v19, %v20675_v44  ;;  %v14737_v36 = vadd.f32 %v14736_v7, %v14735_v60  ;;  %v16400_v44 = vld [vmem:[%s16563_s26 + $0x2d8] sm:$0xff]  ;;  %15325 = vmatpush3.bf16.msra.mxu1 %v16234_v63 }
 0x2fc   : > { %v13326_v10 = vrot.slane %v16400_v44, 9  ;;  %10689 = vmatmul.mubr.bf16.gmra.mrb[72].mxu0 %v21676_v48  ;;  %v14778_v9 = vpop.f32.mrb[228].mxu1  ;;  %15326 = vmatprep.subr.bf16.mxu1 %v16237_v52  ;;  %v16244_v7 = vld [vmem:[%s21153_s1 + $0x1538] sm:$0xff]   ;;  %v21678_v52 = vld [vmem:[#allocation114_spill] sm:$0xff] }
 0x2fd   : > { %v7761_v11 = vadd.f32 %v14737_v36, %v20683_v17  ;;  %v7823_v15 = vadd.f32 %v14774_v26, %v7758_v6  ;;  %15285 = vmatpush3.bf16.msra.mxu0 %v16232_v5  ;;  %10696 = vmatprep.mubr.bf16.mxu0 %v13491_v39  ;;  %v14779_v19 = vpop.f32.mrb[229].mxu1  ;;  %v16245_v6 = vld [vmem:[%s21153_s1 + $0x15f8] sm:$0xff]   ;;  %v16248_v44 = vld [vmem:[%s21153_s1 + $0x1600] sm:$0xff]  }
 0x2fe   : > { %v9956_v24 = vsel %vm17694_vm5, %v13326_v10, %v9955_v12  ;;  %15286 = vmatprep.subr.bf16.mxu0 %v16235_v1  ;;  %v14780_v60 = vadd.f32 %v14779_v19, %v14778_v9  ;;  %v14781_v63 = vpop.f32.mrb[230].mxu1 }
 0x2ff   : > { %v20822_v17 = vadd.f32 %v7823_v15, %v20496_v29  ;;  %v13493_v0 = vcombine.high %v19691_v47, %v9956_v24  ;;  %v14738_v4 = vpop.f32.mrb[228].mxu0  ;;  %v7826_v59 = vadd.f32 %v14777_v28, %v7761_v11  ;;  %v13492_v13 = vcombine.low %v19691_v47, %v9956_v24  ;;  %15327 = vmatpush3.bf16.msra.mxu1 %v16238_v34  ;;  %v16243_v47 = vld [vmem:[%s21153_s1 + $0x1578] sm:$0xff]   ;;  %v14782_v1 = vpop.f32.mrb[231].mxu1  ;;  %v16249_v24 = vld [vmem:[%s21153_s1 + $0x1648] sm:$0xff]  }
 0x300   : > { %v14739_v61 = vpop.f32.mrb[229].mxu0  ;;  %15328 = vmatprep.subr.bf16.mxu1 %v16241_v58  ;;  %v14783_v56 = vadd.f32 %v14782_v1, %v14781_v63  ;;  %v21681_v58 = vld [vmem:[#allocation115_spill] sm:$0xff] }
 0x301   : > { %10761 = vmatprep.mubr.bf16.mxu1 %v13493_v0  ;;  %v14740_v29 = vadd.f32 %v14739_v61, %v14738_v4  ;;  %v14741_v26 = vpop.f32.mrb[230].mxu0  ;;  %15287 = vmatpush3.bf16.msra.mxu0 %v16236_v45  ;;  %v20834_v2 = vadd.f32 %v7826_v59, %v20503_v57  ;;  %v16247_v45 = vld [vmem:[%s21153_s1 + $0x1640] sm:$0xff]   ;;  %v21680_v0 = vld [vmem:[#allocation117_spill] sm:$0xff] }
 0x302   : > { %v14742_v5 = vpop.f32.mrb[231].mxu0  ;;  %15288 = vmatprep.subr.bf16.mxu0 %v16239_v23  ;;  %10762 = vmatmul.mubr.bf16.gmra.mrb[76].mxu1 %v13492_v13 }
 0x303   : > { %v7766_v22 = vadd.f32 %v14740_v29, %v20710_v35  ;;  %v14743_v57 = vadd.f32 %v14742_v5, %v14741_v26  ;;  %15329 = vmatpush3.bf16.msra.mxu1 %v16242_v42  ;;  %v21682_v26 = vld [vmem:[#allocation120_spill] sm:$0xff] }
 0x304   : > { %10697 = vmatmul.mubr.bf16.gmra.mrb[76].mxu0 %v13490_v32  ;;  %v14784_v25 = vpop.f32.mrb[232].mxu1  ;;  %15330 = vmatprep.subr.bf16.mxu1 %v16245_v6  ;;  %v21683_v5 = vld [vmem:[#allocation116_spill] sm:$0xff] }
 0x305   : > { %v7769_v35 = vadd.f32 %v14743_v57, %v20719_v16  ;;  %v7831_v36 = vadd.f32 %v14780_v60, %v7766_v22  ;;  %15289 = vmatpush3.bf16.msra.mxu0 %v16240_v62  ;;  %10802 = vmatprep.mubr.bf16.mxu0 %v21678_v52  ;;  %v14785_v12 = vpop.f32.mrb[233].mxu1  ;;  %v16252_v60 = vld [vmem:[%s21153_s1 + $0x1610] sm:$0xff]  }
 0x306   : > { %15290 = vmatprep.subr.bf16.mxu0 %v16243_v47  ;;  %v14786_v15 = vadd.f32 %v14785_v12, %v14784_v25  ;;  %v14787_v54 = vpop.f32.mrb[234].mxu1  ;;  %v16255_v12 = vld [vmem:[%s21153_s1 + $0x1660] sm:$0xff]  }
 0x307   : > { %v20857_v31 = vadd.f32 %v7831_v36, %v20533_v53  ;;  %v7834_v51 = vadd.f32 %v14783_v56, %v7769_v35  ;;  %v14744_v16 = vpop.f32.mrb[232].mxu0  ;;  %v21679_v53 = vld [vmem:[#allocation111_spill] sm:$0xff]  ;;  %v14788_v46 = vpop.f32.mrb[235].mxu1  ;;  %15331 = vmatpush3.bf16.msra.mxu1 %v16246_v41  ;;  %v16253_v35 = vld [vmem:[%s21153_s1 + $0x1658] sm:$0xff]  }
 0x308   : > { %v14745_v10 = vpop.f32.mrb[233].mxu0  ;;  %10867 = vmatprep.mubr.bf16.mxu1 %v21679_v53  ;;  %v16254_v41 = vld [vmem:[%s21153_s1 + $0x1618] sm:$0xff]  }
 0x309   : > { %v20867_v55 = vadd.f32 %v7834_v51, %v20551_v20  ;;  %v14746_v48 = vadd.f32 %v14745_v10, %v14744_v16  ;;  %v14747_v11 = vpop.f32.mrb[234].mxu0  ;;  %15291 = vmatpush3.bf16.msra.mxu0 %v16244_v7  ;;  %v14789_v20 = vadd.f32 %v14788_v46, %v14787_v54  ;;  %v16401_v7 = vld [vmem:[%s16563_s26 + $0x2e0] sm:$0xff]  ;;  %v13328_v51 = vrot.slane %v20658_v8, 9  ;;  %v21685_v10 = vld [vmem:[#allocation121_spill] sm:$0xff] }
 0x30a   : > { %v14748_v28 = vpop.f32.mrb[235].mxu0  ;;  %15356 = vmatprep.subr.bf16.mxu0 %v16247_v45  ;;  %10868 = vmatmul.mubr.bf16.vlgmr.msra.gmra.mrb[80].mxu1 %v21681_v58  ;;  %v13327_v6 = vrot.slane %v16401_v7, 9  ;;  %v21684_v45 = vld [vmem:[#allocation123_spill] sm:$0xff] }
 0x30b   : > { %v7774_v39 = vadd.f32 %v14746_v48, %v20740_v14  ;;  %v14749_v34 = vadd.f32 %v14748_v28, %v14747_v11  ;;  %v16250_v14 = vld [vmem:[%s21153_s1 + $0x1608] sm:$0xff]   ;;  %10875 = vmatprep.mubr.bf16.mxu1 %v21683_v5  ;;  %v21686_v11 = vld [vmem:[#allocation124_spill] sm:$0xff]  ;;  %v21687_v28 = vld [vmem:[#allocation122_spill] sm:$0xff] }
 0x30c   : > { %v14790_v9 = vpop.f32.mrb[236].mxu1  ;;  %10803 = vmatmul.mubr.bf16.vlgmr.msra.gmra.mrb[80].mxu0 %v21680_v0  ;;  %v16257_v0 = vld [vmem:[%s21153_s1 + $0x1668] sm:$0xff]  }
 0x30d   : > { %v7777_v23 = vadd.f32 %v14749_v34, %v20746_v40  ;;  %v7839_v4 = vadd.f32 %v14786_v15, %v7774_v39  ;;  %v14791_v59 = vpop.f32.mrb[237].mxu1  ;;  %15357 = vmatpush3.bf16.msra.mxu0 %v16248_v44  ;;  %10810 = vmatprep.mubr.bf16.mxu0 %v21682_v26  ;;  %v16251_v40 = vld [vmem:[%s21153_s1 + $0x1650] sm:$0xff]   ;;  %v9963_v44 = vrot.slane %v20655_v37, 5 }
 0x30e   : > { %v14792_v61 = vadd.f32 %v14791_v59, %v14790_v9  ;;  %v14793_v32 = vpop.f32.mrb[238].mxu1  ;;  %15358 = vmatprep.subr.bf16.mxu0 %v16249_v24 }
 0x30f   : > { %v20881_v29 = vadd.f32 %v7839_v4, %v20566_v27  ;;  %v7842_v13 = vadd.f32 %v14789_v20, %v7777_v23  ;;  %v14750_v62 = vpop.f32.mrb[236].mxu0  ;;  %v14794_v42 = vpop.f32.mrb[239].mxu1  ;;  %v9964_v9 = vsel %vm17694_vm5, %v13328_v51, %v9963_v44 }
 0x310   : > { %v14751_v19 = vpop.f32.mrb[237].mxu0  ;;  %v14795_v22 = vadd.f32 %v14794_v42, %v14793_v32  ;;  %v13497_v58 = vcombine.high %v19900_v30, %v9964_v9  ;;  %v16258_v32 = vld [vmem:[%s21153_s1 + $0x1628] sm:$0xff]  }
 0x311   : > { %v20889_v47 = vadd.f32 %v7842_v13, %v20582_v3  ;;  %v14752_v57 = vadd.f32 %v14751_v19, %v14750_v62  ;;  %v14753_v27 = vpop.f32.mrb[238].mxu0  ;;  %15359 = vmatpush3.bf16.msra.mxu0 %v16250_v14  ;;  %v16402_v3 = vld [vmem:[%s16563_s26 + $0x308] sm:$0x11]  ;;  %v16259_v62 = vld [vmem:[%s21153_s1 + $0x1670] sm:$0xff]  }
 0x312   : > { %v14754_v63 = vpop.f32.mrb[239].mxu0  ;;  %15360 = vmatprep.subr.bf16.mxu0 %v16251_v40  ;;  %v9959_v56 = vrot.slane %v16402_v3, 5  ;;  %10876 = vmatmul.mubr.bf16.gmra.mrb[84].mxu1 %v21685_v10  ;;  %v21689_v40 = vld [vmem:[#allocation125_spill] sm:$0xff] }
 0x313   : > { %v7782_v1 = vadd.f32 %v14752_v57, %v20774_v18  ;;  %v14755_v36 = vadd.f32 %v14754_v63, %v14753_v27  ;;  %10883 = vmatprep.mubr.bf16.mxu1 %v21687_v28  ;;  %v16261_v3 = vld [vmem:[%s21153_s1 + $0x1678] sm:$0xff]  }
 0x314   : > { %v14852_v25 = vpop.f32.mrb[240].mxu1  ;;  %10811 = vmatmul.mubr.bf16.gmra.mrb[84].mxu0 %v21684_v45  ;;  %v9960_v39 = vsel %vm17694_vm5, %v13327_v6, %v9959_v56  ;;  %v13496_v6 = vcombine.low %v19900_v30, %v9964_v9  ;;  %v16262_v30 = vld [vmem:[%s21153_s1 + $0x1638] sm:$0xff]  }
 0x315   : > { %v7785_v16 = vadd.f32 %v14755_v36, %v20780_v49  ;;  %v7847_v52 = vadd.f32 %v14792_v61, %v7782_v1  ;;  %v14853_v18 = vpop.f32.mrb[241].mxu1  ;;  %15361 = vmatpush3.bf16.msra.mxu0 %v16252_v60  ;;  %10818 = vmatprep.mubr.bf16.mxu0 %v21686_v11  ;;  %v13495_v59 = vcombine.high %v19708_v38, %v9960_v39  ;;  %v21688_v61 = vld [vmem:[#allocation126_spill] sm:$0xff]  ;;  %v16260_v1 = vld [vmem:[%s21153_s1 + $0x1630] sm:$0xff]  }
 0x316   : > { %v14854_v53 = vadd.f32 %v14853_v18, %v14852_v25  ;;  %v14855_v48 = vpop.f32.mrb[242].mxu1  ;;  %15362 = vmatprep.subr.bf16.mxu0 %v16253_v35  ;;  %v13494_v60 = vcombine.low %v19708_v38, %v9960_v39 }
 0x317   : > { %v20912_v8 = vadd.f32 %v7847_v52, %v20632_v21  ;;  %v7850_v49 = vadd.f32 %v14795_v22, %v7785_v16  ;;  %v14812_v15 = vpop.f32.mrb[240].mxu0  ;;  %v14856_v54 = vpop.f32.mrb[243].mxu1  ;;  %v16256_v21 = vld [vmem:[%s21153_s1 + $0x1620] sm:$0xff]   ;;  %v21690_v16 = vld [vmem:[#allocation128_spill] sm:$0xff] }
 0x318   : > { %v14813_v37 = vpop.f32.mrb[241].mxu0  ;;  %v14857_v46 = vadd.f32 %v14856_v54, %v14855_v48  ;;  %v21691_v54 = vld [vmem:[#allocation131_spill] sm:$0xff] }
 0x319   : > { %v20919_v24 = vadd.f32 %v7850_v49, %v20645_v43  ;;  %v14814_v34 = vadd.f32 %v14813_v37, %v14812_v15  ;;  %v14815_v20 = vpop.f32.mrb[242].mxu0  ;;  %15363 = vmatpush3.bf16.msra.mxu0 %v16254_v41 }
 0x31a   : > { %v14816_v23 = vpop.f32.mrb[243].mxu0  ;;  %15364 = vmatprep.subr.bf16.mxu0 %v16255_v12  ;;  %10884 = vmatmul.mubr.bf16.gmra.mrb[88].mxu1 %v21689_v40 }
 0x31b   : > { %v20929_v4 = vadd.f32 %v14854_v53, %v14814_v34  ;;  %v14817_v43 = vadd.f32 %v14816_v23, %v14815_v20  ;;  %10891 = vmatprep.mubr.bf16.mxu1 %v13497_v58 }
 0x31c   : > { %v14858_v14 = vpop.f32.mrb[244].mxu1  ;;  %10819 = vmatmul.mubr.bf16.gmra.mrb[88].mxu0 %v21688_v61  ;;  %v16403_v61 = vld [vmem:[%s16563_s26 + $0x2f0] sm:$0xff] }
 0x31d   : > { %v20937_v26 = vadd.f32 %v14857_v46, %v14817_v43  ;;  %v14859_v13 = vpop.f32.mrb[245].mxu1  ;;  %15365 = vmatpush3.bf16.msra.mxu0 %v16256_v21  ;;  %10826 = vmatprep.mubr.bf16.mxu0 %v13495_v59  ;;  %v21692_v46 = vld [vmem:[#allocation132_spill] sm:$0xff] }
 0x31e   : > { %v14860_v42 = vadd.f32 %v14859_v13, %v14858_v14  ;;  %v14861_v5 = vpop.f32.mrb[246].mxu1  ;;  %15366 = vmatprep.subr.bf16.mxu0 %v16257_v0  ;;  %v16404_v13 = vld [vmem:[%s16563_s26 + $0x318] sm:$0x11] }
 0x31f   : > { %v14818_v19 = vpop.f32.mrb[244].mxu0  ;;  %v14862_v22 = vpop.f32.mrb[247].mxu1  ;;  %v9967_v40 = vrot.slane %v16404_v13, 5 }
 0x320   : > { %v14819_v57 = vpop.f32.mrb[245].mxu0  ;;  %v14863_v27 = vadd.f32 %v14862_v22, %v14861_v5  ;;  %v21694_v22 = vld [vmem:[#allocation136_spill] sm:$0xff] }
 0x321   : > { %v14820_v63 = vadd.f32 %v14819_v57, %v14818_v19  ;;  %v14821_v7 = vpop.f32.mrb[246].mxu0  ;;  %15367 = vmatpush3.bf16.msra.mxu0 %v16258_v32  ;;  %v13329_v32 = vrot.slane %v16403_v61, 9 }
 0x322   : > { %v14822_v35 = vpop.f32.mrb[247].mxu0  ;;  %15368 = vmatprep.subr.bf16.mxu0 %v16259_v62  ;;  %10892 = vmatmul.mubr.bf16.gmra.mrb[92].mxu1 %v13496_v6 }
 0x323   : > { %v20948_v36 = vadd.f32 %v14860_v42, %v14820_v63  ;;  %v14823_v56 = vadd.f32 %v14822_v35, %v14821_v7  ;;  %v21693_v42 = vld [vmem:[#allocation135_spill] sm:$0xff]  ;;  %v9968_v63 = vsel %vm17694_vm5, %v13329_v32, %v9967_v40 }
 0x324   : > { %v14864_v41 = vpop.f32.mrb[248].mxu1  ;;  %10827 = vmatmul.mubr.bf16.gmra.mrb[92].mxu0 %v13494_v60 }
 0x325   : > { %v20953_v38 = vadd.f32 %v14863_v27, %v14823_v56  ;;  %v14865_v25 = vpop.f32.mrb[249].mxu1  ;;  %15369 = vmatpush3.bf16.msra.mxu0 %v16260_v1  ;;  %10932 = vmatprep.mubr.bf16.mxu0 %v21690_v16 }
 0x326   : > { %v14866_v51 = vadd.f32 %v14865_v25, %v14864_v41  ;;  %v14867_v45 = vpop.f32.mrb[250].mxu1  ;;  %15370 = vmatprep.subr.bf16.mxu0 %v16261_v3  ;;  %v13499_v41 = vcombine.high %v19906_v33, %v9968_v63 }
 0x327   : > { %v14824_v52 = vpop.f32.mrb[248].mxu0  ;;  %v14868_v18 = vpop.f32.mrb[251].mxu1 }
 0x328   : > { %v14825_v44 = vpop.f32.mrb[249].mxu0  ;;  %v14869_v10 = vadd.f32 %v14868_v18, %v14867_v45  ;;  %v21695_v45 = vld [vmem:[#allocation137_spill] sm:$0xff] }
 0x329   : > { %v14826_v12 = vadd.f32 %v14825_v44, %v14824_v52  ;;  %v14827_v53 = vpop.f32.mrb[250].mxu0  ;;  %15371 = vmatpush3.bf16.msra.mxu0 %v16262_v30 }
 0x32a   : > { %v14828_v48 = vpop.f32.mrb[251].mxu0 }
 0x32b   : > { %v20959_v11 = vadd.f32 %v14866_v51, %v14826_v12  ;;  %v14829_v49 = vadd.f32 %v14828_v48, %v14827_v53 }
 0x32c   : > { %v14870_v15 = vpop.f32.mrb[252].mxu1  ;;  %10933 = vmatmul.mubr.bf16.vlgmr.msra.gmra.mrb[96].mxu0 %v21691_v54 }
 0x32d   : > { %v20962_v28 = vadd.f32 %v14869_v10, %v14829_v49  ;;  %v14871_v37 = vpop.f32.mrb[253].mxu1  ;;  %10940 = vmatprep.mubr.bf16.mxu0 %v21692_v46 }
 0x32e   : > { %v14872_v39 = vadd.f32 %v14871_v37, %v14870_v15  ;;  %v14873_v21 = vpop.f32.mrb[254].mxu1  ;;  %v13498_v15 = vcombine.low %v19906_v33, %v9968_v63 }
 0x32f   : > { %v14830_v34 = vpop.f32.mrb[252].mxu0  ;;  %v14874_v20 = vpop.f32.mrb[255].mxu1 }
 0x330   : > { %v14831_v9 = vpop.f32.mrb[253].mxu0  ;;  %v14875_v0 = vadd.f32 %v14874_v20, %v14873_v21 }
 0x331   : > { %v14832_v23 = vadd.f32 %v14831_v9, %v14830_v34  ;;  %v14833_v43 = vpop.f32.mrb[254].mxu0 }
 0x332   : > { %v14834_v59 = vpop.f32.mrb[255].mxu0 }
 0x333   : > { %v20965_v58 = vadd.f32 %v14872_v39, %v14832_v23  ;;  %v14835_v14 = vadd.f32 %v14834_v59, %v14833_v43 }
 0x334   : > { %v14932_v62 = vpop.f32.mrb[0].mxu1  ;;  %10941 = vmatmul.mubr.bf16.gmra.mrb[100].mxu0 %v21693_v42 }
 0x335   : > { %v20970_v5 = vadd.f32 %v14875_v0, %v14835_v14  ;;  %v14933_v19 = vpop.f32.mrb[1].mxu1  ;;  %10948 = vmatprep.mubr.bf16.mxu0 %v21694_v22 }
 0x336   : > { %v14934_v57 = vadd.f32 %v14933_v19, %v14932_v62  ;;  %v14935_v27 = vpop.f32.mrb[2].mxu1 }
 0x337   : > { %v14892_v60 = vpop.f32.mrb[0].mxu0  ;;  %v14936_v7 = vpop.f32.mrb[3].mxu1 }
 0x338   : > { %v14893_v6 = vpop.f32.mrb[1].mxu0  ;;  %v14937_v1 = vadd.f32 %v14936_v7, %v14935_v27 }
 0x339   : > { %v14894_v35 = vadd.f32 %v14893_v6, %v14892_v60  ;;  %v14895_v3 = vpop.f32.mrb[2].mxu0 }
 0x33a   : > { %v14896_v56 = vpop.f32.mrb[3].mxu0 }
 0x33b   : > { %v8702_v25 = vadd.f32 %v14894_v35, %v20929_v4  ;;  %v14897_v30 = vadd.f32 %v14896_v56, %v14895_v3 }
 0x33c   : > { %v14938_v51 = vpop.f32.mrb[4].mxu1  ;;  %10949 = vmatmul.mubr.bf16.gmra.mrb[104].mxu0 %v21695_v45 }
 0x33d   : > { %v8705_v16 = vadd.f32 %v14897_v30, %v20937_v26  ;;  %v20979_v52 = vadd.f32 %v14934_v57, %v8702_v25  ;;  %v14939_v50 = vpop.f32.mrb[5].mxu1  ;;  %10956 = vmatprep.mubr.bf16.mxu0 %v13499_v41 }
 0x33e   : > { %v14940_v18 = vadd.f32 %v14939_v50, %v14938_v51  ;;  %v14941_v44 = vpop.f32.mrb[6].mxu1 }
 0x33f   : > { %v8770_v10 = vadd.f32 %v14937_v1, %v8705_v16  ;;  %v14898_v12 = vpop.f32.mrb[4].mxu0  ;;  %v14942_v53 = vpop.f32.mrb[7].mxu1 }
 0x340   : > { %v14899_v48 = vpop.f32.mrb[5].mxu0  ;;  %v14943_v49 = vadd.f32 %v14942_v53, %v14941_v44 }
 0x341   : > { %v14900_v4 = vadd.f32 %v14899_v48, %v14898_v12  ;;  %v14901_v54 = vpop.f32.mrb[6].mxu0 }
 0x342   : > { %v14902_v37 = vpop.f32.mrb[7].mxu0 }
 0x343   : > { %v8710_v46 = vadd.f32 %v14900_v4, %v20948_v36  ;;  %v14903_v39 = vadd.f32 %v14902_v37, %v14901_v54 }
 0x344   : > { %v14944_v26 = vpop.f32.mrb[8].mxu1  ;;  %10957 = vmatmul.mubr.bf16.gmra.mrb[108].mxu0 %v13498_v15 }
 0x345   : > { %v8713_v21 = vadd.f32 %v14903_v39, %v20953_v38  ;;  %v8775_v34 = vadd.f32 %v14940_v18, %v8710_v46  ;;  %v14945_v20 = vpop.f32.mrb[9].mxu1 }
 0x346   : > { %v14946_v9 = vadd.f32 %v14945_v20, %v14944_v26  ;;  %v14947_v0 = vpop.f32.mrb[10].mxu1 }
 0x347   : > { %v8778_v23 = vadd.f32 %v14943_v49, %v8713_v21  ;;  %v14904_v43 = vpop.f32.mrb[8].mxu0  ;;  %v14948_v59 = vpop.f32.mrb[11].mxu1 }
 0x348   : > { %v14905_v14 = vpop.f32.mrb[9].mxu0  ;;  %v14949_v61 = vadd.f32 %v14948_v59, %v14947_v0 }
 0x349   : > { %v14906_v33 = vadd.f32 %v14905_v14, %v14904_v43  ;;  %v14907_v32 = vpop.f32.mrb[10].mxu0 }
 0x34a   : > { %v14908_v13 = vpop.f32.mrb[11].mxu0 }
 0x34b   : > { %v8718_v40 = vadd.f32 %v14906_v33, %v20959_v11  ;;  %v14909_v36 = vadd.f32 %v14908_v13, %v14907_v32 }
 0x34c   : > { %v14950_v62 = vpop.f32.mrb[12].mxu1 }
 0x34d   : > { %v8721_v42 = vadd.f32 %v14909_v36, %v20962_v28  ;;  %v8783_v19 = vadd.f32 %v14946_v9, %v8718_v40  ;;  %v14951_v38 = vpop.f32.mrb[13].mxu1 }
 0x34e   : > { %v14952_v22 = vadd.f32 %v14951_v38, %v14950_v62  ;;  %v14953_v57 = vpop.f32.mrb[14].mxu1 }
 0x34f   : > { %v8786_v27 = vadd.f32 %v14949_v61, %v8721_v42  ;;  %v14910_v60 = vpop.f32.mrb[12].mxu0  ;;  %v14954_v63 = vpop.f32.mrb[15].mxu1 }
 0x350   : > { %v14911_v7 = vpop.f32.mrb[13].mxu0  ;;  %v14955_v6 = vadd.f32 %v14954_v63, %v14953_v57 }
 0x351   : > { %v14912_v1 = vadd.f32 %v14911_v7, %v14910_v60  ;;  %v14913_v35 = vpop.f32.mrb[14].mxu0 }
 0x352   : > { %v14914_v3 = vpop.f32.mrb[15].mxu0 }
 0x353   : > { %v8726_v56 = vadd.f32 %v14912_v1, %v20965_v58  ;;  %v14915_v41 = vadd.f32 %v14914_v3, %v14913_v35 }
 0x354   : > { %v15012_v11 = vpop.f32.mrb[16].mxu1 }
 0x355   : > { %v8729_v25 = vadd.f32 %v14915_v41, %v20970_v5  ;;  %v8791_v30 = vadd.f32 %v14952_v22, %v8726_v56  ;;  %v15013_v28 = vpop.f32.mrb[17].mxu1 }
 0x356   : > { %v20988_v51 = vadd.f32 %v15013_v28, %v15012_v11  ;;  %v15015_v45 = vpop.f32.mrb[18].mxu1 }
 0x357   : > { %v8794_v16 = vadd.f32 %v14955_v6, %v8729_v25  ;;  %v14972_v50 = vpop.f32.mrb[16].mxu0  ;;  %v15016_v18 = vpop.f32.mrb[19].mxu1 }
 0x358   : > { %v14973_v44 = vpop.f32.mrb[17].mxu0  ;;  %v20990_v12 = vadd.f32 %v15016_v18, %v15015_v45 }
 0x359   : > { %v14974_v53 = vadd.f32 %v14973_v44, %v14972_v50  ;;  %v14975_v48 = vpop.f32.mrb[18].mxu0 }
 0x35a   : > { %v14976_v49 = vpop.f32.mrb[19].mxu0 }
 0x35b   : > { %v8832_v58 = vadd.f32 %v14974_v53, %v20979_v52  ;;  %v14977_v15 = vadd.f32 %v14976_v49, %v14975_v48 }
 0x35c   : > { %v15018_v4 = vpop.f32.mrb[20].mxu1 }
 0x35d   : > { %v20994_v5 = vadd.f32 %v8832_v58, %v20822_v17  ;;  %v8835_v54 = vadd.f32 %v14977_v15, %v8770_v10  ;;  %v15019_v37 = vpop.f32.mrb[21].mxu1 }
 0x35e   : > { %v20996_v46 = vadd.f32 %v15019_v37, %v15018_v4  ;;  %v15021_v39 = vpop.f32.mrb[22].mxu1 }
 0x35f   : > { %v20999_v26 = vadd.f32 %v8835_v54, %v20834_v2  ;;  %v14978_v21 = vpop.f32.mrb[20].mxu0  ;;  %v15022_v20 = vpop.f32.mrb[23].mxu1 }
 0x360   : > { %v14979_v9 = vpop.f32.mrb[21].mxu0  ;;  %v21001_v0 = vadd.f32 %v15022_v20, %v15021_v39 }
 0x361   : > { %v14980_v43 = vadd.f32 %v14979_v9, %v14978_v21  ;;  %v14981_v52 = vpop.f32.mrb[22].mxu0 }
 0x362   : > { %v14982_v59 = vpop.f32.mrb[23].mxu0 }
 0x363   : > { %v8840_v14 = vadd.f32 %v14980_v43, %v8775_v34  ;;  %v14983_v61 = vadd.f32 %v14982_v59, %v14981_v52 }
 0x364   : > { %v15024_v17 = vpop.f32.mrb[24].mxu1 }
 0x365   : > { %v21004_v10 = vadd.f32 %v8840_v14, %v20857_v31  ;;  %v8843_v33 = vadd.f32 %v14983_v61, %v8778_v23  ;;  %v15025_v32 = vpop.f32.mrb[25].mxu1 }
 0x366   : > { %v21006_v13 = vadd.f32 %v15025_v32, %v15024_v17  ;;  %v15027_v2 = vpop.f32.mrb[26].mxu1 }
 0x367   : > { %v21009_v40 = vadd.f32 %v8843_v33, %v20867_v55  ;;  %v14984_v36 = vpop.f32.mrb[24].mxu0  ;;  %v15028_v62 = vpop.f32.mrb[27].mxu1 }
 0x368   : > { %v14985_v42 = vpop.f32.mrb[25].mxu0  ;;  %v21011_v38 = vadd.f32 %v15028_v62, %v15027_v2 }
 0x369   : > { %v14986_v22 = vadd.f32 %v14985_v42, %v14984_v36  ;;  %v14987_v34 = vpop.f32.mrb[26].mxu0 }
 0x36a   : > { %v14988_v57 = vpop.f32.mrb[27].mxu0 }
 0x36b   : > { %v8848_v60 = vadd.f32 %v14986_v22, %v8783_v19  ;;  %v14989_v63 = vadd.f32 %v14988_v57, %v14987_v34 }
 0x36d   : > { %v21014_v31 = vadd.f32 %v8848_v60, %v20881_v29  ;;  %v8851_v23 = vadd.f32 %v14989_v63, %v8786_v27 }
 0x36e   : > { %v15030_v3 = vpop.f32.mrb[28].mxu1 }
 0x36f   : > { %v21017_v7 = vadd.f32 %v8851_v23, %v20889_v47  ;;  %v14990_v6 = vpop.f32.mrb[28].mxu0  ;;  %v15031_v41 = vpop.f32.mrb[29].mxu1 }
 0x370   : > { %v14991_v55 = vpop.f32.mrb[29].mxu0  ;;  %v15032_v28 = vadd.f32 %v15031_v41, %v15030_v3  ;;  %v15033_v45 = vpop.f32.mrb[30].mxu1 }
 0x371   : > { %v14992_v1 = vadd.f32 %v14991_v55, %v14990_v6  ;;  %v14993_v35 = vpop.f32.mrb[30].mxu0  ;;  %v15034_v19 = vpop.f32.mrb[31].mxu1 }
 0x372   : > { %v14994_v56 = vpop.f32.mrb[31].mxu0  ;;  %v15035_v27 = vadd.f32 %v15034_v19, %v15033_v45 }
 0x373   : > { %v8856_v11 = vadd.f32 %v14992_v1, %v8791_v30  ;;  %v14995_v25 = vadd.f32 %v14994_v56, %v14993_v35 }
 0x375   : > { %v21020_v50 = vadd.f32 %v8856_v11, %v20912_v8  ;;  %v8859_v29 = vadd.f32 %v14995_v25, %v8794_v16 }
 0x376   : > { %v15092_v49 = vpop.f32.mrb[32].mxu1 }
 0x377   : > { %v21023_v47 = vadd.f32 %v8859_v29, %v20919_v24  ;;  %v15052_v18 = vpop.f32.mrb[32].mxu0  ;;  %v15093_v15 = vpop.f32.mrb[33].mxu1 }
 0x378   : > { %v15053_v44 = vpop.f32.mrb[33].mxu0  ;;  %v15094_v54 = vadd.f32 %v15093_v15, %v15092_v49  ;;  %v15095_v37 = vpop.f32.mrb[34].mxu1 }
 0x379   : > { %v15054_v53 = vadd.f32 %v15053_v44, %v15052_v18  ;;  %v15055_v48 = vpop.f32.mrb[34].mxu0  ;;  %v15096_v39 = vpop.f32.mrb[35].mxu1 }
 0x37a   : > { %v15056_v58 = vpop.f32.mrb[35].mxu0  ;;  %v15097_v21 = vadd.f32 %v15096_v39, %v15095_v37 }
 0x37b   : > { %v9711_v30 = vadd.f32 %v15054_v53, %v20988_v51  ;;  %v15057_v4 = vadd.f32 %v15056_v58, %v15055_v48 }
 0x37d   : > { %v9714_v8 = vadd.f32 %v15057_v4, %v20990_v12  ;;  %v9776_v16 = vadd.f32 %v15094_v54, %v9711_v30  ;;  %v16413_v4 = vmov 0.0  }
 0x37e   : > { %v15098_v59 = vpop.f32.mrb[36].mxu1  ;;  %15410 = vmatprep.subr.bf16.mxu1 %v16413_v4  ;;  %15426 = vmatprep.mubr.msk.bf16.mxu1 %vm16414_vm6, %v16413_v4 }
 0x37f   : > { %v21027_v20 = vadd.f32 %v15097_v21, %v9714_v8  ;;  %v15058_v24 = vpop.f32.mrb[36].mxu0  ;;  %v15099_v61 = vpop.f32.mrb[37].mxu1 }
 0x380   : > { %v15059_v9 = vpop.f32.mrb[37].mxu0  ;;  %v15100_v33 = vadd.f32 %v15099_v61, %v15098_v59  ;;  %v15101_v32 = vpop.f32.mrb[38].mxu1 }
 0x381   : > { %v15060_v43 = vadd.f32 %v15059_v9, %v15058_v24  ;;  %v15061_v52 = vpop.f32.mrb[38].mxu0  ;;  %v15102_v2 = vpop.f32.mrb[39].mxu1  ;;  %v16264_v24 = vld [vmem:[%s21155_s3 + $0x8] sm:$0xff]  }
 0x382   : > { %v15062_v14 = vpop.f32.mrb[39].mxu0  ;;  %v15103_v62 = vadd.f32 %v15102_v2, %v15101_v32 }
 0x383   : > { %v9719_v17 = vadd.f32 %v15060_v43, %v20996_v46  ;;  %v15063_v51 = vadd.f32 %v15062_v14, %v15061_v52 }
 0x385   : > { %v9722_v36 = vadd.f32 %v15063_v51, %v21001_v0  ;;  %v21031_v12 = vadd.f32 %v15100_v33, %v9719_v17  ;;  %v16265_v33 = vld [vmem:[%s21155_s3 + $0x10] sm:$0xff]  }
 0x386   : > { %v15104_v63 = vpop.f32.mrb[40].mxu1 }
 0x387   : > { %v21033_v42 = vadd.f32 %v15103_v62, %v9722_v36  ;;  %v15064_v22 = vpop.f32.mrb[40].mxu0  ;;  %v15105_v6 = vpop.f32.mrb[41].mxu1 }
 0x388   : > { %v15065_v34 = vpop.f32.mrb[41].mxu0  ;;  %v15106_v1 = vadd.f32 %v15105_v6, %v15104_v63  ;;  %v15107_v35 = vpop.f32.mrb[42].mxu1 }
 0x389   : > { %v15066_v57 = vadd.f32 %v15065_v34, %v15064_v22  ;;  %v15067_v60 = vpop.f32.mrb[42].mxu0  ;;  %v15108_v3 = vpop.f32.mrb[43].mxu1 }
 0x38a   : > { %v15068_v23 = vpop.f32.mrb[43].mxu0  ;;  %v15109_v41 = vadd.f32 %v15108_v3, %v15107_v35 }
 0x38b   : > { %v9727_v46 = vadd.f32 %v15066_v57, %v21006_v13  ;;  %v15069_v55 = vadd.f32 %v15068_v23, %v15067_v60  ;;  %v16266_v60 = vld [vmem:[%s21155_s3 + $0x18] sm:$0xff]  }
 0x38d   : > { %v9730_v0 = vadd.f32 %v15069_v55, %v21011_v38  ;;  %v21037_v56 = vadd.f32 %v15106_v1, %v9727_v46  ;;  %v16263_v38 = vld [vmem:[%s21155_s3] sm:$0xff]  }
 0x38e   : > { %15411 = vmatpush3.bf16.msra.mxu1 %v16263_v38 }
 0x38f   : > { %v21039_v11 = vadd.f32 %v15109_v41, %v9730_v0  ;;  %v15070_v25 = vpop.f32.mrb[44].mxu0  ;;  %15412 = vmatprep.subr.bf16.mxu1 %v16413_v4  ;;  %v16267_v0 = vld [vmem:[%s21155_s3 + $0x20] sm:$0xff]  }
 0x390   : > { %v15071_v45 = vpop.f32.mrb[45].mxu0 }
 0x391   : > { %v15072_v19 = vadd.f32 %v15071_v45, %v15070_v25  ;;  %v15073_v29 = vpop.f32.mrb[46].mxu0 }
 0x392   : > { %v15074_v18 = vpop.f32.mrb[47].mxu0  ;;  %15413 = vmatpush3.bf16.msra.mxu1 %v16264_v24 }
 0x393   : > { %v9735_v44 = vadd.f32 %v15072_v19, %v15032_v28  ;;  %v15110_v53 = vpop.f32.mrb[44].mxu1  ;;  %v15075_v48 = vadd.f32 %v15074_v18, %v15073_v29  ;;  %15414 = vmatprep.subr.bf16.mxu1 %v16413_v4 }
 0x394   : > { %v15111_v13 = vpop.f32.mrb[45].mxu1 }
 0x395   : > { %v9738_v49 = vadd.f32 %v15075_v48, %v15035_v27  ;;  %v15112_v58 = vadd.f32 %v15111_v13, %v15110_v53  ;;  %v15113_v15 = vpop.f32.mrb[46].mxu1 }
 0x396   : > { %v15114_v30 = vpop.f32.mrb[47].mxu1  ;;  %15415 = vmatpush3.bf16.msra.mxu1 %v16265_v33 }
 0x397   : > { %v21045_v54 = vadd.f32 %v15112_v58, %v9735_v44  ;;  %v15115_v37 = vadd.f32 %v15114_v30, %v15113_v15  ;;  %v15132_v39 = vpop.f32.mrb[48].mxu0  ;;  %15416 = vmatprep.subr.bf16.mxu1 %v16413_v4  ;;  %v16268_v44 = vld [vmem:[%s21155_s3 + $0x28] sm:$0xff]  }
 0x398   : > { %v15133_v28 = vpop.f32.mrb[49].mxu0 }
 0x399   : > { %v21048_v8 = vadd.f32 %v15115_v37, %v9738_v49  ;;  %v15134_v27 = vadd.f32 %v15133_v28, %v15132_v39  ;;  %v15135_v21 = vpop.f32.mrb[50].mxu0  ;;  %v16269_v37 = vld [vmem:[%s21155_s3 + $0x30] sm:$0xff]  }
 0x39a   : > { %v15136_v9 = vpop.f32.mrb[51].mxu0  ;;  %15417 = vmatpush3.bf16.msra.mxu1 %v16266_v60 }
 0x39b   : > { %v9841_v43 = vadd.f32 %v15134_v27, %v9776_v16  ;;  %v15172_v52 = vpop.f32.mrb[48].mxu1  ;;  %v15137_v59 = vadd.f32 %v15136_v9, %v15135_v21  ;;  %15418 = vmatprep.subr.bf16.mxu1 %v16413_v4 }
 0x39c   : > { %v15173_v14 = vpop.f32.mrb[49].mxu1 }
 0x39d   : > { %v9844_v61 = vadd.f32 %v15137_v59, %v21027_v20  ;;  %v15174_v17 = vadd.f32 %v15173_v14, %v15172_v52  ;;  %v15175_v51 = vpop.f32.mrb[50].mxu1 }
 0x39e   : > { %v15176_v32 = vpop.f32.mrb[51].mxu1  ;;  %15419 = vmatpush3.bf16.msra.mxu1 %v16267_v0 }
 0x39f   : > { %v9906_v2 = vadd.f32 %v15174_v17, %v9841_v43  ;;  %v15177_v36 = vadd.f32 %v15176_v32, %v15175_v51  ;;  %v15138_v62 = vpop.f32.mrb[52].mxu0  ;;  %15420 = vmatprep.subr.bf16.mxu1 %v16413_v4 }
 0x3a0   : > { %v15139_v16 = vpop.f32.mrb[53].mxu0 }
 0x3a1   : > { %v21060_v22 = vadd.f32 %v9906_v2, %v20994_v5  ;;  %v9909_v34 = vadd.f32 %v15177_v36, %v9844_v61  ;;  %v15140_v57 = vadd.f32 %v15139_v16, %v15138_v62  ;;  %v15141_v20 = vpop.f32.mrb[54].mxu0 }
 0x3a2   : > { %v15142_v63 = vpop.f32.mrb[55].mxu0  ;;  %15421 = vmatpush3.bf16.msra.mxu1 %v16268_v44 }
 0x3a3   : > { %v21066_v23 = vadd.f32 %v9909_v34, %v20999_v26  ;;  %v9849_v6 = vadd.f32 %v15140_v57, %v21031_v12  ;;  %v15178_v46 = vpop.f32.mrb[52].mxu1  ;;  %v15143_v55 = vadd.f32 %v15142_v63, %v15141_v20  ;;  %15422 = vmatprep.subr.bf16.mxu1 %v16413_v4 }
 0x3a4   : > { %v15179_v1 = vpop.f32.mrb[53].mxu1 }
 0x3a5   : > { %v9852_v5 = vadd.f32 %v15143_v55, %v21033_v42  ;;  %v15180_v35 = vadd.f32 %v15179_v1, %v15178_v46  ;;  %v15181_v3 = vpop.f32.mrb[54].mxu1 }
 0x3a6   : > { %v15182_v41 = vpop.f32.mrb[55].mxu1  ;;  %15423 = vmatpush3.bf16.msra.mxu1 %v16269_v37 }
 0x3a7   : > { %v9914_v25 = vadd.f32 %v15180_v35, %v9849_v6  ;;  %v15183_v26 = vadd.f32 %v15182_v41, %v15181_v3  ;;  %15424 = vmatprep.subr.bf16.mxu1 %v16413_v4 }
 0x3a9   : > { %v15144_v45 = vpop.f32.mrb[56].mxu0  ;;  %v21076_v19 = vadd.f32 %v9914_v25, %v21004_v10  ;;  %v9917_v29 = vadd.f32 %v15183_v26, %v9852_v5 }
 0x3aa   : > { %v15145_v12 = vpop.f32.mrb[57].mxu0 }
 0x3ab   : > { %v15146_v18 = vadd.f32 %v15145_v12, %v15144_v45  ;;  %v15147_v42 = vpop.f32.mrb[58].mxu0  ;;  %v21082_v48 = vadd.f32 %v9917_v29, %v21009_v40  ;;  %v15184_v49 = vpop.f32.mrb[56].mxu1 }
 0x3ac   : > { %v15148_v53 = vpop.f32.mrb[59].mxu0  ;;  %v15185_v15 = vpop.f32.mrb[57].mxu1 }
 0x3ad   : > { %v9857_v13 = vadd.f32 %v15146_v18, %v21037_v56  ;;  %v15149_v58 = vadd.f32 %v15148_v53, %v15147_v42  ;;  %v15186_v38 = vadd.f32 %v15185_v15, %v15184_v49  ;;  %v15187_v30 = vpop.f32.mrb[58].mxu1 }
 0x3ae   : > { %v15188_v39 = vpop.f32.mrb[59].mxu1 }
 0x3af   : > { %v9860_v10 = vadd.f32 %v15149_v58, %v21039_v11  ;;  %v9922_v28 = vadd.f32 %v15186_v38, %v9857_v13  ;;  %v15189_v40 = vadd.f32 %v15188_v39, %v15187_v30  ;;  %v16270_v11 = vld [vmem:[%s21155_s3 + $0x38] sm:$0xff]  }
 0x3b0   : > { %15425 = vmatpush3.bf16.msra.mxu1 %v16270_v11 }
 0x3b1   : > { %v21092_v56 = vadd.f32 %v9922_v28, %v21014_v31  ;;  %v9925_v27 = vadd.f32 %v15189_v40, %v9860_v10  ;;  %15430 = vmatprep.subr.bf16.mxu1 %v16413_v4 }
 0x3b3   : > { %v21098_v21 = vadd.f32 %v9925_v27, %v21017_v7 }
 0x3b5   : > { %v15190_v43 = vpop.f32.mrb[60].mxu1 }
 0x3b6   : > { %v15191_v59 = vpop.f32.mrb[61].mxu1 }
 0x3b7   : > { %v15150_v24 = vpop.f32.mrb[60].mxu0  ;;  %v15192_v61 = vadd.f32 %v15191_v59, %v15190_v43  ;;  %v15193_v17 = vpop.f32.mrb[62].mxu1 }
 0x3b8   : > { %v15151_v9 = vpop.f32.mrb[61].mxu0  ;;  %v15194_v33 = vpop.f32.mrb[63].mxu1 }
 0x3b9   : > { %v15152_v31 = vadd.f32 %v15151_v9, %v15150_v24  ;;  %v15153_v52 = vpop.f32.mrb[62].mxu0  ;;  %v15195_v32 = vadd.f32 %v15194_v33, %v15193_v17 }
 0x3ba   : > { %v15154_v14 = vpop.f32.mrb[63].mxu0 }
 0x3bb   : > { %v9865_v51 = vadd.f32 %v15152_v31, %v21045_v54  ;;  %v15155_v7 = vadd.f32 %v15154_v14, %v15153_v52 }
 0x3bd   : > { %v9868_v2 = vadd.f32 %v15155_v7, %v21048_v8  ;;  %v9930_v36 = vadd.f32 %v15192_v61, %v9865_v51  ;;  %v15252_v57 = vpop.f32.mrb[64].mxu1 }
 0x3be   : > { %v15253_v6 = vpop.f32.mrb[65].mxu1 }
 0x3bf   : > { %v21106_v62 = vadd.f32 %v9930_v36, %v21020_v50  ;;  %v9933_v16 = vadd.f32 %v15195_v32, %v9868_v2  ;;  %v15212_v34 = vpop.f32.mrb[64].mxu0  ;;  %v15254_v54 = vadd.f32 %v15253_v6, %v15252_v57  ;;  %v15255_v55 = vpop.f32.mrb[66].mxu1 }
 0x3c0   : > { %v15213_v20 = vpop.f32.mrb[65].mxu0  ;;  %v15256_v35 = vpop.f32.mrb[67].mxu1 }
 0x3c1   : > { %v21109_v60 = vadd.f32 %v9933_v16, %v21023_v47  ;;  %v15214_v63 = vadd.f32 %v15213_v20, %v15212_v34  ;;  %v15215_v46 = vpop.f32.mrb[66].mxu0  ;;  %v15257_v3 = vadd.f32 %v15256_v35, %v15255_v55 }
 0x3c2   : > { %v15216_v1 = vpop.f32.mrb[67].mxu0 }
 0x3c3   : > { %v15217_v5 = vadd.f32 %v15216_v1, %v15215_v46  ;;  %v10740_v8 = vadd.f32 %v15254_v54, %v15214_v63 }
 0x3c5   : > { %v10743_v0 = vadd.f32 %v15257_v3, %v15217_v5  ;;  %v15258_v41 = vpop.f32.mrb[68].mxu1 }
 0x3c6   : > { %v15259_v45 = vpop.f32.mrb[69].mxu1 }
 0x3c7   : > { %v15218_v50 = vpop.f32.mrb[68].mxu0  ;;  %v15260_v29 = vadd.f32 %v15259_v45, %v15258_v41  ;;  %v15261_v47 = vpop.f32.mrb[70].mxu1 }
 0x3c8   : > { %v15219_v25 = vpop.f32.mrb[69].mxu0  ;;  %v15262_v44 = vpop.f32.mrb[71].mxu1 }
 0x3c9   : > { %v15220_v26 = vadd.f32 %v15219_v25, %v15218_v50  ;;  %v15221_v12 = vpop.f32.mrb[70].mxu0  ;;  %v15263_v13 = vadd.f32 %v15262_v44, %v15261_v47 }
 0x3ca   : > { %v15222_v18 = vpop.f32.mrb[71].mxu0 }
 0x3cb   : > { %v15223_v42 = vadd.f32 %v15222_v18, %v15221_v12  ;;  %v10748_v53 = vadd.f32 %v15260_v29, %v15220_v26 }
 0x3cd   : > { %v10751_v49 = vadd.f32 %v15263_v13, %v15223_v42  ;;  %v15264_v15 = vpop.f32.mrb[72].mxu1 }
 0x3ce   : > { %v15265_v30 = vpop.f32.mrb[73].mxu1 }
 0x3cf   : > { %v15224_v58 = vpop.f32.mrb[72].mxu0  ;;  %v15266_v39 = vadd.f32 %v15265_v30, %v15264_v15  ;;  %v15267_v28 = vpop.f32.mrb[74].mxu1 }
 0x3d0   : > { %v15225_v10 = vpop.f32.mrb[73].mxu0  ;;  %v15268_v11 = vpop.f32.mrb[75].mxu1 }
 0x3d1   : > { %v15226_v38 = vadd.f32 %v15225_v10, %v15224_v58  ;;  %v15227_v37 = vpop.f32.mrb[74].mxu0  ;;  %v15269_v9 = vadd.f32 %v15268_v11, %v15267_v28 }
 0x3d2   : > { %v15228_v40 = vpop.f32.mrb[75].mxu0 }
 0x3d3   : > { %v15229_v27 = vadd.f32 %v15228_v40, %v15227_v37  ;;  %v10756_v24 = vadd.f32 %v15266_v39, %v15226_v38 }
 0x3d5   : > { %v10759_v43 = vadd.f32 %v15269_v9, %v15229_v27  ;;  %v15270_v52 = vpop.f32.mrb[76].mxu1 }
 0x3d6   : > { %v15271_v61 = vpop.f32.mrb[77].mxu1 }
 0x3d7   : > { %v15230_v31 = vpop.f32.mrb[76].mxu0  ;;  %v15272_v51 = vadd.f32 %v15271_v61, %v15270_v52  ;;  %v15273_v7 = vpop.f32.mrb[78].mxu1 }
 0x3d8   : > { %v15231_v59 = vpop.f32.mrb[77].mxu0  ;;  %v15274_v2 = vpop.f32.mrb[79].mxu1 }
 0x3d9   : > { %v15232_v14 = vadd.f32 %v15231_v59, %v15230_v31  ;;  %v15233_v17 = vpop.f32.mrb[78].mxu0  ;;  %v15275_v16 = vadd.f32 %v15274_v2, %v15273_v7 }
 0x3da   : > { %v15234_v33 = vpop.f32.mrb[79].mxu0 }
 0x3db   : > { %v15235_v32 = vadd.f32 %v15234_v33, %v15233_v17  ;;  %v10764_v36 = vadd.f32 %v15272_v51, %v15232_v14 }
 0x3dd   : > { %v10767_v34 = vadd.f32 %v15275_v16, %v15235_v32  ;;  %v15332_v63 = vpop.f32.mrb[80].mxu1 }
 0x3de   : > { %v15333_v54 = vpop.f32.mrb[81].mxu1 }
 0x3df   : > { %v15292_v57 = vpop.f32.mrb[80].mxu0  ;;  %v15334_v1 = vadd.f32 %v15333_v54, %v15332_v63  ;;  %v15335_v5 = vpop.f32.mrb[82].mxu1 }
 0x3e0   : > { %v15293_v20 = vpop.f32.mrb[81].mxu0  ;;  %v15336_v50 = vpop.f32.mrb[83].mxu1 }
 0x3e1   : > { %v15294_v6 = vadd.f32 %v15293_v20, %v15292_v57  ;;  %v15295_v46 = vpop.f32.mrb[82].mxu0  ;;  %v15337_v41 = vadd.f32 %v15336_v50, %v15335_v5 }
 0x3e2   : > { %v15296_v55 = vpop.f32.mrb[83].mxu0 }
 0x3e3   : > { %v10805_v35 = vadd.f32 %v15294_v6, %v10740_v8  ;;  %v15297_v3 = vadd.f32 %v15296_v55, %v15295_v46 }
 0x3e5   : > { %v10808_v25 = vadd.f32 %v15297_v3, %v10743_v0  ;;  %v10870_v26 = vadd.f32 %v15334_v1, %v10805_v35  ;;  %v15338_v47 = vpop.f32.mrb[84].mxu1 }
 0x3e6   : > { %v15339_v44 = vpop.f32.mrb[85].mxu1 }
 0x3e7   : > { %v10873_v45 = vadd.f32 %v15337_v41, %v10808_v25  ;;  %v15298_v12 = vpop.f32.mrb[84].mxu0  ;;  %v15340_v58 = vadd.f32 %v15339_v44, %v15338_v47  ;;  %v15341_v15 = vpop.f32.mrb[86].mxu1 }
 0x3e8   : > { %v15299_v29 = vpop.f32.mrb[85].mxu0  ;;  %v15342_v30 = vpop.f32.mrb[87].mxu1 }
 0x3e9   : > { %v15300_v18 = vadd.f32 %v15299_v29, %v15298_v12  ;;  %v15301_v42 = vpop.f32.mrb[86].mxu0  ;;  %v15343_v37 = vadd.f32 %v15342_v30, %v15341_v15 }
 0x3ea   : > { %v15302_v13 = vpop.f32.mrb[87].mxu0 }
 0x3eb   : > { %v10813_v10 = vadd.f32 %v15300_v18, %v10748_v53  ;;  %v15303_v38 = vadd.f32 %v15302_v13, %v15301_v42  ;;  %v13580_v42 = vld [vmem:[%s21154_s2] ss:$0 sm:$0xff] }
 0x3ed   : > { %v10816_v8 = vadd.f32 %v15303_v38, %v10751_v49  ;;  %v10878_v39 = vadd.f32 %v15340_v58, %v10813_v10  ;;  %v15344_v27 = vpop.f32.mrb[88].mxu1 }
 0x3ee   : > { %v15345_v31 = vpop.f32.mrb[89].mxu1 }
 0x3ef   : > { %v10881_v28 = vadd.f32 %v15343_v37, %v10816_v8  ;;  %v15304_v40 = vpop.f32.mrb[88].mxu0  ;;  %v15346_v59 = vadd.f32 %v15345_v31, %v15344_v27  ;;  %v15347_v14 = vpop.f32.mrb[90].mxu1 }
 0x3f0   : > { %v15305_v0 = vpop.f32.mrb[89].mxu0  ;;  %v15348_v51 = vpop.f32.mrb[91].mxu1 }
 0x3f1   : > { %v15306_v11 = vadd.f32 %v15305_v0, %v15304_v40  ;;  %v15307_v9 = vpop.f32.mrb[90].mxu0  ;;  %v15349_v7 = vadd.f32 %v15348_v51, %v15347_v14 }
 0x3f2   : > { %v15308_v52 = vpop.f32.mrb[91].mxu0 }
 0x3f3   : > { %v10821_v61 = vadd.f32 %v15306_v11, %v10756_v24  ;;  %v15309_v17 = vadd.f32 %v15308_v52, %v15307_v9 }
 0x3f5   : > { %v10824_v53 = vadd.f32 %v15309_v17, %v10759_v43  ;;  %v10886_v33 = vadd.f32 %v15346_v59, %v10821_v61  ;;  %v15350_v16 = vpop.f32.mrb[92].mxu1 }
 0x3f6   : > { %v15351_v63 = vpop.f32.mrb[93].mxu1 }
 0x3f7   : > { %v10889_v32 = vadd.f32 %v15349_v7, %v10824_v53  ;;  %v15310_v2 = vpop.f32.mrb[92].mxu0  ;;  %v15352_v46 = vadd.f32 %v15351_v63, %v15350_v16  ;;  %v15353_v54 = vpop.f32.mrb[94].mxu1 }
 0x3f8   : > { %v15311_v49 = vpop.f32.mrb[93].mxu0  ;;  %v15354_v5 = vpop.f32.mrb[95].mxu1 }
 0x3f9   : > { %v15312_v57 = vadd.f32 %v15311_v49, %v15310_v2  ;;  %v15313_v20 = vpop.f32.mrb[94].mxu0  ;;  %v15355_v35 = vadd.f32 %v15354_v5, %v15353_v54 }
 0x3fa   : > { %v15314_v6 = vpop.f32.mrb[95].mxu0 }
 0x3fb   : > { %v10829_v55 = vadd.f32 %v15312_v57, %v10764_v36  ;;  %v15315_v1 = vadd.f32 %v15314_v6, %v15313_v20 }
 0x3fd   : > { %v10832_v24 = vadd.f32 %v15315_v1, %v10767_v34  ;;  %v10894_v3 = vadd.f32 %v15352_v46, %v10829_v55 }
 0x3ff   : > { %v10897_v50 = vadd.f32 %v15355_v35, %v10832_v24  ;;  %v15372_v41 = vpop.f32.mrb[96].mxu0 }
 0x400   : > { %v15373_v43 = vpop.f32.mrb[97].mxu0 }
 0x401   : > { %v15374_v25 = vadd.f32 %v15373_v43, %v15372_v41  ;;  %v15375_v12 = vpop.f32.mrb[98].mxu0 }
 0x402   : > { %v15376_v29 = vpop.f32.mrb[99].mxu0 }
 0x403   : > { %v10935_v47 = vadd.f32 %v15374_v25, %v10870_v26  ;;  %v15377_v18 = vadd.f32 %v15376_v29, %v15375_v12 }
 0x405   : > { %v10965_v44 = vadd.f32 %v10935_v47, %v21060_v22  ;;  %v10938_v36 = vadd.f32 %v15377_v18, %v10873_v45 }
 0x407   : > { %v10980_v13 = vadd.f32 %v13580_v42, %v10965_v44  ;;  %v10966_v58 = vadd.f32 %v10938_v36, %v21066_v23  ;;  %v15378_v34 = vpop.f32.mrb[100].mxu0 }
 0x408   : > { %v15379_v15 = vpop.f32.mrb[101].mxu0 }
 0x409   : > { %v10981_v10 = vadd.f32 %v13580_v42, %v10966_v58  ;;  %v15380_v38 = vadd.f32 %v15379_v15, %v15378_v34  ;;  %v15381_v30 = vpop.f32.mrb[102].mxu0  ;;  %v10988_v8 = vmax.f32 %v10980_v13, 0.0  ;;  %v16274_v34 = vld [vmem:[%s21157_s5 + $0x18] sm:$0xff]   ;;  %v11027_v15 = vld [vmem:[%s21156_s4] sm:$0x1] }
 0x40a   : > { %v15382_v37 = vpop.f32.mrb[103].mxu0 }
 0x40b   : > { %v10989_v40 = vmax.f32 %v10981_v10, 0.0  ;;  %v10943_v26 = vadd.f32 %v15380_v38, %v10878_v39  ;;  %v15383_v0 = vadd.f32 %v15382_v37, %v15381_v30 }
 0x40d   : > { %v10996_v27 = vadd.f32 %v10989_v40, %v10988_v8  ;;  %v10967_v11 = vadd.f32 %v10943_v26, %v21076_v19  ;;  %v10946_v9 = vadd.f32 %v15383_v0, %v10881_v28 }
 0x40f   : > { %v10982_v31 = vadd.f32 %v13580_v42, %v10967_v11  ;;  %v10968_v22 = vadd.f32 %v10946_v9, %v21082_v48  ;;  %v15384_v45 = vpop.f32.mrb[104].mxu0 }
 0x410   : > { %v15385_v52 = vpop.f32.mrb[105].mxu0 }
 0x411   : > { %v10990_v23 = vmax.f32 %v10982_v31, 0.0  ;;  %v10983_v59 = vadd.f32 %v13580_v42, %v10968_v22  ;;  %v15386_v14 = vadd.f32 %v15385_v52, %v15384_v45  ;;  %v15387_v61 = vpop.f32.mrb[106].mxu0 }
 0x412   : > { %v15388_v17 = vpop.f32.mrb[107].mxu0 }
 0x413   : > { %v10997_v51 = vadd.f32 %v10996_v27, %v10990_v23  ;;  %v10991_v7 = vmax.f32 %v10983_v59, 0.0  ;;  %v10951_v53 = vadd.f32 %v15386_v14, %v10886_v33  ;;  %v15389_v2 = vadd.f32 %v15388_v17, %v15387_v61  ;;  %v11126_v27 = vld [vmem:[%s21158_s6] sm:$0x1] }
 0x415   : > { %v10998_v39 = vadd.f32 %v10997_v51, %v10991_v7  ;;  %v10969_v49 = vadd.f32 %v10951_v53, %v21092_v56  ;;  %v10954_v16 = vadd.f32 %v15389_v2, %v10889_v32 }
 0x417   : > { %v10984_v19 = vadd.f32 %v13580_v42, %v10969_v49  ;;  %v10970_v28 = vadd.f32 %v10954_v16, %v21098_v21  ;;  %v15390_v57 = vpop.f32.mrb[108].mxu0 }
 0x418   : > { %v15391_v48 = vpop.f32.mrb[109].mxu0 }
 0x419   : > { %v10992_v20 = vmax.f32 %v10984_v19, 0.0  ;;  %v10985_v63 = vadd.f32 %v13580_v42, %v10970_v28  ;;  %v15392_v6 = vadd.f32 %v15391_v48, %v15390_v57  ;;  %v15393_v46 = vpop.f32.mrb[110].mxu0 }
 0x41a   : > { %v15394_v54 = vpop.f32.mrb[111].mxu0 }
 0x41b   : > { %v10999_v55 = vadd.f32 %v10998_v39, %v10992_v20  ;;  %v10993_v1 = vmax.f32 %v10985_v63, 0.0  ;;  %v10959_v5 = vadd.f32 %v15392_v6, %v10894_v3  ;;  %v15395_v35 = vadd.f32 %v15394_v54, %v15393_v46 }
 0x41d   : > { %v11000_v33 = vadd.f32 %v10999_v55, %v10993_v1  ;;  %v10971_v24 = vadd.f32 %v10959_v5, %v21106_v62  ;;  %v10962_v41 = vadd.f32 %v15395_v35, %v10897_v50  ;;  %v16271_v62 = vld [vmem:[%s21157_s5] sm:$0xff]  }
 0x41f   : > { %v10986_v56 = vadd.f32 %v13580_v42, %v10971_v24  ;;  %v10972_v32 = vadd.f32 %v10962_v41, %v21109_v60  ;;  %v16272_v60 = vld [vmem:[%s21157_s5 + $0x8] sm:$0xff]  }
 0x421   : > { %v10994_v43 = vmax.f32 %v10986_v56, 0.0  ;;  %v10987_v21 = vadd.f32 %v13580_v42, %v10972_v32  ;;  %v16273_v42 = vld [vmem:[%s21157_s5 + $0x10] sm:$0xff]  }
 0x423   : > { %v11001_v25 = vadd.f32 %v11000_v33, %v10994_v43  ;;  %v10995_v12 = vmax.f32 %v10987_v21, 0.0 }
 0x425   : > { %v11002_v29 = vadd.f32 %v11001_v25, %v10995_v12 }
 0x427   : > { %v11003_v47 = vrot.slane %v11002_v29, 4 }
 0x429   : > { %v11004_v18 = vadd.f32 %v11003_v47, %v11002_v29 }
 0x42b   : > { %v11005_v44 = vrot.slane %v11004_v18, 2 }
 0x42d   : > { %v11006_v36 = vadd.f32 %v11005_v44, %v11004_v18 }
 0x42f   : > { %v11007_v13 = vrot.slane %v11006_v36, 1 }
 0x431   : > { %v11008_v58 = vadd.f32 %v11007_v13, %v11006_v36 }
 0x433   : > { %v11009_v3 = vmul.f32 0.015625, %v11008_v58 }
 0x435   : > { %v11010_v50 = vpack.c.bf16 %v11009_v3, %v11009_v3 }
 0x437   : > { %15427 = vmatmul.mubr.bf16.vlgmr.msra.gmra.mrb[96].mxu1 %v11010_v50 }
 0x438   : > { %15431 = vmatpush3.bf16.msra.mxu1 %v16271_v62  ;;  %15438 = vmatprep.mubr.msk.bf16.mxu1 %vm16414_vm6, %v16413_v4 }
 0x439   : > { %15432 = vmatprep.subr.bf16.mxu1 %v16413_v4 }
 0x43c   : > { %15433 = vmatpush3.bf16.msra.mxu1 %v16272_v60 }
 0x43d   : > { %15434 = vmatprep.subr.bf16.mxu1 %v16413_v4 }
 0x440   : > { %15435 = vmatpush3.bf16.msra.mxu1 %v16273_v42 }
 0x441   : > { %15436 = vmatprep.subr.bf16.mxu1 %v16413_v4  ;;  %v11195_v4 = vlaneseq }
 0x443   : > { %v11196_v0 = vshrl.u32 %v11195_v4, 7 }
 0x444   : > { %15437 = vmatpush3.bf16.msra.mxu1 %v16274_v34 }
 0x445   : > { %v11197_v11 = vsub.s32 0, %v11196_v0 }
 0x50a   : > { %v11110_v10 = vpop.f32.mrb[96].mxu1 }
 0x50b   : > { %v11111_v38 = vadd.f32 %v11110_v10, %v11027_v15  ;;  %v15428_v30 = vpop.f32.mrb[97].mxu1 }
 0x50c   : > { %v11113_v37 = vpop.f32.mrb[98].mxu1 }
 0x50d   : > { %v11116_v8 = vmax.f32 %v11111_v38, 0.0  ;;  %v15429_v40 = vpop.f32.mrb[99].mxu1 }
 0x50f   : > { %v11117_v26 = vpack.c.bf16 %v11116_v8, %v11116_v8 }
 0x511   : > { %15439 = vmatmul.mubr.msk.bf16.vlgmr.msra.gmra.mrb[100].mxu1 %vm11151_vm7, %v11117_v26 }
 0x5e4   : > { %v11189_v9 = vpop.f32.mrb[100].mxu1 }
 0x5e5   : > { %v11190_v31 = vadd.f32 %v11189_v9, %v11126_v27  ;;  %v15440_v22 = vpop.f32.mrb[101].mxu1 }
 0x5e6   : > { %v11192_v45 = vpop.f32.mrb[102].mxu1 }
 0x5e7   : > { %v11198_v52 = vrot.slane %v11190_v31, %v11197_v11  ;;  %v15441_v23 = vpop.f32.mrb[103].mxu1 }
 0x5e9   : > { %11199 = vst [vmem:[%s276_s15] sm:$0xff] %v11198_v52 }
 0x5ea PF: > { %s17_s24 = sadd.s32 1, %s16411_s24  }
 0x5eb   : > { %p14_p4 = scmp.ge.s32.totalorder %s17_s24, 4  }
 0x5ed   :  { %16 = sbr.rel (!%p14_p4) target bundleno = 1 (0x1), region = 86 }

</bundles_post_ra>
